<compile_context>
chip_gen: v7x
topology: tpu7x:2x2x1
jax: 0.10.0
libtpu: 0.0.40
codegen_flags: <defaults>
</compile_context>

<pallas_src>
import math
from functools import partial

import jax
import jax.numpy as jnp
from jax import lax
from jax.experimental import pallas as pl
from jax.experimental.pallas import tpu as pltpu


def _round_up(x, m):
    return (x + m - 1) // m * m


def _tensorcores_per_chip():
    # v7x has 2 TensorCores/chip and wants >=2 'parallel' grid steps so both cores
    # share the (bandwidth-bound) weight stream; v5e/v6e have 1 TC and prefer the
    # minimum number of grid steps.
    try:
        kind = jax.devices()[0].device_kind.lower()
        return 2 if ("v7" in kind or "tpu7" in kind) else 1
    except Exception:
        return 1


_TC_PER_CHIP = _tensorcores_per_chip()

# Full-K weight slab up to 4608x256 bf16 ~= 2.3 MiB/buffer — trivially inside the
# 48 MiB VMEM cap (and v7x's 64 MiB physical VMEM) even with double buffering.
_MAX_TK = 4608
_VMEM_LIMIT = 48 * 1024 * 1024


# ----------------------------- Pallas kernels ------------------------------ #

def _epilogue(out_f32, o_ref, *, relu, relu_cols, tn):
    """Bias already added; apply (per-column) ReLU and store bf16."""
    if relu_cols is not None:
        col = lax.broadcasted_iota(jnp.int32, out_f32.shape, 1) + pl.program_id(1) * tn
        out_f32 = jnp.where(col < relu_cols, jnp.maximum(out_f32, 0.0), out_f32)
    elif relu:
        out_f32 = jnp.maximum(out_f32, 0.0)
    o_ref[...] = out_f32.astype(o_ref.dtype)


def _gemm_bn_1k_kernel(x_ref, w_ref, b_ref, o_ref, *, relu, relu_cols, tn):
    """Single-K fast path: whole K in one tile — no scratch, no init/finalize."""
    out = jnp.dot(x_ref[...], w_ref[...], preferred_element_type=jnp.float32) + b_ref[...]
    _epilogue(out, o_ref, relu=relu, relu_cols=relu_cols, tn=tn)


def _gemm_bn_res_1k_kernel(x_ref, w_ref, b_ref, r_ref, o_ref, *, relu, relu_cols, tn):
    out = (jnp.dot(x_ref[...], w_ref[...], preferred_element_type=jnp.float32)
           + b_ref[...] + r_ref[...].astype(jnp.float32))
    _epilogue(out, o_ref, relu=relu, relu_cols=relu_cols, tn=tn)


def _gemm_bn_kernel(x_ref, w_ref, b_ref, o_ref, acc_ref, *, relu, relu_cols, tn):
    """Multi-K path: f32 VMEM accumulator across the K grid axis."""
    @pl.when(pl.program_id(2) == 0)
    def _():
        acc_ref[...] = jnp.zeros_like(acc_ref)

    acc_ref[...] += jnp.dot(x_ref[...], w_ref[...], preferred_element_type=jnp.float32)

    @pl.when(pl.program_id(2) == pl.num_programs(2) - 1)
    def _():
        _epilogue(acc_ref[...] + b_ref[...], o_ref,
                  relu=relu, relu_cols=relu_cols, tn=tn)


def _gemm_bn_res_kernel(x_ref, w_ref, b_ref, r_ref, o_ref, acc_ref,
                        *, relu, relu_cols, tn):
    @pl.when(pl.program_id(2) == 0)
    def _():
        acc_ref[...] = jnp.zeros_like(acc_ref)

    acc_ref[...] += jnp.dot(x_ref[...], w_ref[...], preferred_element_type=jnp.float32)

    @pl.when(pl.program_id(2) == pl.num_programs(2) - 1)
    def _():
        _epilogue(acc_ref[...] + b_ref[...] + r_ref[...].astype(jnp.float32), o_ref,
                  relu=relu, relu_cols=relu_cols, tn=tn)


def _maxpool_kernel(x_ref, o_ref):
    """3x3 / stride-2 max pool of one whole (padded) image per grid step.

    x_ref: (1, 2*Ho+2, 2*Wo+2, C) zero-padded input (post-ReLU, so 0 acts as -inf)
    o_ref: (1, Ho, Wo, C)
    """
    ho, wo, c = o_ref.shape[1], o_ref.shape[2], o_ref.shape[3]
    for i in range(ho):                      # static unroll; all output rows, 1 step
        v = jnp.maximum(jnp.maximum(x_ref[0, 2 * i], x_ref[0, 2 * i + 1]),
                        x_ref[0, 2 * i + 2])                         # (Wp, C)
        win = jnp.maximum(jnp.maximum(v[0:2 * wo], v[1:2 * wo + 1]),
                          v[2:2 * wo + 2])                           # (2*wo, C)
        o_ref[0, i] = win.reshape(wo, 2, c)[:, 0].astype(o_ref.dtype)


# ------------------------- fused GEMM + BN (+res) (+ReLU) ------------------- #

def fused_gemm_bn(patches, w, bias, residual=None, relu=True, relu_cols=None):
    """(M, K) @ (K_pad, N_pad) with folded-BN bias (+ residual) (+ ReLU).

    bf16 operands, f32 accumulation, bf16 lane-dense output.  `relu_cols` (static)
    applies ReLU only to the first `relu_cols` output columns — used when conv1 and
    the linear downsample branch share one GEMM.
    """
    m, k_in = patches.shape
    k_pad, n_pad = w.shape

    # --- tile selection ------------------------------------------------------
    tn = 256 if n_pad % 256 == 0 else 128
    if m >= 256:
        tm = min((512, 384, 256, 128), key=lambda t: (_round_up(m, t) - m, -t))
    else:
        tm = _round_up(m, 16)                # bf16 sublane-packing granularity (>=16)
    m_pad = _round_up(m, tm)

    if k_pad <= _MAX_TK:
        tk = k_pad                           # single-K fast path (the common case)
    else:
        tk = next(t for t in (2048, 1536, 1024, 512, 256, 128) if k_pad % t == 0)
    single_k = (tk == k_pad)

    # v7x: make sure the parallel grid has >= 2 steps so the 2nd TensorCore helps.
    if (_TC_PER_CHIP >= 2 and (m_pad // tm) * (n_pad // tn) < 2 and n_pad >= 256):
        tn = 128

    if m_pad != m or k_pad != k_in:
        patches = jnp.pad(patches, ((0, m_pad - m), (0, k_pad - k_in)))
    patches = patches.astype(jnp.bfloat16)
    bias2 = bias.reshape(1, n_pad).astype(jnp.float32)

    flops = 2 * m_pad * k_pad * n_pad
    bytes_accessed = 2 * (m_pad * k_pad + k_pad * n_pad + m_pad * n_pad) + 4 * n_pad

    operands = [patches, w, bias2]
    if residual is not None:
        if residual.shape[0] != m_pad:
            residual = jnp.pad(residual, ((0, m_pad - residual.shape[0]), (0, 0)))
        operands.append(residual.astype(jnp.bfloat16))
        bytes_accessed += 2 * m_pad * n_pad

    kern_kwargs = dict(relu=relu, relu_cols=relu_cols, tn=tn)
    out_shape = jax.ShapeDtypeStruct((m_pad, n_pad), jnp.bfloat16)

    if single_k:
        grid = (m_pad // tm, n_pad // tn)
        in_specs = [pl.BlockSpec((tm, tk), lambda i, j: (i, 0)),
                    pl.BlockSpec((tk, tn), lambda i, j: (0, j)),
                    pl.BlockSpec((1, tn), lambda i, j: (0, j))]
        kernel = partial(_gemm_bn_1k_kernel, **kern_kwargs)
        if residual is not None:
            in_specs.append(pl.BlockSpec((tm, tn), lambda i, j: (i, j)))
            kernel = partial(_gemm_bn_res_1k_kernel, **kern_kwargs)
        o_spec = pl.BlockSpec((tm, tn), lambda i, j: (i, j))
        scratch = []
        sems = ("parallel", "parallel")
    else:
        grid = (m_pad // tm, n_pad // tn, k_pad // tk)
        in_specs = [pl.BlockSpec((tm, tk), lambda i, j, k: (i, k)),
                    # deepen the weight pipeline: the kernel is weight-DMA bound
                    pl.BlockSpec((tk, tn), lambda i, j, k: (k, j),
                                 pipeline_mode=pl.Buffered(3)),
                    pl.BlockSpec((1, tn), lambda i, j, k: (0, j))]
        kernel = partial(_gemm_bn_kernel, **kern_kwargs)
        if residual is not None:
            in_specs.append(pl.BlockSpec((tm, tn), lambda i, j, k: (i, j)))
            kernel = partial(_gemm_bn_res_kernel, **kern_kwargs)
        o_spec = pl.BlockSpec((tm, tn), lambda i, j, k: (i, j))
        scratch = [pltpu.VMEM((tm, tn), jnp.float32)]
        sems = ("parallel", "parallel", "arbitrary")

    out = pl.pallas_call(
        kernel,
        out_shape=out_shape,
        grid_spec=pltpu.PrefetchScalarGridSpec(
            num_scalar_prefetch=0, grid=grid,
            in_specs=in_specs, out_specs=o_spec, scratch_shapes=scratch),
        compiler_params=pltpu.CompilerParams(
            dimension_semantics=sems, vmem_limit_bytes=_VMEM_LIMIT),
        cost_estimate=pl.CostEstimate(flops=flops, transcendentals=0,
                                      bytes_accessed=bytes_accessed),
    )(*operands)

    return out[:m] if m_pad != m else out


# ------------------------------ plain-JAX glue ------------------------------ #

def _im2col(x, k, stride, pad, cin):
    """x: (N, H, W, Cpad) -> (N*Ho*Wo, k*k*cin) patches, TRUE cin per tap."""
    n, h, w, _ = x.shape
    x = x[..., :cin]                              # drop zero channel padding per tap
    if pad:
        x = jnp.pad(x, ((0, 0), (pad, pad), (pad, pad), (0, 0)))
    hp, wp = h + 2 * pad, w + 2 * pad
    ho = (hp - k) // stride + 1
    wo = (wp - k) // stride + 1
    cols = []
    for kh in range(k):
        for kw in range(k):
            cols.append(
                x[:, kh:kh + (ho - 1) * stride + 1:stride,
                     kw:kw + (wo - 1) * stride + 1:stride, :])
    patches = jnp.concatenate(cols, axis=-1) if len(cols) > 1 else cols[0]
    return patches.reshape(n * ho * wo, k * k * cin), (n, ho, wo)


def conv_bn(x, w, bias, k, stride, pad, cin, relu=True):
    """Conv (via GEMM) + folded BN + optional ReLU; NHWC, channel-padded output."""
    if k == 1 and pad == 0:
        xs = x[:, ::stride, ::stride, :] if stride > 1 else x
        n, ho, wo, c = xs.shape
        patches = xs.reshape(n * ho * wo, c)      # 1x1 conv: no im2col needed
    else:
        patches, (n, ho, wo) = _im2col(x, k, stride, pad, cin)
    out = fused_gemm_bn(patches, w, bias, relu=relu)
    return out.reshape(n, ho, wo, -1)


def maxpool_3x3_s2_p1(x):
    """MaxPool2d(kernel=3, stride=2, padding=1) on NHWC, one grid step per image.

    The input is post-ReLU (>= 0), so zero padding is equivalent to -inf padding.
    """
    n, h, w, c = x.shape
    ho = (h - 1) // 2 + 1
    wo = (w - 1) // 2 + 1
    hp, wp = 2 * ho + 2, 2 * wo + 2
    xp = jnp.pad(x, ((0, 0), (1, hp - 1 - h), (1, wp - 1 - w), (0, 0)))
    return pl.pallas_call(
        _maxpool_kernel,
        out_shape=jax.ShapeDtypeStruct((n, ho, wo, c), x.dtype),
        grid_spec=pltpu.PrefetchScalarGridSpec(
            num_scalar_prefetch=0,
            grid=(n,),
            in_specs=[pl.BlockSpec((1, hp, wp, c), lambda b: (b, 0, 0, 0))],
            out_specs=pl.BlockSpec((1, ho, wo, c), lambda b: (b, 0, 0, 0)),
        ),
        compiler_params=pltpu.CompilerParams(
            dimension_semantics=("parallel",),
            vmem_limit_bytes=_VMEM_LIMIT,
        ),
        cost_estimate=pl.CostEstimate(
            flops=8 * n * ho * wo * c, transcendentals=0,
            bytes_accessed=2 * (n * hp * wp * c + n * ho * wo * c)),
    )(xp)


def bottleneck_forward(x, p):
    """PyTorch Bottleneck (expansion=4): 1x1 -> 3x3(stride) -> 1x1, + identity, ReLU."""
    stride = p['stride']

    if 'wd' in p and stride == 1:
        # Fused conv1 + downsample: both 1x1 GEMMs share the same LHS -> one
        # pallas_call, one LHS HBM read.  Per-column ReLU keeps conv1's ReLU while
        # the downsample branch stays linear.
        n, hi, wi, c = x.shape
        patches = x.reshape(n * hi * wi, c)
        n1 = p['w1'].shape[1]
        fused = fused_gemm_bn(patches, p['w1d'], p['b1d'], relu=False, relu_cols=n1)
        out = fused[:, :n1].reshape(n, hi, wi, n1)
        identity = fused[:, n1:]
    else:
        out = conv_bn(x, p['w1'], p['b1'], 1, 1, 0, p['cin'], relu=True)
        identity = None

    out = conv_bn(out, p['w2'], p['b2'], 3, stride, 1, p['c_mid'], relu=True)
    n, ho, wo, _ = out.shape

    if identity is None:
        if 'wd' in p:  # strided downsample branch: 1x1 conv (stride) + BN, no ReLU
            xs = x[:, ::stride, ::stride, :] if stride > 1 else x
            identity = fused_gemm_bn(xs.reshape(n * ho * wo, -1),
                                     p['wd'], p['bd'], relu=False)
        else:
            identity = x.reshape(n * ho * wo, -1)

    out = fused_gemm_bn(out.reshape(n * ho * wo, -1), p['w3'], p['b3'],
                        residual=identity, relu=True)
    return out.reshape(n, ho, wo, -1)


# ------------------------------ parameters --------------------------------- #

def _prep_conv(key, k, cin, cout):
    """Kaiming-init conv weight with eval-mode BN folded in, TRUE-cin tap packing.

    Returns a (round_up(k*k*cin, 128), round_up(cout, 128)) bf16 weight and a f32
    bias; padded rows / output channels are zero so channel padding stays exactly
    zero through the network.
    """
    fan_out = cout * k * k                       # kaiming_normal_(mode='fan_out')
    std = math.sqrt(2.0 / fan_out)
    w = jax.random.normal(key, (k, k, cin, cout), jnp.float32) * std
    # Fresh nn.BatchNorm2d (eval): gamma=1, beta=0, running_mean=0, running_var=1.
    eps = 1e-5
    gamma = jnp.ones((cout,), jnp.float32)
    beta = jnp.zeros((cout,), jnp.float32)
    mean = jnp.zeros((cout,), jnp.float32)
    var = jnp.ones((cout,), jnp.float32)
    scale = gamma / jnp.sqrt(var + eps)
    bias = beta - mean * scale
    w = w * scale                                # fold BN scale into the weight
    cout_p = _round_up(cout, 128)
    w2 = jnp.pad(w, ((0, 0), (0, 0), (0, 0), (0, cout_p - cout)))
    w2 = w2.reshape(k * k * cin, cout_p)
    rows = _round_up(k * k * cin, 128)           # lane-align only the TOTAL K
    w2 = jnp.pad(w2, ((0, rows - k * k * cin), (0, 0))).astype(jnp.bfloat16)
    bias = jnp.pad(bias, (0, cout_p - cout))
    return w2, bias


def make_params(base_key, blocks_num=(3, 4, 6, 3)):
    counter = [0]

    def nk():
        counter[0] += 1
        return jax.random.fold_in(base_key, counter[0])

    params = {}
    params['stem_w'], params['stem_b'] = _prep_conv(nk(), 7, 3, 64)

    in_c = 64

    def make_layer(channel, num_blocks, stride):
        nonlocal in_c
        blocks = []
        for i in range(num_blocks):
            s = stride if i == 0 else 1
            cin = in_c if i == 0 else channel * 4
            blk = {'stride': s, 'cin': cin, 'c_mid': channel}
            blk['w1'], blk['b1'] = _prep_conv(nk(), 1, cin, channel)
            blk['w2'], blk['b2'] = _prep_conv(nk(), 3, channel, channel)
            blk['w3'], blk['b3'] = _prep_conv(nk(), 1, channel, channel * 4)
            if i == 0:
                blk['wd'], blk['bd'] = _prep_conv(nk(), 1, cin, channel * 4)
                # Pre-concatenated conv1+downsample weights (used when stride == 1).
                blk['w1d'] = jnp.concatenate([blk['w1'], blk['wd']], axis=1)
                blk['b1d'] = jnp.concatenate([blk['b1'], blk['bd']], axis=0)
            blocks.append(blk)
        in_c = channel * 4
        return blocks

    params['layer1'] = make_layer(64, blocks_num[0], 1)
    params['layer2'] = make_layer(128, blocks_num[1], 2)
    params['layer3'] = make_layer(256, blocks_num[2], 2)
    # ResNet.__init__ override: layer3[0].conv2.stride = (1, 1) and
    # layer3[0].downsample[0].stride = (1, 1)  -> layer3 keeps the spatial size.
    params['layer3'][0]['stride'] = 1
    return params


# ------------------------------- forward ------------------------------------ #

def resnet_forward(x_nchw, params):
    x = jnp.transpose(x_nchw, (0, 2, 3, 1)).astype(jnp.bfloat16)  # NCHW -> NHWC bf16
    # stem: conv7x7/2 + BN + ReLU + maxpool3x3/2
    x = conv_bn(x, params['stem_w'], params['stem_b'], 7, 2, 3, 3, relu=True)
    x = maxpool_3x3_s2_p1(x)
    for blk in params['layer1'] + params['layer2'] + params['layer3']:
        x = bottleneck_forward(x, blk)
    # layer3 true channel count (1024) is already lane-aligned, no padding to strip.
    return jnp.transpose(x, (0, 3, 1, 2)).astype(jnp.float32)     # back to NCHW


if __name__ == "__main__":
    key = jax.random.PRNGKey(0)
    x = jax.random.normal(key, (2, 3, 16, 16), jnp.float32)  # NCHW input
    params = make_params(jax.random.PRNGKey(42), blocks_num=(3, 4, 6, 3))

    fwd = jax.jit(lambda inp: resnet_forward(inp, params))
    out = jax.block_until_ready(fwd(x))

    # 16x16 -> conv1/2 -> 8x8 -> maxpool/2 -> 4x4 -> layer1 -> 4x4
    # -> layer2/2 -> 2x2 -> layer3 (stride overridden to 1) -> 2x2, C=1024
    assert out.shape == (2, 1024, 2, 2), out.shape
    assert bool(jnp.all(jnp.isfinite(out)))
    assert bool(jnp.all(out >= 0.0))  # final op of every bottleneck is ReLU
    print("KERNEL_OK")
</pallas_src>

<mosaic_0001>
module attributes {stable_mosaic.version = 11 : i64} {
  func.func @_gemm_bn_1k_kernel(%arg0: i32, %arg1: i32, %arg2: memref<128x256xbf16, #tpu.memory_space<vmem>>, %arg3: memref<256x128xbf16, #tpu.memory_space<vmem>>, %arg4: memref<1x128xf32, #tpu.memory_space<vmem>>, %arg5: memref<128x128xbf16, #tpu.memory_space<vmem>>) attributes {dimension_semantics = [#tpu.dimension_semantics<parallel>, #tpu.dimension_semantics<parallel>], iteration_bounds = array<i64: 1, 1>, scalar_prefetch = 0 : i64, scratch_operands = 0 : i64, tpu.core_type = #tpu.core_type<tc>, window_params = [{transform_indices = @transform_0, window_bounds = array<i64: 128, 256>}, {transform_indices = @transform_1, window_bounds = array<i64: 256, 128>}, {transform_indices = @transform_2, window_bounds = array<i64: 1, 128>}, {transform_indices = @transform_3, window_bounds = array<i64: 128, 128>}]} {
    %c0 = arith.constant 0 : index
    %c0_0 = arith.constant 0 : index
    %0 = vector.load %arg2[%c0, %c0_0] : memref<128x256xbf16, #tpu.memory_space<vmem>>, vector<128x256xbf16>
    %c0_1 = arith.constant 0 : index
    %c0_2 = arith.constant 0 : index
    %1 = vector.load %arg3[%c0_1, %c0_2] : memref<256x128xbf16, #tpu.memory_space<vmem>>, vector<256x128xbf16>
    %cst = arith.constant dense<0.000000e+00> : vector<128x128xf32>
    %2 = tpu.matmul %0, %1, %cst {dimension_numbers = #tpu.dot_dimension_numbers<[1], [0], [0], [1], [0, 0, 1, 1], [], []>} : vector<128x256xbf16>, vector<256x128xbf16>, vector<128x128xf32> -> vector<128x128xf32>
    %c0_3 = arith.constant 0 : index
    %c0_4 = arith.constant 0 : index
    %3 = vector.load %arg4[%c0_3, %c0_4] : memref<1x128xf32, #tpu.memory_space<vmem>>, vector<1x128xf32>
    %4 = vector.broadcast %3 : vector<1x128xf32> to vector<128x128xf32>
    %5 = arith.addf %2, %4 : vector<128x128xf32>
    %cst_5 = arith.constant 0.000000e+00 : f32
    %6 = vector.broadcast %cst_5 : f32 to vector<128x128xf32>
    %7 = arith.maximumf %5, %6 : vector<128x128xf32>
    %8 = arith.truncf %7 : vector<128x128xf32> to vector<128x128xbf16>
    %c0_6 = arith.constant 0 : index
    %c0_7 = arith.constant 0 : index
    %9 = vector.load %arg5[%c0_6, %c0_7] : memref<128x128xbf16, #tpu.memory_space<vmem>>, vector<128x128xbf16>
    tpu.vector_store %arg5[%c0_6, %c0_7], %8 {strides = array<i32>} : memref<128x128xbf16, #tpu.memory_space<vmem>>, vector<128x128xbf16>,
    return
  }
  func.func @transform_0(%arg0: i32, %arg1: i32) -> (i32, i32) {
    %c0_i32 = arith.constant 0 : i32
    %c0_i32_0 = arith.constant 0 : i32
    return %arg0, %c0_i32 : i32, i32
  }
  func.func @transform_1(%arg0: i32, %arg1: i32) -> (i32, i32) {
    %c0_i32 = arith.constant 0 : i32
    %c0_i32_0 = arith.constant 0 : i32
    return %c0_i32, %arg1 : i32, i32
  }
  func.func @transform_2(%arg0: i32, %arg1: i32) -> (i32, i32) {
    %c0_i32 = arith.constant 0 : i32
    %c0_i32_0 = arith.constant 0 : i32
    return %c0_i32, %arg1 : i32, i32
  }
  func.func @transform_3(%arg0: i32, %arg1: i32) -> (i32, i32) {
    %c0_i32 = arith.constant 0 : i32
    return %arg0, %arg1 : i32, i32
  }
}

module attributes {stable_mosaic.version = 11 : i64} {
  func.func @_maxpool_kernel(%arg0: i32, %arg1: memref<1x10x10x128xbf16, #tpu.memory_space<vmem>>, %arg2: memref<1x4x4x128xbf16, #tpu.memory_space<vmem>>) attributes {dimension_semantics = [#tpu.dimension_semantics<parallel>], iteration_bounds = array<i64: 2>, scalar_prefetch = 0 : i64, scratch_operands = 0 : i64, tpu.core_type = #tpu.core_type<tc>, window_params = [{transform_indices = @transform_0, window_bounds = array<i64: 1, 10, 10, 128>}, {transform_indices = @transform_1, window_bounds = array<i64: 1, 4, 4, 128>}]} {
    %c0 = arith.constant 0 : index
    %c0_0 = arith.constant 0 : index
    %c0_1 = arith.constant 0 : index
    %c0_2 = arith.constant 0 : index
    %0 = vector.load %arg1[%c0, %c0_0, %c0_1, %c0_2] : memref<1x10x10x128xbf16, #tpu.memory_space<vmem>>, vector<1x1x10x128xbf16>
    %1 = vector.shape_cast %0 : vector<1x1x10x128xbf16> to vector<10x128xbf16>
    %c0_3 = arith.constant 0 : index
    %c1 = arith.constant 1 : index
    %c0_4 = arith.constant 0 : index
    %c0_5 = arith.constant 0 : index
    %2 = vector.load %arg1[%c0_3, %c1, %c0_4, %c0_5] : memref<1x10x10x128xbf16, #tpu.memory_space<vmem>>, vector<1x1x10x128xbf16>
    %3 = vector.shape_cast %2 : vector<1x1x10x128xbf16> to vector<10x128xbf16>
    %4 = arith.maximumf %1, %3 : vector<10x128xbf16>
    %c0_6 = arith.constant 0 : index
    %c2 = arith.constant 2 : index
    %c0_7 = arith.constant 0 : index
    %c0_8 = arith.constant 0 : index
    %5 = vector.load %arg1[%c0_6, %c2, %c0_7, %c0_8] : memref<1x10x10x128xbf16, #tpu.memory_space<vmem>>, vector<1x1x10x128xbf16>
    %6 = vector.shape_cast %5 : vector<1x1x10x128xbf16> to vector<10x128xbf16>
    %7 = arith.maximumf %4, %6 : vector<10x128xbf16>
    %8 = vector.extract_strided_slice %7 {offsets = [0, 0], sizes = [8, 128], strides = [1, 1]} : vector<10x128xbf16> to vector<8x128xbf16>
    %9 = vector.extract_strided_slice %7 {offsets = [1, 0], sizes = [8, 128], strides = [1, 1]} : vector<10x128xbf16> to vector<8x128xbf16>
    %10 = arith.maximumf %8, %9 : vector<8x128xbf16>
    %11 = vector.extract_strided_slice %7 {offsets = [2, 0], sizes = [8, 128], strides = [1, 1]} : vector<10x128xbf16> to vector<8x128xbf16>
    %12 = arith.maximumf %10, %11 : vector<8x128xbf16>
    %13 = vector.shape_cast %12 : vector<8x128xbf16> to vector<4x2x128xbf16>
    %14 = vector.extract_strided_slice %13 {offsets = [0, 0, 0], sizes = [4, 1, 128], strides = [1, 1, 1]} : vector<4x2x128xbf16> to vector<4x1x128xbf16>
    %15 = vector.shape_cast %14 : vector<4x1x128xbf16> to vector<4x128xbf16>
    %c0_9 = arith.constant 0 : index
    %c0_10 = arith.constant 0 : index
    %c0_11 = arith.constant 0 : index
    %c0_12 = arith.constant 0 : index
    %16 = vector.load %arg2[%c0_9, %c0_10, %c0_11, %c0_12] : memref<1x4x4x128xbf16, #tpu.memory_space<vmem>>, vector<1x1x4x128xbf16>
    %17 = vector.shape_cast %16 : vector<1x1x4x128xbf16> to vector<4x128xbf16>
    %18 = vector.shape_cast %15 : vector<4x128xbf16> to vector<1x1x4x128xbf16>
    tpu.vector_store %arg2[%c0_9, %c0_10, %c0_11, %c0_12], %18 {strides = array<i32>} : memref<1x4x4x128xbf16, #tpu.memory_space<vmem>>, vector<1x1x4x128xbf16>,
    %c0_13 = arith.constant 0 : index
    %c2_14 = arith.constant 2 : index
    %c0_15 = arith.constant 0 : index
    %c0_16 = arith.constant 0 : index
    %19 = vector.load %arg1[%c0_13, %c2_14, %c0_15, %c0_16] : memref<1x10x10x128xbf16, #tpu.memory_space<vmem>>, vector<1x1x10x128xbf16>
    %20 = vector.shape_cast %19 : vector<1x1x10x128xbf16> to vector<10x128xbf16>
    %c0_17 = arith.constant 0 : index
    %c3 = arith.constant 3 : index
    %c0_18 = arith.constant 0 : index
    %c0_19 = arith.constant 0 : index
    %21 = vector.load %arg1[%c0_17, %c3, %c0_18, %c0_19] : memref<1x10x10x128xbf16, #tpu.memory_space<vmem>>, vector<1x1x10x128xbf16>
    %22 = vector.shape_cast %21 : vector<1x1x10x128xbf16> to vector<10x128xbf16>
    %23 = arith.maximumf %20, %22 : vector<10x128xbf16>
    %c0_20 = arith.constant 0 : index
    %c4 = arith.constant 4 : index
    %c0_21 = arith.constant 0 : index
    %c0_22 = arith.constant 0 : index
    %24 = vector.load %arg1[%c0_20, %c4, %c0_21, %c0_22] : memref<1x10x10x128xbf16, #tpu.memory_space<vmem>>, vector<1x1x10x128xbf16>
    %25 = vector.shape_cast %24 : vector<1x1x10x128xbf16> to vector<10x128xbf16>
    %26 = arith.maximumf %23, %25 : vector<10x128xbf16>
    %27 = vector.extract_strided_slice %26 {offsets = [0, 0], sizes = [8, 128], strides = [1, 1]} : vector<10x128xbf16> to vector<8x128xbf16>
    %28 = vector.extract_strided_slice %26 {offsets = [1, 0], sizes = [8, 128], strides = [1, 1]} : vector<10x128xbf16> to vector<8x128xbf16>
    %29 = arith.maximumf %27, %28 : vector<8x128xbf16>
    %30 = vector.extract_strided_slice %26 {offsets = [2, 0], sizes = [8, 128], strides = [1, 1]} : vector<10x128xbf16> to vector<8x128xbf16>
    %31 = arith.maximumf %29, %30 : vector<8x128xbf16>
    %32 = vector.shape_cast %31 : vector<8x128xbf16> to vector<4x2x128xbf16>
    %33 = vector.extract_strided_slice %32 {offsets = [0, 0, 0], sizes = [4, 1, 128], strides = [1, 1, 1]} : vector<4x2x128xbf16> to vector<4x1x128xbf16>
    %34 = vector.shape_cast %33 : vector<4x1x128xbf16> to vector<4x128xbf16>
    %c0_23 = arith.constant 0 : index
    %c1_24 = arith.constant 1 : index
    %c0_25 = arith.constant 0 : index
    %c0_26 = arith.constant 0 : index
    %35 = vector.load %arg2[%c0_23, %c1_24, %c0_25, %c0_26] : memref<1x4x4x128xbf16, #tpu.memory_space<vmem>>, vector<1x1x4x128xbf16>
    %36 = vector.shape_cast %35 : vector<1x1x4x128xbf16> to vector<4x128xbf16>
    %37 = vector.shape_cast %34 : vector<4x128xbf16> to vector<1x1x4x128xbf16>
    tpu.vector_store %arg2[%c0_23, %c1_24, %c0_25, %c0_26], %37 {strides = array<i32>} : memref<1x4x4x128xbf16, #tpu.memory_space<vmem>>, vector<1x1x4x128xbf16>,
    %c0_27 = arith.constant 0 : index
    %c4_28 = arith.constant 4 : index
    %c0_29 = arith.constant 0 : index
    %c0_30 = arith.constant 0 : index
    %38 = vector.load %arg1[%c0_27, %c4_28, %c0_29, %c0_30] : memref<1x10x10x128xbf16, #tpu.memory_space<vmem>>, vector<1x1x10x128xbf16>
    %39 = vector.shape_cast %38 : vector<1x1x10x128xbf16> to vector<10x128xbf16>
    %c0_31 = arith.constant 0 : index
    %c5 = arith.constant 5 : index
    %c0_32 = arith.constant 0 : index
    %c0_33 = arith.constant 0 : index
    %40 = vector.load %arg1[%c0_31, %c5, %c0_32, %c0_33] : memref<1x10x10x128xbf16, #tpu.memory_space<vmem>>, vector<1x1x10x128xbf16>
    %41 = vector.shape_cast %40 : vector<1x1x10x128xbf16> to vector<10x128xbf16>
    %42 = arith.maximumf %39, %41 : vector<10x128xbf16>
    %c0_34 = arith.constant 0 : index
    %c6 = arith.constant 6 : index
    %c0_35 = arith.constant 0 : index
    %c0_36 = arith.constant 0 : index
    %43 = vector.load %arg1[%c0_34, %c6, %c0_35, %c0_36] : memref<1x10x10x128xbf16, #tpu.memory_space<vmem>>, vector<1x1x10x128xbf16>
    %44 = vector.shape_cast %43 : vector<1x1x10x128xbf16> to vector<10x128xbf16>
    %45 = arith.maximumf %42, %44 : vector<10x128xbf16>
    %46 = vector.extract_strided_slice %45 {offsets = [0, 0], sizes = [8, 128], strides = [1, 1]} : vector<10x128xbf16> to vector<8x128xbf16>
    %47 = vector.extract_strided_slice %45 {offsets = [1, 0], sizes = [8, 128], strides = [1, 1]} : vector<10x128xbf16> to vector<8x128xbf16>
    %48 = arith.maximumf %46, %47 : vector<8x128xbf16>
    %49 = vector.extract_strided_slice %45 {offsets = [2, 0], sizes = [8, 128], strides = [1, 1]} : vector<10x128xbf16> to vector<8x128xbf16>
    %50 = arith.maximumf %48, %49 : vector<8x128xbf16>
    %51 = vector.shape_cast %50 : vector<8x128xbf16> to vector<4x2x128xbf16>
    %52 = vector.extract_strided_slice %51 {offsets = [0, 0, 0], sizes = [4, 1, 128], strides = [1, 1, 1]} : vector<4x2x128xbf16> to vector<4x1x128xbf16>
    %53 = vector.shape_cast %52 : vector<4x1x128xbf16> to vector<4x128xbf16>
    %c0_37 = arith.constant 0 : index
    %c2_38 = arith.constant 2 : index
    %c0_39 = arith.constant 0 : index
    %c0_40 = arith.constant 0 : index
    %54 = vector.load %arg2[%c0_37, %c2_38, %c0_39, %c0_40] : memref<1x4x4x128xbf16, #tpu.memory_space<vmem>>, vector<1x1x4x128xbf16>
    %55 = vector.shape_cast %54 : vector<1x1x4x128xbf16> to vector<4x128xbf16>
    %56 = vector.shape_cast %53 : vector<4x128xbf16> to vector<1x1x4x128xbf16>
    tpu.vector_store %arg2[%c0_37, %c2_38, %c0_39, %c0_40], %56 {strides = array<i32>} : memref<1x4x4x128xbf16, #tpu.memory_space<vmem>>, vector<1x1x4x128xbf16>,
    %c0_41 = arith.constant 0 : index
    %c6_42 = arith.constant 6 : index
    %c0_43 = arith.constant 0 : index
    %c0_44 = arith.constant 0 : index
    %57 = vector.load %arg1[%c0_41, %c6_42, %c0_43, %c0_44] : memref<1x10x10x128xbf16, #tpu.memory_space<vmem>>, vector<1x1x10x128xbf16>
    %58 = vector.shape_cast %57 : vector<1x1x10x128xbf16> to vector<10x128xbf16>
    %c0_45 = arith.constant 0 : index
    %c7 = arith.constant 7 : index
    %c0_46 = arith.constant 0 : index
    %c0_47 = arith.constant 0 : index
    %59 = vector.load %arg1[%c0_45, %c7, %c0_46, %c0_47] : memref<1x10x10x128xbf16, #tpu.memory_space<vmem>>, vector<1x1x10x128xbf16>
    %60 = vector.shape_cast %59 : vector<1x1x10x128xbf16> to vector<10x128xbf16>
    %61 = arith.maximumf %58, %60 : vector<10x128xbf16>
    %c0_48 = arith.constant 0 : index
    %c8 = arith.constant 8 : index
    %c0_49 = arith.constant 0 : index
    %c0_50 = arith.constant 0 : index
    %62 = vector.load %arg1[%c0_48, %c8, %c0_49, %c0_50] : memref<1x10x10x128xbf16, #tpu.memory_space<vmem>>, vector<1x1x10x128xbf16>
    %63 = vector.shape_cast %62 : vector<1x1x10x128xbf16> to vector<10x128xbf16>
    %64 = arith.maximumf %61, %63 : vector<10x128xbf16>
    %65 = vector.extract_strided_slice %64 {offsets = [0, 0], sizes = [8, 128], strides = [1, 1]} : vector<10x128xbf16> to vector<8x128xbf16>
    %66 = vector.extract_strided_slice %64 {offsets = [1, 0], sizes = [8, 128], strides = [1, 1]} : vector<10x128xbf16> to vector<8x128xbf16>
    %67 = arith.maximumf %65, %66 : vector<8x128xbf16>
    %68 = vector.extract_strided_slice %64 {offsets = [2, 0], sizes = [8, 128], strides = [1, 1]} : vector<10x128xbf16> to vector<8x128xbf16>
    %69 = arith.maximumf %67, %68 : vector<8x128xbf16>
    %70 = vector.shape_cast %69 : vector<8x128xbf16> to vector<4x2x128xbf16>
    %71 = vector.extract_strided_slice %70 {offsets = [0, 0, 0], sizes = [4, 1, 128], strides = [1, 1, 1]} : vector<4x2x128xbf16> to vector<4x1x128xbf16>
    %72 = vector.shape_cast %71 : vector<4x1x128xbf16> to vector<4x128xbf16>
    %c0_51 = arith.constant 0 : index
    %c3_52 = arith.constant 3 : index
    %c0_53 = arith.constant 0 : index
    %c0_54 = arith.constant 0 : index
    %73 = vector.load %arg2[%c0_51, %c3_52, %c0_53, %c0_54] : memref<1x4x4x128xbf16, #tpu.memory_space<vmem>>, vector<1x1x4x128xbf16>
    %74 = vector.shape_cast %73 : vector<1x1x4x128xbf16> to vector<4x128xbf16>
    %75 = vector.shape_cast %72 : vector<4x128xbf16> to vector<1x1x4x128xbf16>
    tpu.vector_store %arg2[%c0_51, %c3_52, %c0_53, %c0_54], %75 {strides = array<i32>} : memref<1x4x4x128xbf16, #tpu.memory_space<vmem>>, vector<1x1x4x128xbf16>,
    return
  }
  func.func @transform_0(%arg0: i32) -> (i32, i32, i32, i32) {
    %c0_i32 = arith.constant 0 : i32
    %c0_i32_0 = arith.constant 0 : i32
    %c0_i32_1 = arith.constant 0 : i32
    %c0_i32_2 = arith.constant 0 : i32
    return %arg0, %c0_i32, %c0_i32_0, %c0_i32_1 : i32, i32, i32, i32
  }
  func.func @transform_1(%arg0: i32) -> (i32, i32, i32, i32) {
    %c0_i32 = arith.constant 0 : i32
    %c0_i32_0 = arith.constant 0 : i32
    %c0_i32_1 = arith.constant 0 : i32
    %c0_i32_2 = arith.constant 0 : i32
    return %arg0, %c0_i32, %c0_i32_0, %c0_i32_1 : i32, i32, i32, i32
  }
}

module attributes {stable_mosaic.version = 11 : i64} {
  func.func @_gemm_bn_1k_kernel(%arg0: i32, %arg1: i32, %arg2: memref<32x128xbf16, #tpu.memory_space<vmem>>, %arg3: memref<128x128xbf16, #tpu.memory_space<vmem>>, %arg4: memref<1x128xf32, #tpu.memory_space<vmem>>, %arg5: memref<32x128xbf16, #tpu.memory_space<vmem>>) attributes {dimension_semantics = [#tpu.dimension_semantics<parallel>, #tpu.dimension_semantics<parallel>], iteration_bounds = array<i64: 1, 3>, scalar_prefetch = 0 : i64, scratch_operands = 0 : i64, tpu.core_type = #tpu.core_type<tc>, window_params = [{transform_indices = @transform_0, window_bounds = array<i64: 32, 128>}, {transform_indices = @transform_1, window_bounds = array<i64: 128, 128>}, {transform_indices = @transform_2, window_bounds = array<i64: 1, 128>}, {transform_indices = @transform_3, window_bounds = array<i64: 32, 128>}]} {
    %c0 = arith.constant 0 : index
    %c0_0 = arith.constant 0 : index
    %0 = vector.load %arg2[%c0, %c0_0] : memref<32x128xbf16, #tpu.memory_space<vmem>>, vector<32x128xbf16>
    %c0_1 = arith.constant 0 : index
    %c0_2 = arith.constant 0 : index
    %1 = vector.load %arg3[%c0_1, %c0_2] : memref<128x128xbf16, #tpu.memory_space<vmem>>, vector<128x128xbf16>
    %cst = arith.constant dense<0.000000e+00> : vector<32x128xf32>
    %2 = tpu.matmul %0, %1, %cst {dimension_numbers = #tpu.dot_dimension_numbers<[1], [0], [0], [1], [0, 0, 1, 1], [], []>} : vector<32x128xbf16>, vector<128x128xbf16>, vector<32x128xf32> -> vector<32x128xf32>
    %c0_3 = arith.constant 0 : index
    %c0_4 = arith.constant 0 : index
    %3 = vector.load %arg4[%c0_3, %c0_4] : memref<1x128xf32, #tpu.memory_space<vmem>>, vector<1x128xf32>
    %4 = vector.broadcast %3 : vector<1x128xf32> to vector<32x128xf32>
    %5 = arith.addf %2, %4 : vector<32x128xf32>
    %6 = tpu.iota {dimensions = array<i32: 1>} : vector<32x128xi32>
    %c128_i32 = arith.constant 128 : i32
    %7 = arith.muli %arg1, %c128_i32 : i32
    %8 = vector.broadcast %7 : i32 to vector<32x128xi32>
    %9 = arith.addi %6, %8 : vector<32x128xi32>
    %c128_i32_5 = arith.constant 128 : i32
    %10 = vector.broadcast %c128_i32_5 : i32 to vector<32x128xi32>
    %11 = arith.cmpi slt, %9, %10 : vector<32x128xi32>
    %cst_6 = arith.constant 0.000000e+00 : f32
    %12 = vector.broadcast %cst_6 : f32 to vector<32x128xf32>
    %13 = arith.maximumf %5, %12 : vector<32x128xf32>
    %14 = arith.select %11, %13, %5 : vector<32x128xi1>, vector<32x128xf32>
    %15 = arith.truncf %14 : vector<32x128xf32> to vector<32x128xbf16>
    %c0_7 = arith.constant 0 : index
    %c0_8 = arith.constant 0 : index
    %16 = vector.load %arg5[%c0_7, %c0_8] : memref<32x128xbf16, #tpu.memory_space<vmem>>, vector<32x128xbf16>
    tpu.vector_store %arg5[%c0_7, %c0_8], %15 {strides = array<i32>} : memref<32x128xbf16, #tpu.memory_space<vmem>>, vector<32x128xbf16>,
    return
  }
  func.func @transform_0(%arg0: i32, %arg1: i32) -> (i32, i32) {
    %c0_i32 = arith.constant 0 : i32
    %c0_i32_0 = arith.constant 0 : i32
    return %arg0, %c0_i32 : i32, i32
  }
  func.func @transform_1(%arg0: i32, %arg1: i32) -> (i32, i32) {
    %c0_i32 = arith.constant 0 : i32
    %c0_i32_0 = arith.constant 0 : i32
    return %c0_i32, %arg1 : i32, i32
  }
  func.func @transform_2(%arg0: i32, %arg1: i32) -> (i32, i32) {
    %c0_i32 = arith.constant 0 : i32
    %c0_i32_0 = arith.constant 0 : i32
    return %c0_i32, %arg1 : i32, i32
  }
  func.func @transform_3(%arg0: i32, %arg1: i32) -> (i32, i32) {
    %c0_i32 = arith.constant 0 : i32
    return %arg0, %arg1 : i32, i32
  }
}

module attributes {stable_mosaic.version = 11 : i64} {
  func.func @_gemm_bn_1k_kernel(%arg0: i32, %arg1: i32, %arg2: memref<32x640xbf16, #tpu.memory_space<vmem>>, %arg3: memref<640x128xbf16, #tpu.memory_space<vmem>>, %arg4: memref<1x128xf32, #tpu.memory_space<vmem>>, %arg5: memref<32x128xbf16, #tpu.memory_space<vmem>>) attributes {dimension_semantics = [#tpu.dimension_semantics<parallel>, #tpu.dimension_semantics<parallel>], iteration_bounds = array<i64: 1, 1>, scalar_prefetch = 0 : i64, scratch_operands = 0 : i64, tpu.core_type = #tpu.core_type<tc>, window_params = [{transform_indices = @transform_0, window_bounds = array<i64: 32, 640>}, {transform_indices = @transform_1, window_bounds = array<i64: 640, 128>}, {transform_indices = @transform_2, window_bounds = array<i64: 1, 128>}, {transform_indices = @transform_3, window_bounds = array<i64: 32, 128>}]} {
    %c0 = arith.constant 0 : index
    %c0_0 = arith.constant 0 : index
    %0 = vector.load %arg2[%c0, %c0_0] : memref<32x640xbf16, #tpu.memory_space<vmem>>, vector<32x640xbf16>
    %c0_1 = arith.constant 0 : index
    %c0_2 = arith.constant 0 : index
    %1 = vector.load %arg3[%c0_1, %c0_2] : memref<640x128xbf16, #tpu.memory_space<vmem>>, vector<640x128xbf16>
    %cst = arith.constant dense<0.000000e+00> : vector<32x128xf32>
    %2 = tpu.matmul %0, %1, %cst {dimension_numbers = #tpu.dot_dimension_numbers<[1], [0], [0], [1], [0, 0, 1, 1], [], []>} : vector<32x640xbf16>, vector<640x128xbf16>, vector<32x128xf32> -> vector<32x128xf32>
    %c0_3 = arith.constant 0 : index
    %c0_4 = arith.constant 0 : index
    %3 = vector.load %arg4[%c0_3, %c0_4] : memref<1x128xf32, #tpu.memory_space<vmem>>, vector<1x128xf32>
    %4 = vector.broadcast %3 : vector<1x128xf32> to vector<32x128xf32>
    %5 = arith.addf %2, %4 : vector<32x128xf32>
    %cst_5 = arith.constant 0.000000e+00 : f32
    %6 = vector.broadcast %cst_5 : f32 to vector<32x128xf32>
    %7 = arith.maximumf %5, %6 : vector<32x128xf32>
    %8 = arith.truncf %7 : vector<32x128xf32> to vector<32x128xbf16>
    %c0_6 = arith.constant 0 : index
    %c0_7 = arith.constant 0 : index
    %9 = vector.load %arg5[%c0_6, %c0_7] : memref<32x128xbf16, #tpu.memory_space<vmem>>, vector<32x128xbf16>
    tpu.vector_store %arg5[%c0_6, %c0_7], %8 {strides = array<i32>} : memref<32x128xbf16, #tpu.memory_space<vmem>>, vector<32x128xbf16>,
    return
  }
  func.func @transform_0(%arg0: i32, %arg1: i32) -> (i32, i32) {
    %c0_i32 = arith.constant 0 : i32
    %c0_i32_0 = arith.constant 0 : i32
    return %arg0, %c0_i32 : i32, i32
  }
  func.func @transform_1(%arg0: i32, %arg1: i32) -> (i32, i32) {
    %c0_i32 = arith.constant 0 : i32
    %c0_i32_0 = arith.constant 0 : i32
    return %c0_i32, %arg1 : i32, i32
  }
  func.func @transform_2(%arg0: i32, %arg1: i32) -> (i32, i32) {
    %c0_i32 = arith.constant 0 : i32
    %c0_i32_0 = arith.constant 0 : i32
    return %c0_i32, %arg1 : i32, i32
  }
  func.func @transform_3(%arg0: i32, %arg1: i32) -> (i32, i32) {
    %c0_i32 = arith.constant 0 : i32
    return %arg0, %arg1 : i32, i32
  }
}

module attributes {stable_mosaic.version = 11 : i64} {
  func.func @_gemm_bn_res_1k_kernel(%arg0: i32, %arg1: i32, %arg2: memref<32x128xbf16, #tpu.memory_space<vmem>>, %arg3: memref<128x256xbf16, #tpu.memory_space<vmem>>, %arg4: memref<1x256xf32, #tpu.memory_space<vmem>>, %arg5: memref<32x256xbf16, #tpu.memory_space<vmem>>, %arg6: memref<32x256xbf16, #tpu.memory_space<vmem>>) attributes {dimension_semantics = [#tpu.dimension_semantics<parallel>, #tpu.dimension_semantics<parallel>], iteration_bounds = array<i64: 1, 1>, scalar_prefetch = 0 : i64, scratch_operands = 0 : i64, tpu.core_type = #tpu.core_type<tc>, window_params = [{transform_indices = @transform_0, window_bounds = array<i64: 32, 128>}, {transform_indices = @transform_1, window_bounds = array<i64: 128, 256>}, {transform_indices = @transform_2, window_bounds = array<i64: 1, 256>}, {transform_indices = @transform_3, window_bounds = array<i64: 32, 256>}, {transform_indices = @transform_4, window_bounds = array<i64: 32, 256>}]} {
    %c0 = arith.constant 0 : index
    %c0_0 = arith.constant 0 : index
    %0 = vector.load %arg2[%c0, %c0_0] : memref<32x128xbf16, #tpu.memory_space<vmem>>, vector<32x128xbf16>
    %c0_1 = arith.constant 0 : index
    %c0_2 = arith.constant 0 : index
    %1 = vector.load %arg3[%c0_1, %c0_2] : memref<128x256xbf16, #tpu.memory_space<vmem>>, vector<128x256xbf16>
    %cst = arith.constant dense<0.000000e+00> : vector<32x256xf32>
    %2 = tpu.matmul %0, %1, %cst {dimension_numbers = #tpu.dot_dimension_numbers<[1], [0], [0], [1], [0, 0, 1, 1], [], []>} : vector<32x128xbf16>, vector<128x256xbf16>, vector<32x256xf32> -> vector<32x256xf32>
    %c0_3 = arith.constant 0 : index
    %c0_4 = arith.constant 0 : index
    %3 = vector.load %arg4[%c0_3, %c0_4] : memref<1x256xf32, #tpu.memory_space<vmem>>, vector<1x256xf32>
    %4 = vector.broadcast %3 : vector<1x256xf32> to vector<32x256xf32>
    %5 = arith.addf %2, %4 : vector<32x256xf32>
    %c0_5 = arith.constant 0 : index
    %c0_6 = arith.constant 0 : index
    %6 = vector.load %arg5[%c0_5, %c0_6] : memref<32x256xbf16, #tpu.memory_space<vmem>>, vector<32x256xbf16>
    %7 = arith.extf %6 : vector<32x256xbf16> to vector<32x256xf32>
    %8 = arith.addf %5, %7 : vector<32x256xf32>
    %cst_7 = arith.constant 0.000000e+00 : f32
    %9 = vector.broadcast %cst_7 : f32 to vector<32x256xf32>
    %10 = arith.maximumf %8, %9 : vector<32x256xf32>
    %11 = arith.truncf %10 : vector<32x256xf32> to vector<32x256xbf16>
    %c0_8 = arith.constant 0 : index
    %c0_9 = arith.constant 0 : index
    %12 = vector.load %arg6[%c0_8, %c0_9] : memref<32x256xbf16, #tpu.memory_space<vmem>>, vector<32x256xbf16>
    tpu.vector_store %arg6[%c0_8, %c0_9], %11 {strides = array<i32>} : memref<32x256xbf16, #tpu.memory_space<vmem>>, vector<32x256xbf16>,
    return
  }
  func.func @transform_0(%arg0: i32, %arg1: i32) -> (i32, i32) {
    %c0_i32 = arith.constant 0 : i32
    %c0_i32_0 = arith.constant 0 : i32
    return %arg0, %c0_i32 : i32, i32
  }
  func.func @transform_1(%arg0: i32, %arg1: i32) -> (i32, i32) {
    %c0_i32 = arith.constant 0 : i32
    %c0_i32_0 = arith.constant 0 : i32
    return %c0_i32, %arg1 : i32, i32
  }
  func.func @transform_2(%arg0: i32, %arg1: i32) -> (i32, i32) {
    %c0_i32 = arith.constant 0 : i32
    %c0_i32_0 = arith.constant 0 : i32
    return %c0_i32, %arg1 : i32, i32
  }
  func.func @transform_3(%arg0: i32, %arg1: i32) -> (i32, i32) {
    %c0_i32 = arith.constant 0 : i32
    return %arg0, %arg1 : i32, i32
  }
  func.func @transform_4(%arg0: i32, %arg1: i32) -> (i32, i32) {
    %c0_i32 = arith.constant 0 : i32
    return %arg0, %arg1 : i32, i32
  }
}

module attributes {stable_mosaic.version = 11 : i64} {
  func.func @_gemm_bn_1k_kernel(%arg0: i32, %arg1: i32, %arg2: memref<32x256xbf16, #tpu.memory_space<vmem>>, %arg3: memref<256x128xbf16, #tpu.memory_space<vmem>>, %arg4: memref<1x128xf32, #tpu.memory_space<vmem>>, %arg5: memref<32x128xbf16, #tpu.memory_space<vmem>>) attributes {dimension_semantics = [#tpu.dimension_semantics<parallel>, #tpu.dimension_semantics<parallel>], iteration_bounds = array<i64: 1, 1>, scalar_prefetch = 0 : i64, scratch_operands = 0 : i64, tpu.core_type = #tpu.core_type<tc>, window_params = [{transform_indices = @transform_0, window_bounds = array<i64: 32, 256>}, {transform_indices = @transform_1, window_bounds = array<i64: 256, 128>}, {transform_indices = @transform_2, window_bounds = array<i64: 1, 128>}, {transform_indices = @transform_3, window_bounds = array<i64: 32, 128>}]} {
    %c0 = arith.constant 0 : index
    %c0_0 = arith.constant 0 : index
    %0 = vector.load %arg2[%c0, %c0_0] : memref<32x256xbf16, #tpu.memory_space<vmem>>, vector<32x256xbf16>
    %c0_1 = arith.constant 0 : index
    %c0_2 = arith.constant 0 : index
    %1 = vector.load %arg3[%c0_1, %c0_2] : memref<256x128xbf16, #tpu.memory_space<vmem>>, vector<256x128xbf16>
    %cst = arith.constant dense<0.000000e+00> : vector<32x128xf32>
    %2 = tpu.matmul %0, %1, %cst {dimension_numbers = #tpu.dot_dimension_numbers<[1], [0], [0], [1], [0, 0, 1, 1], [], []>} : vector<32x256xbf16>, vector<256x128xbf16>, vector<32x128xf32> -> vector<32x128xf32>
    %c0_3 = arith.constant 0 : index
    %c0_4 = arith.constant 0 : index
    %3 = vector.load %arg4[%c0_3, %c0_4] : memref<1x128xf32, #tpu.memory_space<vmem>>, vector<1x128xf32>
    %4 = vector.broadcast %3 : vector<1x128xf32> to vector<32x128xf32>
    %5 = arith.addf %2, %4 : vector<32x128xf32>
    %cst_5 = arith.constant 0.000000e+00 : f32
    %6 = vector.broadcast %cst_5 : f32 to vector<32x128xf32>
    %7 = arith.maximumf %5, %6 : vector<32x128xf32>
    %8 = arith.truncf %7 : vector<32x128xf32> to vector<32x128xbf16>
    %c0_6 = arith.constant 0 : index
    %c0_7 = arith.constant 0 : index
    %9 = vector.load %arg5[%c0_6, %c0_7] : memref<32x128xbf16, #tpu.memory_space<vmem>>, vector<32x128xbf16>
    tpu.vector_store %arg5[%c0_6, %c0_7], %8 {strides = array<i32>} : memref<32x128xbf16, #tpu.memory_space<vmem>>, vector<32x128xbf16>,
    return
  }
  func.func @transform_0(%arg0: i32, %arg1: i32) -> (i32, i32) {
    %c0_i32 = arith.constant 0 : i32
    %c0_i32_0 = arith.constant 0 : i32
    return %arg0, %c0_i32 : i32, i32
  }
  func.func @transform_1(%arg0: i32, %arg1: i32) -> (i32, i32) {
    %c0_i32 = arith.constant 0 : i32
    %c0_i32_0 = arith.constant 0 : i32
    return %c0_i32, %arg1 : i32, i32
  }
  func.func @transform_2(%arg0: i32, %arg1: i32) -> (i32, i32) {
    %c0_i32 = arith.constant 0 : i32
    %c0_i32_0 = arith.constant 0 : i32
    return %c0_i32, %arg1 : i32, i32
  }
  func.func @transform_3(%arg0: i32, %arg1: i32) -> (i32, i32) {
    %c0_i32 = arith.constant 0 : i32
    return %arg0, %arg1 : i32, i32
  }
}

module attributes {stable_mosaic.version = 11 : i64} {
  func.func @_gemm_bn_1k_kernel(%arg0: i32, %arg1: i32, %arg2: memref<16x256xbf16, #tpu.memory_space<vmem>>, %arg3: memref<256x256xbf16, #tpu.memory_space<vmem>>, %arg4: memref<1x256xf32, #tpu.memory_space<vmem>>, %arg5: memref<16x256xbf16, #tpu.memory_space<vmem>>) attributes {dimension_semantics = [#tpu.dimension_semantics<parallel>, #tpu.dimension_semantics<parallel>], iteration_bounds = array<i64: 1, 2>, scalar_prefetch = 0 : i64, scratch_operands = 0 : i64, tpu.core_type = #tpu.core_type<tc>, window_params = [{transform_indices = @transform_0, window_bounds = array<i64: 16, 256>}, {transform_indices = @transform_1, window_bounds = array<i64: 256, 256>}, {transform_indices = @transform_2, window_bounds = array<i64: 1, 256>}, {transform_indices = @transform_3, window_bounds = array<i64: 16, 256>}]} {
    %c0 = arith.constant 0 : index
    %c0_0 = arith.constant 0 : index
    %0 = vector.load %arg2[%c0, %c0_0] : memref<16x256xbf16, #tpu.memory_space<vmem>>, vector<16x256xbf16>
    %c0_1 = arith.constant 0 : index
    %c0_2 = arith.constant 0 : index
    %1 = vector.load %arg3[%c0_1, %c0_2] : memref<256x256xbf16, #tpu.memory_space<vmem>>, vector<256x256xbf16>
    %cst = arith.constant dense<0.000000e+00> : vector<16x256xf32>
    %2 = tpu.matmul %0, %1, %cst {dimension_numbers = #tpu.dot_dimension_numbers<[1], [0], [0], [1], [0, 0, 1, 1], [], []>} : vector<16x256xbf16>, vector<256x256xbf16>, vector<16x256xf32> -> vector<16x256xf32>
    %c0_3 = arith.constant 0 : index
    %c0_4 = arith.constant 0 : index
    %3 = vector.load %arg4[%c0_3, %c0_4] : memref<1x256xf32, #tpu.memory_space<vmem>>, vector<1x256xf32>
    %4 = vector.broadcast %3 : vector<1x256xf32> to vector<16x256xf32>
    %5 = arith.addf %2, %4 : vector<16x256xf32>
    %6 = arith.truncf %5 : vector<16x256xf32> to vector<16x256xbf16>
    %c0_5 = arith.constant 0 : index
    %c0_6 = arith.constant 0 : index
    %7 = vector.load %arg5[%c0_5, %c0_6] : memref<16x256xbf16, #tpu.memory_space<vmem>>, vector<16x256xbf16>
    tpu.vector_store %arg5[%c0_5, %c0_6], %6 {strides = array<i32>} : memref<16x256xbf16, #tpu.memory_space<vmem>>, vector<16x256xbf16>,
    return
  }
  func.func @transform_0(%arg0: i32, %arg1: i32) -> (i32, i32) {
    %c0_i32 = arith.constant 0 : i32
    %c0_i32_0 = arith.constant 0 : i32
    return %arg0, %c0_i32 : i32, i32
  }
  func.func @transform_1(%arg0: i32, %arg1: i32) -> (i32, i32) {
    %c0_i32 = arith.constant 0 : i32
    %c0_i32_0 = arith.constant 0 : i32
    return %c0_i32, %arg1 : i32, i32
  }
  func.func @transform_2(%arg0: i32, %arg1: i32) -> (i32, i32) {
    %c0_i32 = arith.constant 0 : i32
    %c0_i32_0 = arith.constant 0 : i32
    return %c0_i32, %arg1 : i32, i32
  }
  func.func @transform_3(%arg0: i32, %arg1: i32) -> (i32, i32) {
    %c0_i32 = arith.constant 0 : i32
    return %arg0, %arg1 : i32, i32
  }
}

module attributes {stable_mosaic.version = 11 : i64} {
  func.func @_gemm_bn_1k_kernel(%arg0: i32, %arg1: i32, %arg2: memref<16x1152xbf16, #tpu.memory_space<vmem>>, %arg3: memref<1152x128xbf16, #tpu.memory_space<vmem>>, %arg4: memref<1x128xf32, #tpu.memory_space<vmem>>, %arg5: memref<16x128xbf16, #tpu.memory_space<vmem>>) attributes {dimension_semantics = [#tpu.dimension_semantics<parallel>, #tpu.dimension_semantics<parallel>], iteration_bounds = array<i64: 1, 1>, scalar_prefetch = 0 : i64, scratch_operands = 0 : i64, tpu.core_type = #tpu.core_type<tc>, window_params = [{transform_indices = @transform_0, window_bounds = array<i64: 16, 1152>}, {transform_indices = @transform_1, window_bounds = array<i64: 1152, 128>}, {transform_indices = @transform_2, window_bounds = array<i64: 1, 128>}, {transform_indices = @transform_3, window_bounds = array<i64: 16, 128>}]} {
    %c0 = arith.constant 0 : index
    %c0_0 = arith.constant 0 : index
    %0 = vector.load %arg2[%c0, %c0_0] : memref<16x1152xbf16, #tpu.memory_space<vmem>>, vector<16x1152xbf16>
    %c0_1 = arith.constant 0 : index
    %c0_2 = arith.constant 0 : index
    %1 = vector.load %arg3[%c0_1, %c0_2] : memref<1152x128xbf16, #tpu.memory_space<vmem>>, vector<1152x128xbf16>
    %cst = arith.constant dense<0.000000e+00> : vector<16x128xf32>
    %2 = tpu.matmul %0, %1, %cst {dimension_numbers = #tpu.dot_dimension_numbers<[1], [0], [0], [1], [0, 0, 1, 1], [], []>} : vector<16x1152xbf16>, vector<1152x128xbf16>, vector<16x128xf32> -> vector<16x128xf32>
    %c0_3 = arith.constant 0 : index
    %c0_4 = arith.constant 0 : index
    %3 = vector.load %arg4[%c0_3, %c0_4] : memref<1x128xf32, #tpu.memory_space<vmem>>, vector<1x128xf32>
    %4 = vector.broadcast %3 : vector<1x128xf32> to vector<16x128xf32>
    %5 = arith.addf %2, %4 : vector<16x128xf32>
    %cst_5 = arith.constant 0.000000e+00 : f32
    %6 = vector.broadcast %cst_5 : f32 to vector<16x128xf32>
    %7 = arith.maximumf %5, %6 : vector<16x128xf32>
    %8 = arith.truncf %7 : vector<16x128xf32> to vector<16x128xbf16>
    %c0_6 = arith.constant 0 : index
    %c0_7 = arith.constant 0 : index
    %9 = vector.load %arg5[%c0_6, %c0_7] : memref<16x128xbf16, #tpu.memory_space<vmem>>, vector<16x128xbf16>
    tpu.vector_store %arg5[%c0_6, %c0_7], %8 {strides = array<i32>} : memref<16x128xbf16, #tpu.memory_space<vmem>>, vector<16x128xbf16>,
    return
  }
  func.func @transform_0(%arg0: i32, %arg1: i32) -> (i32, i32) {
    %c0_i32 = arith.constant 0 : i32
    %c0_i32_0 = arith.constant 0 : i32
    return %arg0, %c0_i32 : i32, i32
  }
  func.func @transform_1(%arg0: i32, %arg1: i32) -> (i32, i32) {
    %c0_i32 = arith.constant 0 : i32
    %c0_i32_0 = arith.constant 0 : i32
    return %c0_i32, %arg1 : i32, i32
  }
  func.func @transform_2(%arg0: i32, %arg1: i32) -> (i32, i32) {
    %c0_i32 = arith.constant 0 : i32
    %c0_i32_0 = arith.constant 0 : i32
    return %c0_i32, %arg1 : i32, i32
  }
  func.func @transform_3(%arg0: i32, %arg1: i32) -> (i32, i32) {
    %c0_i32 = arith.constant 0 : i32
    return %arg0, %arg1 : i32, i32
  }
}

module attributes {stable_mosaic.version = 11 : i64} {
  func.func @_gemm_bn_1k_kernel(%arg0: i32, %arg1: i32, %arg2: memref<16x512xbf16, #tpu.memory_space<vmem>>, %arg3: memref<512x128xbf16, #tpu.memory_space<vmem>>, %arg4: memref<1x128xf32, #tpu.memory_space<vmem>>, %arg5: memref<16x128xbf16, #tpu.memory_space<vmem>>) attributes {dimension_semantics = [#tpu.dimension_semantics<parallel>, #tpu.dimension_semantics<parallel>], iteration_bounds = array<i64: 1, 1>, scalar_prefetch = 0 : i64, scratch_operands = 0 : i64, tpu.core_type = #tpu.core_type<tc>, window_params = [{transform_indices = @transform_0, window_bounds = array<i64: 16, 512>}, {transform_indices = @transform_1, window_bounds = array<i64: 512, 128>}, {transform_indices = @transform_2, window_bounds = array<i64: 1, 128>}, {transform_indices = @transform_3, window_bounds = array<i64: 16, 128>}]} {
    %c0 = arith.constant 0 : index
    %c0_0 = arith.constant 0 : index
    %0 = vector.load %arg2[%c0, %c0_0] : memref<16x512xbf16, #tpu.memory_space<vmem>>, vector<16x512xbf16>
    %c0_1 = arith.constant 0 : index
    %c0_2 = arith.constant 0 : index
    %1 = vector.load %arg3[%c0_1, %c0_2] : memref<512x128xbf16, #tpu.memory_space<vmem>>, vector<512x128xbf16>
    %cst = arith.constant dense<0.000000e+00> : vector<16x128xf32>
    %2 = tpu.matmul %0, %1, %cst {dimension_numbers = #tpu.dot_dimension_numbers<[1], [0], [0], [1], [0, 0, 1, 1], [], []>} : vector<16x512xbf16>, vector<512x128xbf16>, vector<16x128xf32> -> vector<16x128xf32>
    %c0_3 = arith.constant 0 : index
    %c0_4 = arith.constant 0 : index
    %3 = vector.load %arg4[%c0_3, %c0_4] : memref<1x128xf32, #tpu.memory_space<vmem>>, vector<1x128xf32>
    %4 = vector.broadcast %3 : vector<1x128xf32> to vector<16x128xf32>
    %5 = arith.addf %2, %4 : vector<16x128xf32>
    %cst_5 = arith.constant 0.000000e+00 : f32
    %6 = vector.broadcast %cst_5 : f32 to vector<16x128xf32>
    %7 = arith.maximumf %5, %6 : vector<16x128xf32>
    %8 = arith.truncf %7 : vector<16x128xf32> to vector<16x128xbf16>
    %c0_6 = arith.constant 0 : index
    %c0_7 = arith.constant 0 : index
    %9 = vector.load %arg5[%c0_6, %c0_7] : memref<16x128xbf16, #tpu.memory_space<vmem>>, vector<16x128xbf16>
    tpu.vector_store %arg5[%c0_6, %c0_7], %8 {strides = array<i32>} : memref<16x128xbf16, #tpu.memory_space<vmem>>, vector<16x128xbf16>,
    return
  }
  func.func @transform_0(%arg0: i32, %arg1: i32) -> (i32, i32) {
    %c0_i32 = arith.constant 0 : i32
    %c0_i32_0 = arith.constant 0 : i32
    return %arg0, %c0_i32 : i32, i32
  }
  func.func @transform_1(%arg0: i32, %arg1: i32) -> (i32, i32) {
    %c0_i32 = arith.constant 0 : i32
    %c0_i32_0 = arith.constant 0 : i32
    return %c0_i32, %arg1 : i32, i32
  }
  func.func @transform_2(%arg0: i32, %arg1: i32) -> (i32, i32) {
    %c0_i32 = arith.constant 0 : i32
    %c0_i32_0 = arith.constant 0 : i32
    return %c0_i32, %arg1 : i32, i32
  }
  func.func @transform_3(%arg0: i32, %arg1: i32) -> (i32, i32) {
    %c0_i32 = arith.constant 0 : i32
    return %arg0, %arg1 : i32, i32
  }
}

module attributes {stable_mosaic.version = 11 : i64} {
  func.func @_gemm_bn_res_1k_kernel(%arg0: i32, %arg1: i32, %arg2: memref<16x128xbf16, #tpu.memory_space<vmem>>, %arg3: memref<128x256xbf16, #tpu.memory_space<vmem>>, %arg4: memref<1x256xf32, #tpu.memory_space<vmem>>, %arg5: memref<16x256xbf16, #tpu.memory_space<vmem>>, %arg6: memref<16x256xbf16, #tpu.memory_space<vmem>>) attributes {dimension_semantics = [#tpu.dimension_semantics<parallel>, #tpu.dimension_semantics<parallel>], iteration_bounds = array<i64: 1, 2>, scalar_prefetch = 0 : i64, scratch_operands = 0 : i64, tpu.core_type = #tpu.core_type<tc>, window_params = [{transform_indices = @transform_0, window_bounds = array<i64: 16, 128>}, {transform_indices = @transform_1, window_bounds = array<i64: 128, 256>}, {transform_indices = @transform_2, window_bounds = array<i64: 1, 256>}, {transform_indices = @transform_3, window_bounds = array<i64: 16, 256>}, {transform_indices = @transform_4, window_bounds = array<i64: 16, 256>}]} {
    %c0 = arith.constant 0 : index
    %c0_0 = arith.constant 0 : index
    %0 = vector.load %arg2[%c0, %c0_0] : memref<16x128xbf16, #tpu.memory_space<vmem>>, vector<16x128xbf16>
    %c0_1 = arith.constant 0 : index
    %c0_2 = arith.constant 0 : index
    %1 = vector.load %arg3[%c0_1, %c0_2] : memref<128x256xbf16, #tpu.memory_space<vmem>>, vector<128x256xbf16>
    %cst = arith.constant dense<0.000000e+00> : vector<16x256xf32>
    %2 = tpu.matmul %0, %1, %cst {dimension_numbers = #tpu.dot_dimension_numbers<[1], [0], [0], [1], [0, 0, 1, 1], [], []>} : vector<16x128xbf16>, vector<128x256xbf16>, vector<16x256xf32> -> vector<16x256xf32>
    %c0_3 = arith.constant 0 : index
    %c0_4 = arith.constant 0 : index
    %3 = vector.load %arg4[%c0_3, %c0_4] : memref<1x256xf32, #tpu.memory_space<vmem>>, vector<1x256xf32>
    %4 = vector.broadcast %3 : vector<1x256xf32> to vector<16x256xf32>
    %5 = arith.addf %2, %4 : vector<16x256xf32>
    %c0_5 = arith.constant 0 : index
    %c0_6 = arith.constant 0 : index
    %6 = vector.load %arg5[%c0_5, %c0_6] : memref<16x256xbf16, #tpu.memory_space<vmem>>, vector<16x256xbf16>
    %7 = arith.extf %6 : vector<16x256xbf16> to vector<16x256xf32>
    %8 = arith.addf %5, %7 : vector<16x256xf32>
    %cst_7 = arith.constant 0.000000e+00 : f32
    %9 = vector.broadcast %cst_7 : f32 to vector<16x256xf32>
    %10 = arith.maximumf %8, %9 : vector<16x256xf32>
    %11 = arith.truncf %10 : vector<16x256xf32> to vector<16x256xbf16>
    %c0_8 = arith.constant 0 : index
    %c0_9 = arith.constant 0 : index
    %12 = vector.load %arg6[%c0_8, %c0_9] : memref<16x256xbf16, #tpu.memory_space<vmem>>, vector<16x256xbf16>
    tpu.vector_store %arg6[%c0_8, %c0_9], %11 {strides = array<i32>} : memref<16x256xbf16, #tpu.memory_space<vmem>>, vector<16x256xbf16>,
    return
  }
  func.func @transform_0(%arg0: i32, %arg1: i32) -> (i32, i32) {
    %c0_i32 = arith.constant 0 : i32
    %c0_i32_0 = arith.constant 0 : i32
    return %arg0, %c0_i32 : i32, i32
  }
  func.func @transform_1(%arg0: i32, %arg1: i32) -> (i32, i32) {
    %c0_i32 = arith.constant 0 : i32
    %c0_i32_0 = arith.constant 0 : i32
    return %c0_i32, %arg1 : i32, i32
  }
  func.func @transform_2(%arg0: i32, %arg1: i32) -> (i32, i32) {
    %c0_i32 = arith.constant 0 : i32
    %c0_i32_0 = arith.constant 0 : i32
    return %c0_i32, %arg1 : i32, i32
  }
  func.func @transform_3(%arg0: i32, %arg1: i32) -> (i32, i32) {
    %c0_i32 = arith.constant 0 : i32
    return %arg0, %arg1 : i32, i32
  }
  func.func @transform_4(%arg0: i32, %arg1: i32) -> (i32, i32) {
    %c0_i32 = arith.constant 0 : i32
    return %arg0, %arg1 : i32, i32
  }
}

module attributes {stable_mosaic.version = 11 : i64} {
  func.func @_gemm_bn_1k_kernel(%arg0: i32, %arg1: i32, %arg2: memref<16x512xbf16, #tpu.memory_space<vmem>>, %arg3: memref<512x256xbf16, #tpu.memory_space<vmem>>, %arg4: memref<1x256xf32, #tpu.memory_space<vmem>>, %arg5: memref<16x256xbf16, #tpu.memory_space<vmem>>) attributes {dimension_semantics = [#tpu.dimension_semantics<parallel>, #tpu.dimension_semantics<parallel>], iteration_bounds = array<i64: 1, 5>, scalar_prefetch = 0 : i64, scratch_operands = 0 : i64, tpu.core_type = #tpu.core_type<tc>, window_params = [{transform_indices = @transform_0, window_bounds = array<i64: 16, 512>}, {transform_indices = @transform_1, window_bounds = array<i64: 512, 256>}, {transform_indices = @transform_2, window_bounds = array<i64: 1, 256>}, {transform_indices = @transform_3, window_bounds = array<i64: 16, 256>}]} {
    %c0 = arith.constant 0 : index
    %c0_0 = arith.constant 0 : index
    %0 = vector.load %arg2[%c0, %c0_0] : memref<16x512xbf16, #tpu.memory_space<vmem>>, vector<16x512xbf16>
    %c0_1 = arith.constant 0 : index
    %c0_2 = arith.constant 0 : index
    %1 = vector.load %arg3[%c0_1, %c0_2] : memref<512x256xbf16, #tpu.memory_space<vmem>>, vector<512x256xbf16>
    %cst = arith.constant dense<0.000000e+00> : vector<16x256xf32>
    %2 = tpu.matmul %0, %1, %cst {dimension_numbers = #tpu.dot_dimension_numbers<[1], [0], [0], [1], [0, 0, 1, 1], [], []>} : vector<16x512xbf16>, vector<512x256xbf16>, vector<16x256xf32> -> vector<16x256xf32>
    %c0_3 = arith.constant 0 : index
    %c0_4 = arith.constant 0 : index
    %3 = vector.load %arg4[%c0_3, %c0_4] : memref<1x256xf32, #tpu.memory_space<vmem>>, vector<1x256xf32>
    %4 = vector.broadcast %3 : vector<1x256xf32> to vector<16x256xf32>
    %5 = arith.addf %2, %4 : vector<16x256xf32>
    %6 = tpu.iota {dimensions = array<i32: 1>} : vector<16x256xi32>
    %c256_i32 = arith.constant 256 : i32
    %7 = arith.muli %arg1, %c256_i32 : i32
    %8 = vector.broadcast %7 : i32 to vector<16x256xi32>
    %9 = arith.addi %6, %8 : vector<16x256xi32>
    %c256_i32_5 = arith.constant 256 : i32
    %10 = vector.broadcast %c256_i32_5 : i32 to vector<16x256xi32>
    %11 = arith.cmpi slt, %9, %10 : vector<16x256xi32>
    %cst_6 = arith.constant 0.000000e+00 : f32
    %12 = vector.broadcast %cst_6 : f32 to vector<16x256xf32>
    %13 = arith.maximumf %5, %12 : vector<16x256xf32>
    %14 = arith.select %11, %13, %5 : vector<16x256xi1>, vector<16x256xf32>
    %15 = arith.truncf %14 : vector<16x256xf32> to vector<16x256xbf16>
    %c0_7 = arith.constant 0 : index
    %c0_8 = arith.constant 0 : index
    %16 = vector.load %arg5[%c0_7, %c0_8] : memref<16x256xbf16, #tpu.memory_space<vmem>>, vector<16x256xbf16>
    tpu.vector_store %arg5[%c0_7, %c0_8], %15 {strides = array<i32>} : memref<16x256xbf16, #tpu.memory_space<vmem>>, vector<16x256xbf16>,
    return
  }
  func.func @transform_0(%arg0: i32, %arg1: i32) -> (i32, i32) {
    %c0_i32 = arith.constant 0 : i32
    %c0_i32_0 = arith.constant 0 : i32
    return %arg0, %c0_i32 : i32, i32
  }
  func.func @transform_1(%arg0: i32, %arg1: i32) -> (i32, i32) {
    %c0_i32 = arith.constant 0 : i32
    %c0_i32_0 = arith.constant 0 : i32
    return %c0_i32, %arg1 : i32, i32
  }
  func.func @transform_2(%arg0: i32, %arg1: i32) -> (i32, i32) {
    %c0_i32 = arith.constant 0 : i32
    %c0_i32_0 = arith.constant 0 : i32
    return %c0_i32, %arg1 : i32, i32
  }
  func.func @transform_3(%arg0: i32, %arg1: i32) -> (i32, i32) {
    %c0_i32 = arith.constant 0 : i32
    return %arg0, %arg1 : i32, i32
  }
}

module attributes {stable_mosaic.version = 11 : i64} {
  func.func @_gemm_bn_1k_kernel(%arg0: i32, %arg1: i32, %arg2: memref<16x2304xbf16, #tpu.memory_space<vmem>>, %arg3: memref<2304x256xbf16, #tpu.memory_space<vmem>>, %arg4: memref<1x256xf32, #tpu.memory_space<vmem>>, %arg5: memref<16x256xbf16, #tpu.memory_space<vmem>>) attributes {dimension_semantics = [#tpu.dimension_semantics<parallel>, #tpu.dimension_semantics<parallel>], iteration_bounds = array<i64: 1, 1>, scalar_prefetch = 0 : i64, scratch_operands = 0 : i64, tpu.core_type = #tpu.core_type<tc>, window_params = [{transform_indices = @transform_0, window_bounds = array<i64: 16, 2304>}, {transform_indices = @transform_1, window_bounds = array<i64: 2304, 256>}, {transform_indices = @transform_2, window_bounds = array<i64: 1, 256>}, {transform_indices = @transform_3, window_bounds = array<i64: 16, 256>}]} {
    %c0 = arith.constant 0 : index
    %c0_0 = arith.constant 0 : index
    %0 = vector.load %arg2[%c0, %c0_0] : memref<16x2304xbf16, #tpu.memory_space<vmem>>, vector<16x2304xbf16>
    %c0_1 = arith.constant 0 : index
    %c0_2 = arith.constant 0 : index
    %1 = vector.load %arg3[%c0_1, %c0_2] : memref<2304x256xbf16, #tpu.memory_space<vmem>>, vector<2304x256xbf16>
    %cst = arith.constant dense<0.000000e+00> : vector<16x256xf32>
    %2 = tpu.matmul %0, %1, %cst {dimension_numbers = #tpu.dot_dimension_numbers<[1], [0], [0], [1], [0, 0, 1, 1], [], []>} : vector<16x2304xbf16>, vector<2304x256xbf16>, vector<16x256xf32> -> vector<16x256xf32>
    %c0_3 = arith.constant 0 : index
    %c0_4 = arith.constant 0 : index
    %3 = vector.load %arg4[%c0_3, %c0_4] : memref<1x256xf32, #tpu.memory_space<vmem>>, vector<1x256xf32>
    %4 = vector.broadcast %3 : vector<1x256xf32> to vector<16x256xf32>
    %5 = arith.addf %2, %4 : vector<16x256xf32>
    %cst_5 = arith.constant 0.000000e+00 : f32
    %6 = vector.broadcast %cst_5 : f32 to vector<16x256xf32>
    %7 = arith.maximumf %5, %6 : vector<16x256xf32>
    %8 = arith.truncf %7 : vector<16x256xf32> to vector<16x256xbf16>
    %c0_6 = arith.constant 0 : index
    %c0_7 = arith.constant 0 : index
    %9 = vector.load %arg5[%c0_6, %c0_7] : memref<16x256xbf16, #tpu.memory_space<vmem>>, vector<16x256xbf16>
    tpu.vector_store %arg5[%c0_6, %c0_7], %8 {strides = array<i32>} : memref<16x256xbf16, #tpu.memory_space<vmem>>, vector<16x256xbf16>,
    return
  }
  func.func @transform_0(%arg0: i32, %arg1: i32) -> (i32, i32) {
    %c0_i32 = arith.constant 0 : i32
    %c0_i32_0 = arith.constant 0 : i32
    return %arg0, %c0_i32 : i32, i32
  }
  func.func @transform_1(%arg0: i32, %arg1: i32) -> (i32, i32) {
    %c0_i32 = arith.constant 0 : i32
    %c0_i32_0 = arith.constant 0 : i32
    return %c0_i32, %arg1 : i32, i32
  }
  func.func @transform_2(%arg0: i32, %arg1: i32) -> (i32, i32) {
    %c0_i32 = arith.constant 0 : i32
    %c0_i32_0 = arith.constant 0 : i32
    return %c0_i32, %arg1 : i32, i32
  }
  func.func @transform_3(%arg0: i32, %arg1: i32) -> (i32, i32) {
    %c0_i32 = arith.constant 0 : i32
    return %arg0, %arg1 : i32, i32
  }
}

module attributes {stable_mosaic.version = 11 : i64} {
  func.func @_gemm_bn_res_1k_kernel(%arg0: i32, %arg1: i32, %arg2: memref<16x256xbf16, #tpu.memory_space<vmem>>, %arg3: memref<256x256xbf16, #tpu.memory_space<vmem>>, %arg4: memref<1x256xf32, #tpu.memory_space<vmem>>, %arg5: memref<16x256xbf16, #tpu.memory_space<vmem>>, %arg6: memref<16x256xbf16, #tpu.memory_space<vmem>>) attributes {dimension_semantics = [#tpu.dimension_semantics<parallel>, #tpu.dimension_semantics<parallel>], iteration_bounds = array<i64: 1, 4>, scalar_prefetch = 0 : i64, scratch_operands = 0 : i64, tpu.core_type = #tpu.core_type<tc>, window_params = [{transform_indices = @transform_0, window_bounds = array<i64: 16, 256>}, {transform_indices = @transform_1, window_bounds = array<i64: 256, 256>}, {transform_indices = @transform_2, window_bounds = array<i64: 1, 256>}, {transform_indices = @transform_3, window_bounds = array<i64: 16, 256>}, {transform_indices = @transform_4, window_bounds = array<i64: 16, 256>}]} {
    %c0 = arith.constant 0 : index
    %c0_0 = arith.constant 0 : index
    %0 = vector.load %arg2[%c0, %c0_0] : memref<16x256xbf16, #tpu.memory_space<vmem>>, vector<16x256xbf16>
    %c0_1 = arith.constant 0 : index
    %c0_2 = arith.constant 0 : index
    %1 = vector.load %arg3[%c0_1, %c0_2] : memref<256x256xbf16, #tpu.memory_space<vmem>>, vector<256x256xbf16>
    %cst = arith.constant dense<0.000000e+00> : vector<16x256xf32>
    %2 = tpu.matmul %0, %1, %cst {dimension_numbers = #tpu.dot_dimension_numbers<[1], [0], [0], [1], [0, 0, 1, 1], [], []>} : vector<16x256xbf16>, vector<256x256xbf16>, vector<16x256xf32> -> vector<16x256xf32>
    %c0_3 = arith.constant 0 : index
    %c0_4 = arith.constant 0 : index
    %3 = vector.load %arg4[%c0_3, %c0_4] : memref<1x256xf32, #tpu.memory_space<vmem>>, vector<1x256xf32>
    %4 = vector.broadcast %3 : vector<1x256xf32> to vector<16x256xf32>
    %5 = arith.addf %2, %4 : vector<16x256xf32>
    %c0_5 = arith.constant 0 : index
    %c0_6 = arith.constant 0 : index
    %6 = vector.load %arg5[%c0_5, %c0_6] : memref<16x256xbf16, #tpu.memory_space<vmem>>, vector<16x256xbf16>
    %7 = arith.extf %6 : vector<16x256xbf16> to vector<16x256xf32>
    %8 = arith.addf %5, %7 : vector<16x256xf32>
    %cst_7 = arith.constant 0.000000e+00 : f32
    %9 = vector.broadcast %cst_7 : f32 to vector<16x256xf32>
    %10 = arith.maximumf %8, %9 : vector<16x256xf32>
    %11 = arith.truncf %10 : vector<16x256xf32> to vector<16x256xbf16>
    %c0_8 = arith.constant 0 : index
    %c0_9 = arith.constant 0 : index
    %12 = vector.load %arg6[%c0_8, %c0_9] : memref<16x256xbf16, #tpu.memory_space<vmem>>, vector<16x256xbf16>
    tpu.vector_store %arg6[%c0_8, %c0_9], %11 {strides = array<i32>} : memref<16x256xbf16, #tpu.memory_space<vmem>>, vector<16x256xbf16>,
    return
  }
  func.func @transform_0(%arg0: i32, %arg1: i32) -> (i32, i32) {
    %c0_i32 = arith.constant 0 : i32
    %c0_i32_0 = arith.constant 0 : i32
    return %arg0, %c0_i32 : i32, i32
  }
  func.func @transform_1(%arg0: i32, %arg1: i32) -> (i32, i32) {
    %c0_i32 = arith.constant 0 : i32
    %c0_i32_0 = arith.constant 0 : i32
    return %c0_i32, %arg1 : i32, i32
  }
  func.func @transform_2(%arg0: i32, %arg1: i32) -> (i32, i32) {
    %c0_i32 = arith.constant 0 : i32
    %c0_i32_0 = arith.constant 0 : i32
    return %c0_i32, %arg1 : i32, i32
  }
  func.func @transform_3(%arg0: i32, %arg1: i32) -> (i32, i32) {
    %c0_i32 = arith.constant 0 : i32
    return %arg0, %arg1 : i32, i32
  }
  func.func @transform_4(%arg0: i32, %arg1: i32) -> (i32, i32) {
    %c0_i32 = arith.constant 0 : i32
    return %arg0, %arg1 : i32, i32
  }
}

module attributes {stable_mosaic.version = 11 : i64} {
  func.func @_gemm_bn_1k_kernel(%arg0: i32, %arg1: i32, %arg2: memref<16x1024xbf16, #tpu.memory_space<vmem>>, %arg3: memref<1024x256xbf16, #tpu.memory_space<vmem>>, %arg4: memref<1x256xf32, #tpu.memory_space<vmem>>, %arg5: memref<16x256xbf16, #tpu.memory_space<vmem>>) attributes {dimension_semantics = [#tpu.dimension_semantics<parallel>, #tpu.dimension_semantics<parallel>], iteration_bounds = array<i64: 1, 1>, scalar_prefetch = 0 : i64, scratch_operands = 0 : i64, tpu.core_type = #tpu.core_type<tc>, window_params = [{transform_indices = @transform_0, window_bounds = array<i64: 16, 1024>}, {transform_indices = @transform_1, window_bounds = array<i64: 1024, 256>}, {transform_indices = @transform_2, window_bounds = array<i64: 1, 256>}, {transform_indices = @transform_3, window_bounds = array<i64: 16, 256>}]} {
    %c0 = arith.constant 0 : index
    %c0_0 = arith.constant 0 : index
    %0 = vector.load %arg2[%c0, %c0_0] : memref<16x1024xbf16, #tpu.memory_space<vmem>>, vector<16x1024xbf16>
    %c0_1 = arith.constant 0 : index
    %c0_2 = arith.constant 0 : index
    %1 = vector.load %arg3[%c0_1, %c0_2] : memref<1024x256xbf16, #tpu.memory_space<vmem>>, vector<1024x256xbf16>
    %cst = arith.constant dense<0.000000e+00> : vector<16x256xf32>
    %2 = tpu.matmul %0, %1, %cst {dimension_numbers = #tpu.dot_dimension_numbers<[1], [0], [0], [1], [0, 0, 1, 1], [], []>} : vector<16x1024xbf16>, vector<1024x256xbf16>, vector<16x256xf32> -> vector<16x256xf32>
    %c0_3 = arith.constant 0 : index
    %c0_4 = arith.constant 0 : index
    %3 = vector.load %arg4[%c0_3, %c0_4] : memref<1x256xf32, #tpu.memory_space<vmem>>, vector<1x256xf32>
    %4 = vector.broadcast %3 : vector<1x256xf32> to vector<16x256xf32>
    %5 = arith.addf %2, %4 : vector<16x256xf32>
    %cst_5 = arith.constant 0.000000e+00 : f32
    %6 = vector.broadcast %cst_5 : f32 to vector<16x256xf32>
    %7 = arith.maximumf %5, %6 : vector<16x256xf32>
    %8 = arith.truncf %7 : vector<16x256xf32> to vector<16x256xbf16>
    %c0_6 = arith.constant 0 : index
    %c0_7 = arith.constant 0 : index
    %9 = vector.load %arg5[%c0_6, %c0_7] : memref<16x256xbf16, #tpu.memory_space<vmem>>, vector<16x256xbf16>
    tpu.vector_store %arg5[%c0_6, %c0_7], %8 {strides = array<i32>} : memref<16x256xbf16, #tpu.memory_space<vmem>>, vector<16x256xbf16>,
    return
  }
  func.func @transform_0(%arg0: i32, %arg1: i32) -> (i32, i32) {
    %c0_i32 = arith.constant 0 : i32
    %c0_i32_0 = arith.constant 0 : i32
    return %arg0, %c0_i32 : i32, i32
  }
  func.func @transform_1(%arg0: i32, %arg1: i32) -> (i32, i32) {
    %c0_i32 = arith.constant 0 : i32
    %c0_i32_0 = arith.constant 0 : i32
    return %c0_i32, %arg1 : i32, i32
  }
  func.func @transform_2(%arg0: i32, %arg1: i32) -> (i32, i32) {
    %c0_i32 = arith.constant 0 : i32
    %c0_i32_0 = arith.constant 0 : i32
    return %c0_i32, %arg1 : i32, i32
  }
  func.func @transform_3(%arg0: i32, %arg1: i32) -> (i32, i32) {
    %c0_i32 = arith.constant 0 : i32
    return %arg0, %arg1 : i32, i32
  }
}

</mosaic_0001>

<bundles_post_ra>
// kernel: _lambda_.42
= control target key start
LH: loop header
LB: loop body
LE: loop exit
PB: predicated region body
PF: predicated region fallthrough
CT: control target
= control target key end

     0   :  { %s836_s1 = inlined_call_operand.vmem [shape: bf16[256,128], index: 1, kind: input, shape index: {}]   ;;  %s837_s0 = inlined_call_operand.vmem [shape: bf16[128,256], index: 0, kind: input, shape index: {}]   ;;  %s838_s2 = inlined_call_operand.vmem [shape: f32[1,128], index: 2, kind: input, shape index: {}]   ;;  %s839_s3 = inlined_call_operand.vmem [shape: bf16[128,128], index: 3, kind: output, shape index: {}]  }
   0x1   :  { %v635_v0 = vld [vmem:[%s836_s1 + $0x40] sm:$0xff]   ;;  %v637_v2 = vld [vmem:[%s836_s1 + $0x48] sm:$0xff]   ;;  %v639_v4 = vld [vmem:[%s836_s1 + $0x50] sm:$0xff]  }
   0x2   :  { %v636_v1 = vld [vmem:[%s836_s1] sm:$0xff]   ;;  %555 = vmatprep.subr.bf16.mxu0 %v635_v0  ;;  %619 = vmatprep.subr.bf16.mxu1 %v635_v0  ;;  %v638_v3 = vld [vmem:[%s836_s1 + $0x8] sm:$0xff]   ;;  %v640_v5 = vld [vmem:[%s836_s1 + $0x10] sm:$0xff]  }
   0x3   :  { %556 = vmatpush3.bf16.msra.mxu0 %v636_v1  ;;  %627 = vmatpush3.bf16.msra.mxu1 %v636_v1  ;;  %v641_v6 = vld [vmem:[%s836_s1 + $0x58] sm:$0xff]   ;;  %v643_v8 = vld [vmem:[%s836_s1 + $0x60] sm:$0xff]   ;;  %v645_v10 = vld [vmem:[%s836_s1 + $0x68] sm:$0xff]  }
   0x4   :  { %557 = vmatprep.subr.bf16.mxu0 %v637_v2  ;;  %620 = vmatprep.subr.bf16.mxu1 %v637_v2  ;;  %v642_v7 = vld [vmem:[%s836_s1 + $0x18] sm:$0xff]   ;;  %v644_v9 = vld [vmem:[%s836_s1 + $0x20] sm:$0xff]   ;;  %v646_v13 = vld [vmem:[%s836_s1 + $0x28] sm:$0xff]  }
   0x5   :  { %v653_v11 = vld [vmem:[%s837_s0 + $0x4] ss:$8 sps:$4 sm:$0xff]   ;;  %v647_v14 = vld [vmem:[%s836_s1 + $0x70] sm:$0xff]   ;;  %v649_v16 = vld [vmem:[%s836_s1 + $0x78] sm:$0xff]  }
   0x6   :  { %v656_v12 = vld [vmem:[%s837_s0 + $0x44] ss:$8 sps:$4 sm:$0xff]   ;;  %278 = vmatprep.mubr.bf16.mxu0 %v653_v11  ;;  %v648_v15 = vld [vmem:[%s836_s1 + $0x30] sm:$0xff]   ;;  %v650_v17 = vld [vmem:[%s836_s1 + $0x38] sm:$0xff]  }
   0x7   :  { %558 = vmatpush3.bf16.msra.mxu0 %v638_v3  ;;  %628 = vmatpush3.bf16.msra.mxu1 %v638_v3  ;;  %v651_v18 = vld [vmem:[%s837_s0] ss:$8 sps:$4 sm:$0xff]   ;;  %v657_v20 = vld [vmem:[%s837_s0 + $0x14] ss:$8 sps:$4 sm:$0xff]   ;;  %v661_v22 = vld [vmem:[%s837_s0 + $0x10] ss:$8 sps:$4 sm:$0xff]  }
   0x8   :  { %559 = vmatprep.subr.bf16.mxu0 %v639_v4  ;;  %621 = vmatprep.subr.bf16.mxu1 %v639_v4  ;;  %v654_v19 = vld [vmem:[%s837_s0 + $0x40] ss:$8 sps:$4 sm:$0xff]   ;;  %v659_v21 = vld [vmem:[%s837_s0 + $0x54] ss:$8 sps:$4 sm:$0xff]   ;;  %v662_v23 = vld [vmem:[%s837_s0 + $0x50] ss:$8 sps:$4 sm:$0xff]  }
   0x9   :  { %310 = vmatprep.mubr.bf16.mxu1 %v656_v12  ;;  %v663_v24 = vld [vmem:[%s837_s0 + $0x24] ss:$8 sps:$4 sm:$0xff]   ;;  %v667_v26 = vld [vmem:[%s837_s0 + $0x20] ss:$8 sps:$4 sm:$0xff]   ;;  %v669_v28 = vld [vmem:[%s837_s0 + $0x34] ss:$8 sps:$4 sm:$0xff]  }
   0xa   :  { %v665_v25 = vld [vmem:[%s837_s0 + $0x64] ss:$8 sps:$4 sm:$0xff]   ;;  %v668_v27 = vld [vmem:[%s837_s0 + $0x60] ss:$8 sps:$4 sm:$0xff]   ;;  %v671_v29 = vld [vmem:[%s837_s0 + $0x74] ss:$8 sps:$4 sm:$0xff]  }
   0xb   :  { %560 = vmatpush3.bf16.msra.mxu0 %v640_v5  ;;  %629 = vmatpush3.bf16.msra.mxu1 %v640_v5  ;;  %v673_v30 = vld [vmem:[%s837_s0 + $0x30] ss:$8 sps:$4 sm:$0xff]   ;;  %v794_v34 = vld [vmem:[%s838_s2] ss:$0 sm:$0xff] }
   0xc   :  { %561 = vmatprep.subr.bf16.mxu0 %v641_v6  ;;  %622 = vmatprep.subr.bf16.mxu1 %v641_v6  ;;  %v674_v31 = vld [vmem:[%s837_s0 + $0x70] ss:$8 sps:$4 sm:$0xff]  }
   0xf   :  { %562 = vmatpush3.bf16.msra.mxu0 %v642_v7  ;;  %630 = vmatpush3.bf16.msra.mxu1 %v642_v7 }
  0x10   :  { %563 = vmatprep.subr.bf16.mxu0 %v643_v8  ;;  %623 = vmatprep.subr.bf16.mxu1 %v643_v8 }
  0x13   :  { %564 = vmatpush3.bf16.msra.mxu0 %v644_v9  ;;  %631 = vmatpush3.bf16.msra.mxu1 %v644_v9 }
  0x14   :  { %565 = vmatprep.subr.bf16.mxu0 %v645_v10  ;;  %624 = vmatprep.subr.bf16.mxu1 %v645_v10 }
  0x17   :  { %566 = vmatpush3.bf16.msra.mxu0 %v646_v13  ;;  %632 = vmatpush3.bf16.msra.mxu1 %v646_v13 }
  0x18   :  { %567 = vmatprep.subr.bf16.mxu0 %v647_v14  ;;  %625 = vmatprep.subr.bf16.mxu1 %v647_v14 }
  0x1b   :  { %568 = vmatpush3.bf16.msra.mxu0 %v648_v15  ;;  %633 = vmatpush3.bf16.msra.mxu1 %v648_v15 }
  0x1c   :  { %569 = vmatprep.subr.bf16.mxu0 %v649_v16  ;;  %626 = vmatprep.subr.bf16.mxu1 %v649_v16 }
  0x1f   :  { %570 = vmatpush3.bf16.msra.mxu0 %v650_v17  ;;  %634 = vmatpush3.bf16.msra.mxu1 %v650_v17 }
  0x22   :  { %279 = vmatmul.mubr.bf16.vlgmr.msra.gmra.mrb[0].mxu0 %v651_v18  ;;  %311 = vmatmul.mubr.bf16.vlgmr.msra.gmra.mrb[0].mxu1 %v654_v19 }
  0x23   :  { %286 = vmatprep.mubr.bf16.mxu0 %v657_v20  ;;  %318 = vmatprep.mubr.bf16.mxu1 %v659_v21 }
  0x2a   :  { %287 = vmatmul.mubr.bf16.gmra.mrb[4].mxu0 %v661_v22  ;;  %319 = vmatmul.mubr.bf16.gmra.mrb[4].mxu1 %v662_v23 }
  0x2b   :  { %294 = vmatprep.mubr.bf16.mxu0 %v663_v24  ;;  %326 = vmatprep.mubr.bf16.mxu1 %v665_v25 }
  0x32   :  { %295 = vmatmul.mubr.bf16.gmra.mrb[8].mxu0 %v667_v26  ;;  %327 = vmatmul.mubr.bf16.gmra.mrb[8].mxu1 %v668_v27 }
  0x33   :  { %302 = vmatprep.mubr.bf16.mxu0 %v669_v28  ;;  %334 = vmatprep.mubr.bf16.mxu1 %v671_v29 }
  0x3a   :  { %303 = vmatmul.mubr.bf16.gmra.mrb[12].mxu0 %v673_v30  ;;  %335 = vmatmul.mubr.bf16.gmra.mrb[12].mxu1 %v674_v31 }
  0xf5   :  { %v571_v32 = vpop.f32.mrb[0].mxu0  ;;  %v595_v33 = vpop.f32.mrb[0].mxu1 }
  0xf6   :  { %v572_v35 = vpop.f32.mrb[1].mxu0  ;;  %v596_v36 = vpop.f32.mrb[1].mxu1 }
  0xf7   :  { %v573_v37 = vadd.f32 %v572_v35, %v571_v32  ;;  %v597_v38 = vadd.f32 %v596_v36, %v595_v33  ;;  %v574_v39 = vpop.f32.mrb[2].mxu0  ;;  %v598_v40 = vpop.f32.mrb[2].mxu1 }
  0xf8   :  { %v575_v41 = vpop.f32.mrb[3].mxu0  ;;  %v599_v42 = vpop.f32.mrb[3].mxu1 }
  0xf9   :  { %v281_v43 = vadd.f32 %v573_v37, %v794_v34  ;;  %v313_v44 = vadd.f32 %v597_v38, %v794_v34  ;;  %v576_v45 = vadd.f32 %v575_v41, %v574_v39  ;;  %v600_v46 = vadd.f32 %v599_v42, %v598_v40 }
  0xfb   :  { %v284_v47 = vadd.f32 %v576_v45, %v794_v34  ;;  %v316_v48 = vadd.f32 %v600_v46, %v794_v34  ;;  %v343_v49 = vmax.f32 %v281_v43, 0.0  ;;  %v351_v50 = vmax.f32 %v313_v44, 0.0 }
  0xfd   :  { %v344_v51 = vmax.f32 %v284_v47, 0.0  ;;  %v352_v52 = vmax.f32 %v316_v48, 0.0  ;;  %v577_v53 = vpop.f32.mrb[4].mxu0  ;;  %v601_v54 = vpop.f32.mrb[4].mxu1 }
  0xfe   :  { %v578_v55 = vpop.f32.mrb[5].mxu0  ;;  %v602_v56 = vpop.f32.mrb[5].mxu1 }
  0xff   :  { %v511_v57 = vpack.c.bf16 %v344_v51, %v343_v49  ;;  %v531_v58 = vpack.c.bf16 %v352_v52, %v351_v50  ;;  %v579_v59 = vadd.f32 %v578_v55, %v577_v53  ;;  %v603_v60 = vadd.f32 %v602_v56, %v601_v54  ;;  %v580_v61 = vpop.f32.mrb[6].mxu0  ;;  %v604_v62 = vpop.f32.mrb[6].mxu1 }
 0x100   :  { %v581_v63 = vpop.f32.mrb[7].mxu0  ;;  %v605_v0 = vpop.f32.mrb[7].mxu1 }
 0x101   :  { %512 = vst [vmem:[%s839_s3] sm:$0xff] %v511_v57   ;;  %551 = vst [vmem:[%s839_s3 + $0x20] sm:$0xff] %v531_v58   ;;  %v289_v1 = vadd.f32 %v579_v59, %v794_v34  ;;  %v321_v2 = vadd.f32 %v603_v60, %v794_v34  ;;  %v582_v3 = vadd.f32 %v581_v63, %v580_v61 }
 0x102   :  { %v606_v4 = vadd.f32 %v605_v0, %v604_v62 }
 0x103   :  { %v292_v5 = vadd.f32 %v582_v3, %v794_v34  ;;  %v345_v7 = vmax.f32 %v289_v1, 0.0  ;;  %v353_v8 = vmax.f32 %v321_v2, 0.0 }
 0x104   :  { %v324_v6 = vadd.f32 %v606_v4, %v794_v34 }
 0x105   :  { %v346_v9 = vmax.f32 %v292_v5, 0.0  ;;  %v583_v11 = vpop.f32.mrb[8].mxu0  ;;  %v607_v12 = vpop.f32.mrb[8].mxu1 }
 0x106   :  { %v354_v10 = vmax.f32 %v324_v6, 0.0  ;;  %v584_v13 = vpop.f32.mrb[9].mxu0  ;;  %v608_v14 = vpop.f32.mrb[9].mxu1 }
 0x107   :  { %v516_v15 = vpack.c.bf16 %v346_v9, %v345_v7  ;;  %v585_v17 = vadd.f32 %v584_v13, %v583_v11  ;;  %v609_v18 = vadd.f32 %v608_v14, %v607_v12  ;;  %v586_v19 = vpop.f32.mrb[10].mxu0  ;;  %v610_v20 = vpop.f32.mrb[10].mxu1 }
 0x108   :  { %v536_v16 = vpack.c.bf16 %v354_v10, %v353_v8  ;;  %v587_v21 = vpop.f32.mrb[11].mxu0  ;;  %v611_v22 = vpop.f32.mrb[11].mxu1 }
 0x109   :  { %548 = vst [vmem:[%s839_s3 + $0x8] sm:$0xff] %v516_v15   ;;  %v297_v23 = vadd.f32 %v585_v17, %v794_v34  ;;  %v329_v24 = vadd.f32 %v609_v18, %v794_v34  ;;  %v588_v25 = vadd.f32 %v587_v21, %v586_v19  ;;  %v612_v26 = vadd.f32 %v611_v22, %v610_v20 }
 0x10a   :  { %552 = vst [vmem:[%s839_s3 + $0x28] sm:$0xff] %v536_v16  }
 0x10b   :  { %v300_v27 = vadd.f32 %v588_v25, %v794_v34  ;;  %v332_v28 = vadd.f32 %v612_v26, %v794_v34  ;;  %v347_v29 = vmax.f32 %v297_v23, 0.0  ;;  %v355_v30 = vmax.f32 %v329_v24, 0.0 }
 0x10d   :  { %v348_v31 = vmax.f32 %v300_v27, 0.0  ;;  %v356_v32 = vmax.f32 %v332_v28, 0.0  ;;  %v589_v33 = vpop.f32.mrb[12].mxu0  ;;  %v613_v35 = vpop.f32.mrb[12].mxu1 }
 0x10e   :  { %v590_v36 = vpop.f32.mrb[13].mxu0  ;;  %v614_v37 = vpop.f32.mrb[13].mxu1 }
 0x10f   :  { %v521_v38 = vpack.c.bf16 %v348_v31, %v347_v29  ;;  %v541_v39 = vpack.c.bf16 %v356_v32, %v355_v30  ;;  %v591_v40 = vadd.f32 %v590_v36, %v589_v33  ;;  %v615_v41 = vadd.f32 %v614_v37, %v613_v35  ;;  %v592_v42 = vpop.f32.mrb[14].mxu0  ;;  %v616_v43 = vpop.f32.mrb[14].mxu1 }
 0x110   :  { %v593_v44 = vpop.f32.mrb[15].mxu0  ;;  %v617_v45 = vpop.f32.mrb[15].mxu1 }
 0x111   :  { %549 = vst [vmem:[%s839_s3 + $0x10] sm:$0xff] %v521_v38   ;;  %553 = vst [vmem:[%s839_s3 + $0x30] sm:$0xff] %v541_v39   ;;  %v305_v46 = vadd.f32 %v591_v40, %v794_v34  ;;  %v337_v47 = vadd.f32 %v615_v41, %v794_v34  ;;  %v594_v48 = vadd.f32 %v593_v44, %v592_v42 }
 0x112   :  { %v618_v49 = vadd.f32 %v617_v45, %v616_v43 }
 0x113   :  { %v308_v50 = vadd.f32 %v594_v48, %v794_v34  ;;  %v349_v52 = vmax.f32 %v305_v46, 0.0  ;;  %v357_v53 = vmax.f32 %v337_v47, 0.0 }
 0x114   :  { %v340_v51 = vadd.f32 %v618_v49, %v794_v34 }
 0x115   :  { %v350_v54 = vmax.f32 %v308_v50, 0.0 }
 0x116   :  { %v358_v55 = vmax.f32 %v340_v51, 0.0 }
 0x117   :  { %v526_v56 = vpack.c.bf16 %v350_v54, %v349_v52 }
 0x118   :  { %v546_v57 = vpack.c.bf16 %v358_v55, %v357_v53 }
 0x119   :  { %550 = vst [vmem:[%s839_s3 + $0x18] sm:$0xff] %v526_v56  }
 0x11a   :  { %554 = vst [vmem:[%s839_s3 + $0x38] sm:$0xff] %v546_v57  }

// kernel: _lambda_.43
= control target key start
LH: loop header
LB: loop body
LE: loop exit
PB: predicated region body
PF: predicated region fallthrough
CT: control target
= control target key end

     0   :  { %s809_s6 = smov 0   ;;  %s982_s0 = inlined_call_operand.vmem [shape: bf16[2,10,10,128], index: 0, kind: input, shape index: {}]   ;;  %s983_s1 = inlined_call_operand.vmem [shape: bf16[2,4,4,128], index: 1, kind: output, shape index: {}]  }
   0x1 LB: > { %s732_s7 = sadd.s32 4294967295, %s794_s6   ;;  %p736_p0 = scmp.ge.s32.totalorder %s794_s6, 1  ;;  %s794_s6 = sphi %s809_s6, %s11_s6  }
   0x2   : > { %p87_p1 = scmp.lt.s32.totalorder %s794_s6, 3 }
   0x4   : > { %p88_p2 = pnand %p736_p0, %p87_p1 }
   0x5   : > { %p107_p3 = scmp.lt.s32.totalorder (!%p88_p2), %s732_s7, 1  ;;  %v163_v0 = vlaneseq (!%p88_p2)  ;;  %v796_v1 = vmov (!%p88_p2), 1966171168   ;;  %vm129_vm0 = vsmask.f32 (!%p88_p2), 3328  ;;  %vm150_vm2 = vcmask (!%p88_p2), 1042432  }
   0x6   : > { %91 = sbr.rel (%p88_p2) target bundleno = 78 (0x4e), region = 24  ;;  %v161_v2 = vunpack.c.l.s4 (!%p88_p2), %v796_v1  ;;  %vm130_vm1 = vsmask.f32 (!%p88_p2), 7440  ;;  %vm151_vm3 = vcmask (!%p88_p2), 1046532   ;;  %v797_v4 = vmov (!%p88_p2), 1935823168  }
   0x7   : > { %v825_v3 = vshrl.u32 (!%p88_p2), %v163_v0, 7  ;;  %v827_v5 = vunpack.c.l.s4 (!%p88_p2), %v797_v4  ;;  %v798_v10 = vmov (!%p88_p2), 1983009808   ;;  %vm852_vm4 = vmor (!%p88_p2), %vm150_vm2, %vm151_vm3  ;;  %vm245_vm6 = vcmask (!%p88_p2), 1041409  }
   0x8   : > { %v162_v9 = vunpack.c.0.s8 (!%p88_p2), %v161_v2  ;;  %v832_v11 = vunpack.c.l.s4 (!%p88_p2), %v798_v10  ;;  %vm867_vm5 = vmor (!%p88_p2), %vm129_vm0, %vm130_vm1  ;;  %vm248_vm7 = vcmask (!%p88_p2), 1042434   ;;  %vm251_vm8 = vcmask (!%p88_p2), 1043459  }
   0x9   : > { %v186_v21 = vunpack.c.0.s8 (!%p88_p2), %v827_v5 }
   0xa   : > { %v845_v27 = vsub.s32 (!%p88_p2), %v162_v9, %v825_v3  ;;  %v214_v28 = vunpack.c.0.s8 (!%p88_p2), %v832_v11 }
   0xd   : > { %s989_s7 = smov (!%p107_p3, %s732_s7), 1 }
   0xe   : > { %s776_s8 = smul.u32 80, %s989_s7  ;;  %s772_s12 = sshll.u32 %s989_s7, 3 }
   0xf   : > { %s943_s15 = scalar_lea.vmem %s983_s1, %s772_s12 }
  0x10   : > { %s823_s11 = scalar_lea.vmem %s982_s0, %s776_s8 }
  0x11   : > { %v117_v6 = vld [vmem:[%s823_s11] sm:$0xf]  ;;  %v118_v7 = vld [vmem:[%s823_s11 + $0x4] sm:$0x1]  ;;  %v740_v8 = vld [vmem:[%s823_s11 + $0x8] sm:$0xf] }
  0x12   : > { %v741_v12 = vld [vmem:[%s823_s11 + $0xc] sm:$0x1]  ;;  %v122_v13 = vmax.bf16 %v740_v8, %v117_v6  ;;  %v742_v14 = vld [vmem:[%s823_s11 + $0x10] sm:$0xf]  ;;  %v743_v15 = vld [vmem:[%s823_s11 + $0x14] sm:$0x1] }
  0x13   : > { %v123_v16 = vmax.bf16 %v741_v12, %v118_v7  ;;  %v746_v17 = vld [vmem:[%s823_s11 + $0x10] sm:$0xf]  ;;  %v747_v18 = vld [vmem:[%s823_s11 + $0x14] sm:$0x1]  ;;  %v748_v19 = vld [vmem:[%s823_s11 + $0x18] sm:$0xf] }
  0x14   : > { %v127_v20 = vmax.bf16 %v742_v14, %v122_v13  ;;  %v749_v22 = vld [vmem:[%s823_s11 + $0x1c] sm:$0x1]  ;;  %v268_v23 = vmax.bf16 %v748_v19, %v746_v17  ;;  %v750_v24 = vld [vmem:[%s823_s11 + $0x20] sm:$0xf]  ;;  %v751_v25 = vld [vmem:[%s823_s11 + $0x24] sm:$0x1] }
  0x15   : > { %v128_v26 = vmax.bf16 %v743_v15, %v123_v16  ;;  %v269_v29 = vmax.bf16 %v749_v22, %v747_v18  ;;  %v754_v30 = vld [vmem:[%s823_s11 + $0x20] sm:$0xf]  ;;  %v756_v31 = vld [vmem:[%s823_s11 + $0x28] sm:$0xf]  ;;  %v755_v37 = vld [vmem:[%s823_s11 + $0x24] sm:$0x1] }
  0x16   : > { %v133_v32 = vshrl.u32 %v127_v20, 16  ;;  %v136_v33 = vshll.u32 %v127_v20, 16  ;;  %v744_v35 = vrot.slane %v127_v20, 9  ;;  %v273_v36 = vmax.bf16 %v750_v24, %v268_v23  ;;  %v757_v41 = vld [vmem:[%s823_s11 + $0x2c] sm:$0x1] }
  0x17   : > { %v142_v38 = vshll.u32 %v128_v26, 16  ;;  %v155_v39 = vrot.slane %v128_v26, 5  ;;  %v274_v40 = vmax.bf16 %v751_v25, %v269_v29  ;;  %v406_v42 = vmax.bf16 %v756_v31, %v754_v30  ;;  %v758_v43 = vld [vmem:[%s823_s11 + $0x30] sm:$0xf]  ;;  %v759_v48 = vld [vmem:[%s823_s11 + $0x34] sm:$0x1] }
  0x18   : > { %v135_v44 = vrot.slane %v133_v32, 4  ;;  %v138_v45 = vrot.slane %v136_v33, 5  ;;  %v276_v46 = vshrl.u32 %v273_v36, 16  ;;  %v279_v47 = vshll.u32 %v273_v36, 16  ;;  %v762_v49 = vld [vmem:[%s823_s11 + $0x30] sm:$0xf] }
  0x19   : > { %v144_v50 = vrot.slane %v142_v38, 5  ;;  %v156_v51 = vsel %vm852_vm4, %v744_v35, %v155_v39  ;;  %v285_v52 = vshll.u32 %v274_v40, 16  ;;  %v752_v53 = vrot.slane %v273_v36, 9  ;;  %v763_v54 = vld [vmem:[%s823_s11 + $0x34] sm:$0x1] }
  0x1a   : > { %v139_v55 = vor.u32 %v138_v45, %v135_v44  ;;  %v278_v56 = vrot.slane %v276_v46, 4  ;;  %v281_v57 = vrot.slane %v279_v47, 5  ;;  %v295_v58 = vrot.slane %v274_v40, 5  ;;  %v764_v59 = vld [vmem:[%s823_s11 + $0x38] sm:$0xf] }
  0x1b   : > { %v287_v61 = vrot.slane %v285_v52, 5  ;;  %v407_v62 = vmax.bf16 %v757_v41, %v755_v37  ;;  %v411_v63 = vmax.bf16 %v758_v43, %v406_v42  ;;  %v765_v0 = vld [vmem:[%s823_s11 + $0x3c] sm:$0x1]  ;;  %v544_v1 = vmax.bf16 %v764_v59, %v762_v49  ;;  %v766_v2 = vld [vmem:[%s823_s11 + $0x40] sm:$0xf] }
  0x1c   : > { %v140_v4 = vrot.slane %v139_v55, 4  ;;  %v282_v6 = vor.u32 %v281_v57, %v278_v56  ;;  %v296_v7 = vsel %vm852_vm4, %v752_v53, %v295_v58  ;;  %v545_v8 = vmax.bf16 %v765_v0, %v763_v54  ;;  %v767_v9 = vld [vmem:[%s823_s11 + $0x44] sm:$0x1] }
  0x1d   : > { %v412_v10 = vmax.bf16 %v759_v48, %v407_v62  ;;  %v414_v12 = vshrl.u32 %v411_v63, 16  ;;  %v417_v13 = vshll.u32 %v411_v63, 16  ;;  %v760_v14 = vrot.slane %v411_v63, 9 }
  0x1e   : > { %v145_v15 = vsel %vm867_vm5, %v140_v4, %v144_v50  ;;  %v283_v16 = vrot.slane %v282_v6, 4  ;;  %v878_v17 = vmax.bf16 %v766_v2, %v544_v1  ;;  %v550_v18 = vmax.bf16 %v767_v9, %v545_v8 }
  0x1f   : > { %v147_v19 = vmax.bf16 %v145_v15, %v127_v20  ;;  %v416_v22 = vrot.slane %v414_v12, 4  ;;  %v419_v23 = vrot.slane %v417_v13, 5  ;;  %v423_v24 = vshll.u32 %v412_v10, 16 }
  0x20   : > { %v288_v25 = vsel %vm867_vm5, %v283_v16, %v287_v61  ;;  %v433_v26 = vrot.slane %v412_v10, 5  ;;  %v552_v29 = vshrl.u32 %v878_v17, 16  ;;  %v555_v30 = vshll.u32 %v878_v17, 16 }
  0x21   : > { %v158_v31 = vmax.bf16 %v156_v51, %v147_v19  ;;  %v290_v32 = vmax.bf16 %v288_v25, %v273_v36  ;;  %v420_v33 = vor.u32 %v419_v23, %v416_v22  ;;  %v425_v35 = vrot.slane %v423_v24, 5 }
  0x22   : > { %v887_v37 = vsub.s32 %v186_v21, %v825_v3  ;;  %v554_v20 = vrot.slane %v552_v29, 4  ;;  %v557_v38 = vrot.slane %v555_v30, 5  ;;  %v561_v39 = vshll.u32 %v550_v18, 16 }
  0x23   : > { %v166_v40 = vrot.slane %v158_v31, %v845_v27  ;;  %v298_v41 = vmax.bf16 %v296_v7, %v290_v32  ;;  %v421_v42 = vrot.slane %v420_v33, 4  ;;  %v434_v43 = vsel %vm852_vm4, %v760_v14, %v433_v26 }
  0x24   : > { %v558_v44 = vor.u32 %v557_v38, %v554_v20  ;;  %v892_v45 = vrot.slane %v561_v39, 5  ;;  %v768_v36 = vrot.slane %v878_v17, 9  ;;  %v571_v46 = vrot.slane %v550_v18, 5 }
  0x25   : > { %v167_v47 = vcombine.high %v166_v40, %v166_v40  ;;  %v174_v5 = vrot.slane %v166_v40, %v845_v27  ;;  %v306_v21 = vrot.slane %v298_v41, %v845_v27  ;;  %v426_v48 = vsel %vm867_vm5, %v421_v42, %v425_v35 }
  0x26   : > { %v902_v49 = vsub.s32 %v214_v28, %v825_v3  ;;  %v428_v50 = vmax.bf16 %v426_v48, %v411_v63  ;;  %v904_v51 = vrot.slane %v558_v44, 4  ;;  %v915_v11 = vsel %vm852_vm4, %v768_v36, %v571_v46 }
  0x27   : > { %v181_v52 = vrot.slane %v167_v47, %v845_v27  ;;  %v182_v53 = vcombine.high %v174_v5, %v174_v5  ;;  %v190_v54 = vrot.slane %v174_v5, %v887_v37  ;;  %v307_v55 = vcombine.high %v306_v21, %v306_v21 }
  0x28   : > { %v314_v56 = vrot.slane %v306_v21, %v845_v27  ;;  %v436_v57 = vmax.bf16 %v434_v43, %v428_v50  ;;  %v564_v3 = vsel %vm867_vm5, %v904_v51, %v892_v45 }
  0x29   : > { %v183_v28 = vcombine.high %v181_v52, %v181_v52  ;;  %v197_v58 = vrot.slane %v181_v52, %v887_v37  ;;  %v204_v59 = vrot.slane %v182_v53, %v887_v37  ;;  %v218_v61 = vrot.slane %v190_v54, %v902_v49 }
  0x2a   : > { %v321_v62 = vrot.slane %v307_v55, %v845_v27  ;;  %v322_v63 = vcombine.high %v314_v56, %v314_v56  ;;  %v330_v0 = vrot.slane %v314_v56, %v887_v37  ;;  %v444_v1 = vrot.slane %v436_v57, %v845_v27 }
  0x2b   : > { %v211_v60 = vrot.slane %v183_v28, %v887_v37  ;;  %v225_v34 = vrot.slane %v197_v58, %v902_v49  ;;  %v232_v2 = vrot.slane %v204_v59, %v902_v49  ;;  %v240_v4 = vunpack.c.l.b16 %v218_v61 }
  0x2c   : > { %v323_v6 = vcombine.high %v321_v62, %v321_v62  ;;  %v337_v7 = vrot.slane %v321_v62, %v887_v37  ;;  %v344_v8 = vrot.slane %v322_v63, %v887_v37  ;;  %v358_v9 = vrot.slane %v330_v0, %v902_v49 }
  0x2d   : > { %v239_v10 = vrot.slane %v211_v60, %v902_v49  ;;  %v241_v12 = vunpack.c.l.b16 %v225_v34  ;;  %v242_v13 = vunpack.c.l.b16 %v232_v2  ;;  %v445_v14 = vcombine.high %v444_v1, %v444_v1 }
  0x2e   : > { %v351_v15 = vrot.slane %v323_v6, %v887_v37  ;;  %v365_v16 = vrot.slane %v337_v7, %v902_v49  ;;  %v372_v18 = vrot.slane %v344_v8, %v902_v49  ;;  %v380_v19 = vunpack.c.l.b16 %v358_v9 }
  0x2f   : > { %v243_v22 = vunpack.c.l.b16 %v239_v10  ;;  %v244_v23 = vrot.slane %v241_v12, 7  ;;  %v247_v24 = vrot.slane %v242_v13, 6  ;;  %v452_v25 = vrot.slane %v444_v1, %v845_v27 }
  0x30   : > { %v379_v26 = vrot.slane %v351_v15, %v902_v49  ;;  %v381_v29 = vunpack.c.l.b16 %v365_v16  ;;  %v382_v30 = vunpack.c.l.b16 %v372_v18  ;;  %v459_v31 = vrot.slane %v445_v14, %v845_v27 }
  0x31   : > { %v246_v32 = vsel %vm245_vm6, %v244_v23, %v240_v4  ;;  %v250_v33 = vrot.slane %v243_v22, 5  ;;  %v460_v35 = vcombine.high %v452_v25, %v452_v25  ;;  %v468_v20 = vrot.slane %v452_v25, %v887_v37 }
  0x32   : > { %v249_v38 = vsel %vm248_vm7, %v247_v24, %v246_v32  ;;  %v383_v39 = vunpack.c.l.b16 %v379_v26  ;;  %v384_v40 = vrot.slane %v381_v29, 7  ;;  %v386_v41 = vrot.slane %v382_v30, 6 }
  0x33   : > { %v252_v42 = vsel %vm251_vm8, %v250_v33, %v249_v38  ;;  %v461_v43 = vcombine.high %v459_v31, %v459_v31  ;;  %v475_v44 = vrot.slane %v459_v31, %v887_v37  ;;  %v482_v45 = vrot.slane %v460_v35, %v887_v37 }
  0x34   : > { %v253_v36 = vpack.c.b16 %v252_v42, %v252_v42  ;;  %v385_v46 = vsel %vm245_vm6, %v384_v40, %v380_v19  ;;  %v388_v47 = vrot.slane %v383_v39, 5  ;;  %v496_v5 = vrot.slane %v468_v20, %v902_v49 }
  0x35   : > { %v387_v21 = vsel %vm248_vm7, %v386_v41, %v385_v46  ;;  %v489_v48 = vrot.slane %v461_v43, %v887_v37  ;;  %v503_v50 = vrot.slane %v475_v44, %v902_v49  ;;  %v510_v51 = vrot.slane %v482_v45, %v902_v49 }
  0x36   : > { %745 = vst.sshfl [vmem:[%s943_s15] sm:$0x3 pattern:$0x76325410] %v253_v36  ;;  %v389_v52 = vsel %vm251_vm8, %v388_v47, %v387_v21  ;;  %v518_v53 = vunpack.c.l.b16 %v496_v5  ;;  %v566_v54 = vmax.bf16 %v564_v3, %v878_v17 }
  0x37   : > { %v390_v55 = vpack.c.b16 %v389_v52, %v389_v52  ;;  %v517_v56 = vrot.slane %v489_v48, %v902_v49  ;;  %v519_v57 = vunpack.c.l.b16 %v503_v50  ;;  %v520_v28 = vunpack.c.l.b16 %v510_v51 }
  0x38   : > { %v574_v58 = vmax.bf16 %v915_v11, %v566_v54 }
  0x39   : > { %773 = vst.sshfl [vmem:[%s943_s15 + $0x2] sm:$0x3 pattern:$0x76325410] %v390_v55  ;;  %v521_v59 = vunpack.c.l.b16 %v517_v56  ;;  %v522_v61 = vrot.slane %v519_v57, 7  ;;  %v524_v62 = vrot.slane %v520_v28, 6 }
  0x3a   : > { %v582_v63 = vrot.slane %v574_v58, %v845_v27 }
  0x3b   : > { %v523_v0 = vsel %vm245_vm6, %v522_v61, %v518_v53  ;;  %v526_v1 = vrot.slane %v521_v59, 5 }
  0x3c   : > { %v525_v60 = vsel %vm248_vm7, %v524_v62, %v523_v0  ;;  %v583_v17 = vcombine.high %v582_v63, %v582_v63  ;;  %v590_v3 = vrot.slane %v582_v63, %v845_v27 }
  0x3d   : > { %v527_v34 = vsel %vm251_vm8, %v526_v1, %v525_v60 }
  0x3e   : > { %v528_v2 = vpack.c.b16 %v527_v34, %v527_v34  ;;  %v597_v11 = vrot.slane %v583_v17, %v845_v27  ;;  %v598_v4 = vcombine.high %v590_v3, %v590_v3  ;;  %v606_v6 = vrot.slane %v590_v3, %v887_v37 }
  0x40   : > { %774 = vst.sshfl [vmem:[%s943_s15 + $0x4] sm:$0x3 pattern:$0x76325410] %v528_v2  ;;  %v599_v7 = vcombine.high %v597_v11, %v597_v11  ;;  %v613_v8 = vrot.slane %v597_v11, %v887_v37  ;;  %v620_v9 = vrot.slane %v598_v4, %v887_v37  ;;  %v634_v10 = vrot.slane %v606_v6, %v902_v49 }
  0x42   : > { %v627_v12 = vrot.slane %v599_v7, %v887_v37  ;;  %v641_v13 = vrot.slane %v613_v8, %v902_v49  ;;  %v648_v14 = vrot.slane %v620_v9, %v902_v49  ;;  %v656_v15 = vunpack.c.l.b16 %v634_v10 }
  0x44   : > { %v655_v27 = vrot.slane %v627_v12, %v902_v49  ;;  %v657_v16 = vunpack.c.l.b16 %v641_v13  ;;  %v658_v18 = vunpack.c.l.b16 %v648_v14 }
  0x46   : > { %v659_v19 = vunpack.c.l.b16 %v655_v27  ;;  %v660_v22 = vrot.slane %v657_v16, 7  ;;  %v662_v23 = vrot.slane %v658_v18, 6 }
  0x48   : > { %v661_v24 = vsel %vm245_vm6, %v660_v22, %v656_v15  ;;  %v664_v25 = vrot.slane %v659_v19, 5 }
  0x49   : > { %v663_v26 = vsel %vm248_vm7, %v662_v23, %v661_v24 }
  0x4a   : > { %v665_v29 = vsel %vm251_vm8, %v664_v25, %v663_v26 }
  0x4b   : > { %v666_v37 = vpack.c.b16 %v665_v29, %v665_v29 }
  0x4d   : > { %775 = vst.sshfl [vmem:[%s943_s15 + $0x6] sm:$0x3 pattern:$0x76325410] %v666_v37 }
  0x4e PF: > { %s11_s6 = sadd.s32 1, %s794_s6  }
  0x4f   : > { %p8_p4 = scmp.ge.s32.totalorder %s11_s6, 4  }
  0x51   :  { %10 = sbr.rel (!%p8_p4) target bundleno = 1 (0x1), region = 65 }

// kernel: _lambda_.44
= control target key start
LH: loop header
LB: loop body
LE: loop exit
PB: predicated region body
PF: predicated region fallthrough
CT: control target
= control target key end

     0   :  { %s827_s12 = smov 0   ;;  %s829_s13 = smov 0   ;;  %s933_s0 = inlined_call_operand.vmem [shape: bf16[32,128], index: 0, kind: input, shape index: {}]   ;;  %s934_s1 = inlined_call_operand.vmem [shape: bf16[128,384], index: 1, kind: input, shape index: {}]   ;;  %s935_s2 = inlined_call_operand.vmem [shape: f32[1,384], index: 2, kind: input, shape index: {}]   ;;  %s936_s3 = inlined_call_operand.vmem [shape: bf16[32,384], index: 3, kind: output, shape index: {}]  }
   0x1   :  { %s831_s14 = smov 0   ;;  %s833_s15 = smov 0  }
   0x2   :  { %s835_s16 = smov 0  }
   0x3 LB: > { %s22_s17 = sadd.s32 1, %s801_s15  ;;  %s642_s18 = sadd.s32 4294967295, %s805_s16   ;;  %s805_s16 = sphi %s835_s16, %s13_s16   ;;  %s801_s15 = sphi %s833_s15, %s941_s15   ;;  %s797_s14 = sphi %s831_s14, %s940_s14   ;;  %s793_s13 = sphi %s829_s13, %s939_s13   ;;  %s789_s12 = sphi %s827_s12, %s938_s12  }
   0x4   : > { %p23_p0 = scmp.ge.s32.totalorder %s22_s17, 3  ;;  %p65_p1 = scmp.ne.s32.totalorder %s793_s13, %s789_s12 }
   0x5   : > { %p66_p2 = scmp.eq.s32.totalorder %s805_s16, 0  ;;  %p123_p4 = scmp.eq.s32.totalorder %s642_s18, 2 }
   0x6   : > { %s943_s17 = smov (%p23_p0, %s22_s17), 0  ;;  %s58_s20 = sadd.s32 1, %s793_s13 }
   0x7   : > { %p67_p3 = por %p66_p2, %p65_p1  ;;  %s55_s19 = ssub.s32 %s801_s15, %s943_s17 }
   0x8   : > { %p56_p5 = scmp.eq.s32.totalorder %s55_s19, 0  ;;  %p862_p6 = por %p123_p4, %p65_p1 }
   0x9   : > { %p646_p7 = scmp.ge.s32.totalorder %s805_s16, 3 }
   0xa   : > { %s867_s22 = scalar_select %p56_p5, %s793_s13, %s58_s20  }
   0xb   : > { %154 = sbr.rel (%p646_p7) target bundleno = 32 (0x20), region = 20 }
  0x12   : > { %157 = sbr.rel (!%p67_p3) target bundleno = 32 (0x20), region = 24  ;;  %s159_s23 = sand.u32 (%p67_p3), 1, %s793_s13  }
  0x13   : > { %s648_s24 = sshll.u32 (%p67_p3), %s801_s15, 2  ;;  %s647_s25 = sshll.u32 (%p67_p3), %s159_s23, 6 }
  0x14   : > { %s875_s28 = scalar_lea.vmem (%p67_p3), %s934_s1, %s648_s24  ;;  %s161_s29 = scalar_lea.vmem (%p67_p3), [#allocation2], %s647_s25 }
  0x15   : > { %v179_v0 = vld [vmem:[%s875_s28] sm:$0xf] (%p67_p3)  ;;  %v181_v1 = vld [vmem:[%s875_s28 + $0xc] sm:$0xf] (%p67_p3)  ;;  %v183_v2 = vld [vmem:[%s875_s28 + $0x18] sm:$0xf] (%p67_p3) }
  0x16   : > { %180 = vst [vmem:[%s161_s29] sm:$0xf] (%p67_p3), %v179_v0  ;;  %182 = vst [vmem:[%s161_s29 + $0x4] sm:$0xf] (%p67_p3), %v181_v1  ;;  %v185_v3 = vld [vmem:[%s875_s28 + $0x24] sm:$0xf] (%p67_p3) }
  0x17   : > { %v187_v4 = vld [vmem:[%s875_s28 + $0x30] sm:$0xf] (%p67_p3)  ;;  %184 = vst [vmem:[%s161_s29 + $0x8] sm:$0xf] (%p67_p3), %v183_v2  ;;  %186 = vst [vmem:[%s161_s29 + $0xc] sm:$0xf] (%p67_p3), %v185_v3 }
  0x18   : > { %188 = vst [vmem:[%s161_s29 + $0x10] sm:$0xf] (%p67_p3), %v187_v4  ;;  %v189_v5 = vld [vmem:[%s875_s28 + $0x3c] sm:$0xf] (%p67_p3)  ;;  %v191_v6 = vld [vmem:[%s875_s28 + $0x48] sm:$0xf] (%p67_p3) }
  0x19   : > { %v193_v7 = vld [vmem:[%s875_s28 + $0x54] sm:$0xf]  ;;  %190 = vst [vmem:[%s161_s29 + $0x14] sm:$0xf] %v189_v5  ;;  %192 = vst [vmem:[%s161_s29 + $0x18] sm:$0xf] %v191_v6 }
  0x1a   : > { %194 = vst [vmem:[%s161_s29 + $0x1c] sm:$0xf] %v193_v7  ;;  %v195_v8 = vld [vmem:[%s875_s28 + $0x60] sm:$0xf]  ;;  %v197_v9 = vld [vmem:[%s875_s28 + $0x6c] sm:$0xf] }
  0x1b   : > { %v199_v10 = vld [vmem:[%s875_s28 + $0x78] sm:$0xf]  ;;  %196 = vst [vmem:[%s161_s29 + $0x20] sm:$0xf] %v195_v8  ;;  %198 = vst [vmem:[%s161_s29 + $0x24] sm:$0xf] %v197_v9 }
  0x1c   : > { %200 = vst [vmem:[%s161_s29 + $0x28] sm:$0xf] %v199_v10  ;;  %v201_v11 = vld [vmem:[%s875_s28 + $0x84] sm:$0xf]  ;;  %v203_v12 = vld [vmem:[%s875_s28 + $0x90] sm:$0xf] }
  0x1d   : > { %v205_v13 = vld [vmem:[%s875_s28 + $0x9c] sm:$0xf]  ;;  %202 = vst [vmem:[%s161_s29 + $0x2c] sm:$0xf] %v201_v11  ;;  %204 = vst [vmem:[%s161_s29 + $0x30] sm:$0xf] %v203_v12 }
  0x1e   : > { %206 = vst [vmem:[%s161_s29 + $0x34] sm:$0xf] %v205_v13  ;;  %v207_v14 = vld [vmem:[%s875_s28 + $0xa8] sm:$0xf]  ;;  %v209_v15 = vld [vmem:[%s875_s28 + $0xb4] sm:$0xf] }
  0x1f   : > { %208 = vst [vmem:[%s161_s29 + $0x38] sm:$0xf] %v207_v14  ;;  %210 = vst [vmem:[%s161_s29 + $0x3c] sm:$0xf] %v209_v15 }
  0x20 PF: > { %p649_p8 = scmp.ge.s32.totalorder %s805_s16, 1  ;;  %p270_p9 = scmp.lt.s32.totalorder %s805_s16, 4 }
  0x22   : > { %p271_p10 = pnand %p649_p8, %p270_p9 }
  0x23   : > { %s277_s30 = sand.u32 (!%p271_p10), 1, %s789_s12   ;;  %v765_v16 = vld [vmem:[%s933_s0] sm:$0xff] (!%p271_p10)   ;;  %v766_v25 = vld [vmem:[%s933_s0 + $0x8] sm:$0xff] (!%p271_p10)   ;;  %p313_p11 = scmp.lt.s32.totalorder (!%p271_p10), %s797_s14, 2  ;;  %v454_v26 = vlaneseq (!%p271_p10) }
  0x24   : > { %274 = sbr.rel (%p271_p10) target bundleno = 303 (0x12f), region = 69  ;;  %s650_s6 = sshll.u32 (!%p271_p10), %s277_s30, 6  ;;  %713 = vmatprep.mubr.bf16.mxu0 (!%p271_p10), %v765_v16 }
  0x25   : > { %s279_s7 = scalar_lea.vmem (!%p271_p10), [#allocation2], %s650_s6  ;;  %s663_s11 = sshll.u32 (!%p271_p10), %s797_s14, 7  ;;  %v455_v27 = vand.u32 (!%p271_p10), 127, %v454_v26 }
  0x26   : > { %v757_v17 = vld [vmem:[%s279_s7] sm:$0xff] (!%p271_p10)   ;;  %v758_v18 = vld [vmem:[%s279_s7 + $0x8] sm:$0xff] (!%p271_p10)   ;;  %v759_v19 = vld [vmem:[%s279_s7 + $0x10] sm:$0xff] (!%p271_p10)   ;;  %v457_v28 = vstv (!%p271_p10), %s663_s11  ;;  %s651_s23 = sshll.u32 (!%p271_p10), %s277_s30, 4 }
  0x27   : > { %697 = vmatprep.subr.bf16.mxu0 (!%p271_p10), %v757_v17  ;;  %v760_v20 = vld [vmem:[%s279_s7 + $0x18] sm:$0xff] (!%p271_p10)   ;;  %v761_v21 = vld [vmem:[%s279_s7 + $0x20] sm:$0xff] (!%p271_p10)   ;;  %v762_v22 = vld [vmem:[%s279_s7 + $0x28] sm:$0xff] (!%p271_p10)   ;;  %v458_v31 = vadd.s32 (!%p271_p10), %v457_v28, %v455_v27  ;;  %s306_s24 = scalar_lea.vmem (!%p271_p10), [#allocation3], %s651_s23 }
  0x28   : > { %698 = vmatpush3.bf16.msra.mxu0 (!%p271_p10), %v757_v17  ;;  %v763_v23 = vld [vmem:[%s279_s7 + $0x30] sm:$0xff] (!%p271_p10)   ;;  %v764_v24 = vld [vmem:[%s279_s7 + $0x38] sm:$0xff] (!%p271_p10)  }
  0x29   : > { %699 = vmatprep.subr.bf16.mxu0 (!%p271_p10), %v758_v18  ;;  %vm459_vm0 = vcmp.lt.s32.totalorder (!%p271_p10), %v458_v31, 128 }
  0x2b   : > { %s314_s10 = scalar_select %p313_p11, %s797_s14, 2 }
  0x2c   : > { %700 = vmatpush3.bf16.msra.mxu0 %v758_v18  ;;  %s669_s25 = sshll.u32 (%p862_p6), %s797_s14, 2 }
  0x2d   : > { %701 = vmatprep.subr.bf16.mxu0 %v759_v19  ;;  %s315_s20 = scalar_lea.vmem %s935_s2, %s314_s10  ;;  %s499_s27 = scalar_lea.vmem (%p862_p6), %s936_s3, %s669_s25 }
  0x2e   : > { %v652_v29 = vld [vmem:[%s315_s20] ss:$0 sm:$0xff] }
  0x30   : > { %702 = vmatpush3.bf16.msra.mxu0 %v759_v19 }
  0x31   : > { %703 = vmatprep.subr.bf16.mxu0 %v760_v20 }
  0x34   : > { %704 = vmatpush3.bf16.msra.mxu0 %v760_v20 }
  0x35   : > { %705 = vmatprep.subr.bf16.mxu0 %v761_v21 }
  0x38   : > { %706 = vmatpush3.bf16.msra.mxu0 %v761_v21 }
  0x39   : > { %707 = vmatprep.subr.bf16.mxu0 %v762_v22 }
  0x3c   : > { %708 = vmatpush3.bf16.msra.mxu0 %v762_v22 }
  0x3d   : > { %709 = vmatprep.subr.bf16.mxu0 %v763_v23 }
  0x40   : > { %710 = vmatpush3.bf16.msra.mxu0 %v763_v23 }
  0x41   : > { %711 = vmatprep.subr.bf16.mxu0 %v764_v24 }
  0x44   : > { %712 = vmatpush3.bf16.msra.mxu0 %v764_v24 }
  0x47   : > { %714 = vmatmul.mubr.bf16.vlgmr.msra.gmra.mrb[0].mxu0 %v766_v25 }
 0x11a   : > { %v715_v30 = vpop.f32.mrb[0].mxu0 }
 0x11b   : > { %v448_v32 = vadd.f32 %v715_v30, %v652_v29  ;;  %v439_v33 = vpop.f32.mrb[1].mxu0 }
 0x11c   : > { %v440_v34 = vadd.f32 %v652_v29, %v439_v33  ;;  %v716_v35 = vpop.f32.mrb[2].mxu0 }
 0x11d   : > { %v462_v36 = vmax.f32 %v448_v32, 0.0  ;;  %v451_v37 = vadd.f32 %v716_v35, %v652_v29  ;;  %v442_v38 = vpop.f32.mrb[3].mxu0 }
 0x11e   : > { %v460_v39 = vmax.f32 %v440_v34, 0.0  ;;  %v443_v40 = vadd.f32 %v652_v29, %v442_v38 }
 0x11f   : > { %v463_v41 = vmax.f32 %v451_v37, 0.0  ;;  %v466_v43 = vsel %vm459_vm0, %v462_v36, %v448_v32  ;;  %494 = sbr.rel (!%p862_p6) target bundleno = 303 (0x12f), region = 77 }
 0x120   : > { %v461_v42 = vmax.f32 %v443_v40, 0.0  ;;  %v464_v45 = vsel %vm459_vm0, %v460_v39, %v440_v34 }
 0x121   : > { %v467_v44 = vsel %vm459_vm0, %v463_v41, %v451_v37 }
 0x122   : > { %v684_v46 = vpack.c.bf16 %v467_v44, %v466_v43  ;;  %v465_v47 = vsel %vm459_vm0, %v461_v42, %v443_v40 }
 0x123   : > { %v679_v48 = vpack.c.bf16 %v465_v47, %v464_v45 }
 0x124   : > { %686 = vst [vmem:[%s306_s24 + $0x8] sm:$0xff] %v684_v46  }
 0x125   : > { %680 = vst [vmem:[%s306_s24] sm:$0xff] %v679_v48  }
 0x12b   : > { %v519_v51 = vld [vmem:[%s306_s24 + $0x8] sm:$0xf]  ;;  %v521_v52 = vld [vmem:[%s306_s24 + $0xc] sm:$0xf] }
 0x12c   : > { %v515_v49 = vld [vmem:[%s306_s24] sm:$0xf]  ;;  %v517_v50 = vld [vmem:[%s306_s24 + $0x4] sm:$0xf]  ;;  %520 = vst [vmem:[%s499_s27 + $0x18] sm:$0xf] %v519_v51 }
 0x12d   : > { %516 = vst [vmem:[%s499_s27] sm:$0xf] %v515_v49  ;;  %518 = vst [vmem:[%s499_s27 + $0xc] sm:$0xf] %v517_v50 }
 0x12e   : > { %522 = vst [vmem:[%s499_s27 + $0x24] sm:$0xf] %v521_v52 }
 0x12f PF: > { %s13_s16 = sadd.s32 1, %s805_s16   ;;  %s938_s12 = smov %s793_s13 }
 0x130   : > { %p10_p12 = scmp.ge.s32.totalorder %s13_s16, 5   ;;  %s939_s13 = smov %s867_s22 }
 0x131   : > { %s940_s14 = smov %s801_s15  ;;  %s941_s15 = smov %s943_s17 }
 0x132   :  { %12 = sbr.rel (!%p10_p12) target bundleno = 3 (0x3), region = 155 }

// kernel: _lambda_.45
= control target key start
LH: loop header
LB: loop body
LE: loop exit
PB: predicated region body
PF: predicated region fallthrough
CT: control target
= control target key end

     0   :  { %s970_s1 = inlined_call_operand.vmem [shape: bf16[640,128], index: 1, kind: input, shape index: {}]   ;;  %s971_s0 = inlined_call_operand.vmem [shape: bf16[32,640], index: 0, kind: input, shape index: {}]   ;;  %s972_s2 = inlined_call_operand.vmem [shape: f32[1,128], index: 2, kind: input, shape index: {}]   ;;  %s973_s3 = inlined_call_operand.vmem [shape: bf16[32,128], index: 3, kind: output, shape index: {}]  }
   0x1   :  { %v737_v0 = vld [vmem:[%s970_s1 + $0x40] sm:$0xff]   ;;  %v741_v4 = vld [vmem:[%s970_s1 + $0x48] sm:$0xff]   ;;  %v745_v8 = vld [vmem:[%s970_s1 + $0x50] sm:$0xff]  }
   0x2   :  { %v738_v1 = vld [vmem:[%s970_s1] sm:$0xff]   ;;  %651 = vmatprep.subr.bf16.mxu0 %v737_v0  ;;  %v742_v5 = vld [vmem:[%s970_s1 + $0x8] sm:$0xff]   ;;  %v746_v9 = vld [vmem:[%s970_s1 + $0x10] sm:$0xff]  }
   0x3   :  { %v739_v2 = vld [vmem:[%s970_s1 + $0xc0] sm:$0xff]   ;;  %652 = vmatpush3.bf16.msra.mxu0 %v738_v1  ;;  %v743_v6 = vld [vmem:[%s970_s1 + $0xc8] sm:$0xff]   ;;  %v747_v10 = vld [vmem:[%s970_s1 + $0xd0] sm:$0xff]  }
   0x4   :  { %v740_v3 = vld [vmem:[%s970_s1 + $0x80] sm:$0xff]   ;;  %679 = vmatprep.subr.bf16.mxu1 %v739_v2  ;;  %653 = vmatprep.subr.bf16.mxu0 %v741_v4  ;;  %v744_v7 = vld [vmem:[%s970_s1 + $0x88] sm:$0xff]   ;;  %v748_v11 = vld [vmem:[%s970_s1 + $0x90] sm:$0xff]  }
   0x5   :  { %680 = vmatpush3.bf16.msra.mxu1 %v740_v3  ;;  %v749_v12 = vld [vmem:[%s970_s1 + $0x58] sm:$0xff]   ;;  %v753_v16 = vld [vmem:[%s970_s1 + $0x60] sm:$0xff]   ;;  %v757_v20 = vld [vmem:[%s970_s1 + $0x68] sm:$0xff]  }
   0x6   :  { %681 = vmatprep.subr.bf16.mxu1 %v743_v6  ;;  %v750_v13 = vld [vmem:[%s970_s1 + $0x18] sm:$0xff]   ;;  %v754_v17 = vld [vmem:[%s970_s1 + $0x20] sm:$0xff]   ;;  %v758_v21 = vld [vmem:[%s970_s1 + $0x28] sm:$0xff]  }
   0x7   :  { %654 = vmatpush3.bf16.msra.mxu0 %v742_v5  ;;  %v751_v14 = vld [vmem:[%s970_s1 + $0xd8] sm:$0xff]   ;;  %v755_v18 = vld [vmem:[%s970_s1 + $0xe0] sm:$0xff]   ;;  %v759_v22 = vld [vmem:[%s970_s1 + $0xe8] sm:$0xff]  }
   0x8   :  { %655 = vmatprep.subr.bf16.mxu0 %v745_v8  ;;  %v752_v15 = vld [vmem:[%s970_s1 + $0x98] sm:$0xff]   ;;  %v756_v19 = vld [vmem:[%s970_s1 + $0xa0] sm:$0xff]   ;;  %v760_v23 = vld [vmem:[%s970_s1 + $0xa8] sm:$0xff]  }
   0x9   :  { %682 = vmatpush3.bf16.msra.mxu1 %v744_v7  ;;  %v761_v24 = vld [vmem:[%s970_s1 + $0x70] sm:$0xff]   ;;  %v765_v28 = vld [vmem:[%s970_s1 + $0x78] sm:$0xff]   ;;  %v772_v34 = vld [vmem:[%s970_s1 + $0x100] sm:$0xff]  }
   0xa   :  { %683 = vmatprep.subr.bf16.mxu1 %v747_v10  ;;  %v762_v25 = vld [vmem:[%s970_s1 + $0x30] sm:$0xff]   ;;  %v766_v29 = vld [vmem:[%s970_s1 + $0x38] sm:$0xff]   ;;  %v775_v36 = vld [vmem:[%s971_s0 + $0xc] ss:$20 sps:$4 sm:$0xff]  }
   0xb   :  { %656 = vmatpush3.bf16.msra.mxu0 %v746_v9  ;;  %v763_v26 = vld [vmem:[%s970_s1 + $0xf0] sm:$0xff]   ;;  %v767_v30 = vld [vmem:[%s970_s1 + $0xf8] sm:$0xff]   ;;  %v776_v37 = vld [vmem:[%s970_s1 + $0x108] sm:$0xff]   ;;  %487 = vmatprep.mubr.bf16.mxu1 %v775_v36 }
   0xc   :  { %657 = vmatprep.subr.bf16.mxu0 %v749_v12  ;;  %v764_v27 = vld [vmem:[%s970_s1 + $0xb0] sm:$0xff]   ;;  %v770_v32 = vld [vmem:[%s971_s0 + $0x4] ss:$20 sps:$4 sm:$0xff]   ;;  %v773_v35 = vld [vmem:[%s971_s0 + $0x8] ss:$20 sps:$4 sm:$0xff]  }
   0xd   :  { %684 = vmatpush3.bf16.msra.mxu1 %v748_v11  ;;  %v768_v31 = vld [vmem:[%s971_s0] ss:$20 sps:$4 sm:$0xff]   ;;  %v771_v33 = vld [vmem:[%s970_s1 + $0xb8] sm:$0xff]   ;;  %438 = vmatprep.mubr.bf16.mxu0 %v770_v32  ;;  %v786_v43 = vld [vmem:[%s971_s0 + $0x30] ss:$20 sps:$4 sm:$0xff]  }
   0xe   :  { %685 = vmatprep.subr.bf16.mxu1 %v751_v14  ;;  %v777_v38 = vld [vmem:[%s970_s1 + $0x110] sm:$0xff]   ;;  %v780_v39 = vld [vmem:[%s971_s0 + $0x2c] ss:$20 sps:$4 sm:$0xff]   ;;  %v778_v40 = vld [vmem:[%s970_s1 + $0x118] sm:$0xff]  }
   0xf   :  { %658 = vmatpush3.bf16.msra.mxu0 %v750_v13  ;;  %v783_v41 = vld [vmem:[%s971_s0 + $0x28] ss:$20 sps:$4 sm:$0xff]   ;;  %v779_v44 = vld [vmem:[%s970_s1 + $0x120] sm:$0xff]   ;;  %v787_v47 = vld [vmem:[%s970_s1 + $0x130] sm:$0xff]  }
  0x10   :  { %659 = vmatprep.subr.bf16.mxu0 %v753_v16  ;;  %v784_v42 = vld [vmem:[%s971_s0 + $0x34] ss:$20 sps:$4 sm:$0xff]   ;;  %v789_v45 = vld [vmem:[%s971_s0 + $0x10] ss:$20 sps:$4 sm:$0xff]   ;;  %v788_v48 = vld [vmem:[%s970_s1 + $0x138] sm:$0xff]  }
  0x11   :  { %686 = vmatpush3.bf16.msra.mxu1 %v752_v15  ;;  %v782_v46 = vld [vmem:[%s970_s1 + $0x128] sm:$0xff]   ;;  %v581_v51 = vld [vmem:[%s972_s2] ss:$0 sm:$0xff] }
  0x12   :  { %687 = vmatprep.subr.bf16.mxu1 %v755_v18  ;;  %v790_v49 = vld [vmem:[%s971_s0 + $0x38] ss:$20 sps:$4 sm:$0xff]  }
  0x13   :  { %660 = vmatpush3.bf16.msra.mxu0 %v754_v17 }
  0x14   :  { %661 = vmatprep.subr.bf16.mxu0 %v757_v20 }
  0x15   :  { %688 = vmatpush3.bf16.msra.mxu1 %v756_v19 }
  0x16   :  { %689 = vmatprep.subr.bf16.mxu1 %v759_v22 }
  0x17   :  { %662 = vmatpush3.bf16.msra.mxu0 %v758_v21 }
  0x18   :  { %663 = vmatprep.subr.bf16.mxu0 %v761_v24 }
  0x19   :  { %690 = vmatpush3.bf16.msra.mxu1 %v760_v23 }
  0x1a   :  { %691 = vmatprep.subr.bf16.mxu1 %v763_v26 }
  0x1b   :  { %664 = vmatpush3.bf16.msra.mxu0 %v762_v25 }
  0x1c   :  { %665 = vmatprep.subr.bf16.mxu0 %v765_v28 }
  0x1d   :  { %692 = vmatpush3.bf16.msra.mxu1 %v764_v27 }
  0x1e   :  { %693 = vmatprep.subr.bf16.mxu1 %v767_v30 }
  0x1f   :  { %666 = vmatpush3.bf16.msra.mxu0 %v766_v29 }
  0x20   :  { %717 = vmatprep.subr.bf16.mxu0 %v772_v34 }
  0x21   :  { %694 = vmatpush3.bf16.msra.mxu1 %v771_v33 }
  0x22   :  { %439 = vmatmul.mubr.bf16.vlgmr.msra.gmra.mrb[0].mxu0 %v768_v31 }
  0x23   :  { %718 = vmatpush3.bf16.msra.mxu0 %v772_v34  ;;  %446 = vmatprep.mubr.bf16.mxu0 %v780_v39 }
  0x24   :  { %488 = vmatmul.mubr.bf16.vlgmr.msra.gmra.mrb[0].mxu1 %v773_v35  ;;  %719 = vmatprep.subr.bf16.mxu0 %v776_v37 }
  0x25   :  { %495 = vmatprep.mubr.bf16.mxu1 %v784_v42 }
  0x27   :  { %720 = vmatpush3.bf16.msra.mxu0 %v776_v37 }
  0x28   :  { %721 = vmatprep.subr.bf16.mxu0 %v777_v38 }
  0x2a   :  { %447 = vmatmul.mubr.bf16.gmra.mrb[4].mxu0 %v783_v41 }
  0x2b   :  { %722 = vmatpush3.bf16.msra.mxu0 %v777_v38  ;;  %733 = vmatprep.mubr.bf16.mxu0 %v789_v45 }
  0x2c   :  { %723 = vmatprep.subr.bf16.mxu0 %v778_v40  ;;  %496 = vmatmul.mubr.bf16.gmra.mrb[4].mxu1 %v786_v43 }
  0x2f   :  { %724 = vmatpush3.bf16.msra.mxu0 %v778_v40 }
  0x30   :  { %725 = vmatprep.subr.bf16.mxu0 %v779_v44 }
  0x33   :  { %726 = vmatpush3.bf16.msra.mxu0 %v779_v44 }
  0x34   :  { %727 = vmatprep.subr.bf16.mxu0 %v782_v46 }
  0x37   :  { %728 = vmatpush3.bf16.msra.mxu0 %v782_v46 }
  0x38   :  { %729 = vmatprep.subr.bf16.mxu0 %v787_v47 }
  0x3b   :  { %730 = vmatpush3.bf16.msra.mxu0 %v787_v47 }
  0x3c   :  { %731 = vmatprep.subr.bf16.mxu0 %v788_v48 }
  0x3f   :  { %732 = vmatpush3.bf16.msra.mxu0 %v788_v48 }
  0x42   :  { %734 = vmatmul.mubr.bf16.vlgmr.msra.gmra.mrb[8].mxu0 %v790_v49 }
  0xf5   :  { %v667_v50 = vpop.f32.mrb[0].mxu0 }
  0xf6   :  { %v668_v52 = vpop.f32.mrb[1].mxu0 }
  0xf7   :  { %v669_v53 = vadd.f32 %v668_v52, %v667_v50  ;;  %v670_v54 = vpop.f32.mrb[2].mxu0  ;;  %v695_v55 = vpop.f32.mrb[0].mxu1 }
  0xf8   :  { %v671_v56 = vpop.f32.mrb[3].mxu0  ;;  %v696_v59 = vpop.f32.mrb[1].mxu1 }
  0xf9   :  { %v441_v57 = vadd.f32 %v669_v53, %v581_v51  ;;  %v672_v58 = vadd.f32 %v671_v56, %v670_v54  ;;  %v697_v60 = vadd.f32 %v696_v59, %v695_v55  ;;  %v698_v61 = vpop.f32.mrb[2].mxu1 }
  0xfa   :  { %v699_v63 = vpop.f32.mrb[3].mxu1 }
  0xfb   :  { %v444_v62 = vadd.f32 %v672_v58, %v581_v51  ;;  %v700_v0 = vadd.f32 %v699_v63, %v698_v61  ;;  %v490_v1 = vadd.f32 %v697_v60, %v441_v57 }
  0xfd   :  { %v673_v2 = vpop.f32.mrb[4].mxu0  ;;  %v493_v4 = vadd.f32 %v700_v0, %v444_v62 }
  0xfe   :  { %v674_v3 = vpop.f32.mrb[5].mxu0 }
  0xff   :  { %v675_v5 = vadd.f32 %v674_v3, %v673_v2  ;;  %v676_v6 = vpop.f32.mrb[6].mxu0  ;;  %v701_v7 = vpop.f32.mrb[4].mxu1 }
 0x100   :  { %v677_v8 = vpop.f32.mrb[7].mxu0  ;;  %v702_v11 = vpop.f32.mrb[5].mxu1 }
 0x101   :  { %v449_v9 = vadd.f32 %v675_v5, %v581_v51  ;;  %v678_v10 = vadd.f32 %v677_v8, %v676_v6  ;;  %v703_v12 = vadd.f32 %v702_v11, %v701_v7  ;;  %v704_v13 = vpop.f32.mrb[6].mxu1 }
 0x102   :  { %v705_v15 = vpop.f32.mrb[7].mxu1 }
 0x103   :  { %v452_v14 = vadd.f32 %v678_v10, %v581_v51  ;;  %v706_v16 = vadd.f32 %v705_v15, %v704_v13  ;;  %v498_v17 = vadd.f32 %v703_v12, %v449_v9 }
 0x105   :  { %v501_v18 = vadd.f32 %v706_v16, %v452_v14 }
 0x115   :  { %v735_v19 = vpop.f32.mrb[8].mxu0 }
 0x116   :  { %v547_v20 = vadd.f32 %v735_v19, %v498_v17  ;;  %v538_v21 = vpop.f32.mrb[9].mxu0 }
 0x117   :  { %v539_v22 = vadd.f32 %v538_v21, %v490_v1  ;;  %v736_v23 = vpop.f32.mrb[10].mxu0 }
 0x118   :  { %v550_v24 = vadd.f32 %v736_v23, %v501_v18  ;;  %v541_v25 = vpop.f32.mrb[11].mxu0  ;;  %v555_v27 = vmax.f32 %v547_v20, 0.0 }
 0x119   :  { %v542_v26 = vadd.f32 %v541_v25, %v493_v4  ;;  %v553_v29 = vmax.f32 %v539_v22, 0.0 }
 0x11a   :  { %v556_v28 = vmax.f32 %v550_v24, 0.0 }
 0x11b   :  { %v554_v30 = vmax.f32 %v542_v26, 0.0 }
 0x11c   :  { %v648_v31 = vpack.c.bf16 %v556_v28, %v555_v27 }
 0x11d   :  { %v643_v32 = vpack.c.bf16 %v554_v30, %v553_v29 }
 0x11e   :  { %650 = vst [vmem:[%s973_s3 + $0x8] sm:$0xff] %v648_v31  }
 0x11f   :  { %644 = vst [vmem:[%s973_s3] sm:$0xff] %v643_v32  }

// kernel: _lambda_.46
= control target key start
LH: loop header
LB: loop body
LE: loop exit
PB: predicated region body
PF: predicated region fallthrough
CT: control target
= control target key end

     0   :  { %v324_v1 = vmov 0   ;;  %v40_v19 = vlaneseq  ;;  %s431_s1 = inlined_call_operand.vmem [shape: bf16[128,256], index: 1, kind: input, shape index: {}]   ;;  %s432_s0 = inlined_call_operand.vmem [shape: bf16[32,128], index: 0, kind: input, shape index: {}]   ;;  %s433_s2 = inlined_call_operand.vmem [shape: f32[1,256], index: 2, kind: input, shape index: {}]   ;;  %s434_s3 = inlined_call_operand.vmem [shape: bf16[32,256], index: 3, kind: input, shape index: {}]   ;;  %s435_s4 = inlined_call_operand.vmem [shape: bf16[32,256], index: 4, kind: output, shape index: {}]  }
   0x1   :  { %v298_v0 = vld [vmem:[%s431_s1 + $0x4] ss:$8 sps:$4 sm:$0xff]   ;;  %174 = vmatprep.mubr.bf16.mxu0 %v324_v1  ;;  %184 = vmatprep.mubr.bf16.mxu1 %v324_v1  ;;  %v300_v2 = vld [vmem:[%s431_s1] ss:$8 sps:$4 sm:$0xff]   ;;  %v301_v3 = vld [vmem:[%s431_s1 + $0x14] ss:$8 sps:$4 sm:$0xff]  }
   0x2   :  { %142 = vmatprep.subr.bf16.mxu0 %v298_v0  ;;  %281 = vmatprep.subr.bf16.mxu1 %v298_v0  ;;  %v303_v4 = vld [vmem:[%s431_s1 + $0x10] ss:$8 sps:$4 sm:$0xff]   ;;  %v304_v5 = vld [vmem:[%s431_s1 + $0x24] ss:$8 sps:$4 sm:$0xff]   ;;  %v306_v6 = vld [vmem:[%s431_s1 + $0x20] ss:$8 sps:$4 sm:$0xff]  }
   0x3   :  { %143 = vmatpush1.bf16.msra.mxu0 %v300_v2  ;;  %289 = vmatpush1.bf16.msra.mxu1 %v300_v2  ;;  %v307_v7 = vld [vmem:[%s431_s1 + $0x34] ss:$8 sps:$4 sm:$0xff]   ;;  %v309_v8 = vld [vmem:[%s431_s1 + $0x30] ss:$8 sps:$4 sm:$0xff]   ;;  %v310_v9 = vld [vmem:[%s431_s1 + $0x44] ss:$8 sps:$4 sm:$0xff]  }
   0x4   :  { %144 = vmatprep.subr.bf16.mxu0 %v301_v3  ;;  %282 = vmatprep.subr.bf16.mxu1 %v301_v3  ;;  %v312_v10 = vld [vmem:[%s431_s1 + $0x40] ss:$8 sps:$4 sm:$0xff]   ;;  %v313_v11 = vld [vmem:[%s431_s1 + $0x54] ss:$8 sps:$4 sm:$0xff]   ;;  %v315_v12 = vld [vmem:[%s431_s1 + $0x50] ss:$8 sps:$4 sm:$0xff]  }
   0x5   :  { %v316_v13 = vld [vmem:[%s431_s1 + $0x64] ss:$8 sps:$4 sm:$0xff]   ;;  %v318_v14 = vld [vmem:[%s431_s1 + $0x60] ss:$8 sps:$4 sm:$0xff]   ;;  %v319_v15 = vld [vmem:[%s431_s1 + $0x74] ss:$8 sps:$4 sm:$0xff]  }
   0x6   :  { %v321_v16 = vld [vmem:[%s431_s1 + $0x70] ss:$8 sps:$4 sm:$0xff]   ;;  %v322_v17 = vld [vmem:[%s432_s0] sm:$0xff]   ;;  %v323_v18 = vld [vmem:[%s432_s0 + $0x8] sm:$0xff]   ;;  %v41_v20 = vshrl.u32 %v40_v19, 7 }
   0x7   :  { %145 = vmatpush1.bf16.msra.mxu0 %v303_v4  ;;  %290 = vmatpush1.bf16.msra.mxu1 %v303_v4  ;;  %v38_v22 = vld [vmem:[%s433_s2] sm:$0x3]  ;;  %v197_v25 = vld [vmem:[%s434_s3 + $0x10] sm:$0xff]  ;;  %v196_v28 = vld [vmem:[%s434_s3 + $0x8] sm:$0xff] }
   0x8   :  { %146 = vmatprep.subr.bf16.mxu0 %v304_v5  ;;  %283 = vmatprep.subr.bf16.mxu1 %v304_v5  ;;  %v42_v21 = vsub.s32 0, %v41_v20  ;;  %v46_v23 = vsub.s32 1, %v41_v20  ;;  %v195_v24 = vld [vmem:[%s434_s3] sm:$0xff]  ;;  %v198_v29 = vld [vmem:[%s434_s3 + $0x18] sm:$0xff]  ;;  %v203_v31 = vunpack.c.l.bf16 %v197_v25  ;;  %v204_v35 = vunpack.c.h.bf16 %v197_v25 }
   0x9   :  { %v199_v30 = vunpack.c.l.bf16 %v195_v24  ;;  %v200_v34 = vunpack.c.h.bf16 %v195_v24  ;;  %v201_v40 = vunpack.c.l.bf16 %v196_v28  ;;  %v205_v41 = vunpack.c.l.bf16 %v198_v29 }
   0xa   :  { %v43_v26 = vrot.slane %v38_v22, %v42_v21  ;;  %v47_v27 = vrot.slane %v38_v22, %v46_v23  ;;  %v202_v46 = vunpack.c.h.bf16 %v196_v28  ;;  %v206_v47 = vunpack.c.h.bf16 %v198_v29 }
   0xb   :  { %147 = vmatpush1.bf16.msra.mxu0 %v306_v6  ;;  %291 = vmatpush1.bf16.msra.mxu1 %v306_v6 }
   0xc   :  { %148 = vmatprep.subr.bf16.mxu0 %v307_v7  ;;  %284 = vmatprep.subr.bf16.mxu1 %v307_v7 }
   0xf   :  { %149 = vmatpush1.bf16.msra.mxu0 %v309_v8  ;;  %292 = vmatpush1.bf16.msra.mxu1 %v309_v8 }
  0x10   :  { %150 = vmatprep.subr.bf16.mxu0 %v310_v9  ;;  %285 = vmatprep.subr.bf16.mxu1 %v310_v9 }
  0x13   :  { %151 = vmatpush1.bf16.msra.mxu0 %v312_v10  ;;  %293 = vmatpush1.bf16.msra.mxu1 %v312_v10 }
  0x14   :  { %152 = vmatprep.subr.bf16.mxu0 %v313_v11  ;;  %286 = vmatprep.subr.bf16.mxu1 %v313_v11 }
  0x17   :  { %153 = vmatpush1.bf16.msra.mxu0 %v315_v12  ;;  %294 = vmatpush1.bf16.msra.mxu1 %v315_v12 }
  0x18   :  { %154 = vmatprep.subr.bf16.mxu0 %v316_v13  ;;  %287 = vmatprep.subr.bf16.mxu1 %v316_v13 }
  0x1b   :  { %155 = vmatpush1.bf16.msra.mxu0 %v318_v14  ;;  %295 = vmatpush1.bf16.msra.mxu1 %v318_v14 }
  0x1c   :  { %156 = vmatprep.subr.bf16.mxu0 %v319_v15  ;;  %288 = vmatprep.subr.bf16.mxu1 %v319_v15 }
  0x1f   :  { %157 = vmatpush1.bf16.msra.mxu0 %v321_v16  ;;  %296 = vmatpush1.bf16.msra.mxu1 %v321_v16 }
  0x22   :  { %175 = vmatmul.mubr.bf16.vlgmr.msra.gmra.mrb[0].mxu0 %v322_v17  ;;  %185 = vmatmul.mubr.bf16.vlgmr.msra.gmra.mrb[0].mxu1 %v323_v18 }
  0xf5   :  { %v176_v32 = vpop.f32.mrb[0].mxu0  ;;  %v186_v33 = vpop.f32.mrb[0].mxu1 }
  0xf6   :  { %v177_v36 = vadd.f32 %v176_v32, %v43_v26  ;;  %v187_v37 = vadd.f32 %v186_v33, %v43_v26  ;;  %v178_v38 = vpop.f32.mrb[1].mxu0  ;;  %v188_v39 = vpop.f32.mrb[1].mxu1 }
  0xf7   :  { %v179_v42 = vadd.f32 %v178_v38, %v47_v27  ;;  %v189_v43 = vadd.f32 %v188_v39, %v47_v27  ;;  %v180_v44 = vpop.f32.mrb[2].mxu0  ;;  %v190_v45 = vpop.f32.mrb[2].mxu1 }
  0xf8   :  { %v207_v48 = vadd.f32 %v199_v30, %v177_v36  ;;  %v211_v49 = vadd.f32 %v203_v31, %v187_v37  ;;  %v181_v50 = vadd.f32 %v180_v44, %v43_v26  ;;  %v191_v51 = vadd.f32 %v190_v45, %v43_v26  ;;  %v182_v52 = vpop.f32.mrb[3].mxu0  ;;  %v192_v53 = vpop.f32.mrb[3].mxu1 }
  0xf9   :  { %v208_v54 = vadd.f32 %v200_v34, %v179_v42  ;;  %v212_v55 = vadd.f32 %v204_v35, %v189_v43  ;;  %v183_v56 = vadd.f32 %v182_v52, %v47_v27  ;;  %v193_v57 = vadd.f32 %v192_v53, %v47_v27 }
  0xfa   :  { %v215_v58 = vmax.f32 %v207_v48, 0.0  ;;  %v219_v59 = vmax.f32 %v211_v49, 0.0  ;;  %v209_v60 = vadd.f32 %v201_v40, %v181_v50  ;;  %v213_v61 = vadd.f32 %v205_v41, %v191_v51 }
  0xfb   :  { %v216_v62 = vmax.f32 %v208_v54, 0.0  ;;  %v220_v63 = vmax.f32 %v212_v55, 0.0  ;;  %v210_v0 = vadd.f32 %v202_v46, %v183_v56  ;;  %v214_v1 = vadd.f32 %v206_v47, %v193_v57 }
  0xfc   :  { %v217_v2 = vmax.f32 %v209_v60, 0.0  ;;  %v221_v3 = vmax.f32 %v213_v61, 0.0 }
  0xfd   :  { %v277_v4 = vpack.c.bf16 %v216_v62, %v215_v58  ;;  %v279_v5 = vpack.c.bf16 %v220_v63, %v219_v59  ;;  %v218_v6 = vmax.f32 %v210_v0, 0.0  ;;  %v222_v7 = vmax.f32 %v214_v1, 0.0 }
  0xff   :  { %247 = vst [vmem:[%s435_s4] sm:$0xff] %v277_v4  ;;  %249 = vst [vmem:[%s435_s4 + $0x10] sm:$0xff] %v279_v5  ;;  %v278_v8 = vpack.c.bf16 %v218_v6, %v217_v2  ;;  %v280_v9 = vpack.c.bf16 %v222_v7, %v221_v3 }
 0x101   :  { %248 = vst [vmem:[%s435_s4 + $0x8] sm:$0xff] %v278_v8  ;;  %250 = vst [vmem:[%s435_s4 + $0x18] sm:$0xff] %v280_v9 }

// kernel: _lambda_.47
= control target key start
LH: loop header
LB: loop body
LE: loop exit
PB: predicated region body
PF: predicated region fallthrough
CT: control target
= control target key end

     0   :  { %s446_s1 = inlined_call_operand.vmem [shape: bf16[256,128], index: 1, kind: input, shape index: {}]   ;;  %s447_s0 = inlined_call_operand.vmem [shape: bf16[32,256], index: 0, kind: input, shape index: {}]   ;;  %s448_s2 = inlined_call_operand.vmem [shape: f32[1,128], index: 2, kind: input, shape index: {}]   ;;  %s449_s3 = inlined_call_operand.vmem [shape: bf16[32,128], index: 3, kind: output, shape index: {}]  }
   0x1   :  { %v335_v0 = vld [vmem:[%s446_s1 + $0x40] sm:$0xff]   ;;  %v337_v2 = vld [vmem:[%s446_s1 + $0x48] sm:$0xff]   ;;  %v339_v4 = vld [vmem:[%s446_s1 + $0x50] sm:$0xff]  }
   0x2   :  { %v336_v1 = vld [vmem:[%s446_s1] sm:$0xff]   ;;  %291 = vmatprep.subr.bf16.mxu0 %v335_v0  ;;  %319 = vmatprep.subr.bf16.mxu1 %v335_v0  ;;  %v338_v3 = vld [vmem:[%s446_s1 + $0x8] sm:$0xff]   ;;  %v340_v5 = vld [vmem:[%s446_s1 + $0x10] sm:$0xff]  }
   0x3   :  { %292 = vmatpush3.bf16.msra.mxu0 %v336_v1  ;;  %327 = vmatpush3.bf16.msra.mxu1 %v336_v1  ;;  %v341_v6 = vld [vmem:[%s446_s1 + $0x58] sm:$0xff]   ;;  %v343_v8 = vld [vmem:[%s446_s1 + $0x60] sm:$0xff]   ;;  %v345_v10 = vld [vmem:[%s446_s1 + $0x68] sm:$0xff]  }
   0x4   :  { %293 = vmatprep.subr.bf16.mxu0 %v337_v2  ;;  %320 = vmatprep.subr.bf16.mxu1 %v337_v2  ;;  %v342_v7 = vld [vmem:[%s446_s1 + $0x18] sm:$0xff]   ;;  %v344_v9 = vld [vmem:[%s446_s1 + $0x20] sm:$0xff]   ;;  %v346_v13 = vld [vmem:[%s446_s1 + $0x28] sm:$0xff]  }
   0x5   :  { %v353_v11 = vld [vmem:[%s447_s0 + $0x4] ss:$8 sps:$4 sm:$0xff]   ;;  %v356_v12 = vld [vmem:[%s447_s0 + $0x14] ss:$8 sps:$4 sm:$0xff]   ;;  %v351_v18 = vld [vmem:[%s447_s0] ss:$8 sps:$4 sm:$0xff]  }
   0x6   :  { %v347_v14 = vld [vmem:[%s446_s1 + $0x70] sm:$0xff]   ;;  %206 = vmatprep.mubr.bf16.mxu0 %v353_v11  ;;  %214 = vmatprep.mubr.bf16.mxu1 %v356_v12  ;;  %v349_v16 = vld [vmem:[%s446_s1 + $0x78] sm:$0xff]   ;;  %v251_v22 = vld [vmem:[%s448_s2] ss:$0 sm:$0xff] }
   0x7   :  { %294 = vmatpush3.bf16.msra.mxu0 %v338_v3  ;;  %328 = vmatpush3.bf16.msra.mxu1 %v338_v3  ;;  %v348_v15 = vld [vmem:[%s446_s1 + $0x30] sm:$0xff]   ;;  %v350_v17 = vld [vmem:[%s446_s1 + $0x38] sm:$0xff]  }
   0x8   :  { %295 = vmatprep.subr.bf16.mxu0 %v339_v4  ;;  %321 = vmatprep.subr.bf16.mxu1 %v339_v4  ;;  %v354_v19 = vld [vmem:[%s447_s0 + $0x10] ss:$8 sps:$4 sm:$0xff]  }
   0xb   :  { %296 = vmatpush3.bf16.msra.mxu0 %v340_v5  ;;  %329 = vmatpush3.bf16.msra.mxu1 %v340_v5 }
   0xc   :  { %297 = vmatprep.subr.bf16.mxu0 %v341_v6  ;;  %322 = vmatprep.subr.bf16.mxu1 %v341_v6 }
   0xf   :  { %298 = vmatpush3.bf16.msra.mxu0 %v342_v7  ;;  %330 = vmatpush3.bf16.msra.mxu1 %v342_v7 }
  0x10   :  { %299 = vmatprep.subr.bf16.mxu0 %v343_v8  ;;  %323 = vmatprep.subr.bf16.mxu1 %v343_v8 }
  0x13   :  { %300 = vmatpush3.bf16.msra.mxu0 %v344_v9  ;;  %331 = vmatpush3.bf16.msra.mxu1 %v344_v9 }
  0x14   :  { %301 = vmatprep.subr.bf16.mxu0 %v345_v10  ;;  %324 = vmatprep.subr.bf16.mxu1 %v345_v10 }
  0x17   :  { %302 = vmatpush3.bf16.msra.mxu0 %v346_v13  ;;  %332 = vmatpush3.bf16.msra.mxu1 %v346_v13 }
  0x18   :  { %303 = vmatprep.subr.bf16.mxu0 %v347_v14  ;;  %325 = vmatprep.subr.bf16.mxu1 %v347_v14 }
  0x1b   :  { %304 = vmatpush3.bf16.msra.mxu0 %v348_v15  ;;  %333 = vmatpush3.bf16.msra.mxu1 %v348_v15 }
  0x1c   :  { %305 = vmatprep.subr.bf16.mxu0 %v349_v16  ;;  %326 = vmatprep.subr.bf16.mxu1 %v349_v16 }
  0x1f   :  { %306 = vmatpush3.bf16.msra.mxu0 %v350_v17  ;;  %334 = vmatpush3.bf16.msra.mxu1 %v350_v17 }
  0x22   :  { %207 = vmatmul.mubr.bf16.vlgmr.msra.gmra.mrb[0].mxu0 %v351_v18  ;;  %215 = vmatmul.mubr.bf16.vlgmr.msra.gmra.mrb[0].mxu1 %v354_v19 }
  0xf5   :  { %v307_v20 = vpop.f32.mrb[0].mxu0  ;;  %v313_v21 = vpop.f32.mrb[0].mxu1 }
  0xf6   :  { %v308_v23 = vpop.f32.mrb[1].mxu0  ;;  %v314_v24 = vpop.f32.mrb[1].mxu1 }
  0xf7   :  { %v309_v25 = vadd.f32 %v308_v23, %v307_v20  ;;  %v315_v26 = vadd.f32 %v314_v24, %v313_v21  ;;  %v310_v27 = vpop.f32.mrb[2].mxu0  ;;  %v316_v28 = vpop.f32.mrb[2].mxu1 }
  0xf8   :  { %v311_v29 = vpop.f32.mrb[3].mxu0  ;;  %v317_v30 = vpop.f32.mrb[3].mxu1 }
  0xf9   :  { %v209_v31 = vadd.f32 %v309_v25, %v251_v22  ;;  %v217_v32 = vadd.f32 %v315_v26, %v251_v22  ;;  %v312_v33 = vadd.f32 %v311_v29, %v310_v27  ;;  %v318_v34 = vadd.f32 %v317_v30, %v316_v28 }
  0xfb   :  { %v212_v35 = vadd.f32 %v312_v33, %v251_v22  ;;  %v220_v36 = vadd.f32 %v318_v34, %v251_v22  ;;  %v223_v37 = vmax.f32 %v209_v31, 0.0  ;;  %v225_v38 = vmax.f32 %v217_v32, 0.0 }
  0xfd   :  { %v224_v39 = vmax.f32 %v212_v35, 0.0  ;;  %v226_v40 = vmax.f32 %v220_v36, 0.0 }
  0xff   :  { %v283_v41 = vpack.c.bf16 %v224_v39, %v223_v37  ;;  %v288_v42 = vpack.c.bf16 %v226_v40, %v225_v38 }
 0x101   :  { %284 = vst [vmem:[%s449_s3] sm:$0xff] %v283_v41   ;;  %290 = vst [vmem:[%s449_s3 + $0x8] sm:$0xff] %v288_v42  }

// kernel: _lambda_.55
= control target key start
LH: loop header
LB: loop body
LE: loop exit
PB: predicated region body
PF: predicated region fallthrough
CT: control target
= control target key end

     0   :  { %s1007_s12 = smov 0   ;;  %s1009_s13 = smov 0   ;;  %s1195_s0 = inlined_call_operand.vmem [shape: bf16[16,256], index: 0, kind: input, shape index: {}]   ;;  %s1196_s1 = inlined_call_operand.vmem [shape: bf16[256,512], index: 1, kind: input, shape index: {}]   ;;  %s1197_s2 = inlined_call_operand.vmem [shape: f32[1,512], index: 2, kind: input, shape index: {}]   ;;  %s1198_s3 = inlined_call_operand.vmem [shape: bf16[16,512], index: 3, kind: output, shape index: {}]  }
   0x1   :  { %s1011_s14 = smov 0   ;;  %s1013_s15 = smov 0  }
   0x2   :  { %s1015_s16 = smov 0  }
   0x3 LB: > { %s22_s17 = sadd.s32 1, %s981_s15  ;;  %s799_s18 = sadd.s32 4294967295, %s985_s16   ;;  %s985_s16 = sphi %s1015_s16, %s13_s16   ;;  %s981_s15 = sphi %s1013_s15, %s1203_s15   ;;  %s977_s14 = sphi %s1011_s14, %s1202_s14   ;;  %s973_s13 = sphi %s1009_s13, %s1201_s13   ;;  %s969_s12 = sphi %s1007_s12, %s1200_s12  }
   0x4   : > { %p23_p0 = scmp.ge.s32.totalorder %s22_s17, 2  ;;  %p65_p1 = scmp.ne.s32.totalorder %s973_s13, %s969_s12 }
   0x5   : > { %p66_p2 = scmp.eq.s32.totalorder %s985_s16, 0  ;;  %p123_p4 = scmp.eq.s32.totalorder %s799_s18, 1 }
   0x6   : > { %s1205_s17 = smov (%p23_p0, %s22_s17), 0  ;;  %s58_s20 = sadd.s32 1, %s973_s13 }
   0x7   : > { %p67_p3 = por %p66_p2, %p65_p1  ;;  %s55_s19 = ssub.s32 %s981_s15, %s1205_s17 }
   0x8   : > { %p56_p5 = scmp.eq.s32.totalorder %s55_s19, 0  ;;  %p1042_p6 = por %p123_p4, %p65_p1 }
   0x9   : > { %p803_p7 = scmp.ge.s32.totalorder %s985_s16, 2 }
   0xa   : > { %s1047_s22 = scalar_select %p56_p5, %s973_s13, %s58_s20  }
   0xb   : > { %155 = sbr.rel (%p803_p7) target bundleno = 38 (0x26), region = 20 }
  0x12   : > { %158 = sbr.rel (!%p67_p3) target bundleno = 38 (0x26), region = 24  ;;  %s160_s23 = sand.u32 (%p67_p3), 1, %s973_s13  }
  0x13   : > { %s852_s24 = sshll.u32 (%p67_p3), %s981_s15, 3  ;;  %s804_s25 = sshll.u32 (%p67_p3), %s160_s23, 8 }
  0x14   : > { %s1055_s28 = scalar_lea.vmem (%p67_p3), %s1196_s1, %s852_s24  ;;  %s1060_s29 = scalar_lea.vmem (%p67_p3), [#allocation2], %s804_s25 }
  0x15   : > { %v255_v0 = vld [vmem:[%s1055_s28] sm:$0xff] (%p67_p3)  ;;  %v257_v1 = vld [vmem:[%s1055_s28 + $0x10] sm:$0xff] (%p67_p3) }
  0x16   : > { %v259_v2 = vld [vmem:[%s1055_s28 + $0x20] sm:$0xff] (%p67_p3)  ;;  %256 = vst [vmem:[%s1060_s29] sm:$0xff] (%p67_p3), %v255_v0  ;;  %258 = vst [vmem:[%s1060_s29 + $0x8] sm:$0xff] (%p67_p3), %v257_v1  ;;  %v261_v3 = vld [vmem:[%s1055_s28 + $0x30] sm:$0xff] (%p67_p3) }
  0x17   : > { %260 = vst [vmem:[%s1060_s29 + $0x10] sm:$0xff] (%p67_p3), %v259_v2  ;;  %v263_v4 = vld [vmem:[%s1055_s28 + $0x40] sm:$0xff] (%p67_p3)  ;;  %v265_v5 = vld [vmem:[%s1055_s28 + $0x50] sm:$0xff] (%p67_p3)  ;;  %262 = vst [vmem:[%s1060_s29 + $0x18] sm:$0xff] (%p67_p3), %v261_v3 }
  0x18   : > { %264 = vst [vmem:[%s1060_s29 + $0x20] sm:$0xff] (%p67_p3), %v263_v4  ;;  %266 = vst [vmem:[%s1060_s29 + $0x28] sm:$0xff] (%p67_p3), %v265_v5  ;;  %v267_v6 = vld [vmem:[%s1055_s28 + $0x60] sm:$0xff] (%p67_p3)  ;;  %v269_v7 = vld [vmem:[%s1055_s28 + $0x70] sm:$0xff] (%p67_p3) }
  0x19   : > { %v271_v8 = vld [vmem:[%s1055_s28 + $0x80] sm:$0xff]  ;;  %268 = vst [vmem:[%s1060_s29 + $0x30] sm:$0xff] %v267_v6  ;;  %270 = vst [vmem:[%s1060_s29 + $0x38] sm:$0xff] %v269_v7  ;;  %v273_v9 = vld [vmem:[%s1055_s28 + $0x90] sm:$0xff] }
  0x1a   : > { %272 = vst [vmem:[%s1060_s29 + $0x40] sm:$0xff] %v271_v8  ;;  %v275_v10 = vld [vmem:[%s1055_s28 + $0xa0] sm:$0xff]  ;;  %v277_v11 = vld [vmem:[%s1055_s28 + $0xb0] sm:$0xff]  ;;  %274 = vst [vmem:[%s1060_s29 + $0x48] sm:$0xff] %v273_v9 }
  0x1b   : > { %276 = vst [vmem:[%s1060_s29 + $0x50] sm:$0xff] %v275_v10  ;;  %278 = vst [vmem:[%s1060_s29 + $0x58] sm:$0xff] %v277_v11  ;;  %v279_v12 = vld [vmem:[%s1055_s28 + $0xc0] sm:$0xff]  ;;  %v281_v13 = vld [vmem:[%s1055_s28 + $0xd0] sm:$0xff] }
  0x1c   : > { %v283_v14 = vld [vmem:[%s1055_s28 + $0xe0] sm:$0xff]  ;;  %280 = vst [vmem:[%s1060_s29 + $0x60] sm:$0xff] %v279_v12  ;;  %282 = vst [vmem:[%s1060_s29 + $0x68] sm:$0xff] %v281_v13  ;;  %v285_v15 = vld [vmem:[%s1055_s28 + $0xf0] sm:$0xff] }
  0x1d   : > { %284 = vst [vmem:[%s1060_s29 + $0x70] sm:$0xff] %v283_v14  ;;  %v287_v16 = vld [vmem:[%s1055_s28 + $0x100] sm:$0xff]  ;;  %v289_v17 = vld [vmem:[%s1055_s28 + $0x110] sm:$0xff]  ;;  %286 = vst [vmem:[%s1060_s29 + $0x78] sm:$0xff] %v285_v15 }
  0x1e   : > { %288 = vst [vmem:[%s1060_s29 + $0x80] sm:$0xff] %v287_v16  ;;  %290 = vst [vmem:[%s1060_s29 + $0x88] sm:$0xff] %v289_v17  ;;  %v291_v18 = vld [vmem:[%s1055_s28 + $0x120] sm:$0xff]  ;;  %v293_v19 = vld [vmem:[%s1055_s28 + $0x130] sm:$0xff] }
  0x1f   : > { %v295_v20 = vld [vmem:[%s1055_s28 + $0x140] sm:$0xff]  ;;  %292 = vst [vmem:[%s1060_s29 + $0x90] sm:$0xff] %v291_v18  ;;  %294 = vst [vmem:[%s1060_s29 + $0x98] sm:$0xff] %v293_v19  ;;  %v297_v21 = vld [vmem:[%s1055_s28 + $0x150] sm:$0xff] }
  0x20   : > { %296 = vst [vmem:[%s1060_s29 + $0xa0] sm:$0xff] %v295_v20  ;;  %v299_v22 = vld [vmem:[%s1055_s28 + $0x160] sm:$0xff]  ;;  %v301_v23 = vld [vmem:[%s1055_s28 + $0x170] sm:$0xff]  ;;  %298 = vst [vmem:[%s1060_s29 + $0xa8] sm:$0xff] %v297_v21 }
  0x21   : > { %300 = vst [vmem:[%s1060_s29 + $0xb0] sm:$0xff] %v299_v22  ;;  %302 = vst [vmem:[%s1060_s29 + $0xb8] sm:$0xff] %v301_v23  ;;  %v303_v24 = vld [vmem:[%s1055_s28 + $0x180] sm:$0xff]  ;;  %v305_v25 = vld [vmem:[%s1055_s28 + $0x190] sm:$0xff] }
  0x22   : > { %v307_v26 = vld [vmem:[%s1055_s28 + $0x1a0] sm:$0xff]  ;;  %304 = vst [vmem:[%s1060_s29 + $0xc0] sm:$0xff] %v303_v24  ;;  %306 = vst [vmem:[%s1060_s29 + $0xc8] sm:$0xff] %v305_v25  ;;  %v309_v27 = vld [vmem:[%s1055_s28 + $0x1b0] sm:$0xff] }
  0x23   : > { %308 = vst [vmem:[%s1060_s29 + $0xd0] sm:$0xff] %v307_v26  ;;  %v311_v28 = vld [vmem:[%s1055_s28 + $0x1c0] sm:$0xff]  ;;  %v313_v29 = vld [vmem:[%s1055_s28 + $0x1d0] sm:$0xff]  ;;  %310 = vst [vmem:[%s1060_s29 + $0xd8] sm:$0xff] %v309_v27 }
  0x24   : > { %312 = vst [vmem:[%s1060_s29 + $0xe0] sm:$0xff] %v311_v28  ;;  %314 = vst [vmem:[%s1060_s29 + $0xe8] sm:$0xff] %v313_v29  ;;  %v315_v30 = vld [vmem:[%s1055_s28 + $0x1e0] sm:$0xff]  ;;  %v317_v31 = vld [vmem:[%s1055_s28 + $0x1f0] sm:$0xff] }
  0x25   : > { %316 = vst [vmem:[%s1060_s29 + $0xf0] sm:$0xff] %v315_v30  ;;  %318 = vst [vmem:[%s1060_s29 + $0xf8] sm:$0xff] %v317_v31 }
  0x26 PF: > { %p807_p8 = scmp.ge.s32.totalorder %s985_s16, 1  ;;  %p331_p9 = scmp.lt.s32.totalorder %s985_s16, 3 }
  0x28   : > { %p332_p10 = pnand %p807_p8, %p331_p9 }
  0x29   : > { %s338_s30 = sand.u32 (!%p332_p10), 1, %s969_s12   ;;  %v946_v32 = vld [vmem:[%s1195_s0 + $0x4] ss:$8 sps:$4 sm:$0xff] (!%p332_p10)   ;;  %v944_v1 = vld [vmem:[%s1195_s0] ss:$8 sps:$4 sm:$0xff] (!%p332_p10)   ;;  %s810_s10 = sshll.u32 (!%p332_p10), %s977_s14, 1  ;;  %v421_v2 = vlaneseq (!%p332_p10) }
  0x2a   : > { %335 = sbr.rel (%p332_p10) target bundleno = 337 (0x151), region = 66  ;;  %s808_s4 = sshll.u32 (!%p332_p10), %s338_s30, 8  ;;  %633 = vmatprep.mubr.bf16.mxu0 (!%p332_p10), %v946_v32 }
  0x2b   : > { %s1131_s7 = scalar_lea.vmem (!%p332_p10), [#allocation2], %s808_s4  ;;  %p379_p11 = scmp.lt.s32.totalorder (!%p332_p10), %s810_s10, 3  ;;  %v422_v3 = vshrl.u32 (!%p332_p10), %v421_v2, 7 }
  0x2c   : > { %v896_v33 = vld [vmem:[%s1131_s7 + $0x4] ss:$8 sps:$4 sm:$0xff] (!%p332_p10)   ;;  %v898_v34 = vld [vmem:[%s1131_s7] ss:$8 sps:$4 sm:$0xff] (!%p332_p10)   ;;  %v899_v35 = vld [vmem:[%s1131_s7 + $0x14] ss:$8 sps:$4 sm:$0xff] (!%p332_p10)  }
  0x2d   : > { %601 = vmatprep.subr.bf16.mxu0 (!%p332_p10), %v896_v33  ;;  %v901_v36 = vld [vmem:[%s1131_s7 + $0x10] ss:$8 sps:$4 sm:$0xff] (!%p332_p10)   ;;  %v902_v37 = vld [vmem:[%s1131_s7 + $0x24] ss:$8 sps:$4 sm:$0xff] (!%p332_p10)   ;;  %v904_v38 = vld [vmem:[%s1131_s7 + $0x20] ss:$8 sps:$4 sm:$0xff] (!%p332_p10)  }
  0x2e   : > { %602 = vmatpush1.bf16.msra.mxu0 (!%p332_p10), %v898_v34  ;;  %v905_v39 = vld [vmem:[%s1131_s7 + $0x34] ss:$8 sps:$4 sm:$0xff] (!%p332_p10)   ;;  %v907_v40 = vld [vmem:[%s1131_s7 + $0x30] ss:$8 sps:$4 sm:$0xff] (!%p332_p10)   ;;  %v908_v41 = vld [vmem:[%s1131_s7 + $0x44] ss:$8 sps:$4 sm:$0xff] (!%p332_p10)  }
  0x2f   : > { %603 = vmatprep.subr.bf16.mxu0 (!%p332_p10), %v899_v35  ;;  %v910_v42 = vld [vmem:[%s1131_s7 + $0x40] ss:$8 sps:$4 sm:$0xff] (!%p332_p10)   ;;  %v911_v43 = vld [vmem:[%s1131_s7 + $0x54] ss:$8 sps:$4 sm:$0xff] (!%p332_p10)   ;;  %v913_v44 = vld [vmem:[%s1131_s7 + $0x50] ss:$8 sps:$4 sm:$0xff] (!%p332_p10)  }
  0x30   : > { %v914_v45 = vld [vmem:[%s1131_s7 + $0x64] ss:$8 sps:$4 sm:$0xff] (!%p332_p10)   ;;  %v916_v46 = vld [vmem:[%s1131_s7 + $0x60] ss:$8 sps:$4 sm:$0xff] (!%p332_p10)   ;;  %v917_v47 = vld [vmem:[%s1131_s7 + $0x74] ss:$8 sps:$4 sm:$0xff] (!%p332_p10)  }
  0x31   : > { %v919_v48 = vld [vmem:[%s1131_s7 + $0x70] ss:$8 sps:$4 sm:$0xff]   ;;  %v920_v49 = vld [vmem:[%s1131_s7 + $0x84] ss:$8 sps:$4 sm:$0xff]   ;;  %v922_v50 = vld [vmem:[%s1131_s7 + $0x80] ss:$8 sps:$4 sm:$0xff]  }
  0x32   : > { %604 = vmatpush1.bf16.msra.mxu0 %v901_v36  ;;  %v923_v51 = vld [vmem:[%s1131_s7 + $0x94] ss:$8 sps:$4 sm:$0xff]   ;;  %v925_v52 = vld [vmem:[%s1131_s7 + $0x90] ss:$8 sps:$4 sm:$0xff]   ;;  %v926_v53 = vld [vmem:[%s1131_s7 + $0xa4] ss:$8 sps:$4 sm:$0xff]  }
  0x33   : > { %605 = vmatprep.subr.bf16.mxu0 %v902_v37  ;;  %v928_v54 = vld [vmem:[%s1131_s7 + $0xa0] ss:$8 sps:$4 sm:$0xff]   ;;  %v929_v55 = vld [vmem:[%s1131_s7 + $0xb4] ss:$8 sps:$4 sm:$0xff]   ;;  %v931_v56 = vld [vmem:[%s1131_s7 + $0xb0] ss:$8 sps:$4 sm:$0xff]  }
  0x34   : > { %v932_v57 = vld [vmem:[%s1131_s7 + $0xc4] ss:$8 sps:$4 sm:$0xff]   ;;  %v934_v58 = vld [vmem:[%s1131_s7 + $0xc0] ss:$8 sps:$4 sm:$0xff]   ;;  %v935_v59 = vld [vmem:[%s1131_s7 + $0xd4] ss:$8 sps:$4 sm:$0xff]  }
  0x35   : > { %v937_v60 = vld [vmem:[%s1131_s7 + $0xd0] ss:$8 sps:$4 sm:$0xff]   ;;  %v938_v61 = vld [vmem:[%s1131_s7 + $0xe4] ss:$8 sps:$4 sm:$0xff]   ;;  %v940_v62 = vld [vmem:[%s1131_s7 + $0xe0] ss:$8 sps:$4 sm:$0xff]  }
  0x36   : > { %606 = vmatpush1.bf16.msra.mxu0 %v904_v38  ;;  %v941_v63 = vld [vmem:[%s1131_s7 + $0xf4] ss:$8 sps:$4 sm:$0xff]   ;;  %v943_v0 = vld [vmem:[%s1131_s7 + $0xf0] ss:$8 sps:$4 sm:$0xff]   ;;  %s1207_s10 = smov (!%p379_p11, %s810_s10), 3  ;;  %v423_v4 = vsub.s32 0, %v422_v3 }
  0x37   : > { %607 = vmatprep.subr.bf16.mxu0 %v905_v39  ;;  %s381_s19 = scalar_lea.vmem %s1197_s2, %s1207_s10  ;;  %v427_v6 = vsub.s32 1, %v422_v3  ;;  %s809_s20 = sshll.u32 %s338_s30, 4 }
  0x38   : > { %v419_v5 = vld [vmem:[%s381_s19] sm:$0x3]  ;;  %s369_s23 = scalar_lea.vmem [#allocation3], %s809_s20  ;;  %s855_s24 = sshll.u32 (%p1042_p6), %s977_s14, 3 }
  0x39   : > { %v424_v7 = vrot.slane %v419_v5, %v423_v4  ;;  %v428_v8 = vrot.slane %v419_v5, %v427_v6  ;;  %s670_s26 = scalar_lea.vmem (%p1042_p6), %s1198_s3, %s855_s24 }
  0x3a   : > { %608 = vmatpush1.bf16.msra.mxu0 %v907_v40 }
  0x3b   : > { %609 = vmatprep.subr.bf16.mxu0 %v908_v41 }
  0x3e   : > { %610 = vmatpush1.bf16.msra.mxu0 %v910_v42 }
  0x3f   : > { %611 = vmatprep.subr.bf16.mxu0 %v911_v43 }
  0x42   : > { %612 = vmatpush1.bf16.msra.mxu0 %v913_v44 }
  0x43   : > { %613 = vmatprep.subr.bf16.mxu0 %v914_v45 }
  0x46   : > { %614 = vmatpush1.bf16.msra.mxu0 %v916_v46 }
  0x47   : > { %615 = vmatprep.subr.bf16.mxu0 %v917_v47 }
  0x4a   : > { %616 = vmatpush1.bf16.msra.mxu0 %v919_v48 }
  0x4b   : > { %617 = vmatprep.subr.bf16.mxu0 %v920_v49 }
  0x4e   : > { %618 = vmatpush1.bf16.msra.mxu0 %v922_v50 }
  0x4f   : > { %619 = vmatprep.subr.bf16.mxu0 %v923_v51 }
  0x52   : > { %620 = vmatpush1.bf16.msra.mxu0 %v925_v52 }
  0x53   : > { %621 = vmatprep.subr.bf16.mxu0 %v926_v53 }
  0x56   : > { %622 = vmatpush1.bf16.msra.mxu0 %v928_v54 }
  0x57   : > { %623 = vmatprep.subr.bf16.mxu0 %v929_v55 }
  0x5a   : > { %624 = vmatpush1.bf16.msra.mxu0 %v931_v56 }
  0x5b   : > { %625 = vmatprep.subr.bf16.mxu0 %v932_v57 }
  0x5e   : > { %626 = vmatpush1.bf16.msra.mxu0 %v934_v58 }
  0x5f   : > { %627 = vmatprep.subr.bf16.mxu0 %v935_v59 }
  0x62   : > { %628 = vmatpush1.bf16.msra.mxu0 %v937_v60 }
  0x63   : > { %629 = vmatprep.subr.bf16.mxu0 %v938_v61 }
  0x66   : > { %630 = vmatpush1.bf16.msra.mxu0 %v940_v62 }
  0x67   : > { %631 = vmatprep.subr.bf16.mxu0 %v941_v63 }
  0x6a   : > { %632 = vmatpush1.bf16.msra.mxu0 %v943_v0 }
  0x6d   : > { %634 = vmatmul.mubr.bf16.vlgmr.msra.gmra.mrb[0].mxu0 %v944_v1 }
 0x140   : > { %v635_v9 = vpop.f32.mrb[0].mxu0 }
 0x141   : > { %v636_v10 = vadd.f32 %v635_v9, %v424_v7  ;;  %v637_v11 = vpop.f32.mrb[1].mxu0 }
 0x142   : > { %v638_v12 = vadd.f32 %v637_v11, %v428_v8  ;;  %v639_v13 = vpop.f32.mrb[2].mxu0  ;;  %664 = sbr.rel (!%p1042_p6) target bundleno = 337 (0x151), region = 74 }
 0x143   : > { %v640_v14 = vadd.f32 %v639_v13, %v424_v7  ;;  %v641_v15 = vpop.f32.mrb[3].mxu0 }
 0x144   : > { %v853_v16 = vpack.c.bf16 %v638_v12, %v636_v10  ;;  %v642_v17 = vadd.f32 %v641_v15, %v428_v8 }
 0x146   : > { %656 = vst [vmem:[%s369_s23] sm:$0xff] %v853_v16  ;;  %v854_v18 = vpack.c.bf16 %v642_v17, %v640_v14 }
 0x148   : > { %657 = vst [vmem:[%s369_s23 + $0x8] sm:$0xff] %v854_v18 }
 0x14d   : > { %v700_v19 = vld [vmem:[%s369_s23] sm:$0xff] }
 0x14e   : > { %701 = vst [vmem:[%s670_s26] sm:$0xff] %v700_v19 }
 0x14f   : > { %v702_v20 = vld [vmem:[%s369_s23 + $0x8] sm:$0xff] }
 0x150   : > { %703 = vst [vmem:[%s670_s26 + $0x10] sm:$0xff] %v702_v20 }
 0x151 PF: > { %s13_s16 = sadd.s32 1, %s985_s16   ;;  %s1200_s12 = smov %s973_s13 }
 0x152   : > { %p10_p12 = scmp.ge.s32.totalorder %s13_s16, 4   ;;  %s1201_s13 = smov %s1047_s22 }
 0x153   : > { %s1202_s14 = smov %s981_s15  ;;  %s1203_s15 = smov %s1205_s17 }
 0x154   :  { %12 = sbr.rel (!%p10_p12) target bundleno = 3 (0x3), region = 149 }

// kernel: _lambda_.57
= control target key start
LH: loop header
LB: loop body
LE: loop exit
PB: predicated region body
PF: predicated region fallthrough
CT: control target
= control target key end

     0   :  { %s662_s1 = inlined_call_operand.vmem [shape: bf16[512,128], index: 1, kind: input, shape index: {}]   ;;  %s663_s0 = inlined_call_operand.vmem [shape: bf16[16,512], index: 0, kind: input, shape index: {}]   ;;  %s664_s2 = inlined_call_operand.vmem [shape: f32[1,128], index: 2, kind: input, shape index: {}]   ;;  %s665_s3 = inlined_call_operand.vmem [shape: bf16[16,128], index: 3, kind: output, shape index: {}]  }
   0x1   :  { %v490_v0 = vld [vmem:[%s662_s1 + $0x40] sm:$0xff]   ;;  %v494_v4 = vld [vmem:[%s662_s1 + $0x48] sm:$0xff]   ;;  %v498_v8 = vld [vmem:[%s662_s1 + $0x50] sm:$0xff]  }
   0x2   :  { %v491_v1 = vld [vmem:[%s662_s1 + $0xc0] sm:$0xff]   ;;  %446 = vmatprep.subr.bf16.mxu0 %v490_v0  ;;  %v495_v5 = vld [vmem:[%s662_s1 + $0xc8] sm:$0xff]   ;;  %v499_v9 = vld [vmem:[%s662_s1 + $0xd0] sm:$0xff]  }
   0x3   :  { %v492_v2 = vld [vmem:[%s662_s1] sm:$0xff]   ;;  %468 = vmatprep.subr.bf16.mxu1 %v491_v1  ;;  %v496_v6 = vld [vmem:[%s662_s1 + $0x8] sm:$0xff]   ;;  %v500_v10 = vld [vmem:[%s662_s1 + $0x10] sm:$0xff]  }
   0x4   :  { %v493_v3 = vld [vmem:[%s662_s1 + $0x80] sm:$0xff]   ;;  %447 = vmatpush3.bf16.msra.mxu0 %v492_v2  ;;  %v497_v7 = vld [vmem:[%s662_s1 + $0x88] sm:$0xff]   ;;  %v501_v11 = vld [vmem:[%s662_s1 + $0x90] sm:$0xff]  }
   0x5   :  { %469 = vmatpush3.bf16.msra.mxu1 %v493_v3  ;;  %448 = vmatprep.subr.bf16.mxu0 %v494_v4  ;;  %v502_v12 = vld [vmem:[%s662_s1 + $0x58] sm:$0xff]   ;;  %v506_v16 = vld [vmem:[%s662_s1 + $0x60] sm:$0xff]   ;;  %v510_v20 = vld [vmem:[%s662_s1 + $0x68] sm:$0xff]  }
   0x6   :  { %470 = vmatprep.subr.bf16.mxu1 %v495_v5  ;;  %v503_v13 = vld [vmem:[%s662_s1 + $0xd8] sm:$0xff]   ;;  %v507_v17 = vld [vmem:[%s662_s1 + $0xe0] sm:$0xff]   ;;  %v511_v21 = vld [vmem:[%s662_s1 + $0xe8] sm:$0xff]  }
   0x7   :  { %v504_v14 = vld [vmem:[%s662_s1 + $0x18] sm:$0xff]   ;;  %v508_v18 = vld [vmem:[%s662_s1 + $0x20] sm:$0xff]   ;;  %v512_v22 = vld [vmem:[%s662_s1 + $0x28] sm:$0xff]  }
   0x8   :  { %449 = vmatpush3.bf16.msra.mxu0 %v496_v6  ;;  %v505_v15 = vld [vmem:[%s662_s1 + $0x98] sm:$0xff]   ;;  %v509_v19 = vld [vmem:[%s662_s1 + $0xa0] sm:$0xff]   ;;  %v513_v23 = vld [vmem:[%s662_s1 + $0xa8] sm:$0xff]  }
   0x9   :  { %471 = vmatpush3.bf16.msra.mxu1 %v497_v7  ;;  %450 = vmatprep.subr.bf16.mxu0 %v498_v8  ;;  %v514_v24 = vld [vmem:[%s662_s1 + $0x70] sm:$0xff]   ;;  %v518_v28 = vld [vmem:[%s662_s1 + $0x78] sm:$0xff]   ;;  %v400_v38 = vld [vmem:[%s664_s2] ss:$0 sm:$0xff] }
   0xa   :  { %472 = vmatprep.subr.bf16.mxu1 %v499_v9  ;;  %v515_v25 = vld [vmem:[%s662_s1 + $0xf0] sm:$0xff]   ;;  %v519_v29 = vld [vmem:[%s662_s1 + $0xf8] sm:$0xff]  }
   0xb   :  { %v516_v26 = vld [vmem:[%s662_s1 + $0x30] sm:$0xff]   ;;  %v520_v30 = vld [vmem:[%s662_s1 + $0x38] sm:$0xff]  }
   0xc   :  { %451 = vmatpush3.bf16.msra.mxu0 %v500_v10  ;;  %v517_v27 = vld [vmem:[%s662_s1 + $0xb0] sm:$0xff]   ;;  %v521_v31 = vld [vmem:[%s662_s1 + $0xb8] sm:$0xff]  }
   0xd   :  { %473 = vmatpush3.bf16.msra.mxu1 %v501_v11  ;;  %452 = vmatprep.subr.bf16.mxu0 %v502_v12  ;;  %v522_v32 = vld [vmem:[%s663_s0] ss:$16 sps:$4 sm:$0xff]   ;;  %v524_v33 = vld [vmem:[%s663_s0 + $0x4] ss:$16 sps:$4 sm:$0xff]   ;;  %v525_v34 = vld [vmem:[%s663_s0 + $0x8] ss:$16 sps:$4 sm:$0xff]  }
   0xe   :  { %474 = vmatprep.subr.bf16.mxu1 %v503_v13  ;;  %v527_v35 = vld [vmem:[%s663_s0 + $0xc] ss:$16 sps:$4 sm:$0xff]   ;;  %334 = vmatprep.mubr.bf16.mxu0 %v524_v33 }
   0xf   :  { %375 = vmatprep.mubr.bf16.mxu1 %v527_v35 }
  0x10   :  { %453 = vmatpush3.bf16.msra.mxu0 %v504_v14 }
  0x11   :  { %475 = vmatpush3.bf16.msra.mxu1 %v505_v15  ;;  %454 = vmatprep.subr.bf16.mxu0 %v506_v16 }
  0x12   :  { %476 = vmatprep.subr.bf16.mxu1 %v507_v17 }
  0x14   :  { %455 = vmatpush3.bf16.msra.mxu0 %v508_v18 }
  0x15   :  { %477 = vmatpush3.bf16.msra.mxu1 %v509_v19  ;;  %456 = vmatprep.subr.bf16.mxu0 %v510_v20 }
  0x16   :  { %478 = vmatprep.subr.bf16.mxu1 %v511_v21 }
  0x18   :  { %457 = vmatpush3.bf16.msra.mxu0 %v512_v22 }
  0x19   :  { %479 = vmatpush3.bf16.msra.mxu1 %v513_v23  ;;  %458 = vmatprep.subr.bf16.mxu0 %v514_v24 }
  0x1a   :  { %480 = vmatprep.subr.bf16.mxu1 %v515_v25 }
  0x1c   :  { %459 = vmatpush3.bf16.msra.mxu0 %v516_v26 }
  0x1d   :  { %481 = vmatpush3.bf16.msra.mxu1 %v517_v27  ;;  %460 = vmatprep.subr.bf16.mxu0 %v518_v28 }
  0x1e   :  { %482 = vmatprep.subr.bf16.mxu1 %v519_v29 }
  0x20   :  { %461 = vmatpush3.bf16.msra.mxu0 %v520_v30 }
  0x21   :  { %483 = vmatpush3.bf16.msra.mxu1 %v521_v31 }
  0x23   :  { %335 = vmatmul.mubr.bf16.vlgmr.msra.gmra.mrb[0].mxu0 %v522_v32 }
  0x24   :  { %376 = vmatmul.mubr.bf16.vlgmr.msra.gmra.mrb[0].mxu1 %v525_v34 }
  0xf6   :  { %v462_v36 = vpop.f32.mrb[0].mxu0 }
  0xf7   :  { %v484_v37 = vpop.f32.mrb[0].mxu1  ;;  %v463_v39 = vpop.f32.mrb[1].mxu0 }
  0xf8   :  { %v464_v40 = vadd.f32 %v463_v39, %v462_v36  ;;  %v485_v41 = vpop.f32.mrb[1].mxu1  ;;  %v465_v42 = vpop.f32.mrb[2].mxu0 }
  0xf9   :  { %v486_v43 = vadd.f32 %v485_v41, %v484_v37  ;;  %v487_v44 = vpop.f32.mrb[2].mxu1  ;;  %v466_v45 = vpop.f32.mrb[3].mxu0 }
  0xfa   :  { %v337_v46 = vadd.f32 %v464_v40, %v400_v38  ;;  %v467_v47 = vadd.f32 %v466_v45, %v465_v42  ;;  %v488_v48 = vpop.f32.mrb[3].mxu1 }
  0xfb   :  { %v489_v49 = vadd.f32 %v488_v48, %v487_v44 }
  0xfc   :  { %v378_v50 = vadd.f32 %v486_v43, %v337_v46  ;;  %v340_v51 = vadd.f32 %v467_v47, %v400_v38 }
  0xfe   :  { %v381_v52 = vadd.f32 %v489_v49, %v340_v51  ;;  %v384_v53 = vmax.f32 %v378_v50, 0.0 }
 0x100   :  { %v385_v54 = vmax.f32 %v381_v52, 0.0 }
 0x102   :  { %v444_v55 = vpack.c.bf16 %v385_v54, %v384_v53 }
 0x104   :  { %445 = vst [vmem:[%s665_s3] sm:$0xff] %v444_v55  }

// kernel: _lambda_.56
= control target key start
LH: loop header
LB: loop body
LE: loop exit
PB: predicated region body
PF: predicated region fallthrough
CT: control target
= control target key end

     0   :  { %s938_s15 = smov 0   ;;  %s940_s16 = smov 0   ;;  %s1056_s0 = inlined_call_operand.vmem [shape: bf16[16,128], index: 0, kind: input, shape index: {}]   ;;  %s1057_s1 = inlined_call_operand.vmem [shape: bf16[128,512], index: 1, kind: input, shape index: {}]   ;;  %s1058_s2 = inlined_call_operand.vmem [shape: f32[1,512], index: 2, kind: input, shape index: {}]   ;;  %s1059_s3 = inlined_call_operand.vmem [shape: bf16[16,512], index: 3, kind: input, shape index: {}]   ;;  %s1060_s4 = inlined_call_operand.vmem [shape: bf16[16,512], index: 4, kind: output, shape index: {}]  }
   0x1   :  { %s942_s17 = smov 0   ;;  %s944_s18 = smov 0  }
   0x2   :  { %s946_s19 = smov 0  }
   0x3 LB: > { %s23_s20 = sadd.s32 1, %s906_s18  ;;  %s761_s21 = sadd.s32 4294967295, %s910_s19   ;;  %s910_s19 = sphi %s946_s19, %s14_s19   ;;  %s906_s18 = sphi %s944_s18, %s1066_s18   ;;  %s902_s17 = sphi %s942_s17, %s1065_s17   ;;  %s898_s16 = sphi %s940_s16, %s1064_s16   ;;  %s894_s15 = sphi %s938_s15, %s1063_s15  }
   0x4   : > { %p24_p0 = scmp.ge.s32.totalorder %s23_s20, 2  ;;  %p66_p1 = scmp.ne.s32.totalorder %s898_s16, %s894_s15 }
   0x5   : > { %p67_p2 = scmp.eq.s32.totalorder %s910_s19, 0  ;;  %p152_p4 = scmp.eq.s32.totalorder %s761_s21, 1 }
   0x6   : > { %s1068_s20 = smov (%p24_p0, %s23_s20), 0  ;;  %s59_s24 = sadd.s32 1, %s898_s16 }
   0x7   : > { %p970_p3 = por %p67_p2, %p66_p1  ;;  %s56_s23 = ssub.s32 %s906_s18, %s1068_s20 }
   0x8   : > { %p57_p5 = scmp.eq.s32.totalorder %s56_s23, 0  ;;  %p977_p6 = por %p152_p4, %p66_p1 }
   0x9   : > { %p765_p7 = scmp.ge.s32.totalorder %s910_s19, 2 }
   0xa   : > { %s982_s26 = scalar_select %p57_p5, %s898_s16, %s59_s24  }
   0xb   : > { %183 = sbr.rel (%p765_p7) target bundleno = 37 (0x25), region = 20 }
  0x12   : > { %186 = sbr.rel (!%p970_p3) target bundleno = 30 (0x1e), region = 24  ;;  %s188_s27 = sand.u32 (%p970_p3), 1, %s898_s16  }
  0x13   : > { %s801_s28 = sshll.u32 (%p970_p3), %s906_s18, 3  ;;  %s766_s29 = sshll.u32 (%p970_p3), %s188_s27, 7 }
  0x14   : > { %s992_s6 = scalar_lea.vmem (%p970_p3), %s1057_s1, %s801_s28  ;;  %s190_s7 = scalar_lea.vmem (%p970_p3), [#allocation2], %s766_s29 }
  0x15   : > { %v251_v0 = vld [vmem:[%s992_s6] sm:$0xff] (%p970_p3)  ;;  %v253_v1 = vld [vmem:[%s992_s6 + $0x10] sm:$0xff] (%p970_p3) }
  0x16   : > { %v255_v2 = vld [vmem:[%s992_s6 + $0x20] sm:$0xff] (%p970_p3)  ;;  %252 = vst [vmem:[%s190_s7] sm:$0xff] (%p970_p3), %v251_v0  ;;  %254 = vst [vmem:[%s190_s7 + $0x8] sm:$0xff] (%p970_p3), %v253_v1  ;;  %v257_v3 = vld [vmem:[%s992_s6 + $0x30] sm:$0xff] (%p970_p3) }
  0x17   : > { %256 = vst [vmem:[%s190_s7 + $0x10] sm:$0xff] (%p970_p3), %v255_v2  ;;  %v259_v4 = vld [vmem:[%s992_s6 + $0x40] sm:$0xff] (%p970_p3)  ;;  %v261_v5 = vld [vmem:[%s992_s6 + $0x50] sm:$0xff] (%p970_p3)  ;;  %258 = vst [vmem:[%s190_s7 + $0x18] sm:$0xff] (%p970_p3), %v257_v3 }
  0x18   : > { %260 = vst [vmem:[%s190_s7 + $0x20] sm:$0xff] (%p970_p3), %v259_v4  ;;  %262 = vst [vmem:[%s190_s7 + $0x28] sm:$0xff] (%p970_p3), %v261_v5  ;;  %v263_v6 = vld [vmem:[%s992_s6 + $0x60] sm:$0xff] (%p970_p3)  ;;  %v265_v7 = vld [vmem:[%s992_s6 + $0x70] sm:$0xff] (%p970_p3) }
  0x19   : > { %v267_v8 = vld [vmem:[%s992_s6 + $0x80] sm:$0xff]  ;;  %264 = vst [vmem:[%s190_s7 + $0x30] sm:$0xff] %v263_v6  ;;  %266 = vst [vmem:[%s190_s7 + $0x38] sm:$0xff] %v265_v7  ;;  %v269_v9 = vld [vmem:[%s992_s6 + $0x90] sm:$0xff] }
  0x1a   : > { %268 = vst [vmem:[%s190_s7 + $0x40] sm:$0xff] %v267_v8  ;;  %v271_v10 = vld [vmem:[%s992_s6 + $0xa0] sm:$0xff]  ;;  %v273_v11 = vld [vmem:[%s992_s6 + $0xb0] sm:$0xff]  ;;  %270 = vst [vmem:[%s190_s7 + $0x48] sm:$0xff] %v269_v9 }
  0x1b   : > { %272 = vst [vmem:[%s190_s7 + $0x50] sm:$0xff] %v271_v10  ;;  %274 = vst [vmem:[%s190_s7 + $0x58] sm:$0xff] %v273_v11  ;;  %v275_v12 = vld [vmem:[%s992_s6 + $0xc0] sm:$0xff]  ;;  %v277_v13 = vld [vmem:[%s992_s6 + $0xd0] sm:$0xff] }
  0x1c   : > { %v279_v14 = vld [vmem:[%s992_s6 + $0xe0] sm:$0xff]  ;;  %276 = vst [vmem:[%s190_s7 + $0x60] sm:$0xff] %v275_v12  ;;  %278 = vst [vmem:[%s190_s7 + $0x68] sm:$0xff] %v277_v13  ;;  %v281_v15 = vld [vmem:[%s992_s6 + $0xf0] sm:$0xff] }
  0x1d   : > { %280 = vst [vmem:[%s190_s7 + $0x70] sm:$0xff] %v279_v14  ;;  %282 = vst [vmem:[%s190_s7 + $0x78] sm:$0xff] %v281_v15 }
  0x1e PF: > { %296 = sbr.rel (!%p970_p3) target bundleno = 37 (0x25), region = 66  ;;  %s298_s8 = sand.u32 (%p970_p3), 1, %s898_s16  }
  0x1f   : > { %s802_s9 = sshll.u32 (%p970_p3), %s906_s18, 3  ;;  %s769_s10 = sshll.u32 (%p970_p3), %s298_s8, 4 }
  0x20   : > { %s306_s13 = scalar_lea.vmem (%p970_p3), %s1059_s3, %s802_s9  ;;  %s300_s14 = scalar_lea.vmem (%p970_p3), [#allocation3], %s769_s10 }
  0x21   : > { %v336_v16 = vld [vmem:[%s306_s13] sm:$0xff] (%p970_p3)  ;;  %v338_v17 = vld [vmem:[%s306_s13 + $0x10] sm:$0xff] (%p970_p3) }
  0x22   : > { %337 = vst [vmem:[%s300_s14] sm:$0xff] (%p970_p3), %v336_v16  ;;  %339 = vst [vmem:[%s300_s14 + $0x8] sm:$0xff] (%p970_p3), %v338_v17 }
  0x25 PF: > { %p772_p8 = scmp.ge.s32.totalorder %s910_s19, 1  ;;  %p344_p9 = scmp.lt.s32.totalorder %s910_s19, 3 }
  0x27   : > { %p345_p10 = pnand %p772_p8, %p344_p9 }
  0x28   : > { %s351_s21 = sand.u32 (!%p345_p10), 1, %s894_s15   ;;  %v912_v18 = vmov (!%p345_p10), 0   ;;  %v871_v35 = vld [vmem:[%s1056_s0] sm:$0xff] (!%p345_p10)   ;;  %s776_s28 = sshll.u32 (!%p345_p10), %s902_s17, 1  ;;  %v432_v36 = vlaneseq (!%p345_p10) }
  0x29   : > { %348 = sbr.rel (%p345_p10) target bundleno = 308 (0x134), region = 104  ;;  %s773_s22 = sshll.u32 (!%p345_p10), %s351_s21, 7  ;;  %560 = vmatprep.mubr.bf16.mxu0 (!%p345_p10), %v912_v18 }
  0x2a   : > { %s353_s23 = scalar_lea.vmem (!%p345_p10), [#allocation2], %s773_s22  ;;  %p403_p11 = scmp.lt.s32.totalorder (!%p345_p10), %s776_s28, 3  ;;  %v433_v37 = vshrl.u32 (!%p345_p10), %v432_v36, 7 }
  0x2b   : > { %v847_v19 = vld [vmem:[%s353_s23 + $0x4] ss:$8 sps:$4 sm:$0xff] (!%p345_p10)   ;;  %v849_v20 = vld [vmem:[%s353_s23] ss:$8 sps:$4 sm:$0xff] (!%p345_p10)   ;;  %v850_v21 = vld [vmem:[%s353_s23 + $0x14] ss:$8 sps:$4 sm:$0xff] (!%p345_p10)  }
  0x2c   : > { %528 = vmatprep.subr.bf16.mxu0 (!%p345_p10), %v847_v19  ;;  %v852_v22 = vld [vmem:[%s353_s23 + $0x10] ss:$8 sps:$4 sm:$0xff] (!%p345_p10)   ;;  %v853_v23 = vld [vmem:[%s353_s23 + $0x24] ss:$8 sps:$4 sm:$0xff] (!%p345_p10)   ;;  %v855_v24 = vld [vmem:[%s353_s23 + $0x20] ss:$8 sps:$4 sm:$0xff] (!%p345_p10)  }
  0x2d   : > { %529 = vmatpush1.bf16.msra.mxu0 (!%p345_p10), %v849_v20  ;;  %v856_v25 = vld [vmem:[%s353_s23 + $0x34] ss:$8 sps:$4 sm:$0xff] (!%p345_p10)   ;;  %v858_v26 = vld [vmem:[%s353_s23 + $0x30] ss:$8 sps:$4 sm:$0xff] (!%p345_p10)   ;;  %v859_v27 = vld [vmem:[%s353_s23 + $0x44] ss:$8 sps:$4 sm:$0xff] (!%p345_p10)  }
  0x2e   : > { %530 = vmatprep.subr.bf16.mxu0 (!%p345_p10), %v850_v21  ;;  %v861_v28 = vld [vmem:[%s353_s23 + $0x40] ss:$8 sps:$4 sm:$0xff] (!%p345_p10)   ;;  %v862_v29 = vld [vmem:[%s353_s23 + $0x54] ss:$8 sps:$4 sm:$0xff] (!%p345_p10)   ;;  %v864_v30 = vld [vmem:[%s353_s23 + $0x50] ss:$8 sps:$4 sm:$0xff] (!%p345_p10)  }
  0x2f   : > { %v865_v31 = vld [vmem:[%s353_s23 + $0x64] ss:$8 sps:$4 sm:$0xff] (!%p345_p10)   ;;  %v867_v32 = vld [vmem:[%s353_s23 + $0x60] ss:$8 sps:$4 sm:$0xff] (!%p345_p10)   ;;  %v868_v33 = vld [vmem:[%s353_s23 + $0x74] ss:$8 sps:$4 sm:$0xff] (!%p345_p10)  }
  0x30   : > { %v870_v34 = vld [vmem:[%s353_s23 + $0x70] ss:$8 sps:$4 sm:$0xff]   ;;  %s1070_s28 = smov (!%p403_p11, %s776_s28), 3  ;;  %s1028_s29 = sshll.u32 %s351_s21, 4  ;;  %v434_v38 = vsub.s32 0, %v433_v37  ;;  %v438_v40 = vsub.s32 1, %v433_v37 }
  0x31   : > { %531 = vmatpush1.bf16.msra.mxu0 %v852_v22  ;;  %s405_s6 = scalar_lea.vmem %s1058_s2, %s1070_s28  ;;  %s360_s7 = scalar_lea.vmem [#allocation3], %s1028_s29 }
  0x32   : > { %532 = vmatprep.subr.bf16.mxu0 %v853_v23  ;;  %v430_v39 = vld [vmem:[%s405_s6] sm:$0x3]  ;;  %v572_v44 = vld [vmem:[%s360_s7 + $0x8] sm:$0xff]  ;;  %s394_s15 = scalar_lea.vmem [#allocation4], %s1028_s29  ;;  %s805_s8 = sshll.u32 (%p977_p6), %s902_s17, 3 }
  0x33   : > { %v571_v41 = vld [vmem:[%s360_s7] sm:$0xff]  ;;  %v435_v42 = vrot.slane %v430_v39, %v434_v38  ;;  %v439_v43 = vrot.slane %v430_v39, %v438_v40  ;;  %v575_v50 = vunpack.c.l.bf16 %v572_v44  ;;  %v576_v53 = vunpack.c.h.bf16 %v572_v44  ;;  %s611_s11 = scalar_lea.vmem (%p977_p6), %s1060_s4, %s805_s8 }
  0x34   : > { %v573_v45 = vunpack.c.l.bf16 %v571_v41  ;;  %v574_v47 = vunpack.c.h.bf16 %v571_v41 }
  0x35   : > { %533 = vmatpush1.bf16.msra.mxu0 %v855_v24 }
  0x36   : > { %534 = vmatprep.subr.bf16.mxu0 %v856_v25 }
  0x39   : > { %535 = vmatpush1.bf16.msra.mxu0 %v858_v26 }
  0x3a   : > { %536 = vmatprep.subr.bf16.mxu0 %v859_v27 }
  0x3d   : > { %537 = vmatpush1.bf16.msra.mxu0 %v861_v28 }
  0x3e   : > { %538 = vmatprep.subr.bf16.mxu0 %v862_v29 }
  0x41   : > { %539 = vmatpush1.bf16.msra.mxu0 %v864_v30 }
  0x42   : > { %540 = vmatprep.subr.bf16.mxu0 %v865_v31 }
  0x45   : > { %541 = vmatpush1.bf16.msra.mxu0 %v867_v32 }
  0x46   : > { %542 = vmatprep.subr.bf16.mxu0 %v868_v33 }
  0x49   : > { %543 = vmatpush1.bf16.msra.mxu0 %v870_v34 }
  0x4c   : > { %561 = vmatmul.mubr.bf16.vlgmr.msra.gmra.mrb[0].mxu0 %v871_v35 }
 0x11f   : > { %v562_v46 = vpop.f32.mrb[0].mxu0 }
 0x120   : > { %v563_v48 = vadd.f32 %v562_v46, %v435_v42  ;;  %v564_v49 = vpop.f32.mrb[1].mxu0 }
 0x121   : > { %v565_v51 = vadd.f32 %v564_v49, %v439_v43  ;;  %v566_v52 = vpop.f32.mrb[2].mxu0 }
 0x122   : > { %v577_v54 = vadd.f32 %v573_v45, %v563_v48  ;;  %v567_v55 = vadd.f32 %v566_v52, %v435_v42  ;;  %v568_v56 = vpop.f32.mrb[3].mxu0 }
 0x123   : > { %v578_v57 = vadd.f32 %v574_v47, %v565_v51  ;;  %v569_v58 = vadd.f32 %v568_v56, %v439_v43 }
 0x124   : > { %v581_v59 = vmax.f32 %v577_v54, 0.0  ;;  %v579_v60 = vadd.f32 %v575_v50, %v567_v55 }
 0x125   : > { %v582_v61 = vmax.f32 %v578_v57, 0.0  ;;  %v580_v62 = vadd.f32 %v576_v53, %v569_v58  ;;  %605 = sbr.rel (!%p977_p6) target bundleno = 308 (0x134), region = 116 }
 0x126   : > { %v583_v63 = vmax.f32 %v579_v60, 0.0 }
 0x127   : > { %v803_v0 = vpack.c.bf16 %v582_v61, %v581_v59  ;;  %v584_v1 = vmax.f32 %v580_v62, 0.0 }
 0x129   : > { %597 = vst [vmem:[%s394_s15] sm:$0xff] %v803_v0  ;;  %v804_v2 = vpack.c.bf16 %v584_v1, %v583_v63 }
 0x12b   : > { %598 = vst [vmem:[%s394_s15 + $0x8] sm:$0xff] %v804_v2 }
 0x130   : > { %v641_v3 = vld [vmem:[%s394_s15] sm:$0xff] }
 0x131   : > { %642 = vst [vmem:[%s611_s11] sm:$0xff] %v641_v3 }
 0x132   : > { %v643_v4 = vld [vmem:[%s394_s15 + $0x8] sm:$0xff] }
 0x133   : > { %644 = vst [vmem:[%s611_s11 + $0x10] sm:$0xff] %v643_v4 }
 0x134 PF: > { %s14_s19 = sadd.s32 1, %s910_s19   ;;  %s1063_s15 = smov %s898_s16 }
 0x135   : > { %p11_p12 = scmp.ge.s32.totalorder %s14_s19, 4   ;;  %s1064_s16 = smov %s982_s26 }
 0x136   : > { %s1065_s17 = smov %s906_s18  ;;  %s1066_s18 = smov %s1068_s20 }
 0x137   :  { %13 = sbr.rel (!%p11_p12) target bundleno = 3 (0x3), region = 199 }

// kernel: _lambda_.54
= control target key start
LH: loop header
LB: loop body
LE: loop exit
PB: predicated region body
PF: predicated region fallthrough
CT: control target
= control target key end

     0   :  { %vm1171_vm0 = vmmov 0   ;;  %s1441_s1 = inlined_call_operand.vmem [shape: bf16[1152,128], index: 1, kind: input, shape index: {}]   ;;  %s1442_s0 = inlined_call_operand.vmem [shape: bf16[16,1152], index: 0, kind: input, shape index: {}]   ;;  %s1443_s2 = inlined_call_operand.vmem [shape: f32[1,128], index: 2, kind: input, shape index: {}]   ;;  %s1444_s3 = inlined_call_operand.vmem [shape: bf16[16,128], index: 3, kind: output, shape index: {}]  }
   0x1   :  { %v1085_v0 = vld [vmem:[%s1441_s1 + $0x40] sm:$0xff]   ;;  %v1089_v4 = vld [vmem:[%s1441_s1 + $0x48] sm:$0xff]   ;;  %v1093_v8 = vld [vmem:[%s1441_s1 + $0x50] sm:$0xff]  }
   0x2   :  { %v1086_v1 = vld [vmem:[%s1441_s1] sm:$0xff]   ;;  %966 = vmatprep.subr.bf16.mxu0 %v1085_v0  ;;  %v1090_v5 = vld [vmem:[%s1441_s1 + $0x8] sm:$0xff]   ;;  %v1094_v9 = vld [vmem:[%s1441_s1 + $0x10] sm:$0xff]  }
   0x3   :  { %v1087_v2 = vld [vmem:[%s1441_s1 + $0xc0] sm:$0xff]   ;;  %967 = vmatpush3.bf16.msra.mxu0 %v1086_v1  ;;  %v1091_v6 = vld [vmem:[%s1441_s1 + $0xc8] sm:$0xff]   ;;  %v1095_v10 = vld [vmem:[%s1441_s1 + $0xd0] sm:$0xff]  }
   0x4   :  { %v1088_v3 = vld [vmem:[%s1441_s1 + $0x80] sm:$0xff]   ;;  %988 = vmatprep.subr.bf16.mxu1 %v1087_v2  ;;  %968 = vmatprep.subr.bf16.mxu0 %v1089_v4  ;;  %v1092_v7 = vld [vmem:[%s1441_s1 + $0x88] sm:$0xff]   ;;  %v1096_v11 = vld [vmem:[%s1441_s1 + $0x90] sm:$0xff]  }
   0x5   :  { %989 = vmatpush3.bf16.msra.mxu1 %v1088_v3  ;;  %v1097_v12 = vld [vmem:[%s1441_s1 + $0x58] sm:$0xff]   ;;  %v1101_v16 = vld [vmem:[%s1441_s1 + $0x60] sm:$0xff]   ;;  %v1105_v20 = vld [vmem:[%s1441_s1 + $0x68] sm:$0xff]  }
   0x6   :  { %990 = vmatprep.subr.bf16.mxu1 %v1091_v6  ;;  %v1098_v13 = vld [vmem:[%s1441_s1 + $0x18] sm:$0xff]   ;;  %v1102_v17 = vld [vmem:[%s1441_s1 + $0x20] sm:$0xff]   ;;  %v1106_v21 = vld [vmem:[%s1441_s1 + $0x28] sm:$0xff]   ;;  %v1170_v6 = vmov 0.0  }
   0x7   :  { %969 = vmatpush3.bf16.msra.mxu0 %v1090_v5  ;;  %v1099_v14 = vld [vmem:[%s1441_s1 + $0xd8] sm:$0xff]   ;;  %v1103_v18 = vld [vmem:[%s1441_s1 + $0xe0] sm:$0xff]   ;;  %v1107_v22 = vld [vmem:[%s1441_s1 + $0xe8] sm:$0xff]  }
   0x8   :  { %970 = vmatprep.subr.bf16.mxu0 %v1093_v8  ;;  %v1100_v15 = vld [vmem:[%s1441_s1 + $0x98] sm:$0xff]   ;;  %v1104_v19 = vld [vmem:[%s1441_s1 + $0xa0] sm:$0xff]   ;;  %v1108_v23 = vld [vmem:[%s1441_s1 + $0xa8] sm:$0xff]  }
   0x9   :  { %991 = vmatpush3.bf16.msra.mxu1 %v1092_v7  ;;  %v1109_v24 = vld [vmem:[%s1441_s1 + $0x70] sm:$0xff]   ;;  %v1113_v28 = vld [vmem:[%s1441_s1 + $0x78] sm:$0xff]   ;;  %v1116_v31 = vld [vmem:[%s1442_s0] ss:$36 sps:$4 sm:$0xff]  }
   0xa   :  { %992 = vmatprep.subr.bf16.mxu1 %v1095_v10  ;;  %v1110_v25 = vld [vmem:[%s1441_s1 + $0x30] sm:$0xff]   ;;  %v1114_v29 = vld [vmem:[%s1441_s1 + $0x38] sm:$0xff]   ;;  %v1118_v32 = vld [vmem:[%s1442_s0 + $0x4] ss:$36 sps:$4 sm:$0xff]  }
   0xb   :  { %971 = vmatpush3.bf16.msra.mxu0 %v1094_v9  ;;  %v1111_v26 = vld [vmem:[%s1441_s1 + $0xf0] sm:$0xff]   ;;  %v1115_v30 = vld [vmem:[%s1441_s1 + $0xf8] sm:$0xff]   ;;  %686 = vmatprep.mubr.bf16.mxu0 %v1118_v32  ;;  %v1120_v34 = vld [vmem:[%s1441_s1 + $0x140] sm:$0xff]  }
   0xc   :  { %972 = vmatprep.subr.bf16.mxu0 %v1097_v12  ;;  %v1112_v27 = vld [vmem:[%s1441_s1 + $0xb0] sm:$0xff]   ;;  %v1119_v33 = vld [vmem:[%s1441_s1 + $0xb8] sm:$0xff]   ;;  %v1121_v35 = vld [vmem:[%s1442_s0 + $0x8] ss:$36 sps:$4 sm:$0xff]  }
   0xd   :  { %993 = vmatpush3.bf16.msra.mxu1 %v1096_v11  ;;  %v1123_v36 = vld [vmem:[%s1442_s0 + $0xc] ss:$36 sps:$4 sm:$0xff]   ;;  %v1124_v37 = vld [vmem:[%s1441_s1 + $0x100] sm:$0xff]   ;;  %v1135_v48 = vld [vmem:[%s1441_s1 + $0x158] sm:$0xff]  }
   0xe   :  { %994 = vmatprep.subr.bf16.mxu1 %v1099_v14  ;;  %727 = vmatprep.mubr.bf16.mxu1 %v1123_v36  ;;  %v1125_v38 = vld [vmem:[%s1441_s1 + $0x1c0] sm:$0xff]   ;;  %v1127_v40 = vld [vmem:[%s1441_s1 + $0x148] sm:$0xff]   ;;  %v1131_v44 = vld [vmem:[%s1441_s1 + $0x150] sm:$0xff]  }
   0xf   :  { %973 = vmatpush3.bf16.msra.mxu0 %v1098_v13  ;;  %v1126_v39 = vld [vmem:[%s1441_s1 + $0x180] sm:$0xff]   ;;  %v1128_v41 = vld [vmem:[%s1441_s1 + $0x108] sm:$0xff]   ;;  %v1132_v45 = vld [vmem:[%s1441_s1 + $0x110] sm:$0xff]  }
  0x10   :  { %974 = vmatprep.subr.bf16.mxu0 %v1101_v16  ;;  %v1129_v42 = vld [vmem:[%s1441_s1 + $0x1c8] sm:$0xff]   ;;  %v1133_v46 = vld [vmem:[%s1441_s1 + $0x1d0] sm:$0xff]   ;;  %v1136_v49 = vld [vmem:[%s1441_s1 + $0x118] sm:$0xff]  }
  0x11   :  { %995 = vmatpush3.bf16.msra.mxu1 %v1100_v15  ;;  %v1130_v43 = vld [vmem:[%s1441_s1 + $0x188] sm:$0xff]   ;;  %v1134_v47 = vld [vmem:[%s1441_s1 + $0x190] sm:$0xff]   ;;  %v1137_v50 = vld [vmem:[%s1441_s1 + $0x1d8] sm:$0xff]  }
  0x12   :  { %996 = vmatprep.subr.bf16.mxu1 %v1103_v18  ;;  %v1138_v51 = vld [vmem:[%s1441_s1 + $0x198] sm:$0xff]   ;;  %v1139_v52 = vld [vmem:[%s1441_s1 + $0x160] sm:$0xff]   ;;  %v1143_v56 = vld [vmem:[%s1441_s1 + $0x168] sm:$0xff]  }
  0x13   :  { %975 = vmatpush3.bf16.msra.mxu0 %v1102_v17  ;;  %v1140_v53 = vld [vmem:[%s1441_s1 + $0x120] sm:$0xff]   ;;  %v1144_v57 = vld [vmem:[%s1441_s1 + $0x128] sm:$0xff]   ;;  %v1147_v60 = vld [vmem:[%s1441_s1 + $0x170] sm:$0xff]  }
  0x14   :  { %976 = vmatprep.subr.bf16.mxu0 %v1105_v20  ;;  %v1141_v54 = vld [vmem:[%s1441_s1 + $0x1e0] sm:$0xff]   ;;  %v1145_v58 = vld [vmem:[%s1441_s1 + $0x1e8] sm:$0xff]   ;;  %v1148_v61 = vld [vmem:[%s1441_s1 + $0x130] sm:$0xff]  }
  0x15   :  { %997 = vmatpush3.bf16.msra.mxu1 %v1104_v19  ;;  %v1142_v55 = vld [vmem:[%s1441_s1 + $0x1a0] sm:$0xff]   ;;  %v1146_v59 = vld [vmem:[%s1441_s1 + $0x1a8] sm:$0xff]   ;;  %v1149_v62 = vld [vmem:[%s1441_s1 + $0x1f0] sm:$0xff]  }
  0x16   :  { %998 = vmatprep.subr.bf16.mxu1 %v1107_v22  ;;  %v1150_v63 = vld [vmem:[%s1441_s1 + $0x1b0] sm:$0xff]   ;;  %v1151_v0 = vld [vmem:[%s1441_s1 + $0x178] sm:$0xff]   ;;  %v1161_v9 = vld [vmem:[%s1441_s1 + $0x200] sm:$0xff]  }
  0x17   :  { %977 = vmatpush3.bf16.msra.mxu0 %v1106_v21  ;;  %v1152_v1 = vld [vmem:[%s1441_s1 + $0x138] sm:$0xff]   ;;  %v1154_v3 = vld [vmem:[%s1442_s0 + $0x10] ss:$36 sps:$4 sm:$0xff]   ;;  %v1162_v10 = vld [vmem:[%s1441_s1 + $0x208] sm:$0xff]  }
  0x18   :  { %978 = vmatprep.subr.bf16.mxu0 %v1109_v24  ;;  %v1153_v2 = vld [vmem:[%s1441_s1 + $0x1f8] sm:$0xff]   ;;  %v1163_v11 = vld [vmem:[%s1441_s1 + $0x210] sm:$0xff]   ;;  %v1165_v13 = vld [vmem:[%s1441_s1 + $0x220] sm:$0xff]  }
  0x19   :  { %999 = vmatpush3.bf16.msra.mxu1 %v1108_v23  ;;  %v1156_v4 = vld [vmem:[%s1442_s0 + $0x14] ss:$36 sps:$4 sm:$0xff]   ;;  %v1160_v8 = vld [vmem:[%s1442_s0 + $0x1c] ss:$36 sps:$4 sm:$0xff]   ;;  %v1166_v14 = vld [vmem:[%s1441_s1 + $0x228] sm:$0xff]  }
  0x1a   :  { %1000 = vmatprep.subr.bf16.mxu1 %v1111_v26  ;;  %v1157_v5 = vld [vmem:[%s1441_s1 + $0x1b8] sm:$0xff]   ;;  %v1167_v15 = vld [vmem:[%s1441_s1 + $0x230] sm:$0xff]   ;;  %v1169_v17 = vld [vmem:[%s1442_s0 + $0x20] ss:$36 sps:$4 sm:$0xff]  }
  0x1b   :  { %979 = vmatpush3.bf16.msra.mxu0 %v1110_v25  ;;  %v1158_v7 = vld [vmem:[%s1442_s0 + $0x18] ss:$36 sps:$4 sm:$0xff]   ;;  %v875_v19 = vld [vmem:[%s1443_s2] ss:$0 sm:$0xff] }
  0x1c   :  { %980 = vmatprep.subr.bf16.mxu0 %v1113_v28  ;;  %v1164_v12 = vld [vmem:[%s1441_s1 + $0x218] sm:$0xff]  }
  0x1d   :  { %1001 = vmatpush3.bf16.msra.mxu1 %v1112_v27  ;;  %v1168_v16 = vld [vmem:[%s1441_s1 + $0x238] sm:$0xff]  }
  0x1e   :  { %1002 = vmatprep.subr.bf16.mxu1 %v1115_v30 }
  0x1f   :  { %981 = vmatpush3.bf16.msra.mxu0 %v1114_v29 }
  0x20   :  { %1010 = vmatprep.subr.bf16.mxu0 %v1120_v34 }
  0x21   :  { %1003 = vmatpush3.bf16.msra.mxu1 %v1119_v33 }
  0x22   :  { %687 = vmatmul.mubr.bf16.vlgmr.msra.gmra.mrb[0].mxu0 %v1116_v31  ;;  %1032 = vmatprep.subr.bf16.mxu1 %v1125_v38 }
  0x23   :  { %1011 = vmatpush3.bf16.msra.mxu0 %v1124_v37  ;;  %768 = vmatprep.mubr.bf16.mxu0 %v1156_v4 }
  0x24   :  { %728 = vmatmul.mubr.bf16.vlgmr.msra.gmra.mrb[0].mxu1 %v1121_v35  ;;  %1012 = vmatprep.subr.bf16.mxu0 %v1127_v40 }
  0x25   :  { %1033 = vmatpush3.bf16.msra.mxu1 %v1126_v39  ;;  %809 = vmatprep.mubr.bf16.mxu1 %v1160_v8 }
  0x26   :  { %1034 = vmatprep.subr.bf16.mxu1 %v1129_v42 }
  0x27   :  { %1013 = vmatpush3.bf16.msra.mxu0 %v1128_v41 }
  0x28   :  { %1014 = vmatprep.subr.bf16.mxu0 %v1131_v44 }
  0x29   :  { %1035 = vmatpush3.bf16.msra.mxu1 %v1130_v43 }
  0x2a   :  { %1036 = vmatprep.subr.bf16.mxu1 %v1133_v46 }
  0x2b   :  { %1015 = vmatpush3.bf16.msra.mxu0 %v1132_v45 }
  0x2c   :  { %1016 = vmatprep.subr.bf16.mxu0 %v1135_v48 }
  0x2d   :  { %1037 = vmatpush3.bf16.msra.mxu1 %v1134_v47 }
  0x2e   :  { %1038 = vmatprep.subr.bf16.mxu1 %v1137_v50 }
  0x2f   :  { %1017 = vmatpush3.bf16.msra.mxu0 %v1136_v49 }
  0x30   :  { %1018 = vmatprep.subr.bf16.mxu0 %v1139_v52 }
  0x31   :  { %1039 = vmatpush3.bf16.msra.mxu1 %v1138_v51 }
  0x32   :  { %1040 = vmatprep.subr.bf16.mxu1 %v1141_v54 }
  0x33   :  { %1019 = vmatpush3.bf16.msra.mxu0 %v1140_v53 }
  0x34   :  { %1020 = vmatprep.subr.bf16.mxu0 %v1143_v56 }
  0x35   :  { %1041 = vmatpush3.bf16.msra.mxu1 %v1142_v55 }
  0x36   :  { %1042 = vmatprep.subr.bf16.mxu1 %v1145_v58 }
  0x37   :  { %1021 = vmatpush3.bf16.msra.mxu0 %v1144_v57 }
  0x38   :  { %1022 = vmatprep.subr.bf16.mxu0 %v1147_v60 }
  0x39   :  { %1043 = vmatpush3.bf16.msra.mxu1 %v1146_v59 }
  0x3a   :  { %1044 = vmatprep.subr.bf16.mxu1 %v1149_v62 }
  0x3b   :  { %1023 = vmatpush3.bf16.msra.mxu0 %v1148_v61 }
  0x3c   :  { %1024 = vmatprep.subr.bf16.mxu0 %v1151_v0 }
  0x3d   :  { %1045 = vmatpush3.bf16.msra.mxu1 %v1150_v63 }
  0x3e   :  { %1046 = vmatprep.subr.bf16.mxu1 %v1153_v2 }
  0x3f   :  { %1025 = vmatpush3.bf16.msra.mxu0 %v1152_v1 }
  0x40   :  { %1063 = vmatprep.subr.bf16.mxu0 %v1170_v6 }
  0x41   :  { %1047 = vmatpush3.bf16.msra.mxu1 %v1157_v5 }
  0x42   :  { %769 = vmatmul.mubr.bf16.vlgmr.msra.gmra.mrb[4].mxu0 %v1154_v3 }
  0x43   :  { %1079 = vmatprep.mubr.msk.bf16.mxu0 %vm1171_vm0, %v1170_v6  ;;  %1064 = vmatpush3.bf16.msra.mxu0 %v1161_v9 }
  0x44   :  { %810 = vmatmul.mubr.bf16.vlgmr.msra.gmra.mrb[4].mxu1 %v1158_v7  ;;  %1065 = vmatprep.subr.bf16.mxu0 %v1170_v6 }
  0x47   :  { %1066 = vmatpush3.bf16.msra.mxu0 %v1162_v10 }
  0x48   :  { %1067 = vmatprep.subr.bf16.mxu0 %v1170_v6 }
  0x4b   :  { %1068 = vmatpush3.bf16.msra.mxu0 %v1163_v11 }
  0x4c   :  { %1069 = vmatprep.subr.bf16.mxu0 %v1170_v6 }
  0x4f   :  { %1070 = vmatpush3.bf16.msra.mxu0 %v1164_v12 }
  0x50   :  { %1071 = vmatprep.subr.bf16.mxu0 %v1170_v6 }
  0x53   :  { %1072 = vmatpush3.bf16.msra.mxu0 %v1165_v13 }
  0x54   :  { %1073 = vmatprep.subr.bf16.mxu0 %v1170_v6 }
  0x57   :  { %1074 = vmatpush3.bf16.msra.mxu0 %v1166_v14 }
  0x58   :  { %1075 = vmatprep.subr.bf16.mxu0 %v1170_v6 }
  0x5b   :  { %1076 = vmatpush3.bf16.msra.mxu0 %v1167_v15 }
  0x5c   :  { %1077 = vmatprep.subr.bf16.mxu0 %v1170_v6 }
  0x5f   :  { %1078 = vmatpush3.bf16.msra.mxu0 %v1168_v16 }
  0x62   :  { %1080 = vmatmul.mubr.bf16.vlgmr.msra.gmra.mrb[8].mxu0 %v1169_v17 }
  0xf5   :  { %v982_v18 = vpop.f32.mrb[0].mxu0 }
  0xf6   :  { %v983_v20 = vpop.f32.mrb[1].mxu0 }
  0xf7   :  { %v984_v21 = vadd.f32 %v983_v20, %v982_v18  ;;  %v985_v22 = vpop.f32.mrb[2].mxu0  ;;  %v1004_v23 = vpop.f32.mrb[0].mxu1 }
  0xf8   :  { %v986_v24 = vpop.f32.mrb[3].mxu0  ;;  %v1005_v27 = vpop.f32.mrb[1].mxu1 }
  0xf9   :  { %v689_v25 = vadd.f32 %v984_v21, %v875_v19  ;;  %v987_v26 = vadd.f32 %v986_v24, %v985_v22  ;;  %v1006_v28 = vadd.f32 %v1005_v27, %v1004_v23  ;;  %v1007_v29 = vpop.f32.mrb[2].mxu1 }
  0xfa   :  { %v1008_v31 = vpop.f32.mrb[3].mxu1 }
  0xfb   :  { %v692_v30 = vadd.f32 %v987_v26, %v875_v19  ;;  %v730_v32 = vadd.f32 %v1006_v28, %v689_v25  ;;  %v1009_v33 = vadd.f32 %v1008_v31, %v1007_v29 }
  0xfd   :  { %v733_v34 = vadd.f32 %v1009_v33, %v692_v30 }
 0x115   :  { %v1026_v35 = vpop.f32.mrb[4].mxu0 }
 0x116   :  { %v1027_v36 = vpop.f32.mrb[5].mxu0 }
 0x117   :  { %v1028_v37 = vadd.f32 %v1027_v36, %v1026_v35  ;;  %v1029_v38 = vpop.f32.mrb[6].mxu0  ;;  %v1048_v39 = vpop.f32.mrb[4].mxu1 }
 0x118   :  { %v1030_v40 = vpop.f32.mrb[7].mxu0  ;;  %v1049_v43 = vpop.f32.mrb[5].mxu1 }
 0x119   :  { %v771_v41 = vadd.f32 %v1028_v37, %v730_v32  ;;  %v1031_v42 = vadd.f32 %v1030_v40, %v1029_v38  ;;  %v1050_v44 = vadd.f32 %v1049_v43, %v1048_v39  ;;  %v1051_v45 = vpop.f32.mrb[6].mxu1 }
 0x11a   :  { %v1052_v47 = vpop.f32.mrb[7].mxu1 }
 0x11b   :  { %v774_v46 = vadd.f32 %v1031_v42, %v733_v34  ;;  %v1053_v48 = vadd.f32 %v1052_v47, %v1051_v45  ;;  %v812_v49 = vadd.f32 %v1050_v44, %v771_v41 }
 0x11d   :  { %v815_v50 = vadd.f32 %v1053_v48, %v774_v46 }
 0x135   :  { %v852_v51 = vpop.f32.mrb[8].mxu0 }
 0x136   :  { %v853_v52 = vadd.f32 %v852_v51, %v812_v49  ;;  %v1081_v53 = vpop.f32.mrb[9].mxu0 }
 0x137   :  { %v855_v54 = vpop.f32.mrb[10].mxu0 }
 0x138   :  { %v856_v55 = vadd.f32 %v855_v54, %v815_v50  ;;  %v1082_v56 = vpop.f32.mrb[11].mxu0  ;;  %v859_v57 = vmax.f32 %v853_v52, 0.0 }
 0x13a   :  { %v860_v58 = vmax.f32 %v856_v55, 0.0 }
 0x13c   :  { %v964_v59 = vpack.c.bf16 %v860_v58, %v859_v57 }
 0x13e   :  { %965 = vst [vmem:[%s1444_s3] sm:$0xff] %v964_v59  }

// kernel: _lambda_.66
= control target key start
LH: loop header
LB: loop body
LE: loop exit
PB: predicated region body
PF: predicated region fallthrough
CT: control target
= control target key end

     0   :  { %s1493_s12 = smov 0   ;;  %s1495_s13 = smov 0   ;;  %s1784_s0 = inlined_call_operand.vmem [shape: bf16[16,512], index: 0, kind: input, shape index: {}]   ;;  %s1785_s1 = inlined_call_operand.vmem [shape: bf16[512,1280], index: 1, kind: input, shape index: {}]   ;;  %s1786_s2 = inlined_call_operand.vmem [shape: f32[1,1280], index: 2, kind: input, shape index: {}]   ;;  %s1787_s3 = inlined_call_operand.vmem [shape: bf16[16,1280], index: 3, kind: output, shape index: {}]  }
   0x1   :  { %s1497_s14 = smov 0   ;;  %s1499_s15 = smov 0  }
   0x2   :  { %s1501_s16 = smov 0  }
   0x3 LB: > { %s22_s17 = sadd.s32 1, %s1467_s15  ;;  %s1191_s18 = sadd.s32 4294967295, %s1471_s16   ;;  %s1471_s16 = sphi %s1501_s16, %s13_s16   ;;  %s1467_s15 = sphi %s1499_s15, %s1792_s15   ;;  %s1463_s14 = sphi %s1497_s14, %s1791_s14   ;;  %s1459_s13 = sphi %s1495_s13, %s1790_s13   ;;  %s1455_s12 = sphi %s1493_s12, %s1789_s12  }
   0x4   : > { %p23_p0 = scmp.ge.s32.totalorder %s22_s17, 5  ;;  %p65_p1 = scmp.ne.s32.totalorder %s1459_s13, %s1455_s12 }
   0x5   : > { %p66_p2 = scmp.eq.s32.totalorder %s1471_s16, 0  ;;  %p123_p4 = scmp.eq.s32.totalorder %s1191_s18, 4 }
   0x6   : > { %s1794_s17 = smov (%p23_p0, %s22_s17), 0  ;;  %s58_s20 = sadd.s32 1, %s1459_s13 }
   0x7   : > { %p67_p3 = por %p66_p2, %p65_p1  ;;  %s55_s19 = ssub.s32 %s1467_s15, %s1794_s17 }
   0x8   : > { %p56_p5 = scmp.eq.s32.totalorder %s55_s19, 0  ;;  %p1528_p6 = por %p123_p4, %p65_p1 }
   0x9   : > { %p1195_p7 = scmp.ge.s32.totalorder %s1471_s16, 5 }
   0xa   : > { %s1533_s22 = scalar_select %p56_p5, %s1459_s13, %s58_s20  }
   0xb   : > { %155 = sbr.rel (%p1195_p7) target bundleno = 54 (0x36), region = 20 }
  0x12   : > { %158 = sbr.rel (!%p67_p3) target bundleno = 54 (0x36), region = 24  ;;  %s160_s23 = sand.u32 (%p67_p3), 1, %s1459_s13  }
  0x13   : > { %s1279_s24 = sshll.u32 (%p67_p3), %s1467_s15, 3  ;;  %s1196_s25 = sshll.u32 (%p67_p3), %s160_s23, 9 }
  0x14   : > { %s1541_s28 = scalar_lea.vmem (%p67_p3), %s1785_s1, %s1279_s24  ;;  %s1546_s29 = scalar_lea.vmem (%p67_p3), [#allocation2], %s1196_s25 }
  0x15   : > { %v319_v0 = vld [vmem:[%s1541_s28] sm:$0xff] (%p67_p3)  ;;  %v321_v1 = vld [vmem:[%s1541_s28 + $0x28] sm:$0xff] (%p67_p3)  ;;  %v323_v2 = vld [vmem:[%s1541_s28 + $0x50] sm:$0xff] (%p67_p3) }
  0x16   : > { %320 = vst [vmem:[%s1546_s29] sm:$0xff] (%p67_p3), %v319_v0  ;;  %322 = vst [vmem:[%s1546_s29 + $0x8] sm:$0xff] (%p67_p3), %v321_v1  ;;  %v325_v3 = vld [vmem:[%s1541_s28 + $0x78] sm:$0xff] (%p67_p3)  ;;  %v327_v4 = vld [vmem:[%s1541_s28 + $0xa0] sm:$0xff] (%p67_p3) }
  0x17   : > { %324 = vst [vmem:[%s1546_s29 + $0x10] sm:$0xff] (%p67_p3), %v323_v2  ;;  %v329_v5 = vld [vmem:[%s1541_s28 + $0xc8] sm:$0xff] (%p67_p3)  ;;  %326 = vst [vmem:[%s1546_s29 + $0x18] sm:$0xff] (%p67_p3), %v325_v3  ;;  %v331_v6 = vld [vmem:[%s1541_s28 + $0xf0] sm:$0xff] (%p67_p3) }
  0x18   : > { %328 = vst [vmem:[%s1546_s29 + $0x20] sm:$0xff] (%p67_p3), %v327_v4  ;;  %330 = vst [vmem:[%s1546_s29 + $0x28] sm:$0xff] (%p67_p3), %v329_v5  ;;  %v333_v7 = vld [vmem:[%s1541_s28 + $0x118] sm:$0xff] (%p67_p3)  ;;  %v335_v8 = vld [vmem:[%s1541_s28 + $0x140] sm:$0xff] (%p67_p3) }
  0x19   : > { %332 = vst [vmem:[%s1546_s29 + $0x30] sm:$0xff] %v331_v6  ;;  %334 = vst [vmem:[%s1546_s29 + $0x38] sm:$0xff] %v333_v7  ;;  %v337_v9 = vld [vmem:[%s1541_s28 + $0x168] sm:$0xff]  ;;  %v339_v10 = vld [vmem:[%s1541_s28 + $0x190] sm:$0xff] }
  0x1a   : > { %336 = vst [vmem:[%s1546_s29 + $0x40] sm:$0xff] %v335_v8  ;;  %v341_v11 = vld [vmem:[%s1541_s28 + $0x1b8] sm:$0xff]  ;;  %338 = vst [vmem:[%s1546_s29 + $0x48] sm:$0xff] %v337_v9  ;;  %v343_v12 = vld [vmem:[%s1541_s28 + $0x1e0] sm:$0xff] }
  0x1b   : > { %340 = vst [vmem:[%s1546_s29 + $0x50] sm:$0xff] %v339_v10  ;;  %342 = vst [vmem:[%s1546_s29 + $0x58] sm:$0xff] %v341_v11  ;;  %v345_v13 = vld [vmem:[%s1541_s28 + $0x208] sm:$0xff]  ;;  %v347_v14 = vld [vmem:[%s1541_s28 + $0x230] sm:$0xff] }
  0x1c   : > { %344 = vst [vmem:[%s1546_s29 + $0x60] sm:$0xff] %v343_v12  ;;  %346 = vst [vmem:[%s1546_s29 + $0x68] sm:$0xff] %v345_v13  ;;  %v349_v15 = vld [vmem:[%s1541_s28 + $0x258] sm:$0xff]  ;;  %v351_v16 = vld [vmem:[%s1541_s28 + $0x280] sm:$0xff] }
  0x1d   : > { %348 = vst [vmem:[%s1546_s29 + $0x70] sm:$0xff] %v347_v14  ;;  %v353_v17 = vld [vmem:[%s1541_s28 + $0x2a8] sm:$0xff]  ;;  %350 = vst [vmem:[%s1546_s29 + $0x78] sm:$0xff] %v349_v15  ;;  %v355_v18 = vld [vmem:[%s1541_s28 + $0x2d0] sm:$0xff] }
  0x1e   : > { %352 = vst [vmem:[%s1546_s29 + $0x80] sm:$0xff] %v351_v16  ;;  %354 = vst [vmem:[%s1546_s29 + $0x88] sm:$0xff] %v353_v17  ;;  %v357_v19 = vld [vmem:[%s1541_s28 + $0x2f8] sm:$0xff]  ;;  %v359_v20 = vld [vmem:[%s1541_s28 + $0x320] sm:$0xff] }
  0x1f   : > { %356 = vst [vmem:[%s1546_s29 + $0x90] sm:$0xff] %v355_v18  ;;  %358 = vst [vmem:[%s1546_s29 + $0x98] sm:$0xff] %v357_v19  ;;  %v361_v21 = vld [vmem:[%s1541_s28 + $0x348] sm:$0xff]  ;;  %v363_v22 = vld [vmem:[%s1541_s28 + $0x370] sm:$0xff] }
  0x20   : > { %360 = vst [vmem:[%s1546_s29 + $0xa0] sm:$0xff] %v359_v20  ;;  %v365_v23 = vld [vmem:[%s1541_s28 + $0x398] sm:$0xff]  ;;  %362 = vst [vmem:[%s1546_s29 + $0xa8] sm:$0xff] %v361_v21  ;;  %v367_v24 = vld [vmem:[%s1541_s28 + $0x3c0] sm:$0xff] }
  0x21   : > { %364 = vst [vmem:[%s1546_s29 + $0xb0] sm:$0xff] %v363_v22  ;;  %366 = vst [vmem:[%s1546_s29 + $0xb8] sm:$0xff] %v365_v23  ;;  %v369_v25 = vld [vmem:[%s1541_s28 + $0x3e8] sm:$0xff]  ;;  %v371_v26 = vld [vmem:[%s1541_s28 + $0x410] sm:$0xff] }
  0x22   : > { %368 = vst [vmem:[%s1546_s29 + $0xc0] sm:$0xff] %v367_v24  ;;  %370 = vst [vmem:[%s1546_s29 + $0xc8] sm:$0xff] %v369_v25  ;;  %v373_v27 = vld [vmem:[%s1541_s28 + $0x438] sm:$0xff]  ;;  %v375_v28 = vld [vmem:[%s1541_s28 + $0x460] sm:$0xff] }
  0x23   : > { %372 = vst [vmem:[%s1546_s29 + $0xd0] sm:$0xff] %v371_v26  ;;  %v377_v29 = vld [vmem:[%s1541_s28 + $0x488] sm:$0xff]  ;;  %374 = vst [vmem:[%s1546_s29 + $0xd8] sm:$0xff] %v373_v27  ;;  %v379_v30 = vld [vmem:[%s1541_s28 + $0x4b0] sm:$0xff] }
  0x24   : > { %376 = vst [vmem:[%s1546_s29 + $0xe0] sm:$0xff] %v375_v28  ;;  %378 = vst [vmem:[%s1546_s29 + $0xe8] sm:$0xff] %v377_v29  ;;  %v381_v31 = vld [vmem:[%s1541_s28 + $0x4d8] sm:$0xff]  ;;  %v383_v32 = vld [vmem:[%s1541_s28 + $0x500] sm:$0xff] }
  0x25   : > { %380 = vst [vmem:[%s1546_s29 + $0xf0] sm:$0xff] %v379_v30  ;;  %382 = vst [vmem:[%s1546_s29 + $0xf8] sm:$0xff] %v381_v31  ;;  %v385_v33 = vld [vmem:[%s1541_s28 + $0x528] sm:$0xff]  ;;  %v387_v34 = vld [vmem:[%s1541_s28 + $0x550] sm:$0xff] }
  0x26   : > { %384 = vst [vmem:[%s1546_s29 + $0x100] sm:$0xff] %v383_v32  ;;  %v389_v35 = vld [vmem:[%s1541_s28 + $0x578] sm:$0xff]  ;;  %386 = vst [vmem:[%s1546_s29 + $0x108] sm:$0xff] %v385_v33  ;;  %v391_v36 = vld [vmem:[%s1541_s28 + $0x5a0] sm:$0xff] }
  0x27   : > { %388 = vst [vmem:[%s1546_s29 + $0x110] sm:$0xff] %v387_v34  ;;  %390 = vst [vmem:[%s1546_s29 + $0x118] sm:$0xff] %v389_v35  ;;  %v393_v37 = vld [vmem:[%s1541_s28 + $0x5c8] sm:$0xff]  ;;  %v395_v38 = vld [vmem:[%s1541_s28 + $0x5f0] sm:$0xff] }
  0x28   : > { %392 = vst [vmem:[%s1546_s29 + $0x120] sm:$0xff] %v391_v36  ;;  %394 = vst [vmem:[%s1546_s29 + $0x128] sm:$0xff] %v393_v37  ;;  %v397_v39 = vld [vmem:[%s1541_s28 + $0x618] sm:$0xff]  ;;  %v399_v40 = vld [vmem:[%s1541_s28 + $0x640] sm:$0xff] }
  0x29   : > { %396 = vst [vmem:[%s1546_s29 + $0x130] sm:$0xff] %v395_v38  ;;  %v401_v41 = vld [vmem:[%s1541_s28 + $0x668] sm:$0xff]  ;;  %398 = vst [vmem:[%s1546_s29 + $0x138] sm:$0xff] %v397_v39  ;;  %v403_v42 = vld [vmem:[%s1541_s28 + $0x690] sm:$0xff] }
  0x2a   : > { %400 = vst [vmem:[%s1546_s29 + $0x140] sm:$0xff] %v399_v40  ;;  %402 = vst [vmem:[%s1546_s29 + $0x148] sm:$0xff] %v401_v41  ;;  %v405_v43 = vld [vmem:[%s1541_s28 + $0x6b8] sm:$0xff]  ;;  %v407_v44 = vld [vmem:[%s1541_s28 + $0x6e0] sm:$0xff] }
  0x2b   : > { %404 = vst [vmem:[%s1546_s29 + $0x150] sm:$0xff] %v403_v42  ;;  %406 = vst [vmem:[%s1546_s29 + $0x158] sm:$0xff] %v405_v43  ;;  %v409_v45 = vld [vmem:[%s1541_s28 + $0x708] sm:$0xff]  ;;  %v411_v46 = vld [vmem:[%s1541_s28 + $0x730] sm:$0xff] }
  0x2c   : > { %408 = vst [vmem:[%s1546_s29 + $0x160] sm:$0xff] %v407_v44  ;;  %v413_v47 = vld [vmem:[%s1541_s28 + $0x758] sm:$0xff]  ;;  %410 = vst [vmem:[%s1546_s29 + $0x168] sm:$0xff] %v409_v45  ;;  %v415_v48 = vld [vmem:[%s1541_s28 + $0x780] sm:$0xff] }
  0x2d   : > { %412 = vst [vmem:[%s1546_s29 + $0x170] sm:$0xff] %v411_v46  ;;  %414 = vst [vmem:[%s1546_s29 + $0x178] sm:$0xff] %v413_v47  ;;  %v417_v49 = vld [vmem:[%s1541_s28 + $0x7a8] sm:$0xff]  ;;  %v419_v50 = vld [vmem:[%s1541_s28 + $0x7d0] sm:$0xff] }
  0x2e   : > { %416 = vst [vmem:[%s1546_s29 + $0x180] sm:$0xff] %v415_v48  ;;  %418 = vst [vmem:[%s1546_s29 + $0x188] sm:$0xff] %v417_v49  ;;  %v421_v51 = vld [vmem:[%s1541_s28 + $0x7f8] sm:$0xff]  ;;  %v423_v52 = vld [vmem:[%s1541_s28 + $0x820] sm:$0xff] }
  0x2f   : > { %420 = vst [vmem:[%s1546_s29 + $0x190] sm:$0xff] %v419_v50  ;;  %v425_v53 = vld [vmem:[%s1541_s28 + $0x848] sm:$0xff]  ;;  %422 = vst [vmem:[%s1546_s29 + $0x198] sm:$0xff] %v421_v51  ;;  %v427_v54 = vld [vmem:[%s1541_s28 + $0x870] sm:$0xff] }
  0x30   : > { %424 = vst [vmem:[%s1546_s29 + $0x1a0] sm:$0xff] %v423_v52  ;;  %426 = vst [vmem:[%s1546_s29 + $0x1a8] sm:$0xff] %v425_v53  ;;  %v429_v55 = vld [vmem:[%s1541_s28 + $0x898] sm:$0xff]  ;;  %v431_v56 = vld [vmem:[%s1541_s28 + $0x8c0] sm:$0xff] }
  0x31   : > { %428 = vst [vmem:[%s1546_s29 + $0x1b0] sm:$0xff] %v427_v54  ;;  %430 = vst [vmem:[%s1546_s29 + $0x1b8] sm:$0xff] %v429_v55  ;;  %v433_v57 = vld [vmem:[%s1541_s28 + $0x8e8] sm:$0xff]  ;;  %v435_v58 = vld [vmem:[%s1541_s28 + $0x910] sm:$0xff] }
  0x32   : > { %432 = vst [vmem:[%s1546_s29 + $0x1c0] sm:$0xff] %v431_v56  ;;  %v437_v59 = vld [vmem:[%s1541_s28 + $0x938] sm:$0xff]  ;;  %434 = vst [vmem:[%s1546_s29 + $0x1c8] sm:$0xff] %v433_v57  ;;  %v439_v60 = vld [vmem:[%s1541_s28 + $0x960] sm:$0xff] }
  0x33   : > { %436 = vst [vmem:[%s1546_s29 + $0x1d0] sm:$0xff] %v435_v58  ;;  %438 = vst [vmem:[%s1546_s29 + $0x1d8] sm:$0xff] %v437_v59  ;;  %v441_v61 = vld [vmem:[%s1541_s28 + $0x988] sm:$0xff]  ;;  %v443_v62 = vld [vmem:[%s1541_s28 + $0x9b0] sm:$0xff] }
  0x34   : > { %440 = vst [vmem:[%s1546_s29 + $0x1e0] sm:$0xff] %v439_v60  ;;  %442 = vst [vmem:[%s1546_s29 + $0x1e8] sm:$0xff] %v441_v61  ;;  %v445_v63 = vld [vmem:[%s1541_s28 + $0x9d8] sm:$0xff] }
  0x35   : > { %444 = vst [vmem:[%s1546_s29 + $0x1f0] sm:$0xff] %v443_v62  ;;  %446 = vst [vmem:[%s1546_s29 + $0x1f8] sm:$0xff] %v445_v63 }
  0x36 PF: > { %p1199_p8 = scmp.ge.s32.totalorder %s1471_s16, 1  ;;  %p459_p9 = scmp.lt.s32.totalorder %s1471_s16, 6 }
  0x38   : > { %p460_p10 = pnand %p1199_p8, %p459_p9 }
  0x39   : > { %s466_s30 = sand.u32 (!%p460_p10), 1, %s1455_s12   ;;  %v1429_v0 = vld [vmem:[%s1784_s0 + $0x4] ss:$16 sps:$4 sm:$0xff] (!%p460_p10)   ;;  %v1432_v1 = vld [vmem:[%s1784_s0 + $0xc] ss:$16 sps:$4 sm:$0xff] (!%p460_p10)   ;;  %s1202_s20 = sshll.u32 (!%p460_p10), %s1463_s14, 1 }
  0x3a   : > { %463 = sbr.rel (%p460_p10) target bundleno = 358 (0x166), region = 66  ;;  %s1200_s4 = sshll.u32 (!%p460_p10), %s466_s30, 9  ;;  %965 = vmatprep.mubr.bf16.mxu1 (!%p460_p10), %v1429_v0  ;;  %1008 = vmatprep.mubr.bf16.mxu0 (!%p460_p10), %v1432_v1 }
  0x3b   : > { %s1684_s9 = scalar_lea.vmem (!%p460_p10), [#allocation2], %s1200_s4  ;;  %p507_p11 = scmp.lt.s32.totalorder (!%p460_p10), %s1202_s20, 9 }
  0x3c   : > { %v1331_v2 = vld [vmem:[%s1684_s9 + $0x4] ss:$8 sps:$4 sm:$0xff] (!%p460_p10)   ;;  %v1335_v4 = vld [vmem:[%s1684_s9] ss:$8 sps:$4 sm:$0xff] (!%p460_p10)   ;;  %v1337_v6 = vld [vmem:[%s1684_s9 + $0x14] ss:$8 sps:$4 sm:$0xff] (!%p460_p10)  }
  0x3d   : > { %v1333_v3 = vld [vmem:[%s1684_s9 + $0x104] ss:$8 sps:$4 sm:$0xff] (!%p460_p10)   ;;  %933 = vmatprep.subr.bf16.mxu1 (!%p460_p10), %v1331_v2  ;;  %v1336_v5 = vld [vmem:[%s1684_s9 + $0x100] ss:$8 sps:$4 sm:$0xff] (!%p460_p10)   ;;  %v1339_v7 = vld [vmem:[%s1684_s9 + $0x114] ss:$8 sps:$4 sm:$0xff] (!%p460_p10)  }
  0x3e   : > { %976 = vmatprep.subr.bf16.mxu0 (!%p460_p10), %v1333_v3  ;;  %934 = vmatpush1.bf16.msra.mxu1 (!%p460_p10), %v1335_v4  ;;  %v1341_v8 = vld [vmem:[%s1684_s9 + $0x10] ss:$8 sps:$4 sm:$0xff] (!%p460_p10)   ;;  %v1343_v10 = vld [vmem:[%s1684_s9 + $0x24] ss:$8 sps:$4 sm:$0xff] (!%p460_p10)   ;;  %v1347_v12 = vld [vmem:[%s1684_s9 + $0x20] ss:$8 sps:$4 sm:$0xff] (!%p460_p10)   ;;  %v583_v4 = vlaneseq (!%p460_p10) }
  0x3f   : > { %977 = vmatpush1.bf16.msra.mxu0 (!%p460_p10), %v1336_v5  ;;  %935 = vmatprep.subr.bf16.mxu1 (!%p460_p10), %v1337_v6  ;;  %v1342_v9 = vld [vmem:[%s1684_s9 + $0x110] ss:$8 sps:$4 sm:$0xff] (!%p460_p10)   ;;  %v1345_v11 = vld [vmem:[%s1684_s9 + $0x124] ss:$8 sps:$4 sm:$0xff] (!%p460_p10)   ;;  %v1348_v13 = vld [vmem:[%s1684_s9 + $0x120] ss:$8 sps:$4 sm:$0xff] (!%p460_p10)  }
  0x40   : > { %978 = vmatprep.subr.bf16.mxu0 (!%p460_p10), %v1339_v7  ;;  %v1349_v14 = vld [vmem:[%s1684_s9 + $0x34] ss:$8 sps:$4 sm:$0xff] (!%p460_p10)   ;;  %v1353_v16 = vld [vmem:[%s1684_s9 + $0x30] ss:$8 sps:$4 sm:$0xff] (!%p460_p10)   ;;  %v1355_v18 = vld [vmem:[%s1684_s9 + $0x44] ss:$8 sps:$4 sm:$0xff] (!%p460_p10)  }
  0x41   : > { %v1351_v15 = vld [vmem:[%s1684_s9 + $0x134] ss:$8 sps:$4 sm:$0xff]   ;;  %v1354_v17 = vld [vmem:[%s1684_s9 + $0x130] ss:$8 sps:$4 sm:$0xff]   ;;  %v1357_v19 = vld [vmem:[%s1684_s9 + $0x144] ss:$8 sps:$4 sm:$0xff]  }
  0x42   : > { %936 = vmatpush1.bf16.msra.mxu1 %v1341_v8  ;;  %v1359_v20 = vld [vmem:[%s1684_s9 + $0x40] ss:$8 sps:$4 sm:$0xff]   ;;  %v1361_v22 = vld [vmem:[%s1684_s9 + $0x54] ss:$8 sps:$4 sm:$0xff]   ;;  %v1365_v24 = vld [vmem:[%s1684_s9 + $0x50] ss:$8 sps:$4 sm:$0xff]  }
  0x43   : > { %979 = vmatpush1.bf16.msra.mxu0 %v1342_v9  ;;  %937 = vmatprep.subr.bf16.mxu1 %v1343_v10  ;;  %v1360_v21 = vld [vmem:[%s1684_s9 + $0x140] ss:$8 sps:$4 sm:$0xff]   ;;  %v1363_v23 = vld [vmem:[%s1684_s9 + $0x154] ss:$8 sps:$4 sm:$0xff]   ;;  %v1366_v25 = vld [vmem:[%s1684_s9 + $0x150] ss:$8 sps:$4 sm:$0xff]  }
  0x44   : > { %980 = vmatprep.subr.bf16.mxu0 %v1345_v11  ;;  %v1367_v26 = vld [vmem:[%s1684_s9 + $0x64] ss:$8 sps:$4 sm:$0xff]   ;;  %v1371_v28 = vld [vmem:[%s1684_s9 + $0x60] ss:$8 sps:$4 sm:$0xff]   ;;  %v1373_v30 = vld [vmem:[%s1684_s9 + $0x74] ss:$8 sps:$4 sm:$0xff]  }
  0x45   : > { %v1369_v27 = vld [vmem:[%s1684_s9 + $0x164] ss:$8 sps:$4 sm:$0xff]   ;;  %v1372_v29 = vld [vmem:[%s1684_s9 + $0x160] ss:$8 sps:$4 sm:$0xff]   ;;  %v1375_v31 = vld [vmem:[%s1684_s9 + $0x174] ss:$8 sps:$4 sm:$0xff]  }
  0x46   : > { %938 = vmatpush1.bf16.msra.mxu1 %v1347_v12  ;;  %v1377_v32 = vld [vmem:[%s1684_s9 + $0x70] ss:$8 sps:$4 sm:$0xff]   ;;  %v1379_v34 = vld [vmem:[%s1684_s9 + $0x84] ss:$8 sps:$4 sm:$0xff]   ;;  %v1383_v36 = vld [vmem:[%s1684_s9 + $0x80] ss:$8 sps:$4 sm:$0xff]  }
  0x47   : > { %981 = vmatpush1.bf16.msra.mxu0 %v1348_v13  ;;  %939 = vmatprep.subr.bf16.mxu1 %v1349_v14  ;;  %v1378_v33 = vld [vmem:[%s1684_s9 + $0x170] ss:$8 sps:$4 sm:$0xff]   ;;  %v1381_v35 = vld [vmem:[%s1684_s9 + $0x184] ss:$8 sps:$4 sm:$0xff]   ;;  %v1384_v37 = vld [vmem:[%s1684_s9 + $0x180] ss:$8 sps:$4 sm:$0xff]  }
  0x48   : > { %982 = vmatprep.subr.bf16.mxu0 %v1351_v15  ;;  %v1385_v38 = vld [vmem:[%s1684_s9 + $0x94] ss:$8 sps:$4 sm:$0xff]   ;;  %v1389_v40 = vld [vmem:[%s1684_s9 + $0x90] ss:$8 sps:$4 sm:$0xff]   ;;  %v1391_v42 = vld [vmem:[%s1684_s9 + $0xa4] ss:$8 sps:$4 sm:$0xff]  }
  0x49   : > { %v1387_v39 = vld [vmem:[%s1684_s9 + $0x194] ss:$8 sps:$4 sm:$0xff]   ;;  %v1390_v41 = vld [vmem:[%s1684_s9 + $0x190] ss:$8 sps:$4 sm:$0xff]   ;;  %v1393_v43 = vld [vmem:[%s1684_s9 + $0x1a4] ss:$8 sps:$4 sm:$0xff]  }
  0x4a   : > { %940 = vmatpush1.bf16.msra.mxu1 %v1353_v16  ;;  %v1395_v44 = vld [vmem:[%s1684_s9 + $0xa0] ss:$8 sps:$4 sm:$0xff]   ;;  %v1397_v46 = vld [vmem:[%s1684_s9 + $0xb4] ss:$8 sps:$4 sm:$0xff]   ;;  %v1401_v48 = vld [vmem:[%s1684_s9 + $0xb0] ss:$8 sps:$4 sm:$0xff]  }
  0x4b   : > { %983 = vmatpush1.bf16.msra.mxu0 %v1354_v17  ;;  %941 = vmatprep.subr.bf16.mxu1 %v1355_v18  ;;  %v1396_v45 = vld [vmem:[%s1684_s9 + $0x1a0] ss:$8 sps:$4 sm:$0xff]   ;;  %v1399_v47 = vld [vmem:[%s1684_s9 + $0x1b4] ss:$8 sps:$4 sm:$0xff]   ;;  %v1402_v49 = vld [vmem:[%s1684_s9 + $0x1b0] ss:$8 sps:$4 sm:$0xff]  }
  0x4c   : > { %984 = vmatprep.subr.bf16.mxu0 %v1357_v19  ;;  %v1403_v50 = vld [vmem:[%s1684_s9 + $0xc4] ss:$8 sps:$4 sm:$0xff]   ;;  %v1407_v52 = vld [vmem:[%s1684_s9 + $0xc0] ss:$8 sps:$4 sm:$0xff]   ;;  %v1409_v54 = vld [vmem:[%s1684_s9 + $0xd4] ss:$8 sps:$4 sm:$0xff]  }
  0x4d   : > { %v1405_v51 = vld [vmem:[%s1684_s9 + $0x1c4] ss:$8 sps:$4 sm:$0xff]   ;;  %v1408_v53 = vld [vmem:[%s1684_s9 + $0x1c0] ss:$8 sps:$4 sm:$0xff]   ;;  %v1411_v55 = vld [vmem:[%s1684_s9 + $0x1d4] ss:$8 sps:$4 sm:$0xff]  }
  0x4e   : > { %942 = vmatpush1.bf16.msra.mxu1 %v1359_v20  ;;  %v1413_v56 = vld [vmem:[%s1684_s9 + $0xd0] ss:$8 sps:$4 sm:$0xff]   ;;  %v1415_v58 = vld [vmem:[%s1684_s9 + $0xe4] ss:$8 sps:$4 sm:$0xff]   ;;  %v1419_v60 = vld [vmem:[%s1684_s9 + $0xe0] ss:$8 sps:$4 sm:$0xff]  }
  0x4f   : > { %985 = vmatpush1.bf16.msra.mxu0 %v1360_v21  ;;  %943 = vmatprep.subr.bf16.mxu1 %v1361_v22  ;;  %v1414_v57 = vld [vmem:[%s1684_s9 + $0x1d0] ss:$8 sps:$4 sm:$0xff]   ;;  %v1417_v59 = vld [vmem:[%s1684_s9 + $0x1e4] ss:$8 sps:$4 sm:$0xff]   ;;  %v1420_v61 = vld [vmem:[%s1684_s9 + $0x1e0] ss:$8 sps:$4 sm:$0xff]  }
  0x50   : > { %986 = vmatprep.subr.bf16.mxu0 %v1363_v23  ;;  %v1421_v62 = vld [vmem:[%s1684_s9 + $0xf4] ss:$8 sps:$4 sm:$0xff]   ;;  %v1425_v0 = vld [vmem:[%s1684_s9 + $0xf0] ss:$8 sps:$4 sm:$0xff]   ;;  %s1796_s20 = smov (!%p507_p11, %s1202_s20), 9  ;;  %v584_v5 = vshrl.u32 %v583_v4, 7 }
  0x51   : > { %v1423_v63 = vld [vmem:[%s1684_s9 + $0x1f4] ss:$8 sps:$4 sm:$0xff]   ;;  %v1426_v1 = vld [vmem:[%s1684_s9 + $0x1f0] ss:$8 sps:$4 sm:$0xff]   ;;  %s509_s25 = scalar_lea.vmem %s1786_s2, %s1796_s20  ;;  %v1020_v7 = vand.u32 127, %v583_v4  ;;  %s1271_s26 = sshll.u32 %s1463_s14, 8 }
  0x52   : > { %944 = vmatpush1.bf16.msra.mxu1 %v1365_v24  ;;  %v1427_v2 = vld [vmem:[%s1784_s0] ss:$16 sps:$4 sm:$0xff]   ;;  %v1430_v3 = vld [vmem:[%s1784_s0 + $0x8] ss:$16 sps:$4 sm:$0xff]   ;;  %v585_v6 = vsub.s32 0, %v584_v5  ;;  %v589_v9 = vsub.s32 1, %v584_v5  ;;  %v1023_v11 = vstv %s1271_s26 }
  0x53   : > { %987 = vmatpush1.bf16.msra.mxu0 %v1366_v25  ;;  %945 = vmatprep.subr.bf16.mxu1 %v1367_v26  ;;  %v581_v8 = vld [vmem:[%s509_s25] sm:$0x3]  ;;  %v1021_v12 = vadd.s32 128, %v1020_v7  ;;  %v1024_v16 = vadd.s32 %v1023_v11, %v1020_v7  ;;  %s1201_s27 = sshll.u32 %s466_s30, 4  ;;  %s1282_s12 = sshll.u32 (%p1528_p6), %s1463_s14, 3 }
  0x54   : > { %988 = vmatprep.subr.bf16.mxu0 %v1369_v27  ;;  %v586_v10 = vrot.slane %v581_v8, %v585_v6  ;;  %v590_v13 = vrot.slane %v581_v8, %v589_v9  ;;  %s497_s28 = scalar_lea.vmem [#allocation3], %s1201_s27  ;;  %s1062_s4 = scalar_lea.vmem (%p1528_p6), %s1787_s3, %s1282_s12 }
  0x55   : > { %v1025_v20 = vadd.s32 %v1023_v11, %v1021_v12  ;;  %vm1026_vm0 = vcmp.lt.s32.totalorder %v1024_v16, 256 }
  0x56   : > { %946 = vmatpush1.bf16.msra.mxu1 %v1371_v28 }
  0x57   : > { %989 = vmatpush1.bf16.msra.mxu0 %v1372_v29  ;;  %947 = vmatprep.subr.bf16.mxu1 %v1373_v30  ;;  %vm1027_vm1 = vcmp.lt.s32.totalorder %v1025_v20, 256 }
  0x58   : > { %990 = vmatprep.subr.bf16.mxu0 %v1375_v31 }
  0x5a   : > { %948 = vmatpush1.bf16.msra.mxu1 %v1377_v32 }
  0x5b   : > { %991 = vmatpush1.bf16.msra.mxu0 %v1378_v33  ;;  %949 = vmatprep.subr.bf16.mxu1 %v1379_v34 }
  0x5c   : > { %992 = vmatprep.subr.bf16.mxu0 %v1381_v35 }
  0x5e   : > { %950 = vmatpush1.bf16.msra.mxu1 %v1383_v36 }
  0x5f   : > { %993 = vmatpush1.bf16.msra.mxu0 %v1384_v37  ;;  %951 = vmatprep.subr.bf16.mxu1 %v1385_v38 }
  0x60   : > { %994 = vmatprep.subr.bf16.mxu0 %v1387_v39 }
  0x62   : > { %952 = vmatpush1.bf16.msra.mxu1 %v1389_v40 }
  0x63   : > { %995 = vmatpush1.bf16.msra.mxu0 %v1390_v41  ;;  %953 = vmatprep.subr.bf16.mxu1 %v1391_v42 }
  0x64   : > { %996 = vmatprep.subr.bf16.mxu0 %v1393_v43 }
  0x66   : > { %954 = vmatpush1.bf16.msra.mxu1 %v1395_v44 }
  0x67   : > { %997 = vmatpush1.bf16.msra.mxu0 %v1396_v45  ;;  %955 = vmatprep.subr.bf16.mxu1 %v1397_v46 }
  0x68   : > { %998 = vmatprep.subr.bf16.mxu0 %v1399_v47 }
  0x6a   : > { %956 = vmatpush1.bf16.msra.mxu1 %v1401_v48 }
  0x6b   : > { %999 = vmatpush1.bf16.msra.mxu0 %v1402_v49  ;;  %957 = vmatprep.subr.bf16.mxu1 %v1403_v50 }
  0x6c   : > { %1000 = vmatprep.subr.bf16.mxu0 %v1405_v51 }
  0x6e   : > { %958 = vmatpush1.bf16.msra.mxu1 %v1407_v52 }
  0x6f   : > { %1001 = vmatpush1.bf16.msra.mxu0 %v1408_v53  ;;  %959 = vmatprep.subr.bf16.mxu1 %v1409_v54 }
  0x70   : > { %1002 = vmatprep.subr.bf16.mxu0 %v1411_v55 }
  0x72   : > { %960 = vmatpush1.bf16.msra.mxu1 %v1413_v56 }
  0x73   : > { %1003 = vmatpush1.bf16.msra.mxu0 %v1414_v57  ;;  %961 = vmatprep.subr.bf16.mxu1 %v1415_v58 }
  0x74   : > { %1004 = vmatprep.subr.bf16.mxu0 %v1417_v59 }
  0x76   : > { %962 = vmatpush1.bf16.msra.mxu1 %v1419_v60 }
  0x77   : > { %1005 = vmatpush1.bf16.msra.mxu0 %v1420_v61  ;;  %963 = vmatprep.subr.bf16.mxu1 %v1421_v62 }
  0x78   : > { %1006 = vmatprep.subr.bf16.mxu0 %v1423_v63 }
  0x7a   : > { %964 = vmatpush1.bf16.msra.mxu1 %v1425_v0 }
  0x7b   : > { %1007 = vmatpush1.bf16.msra.mxu0 %v1426_v1 }
  0x7d   : > { %966 = vmatmul.mubr.bf16.vlgmr.msra.gmra.mrb[0].mxu1 %v1427_v2 }
  0x7e   : > { %1009 = vmatmul.mubr.bf16.vlgmr.msra.gmra.mrb[0].mxu0 %v1430_v3 }
 0x150   : > { %v967_v14 = vpop.f32.mrb[0].mxu1 }
 0x151   : > { %v1010_v15 = vpop.f32.mrb[0].mxu0  ;;  %v968_v17 = vadd.f32 %v967_v14, %v586_v10  ;;  %v969_v18 = vpop.f32.mrb[1].mxu1 }
 0x152   : > { %v1012_v19 = vpop.f32.mrb[1].mxu0  ;;  %v970_v21 = vadd.f32 %v969_v18, %v590_v13  ;;  %v971_v22 = vpop.f32.mrb[2].mxu1 }
 0x153   : > { %v1014_v23 = vpop.f32.mrb[2].mxu0  ;;  %v1011_v24 = vadd.f32 %v1010_v15, %v968_v17  ;;  %v972_v25 = vadd.f32 %v971_v22, %v586_v10  ;;  %v973_v26 = vpop.f32.mrb[3].mxu1 }
 0x154   : > { %v1016_v27 = vpop.f32.mrb[3].mxu0  ;;  %v1013_v28 = vadd.f32 %v1012_v19, %v970_v21  ;;  %v974_v29 = vadd.f32 %v973_v26, %v590_v13 }
 0x155   : > { %v1028_v30 = vmax.f32 %v1011_v24, 0.0  ;;  %v1015_v31 = vadd.f32 %v1014_v23, %v972_v25 }
 0x156   : > { %v1029_v32 = vmax.f32 %v1013_v28, 0.0  ;;  %v1017_v33 = vadd.f32 %v1016_v27, %v974_v29 }
 0x157   : > { %v1032_v34 = vsel %vm1026_vm0, %v1028_v30, %v1011_v24  ;;  %v1030_v35 = vmax.f32 %v1015_v31, 0.0  ;;  %1056 = sbr.rel (!%p1528_p6) target bundleno = 358 (0x166), region = 74 }
 0x158   : > { %v1033_v36 = vsel %vm1027_vm1, %v1029_v32, %v1013_v28  ;;  %v1031_v37 = vmax.f32 %v1017_v33, 0.0 }
 0x159   : > { %v1280_v38 = vpack.c.bf16 %v1033_v36, %v1032_v34  ;;  %v1034_v39 = vsel %vm1026_vm0, %v1030_v35, %v1015_v31 }
 0x15a   : > { %v1035_v40 = vsel %vm1027_vm1, %v1031_v37, %v1017_v33 }
 0x15b   : > { %1048 = vst [vmem:[%s497_s28] sm:$0xff] %v1280_v38  ;;  %v1281_v41 = vpack.c.bf16 %v1035_v40, %v1034_v39 }
 0x15d   : > { %1049 = vst [vmem:[%s497_s28 + $0x8] sm:$0xff] %v1281_v41 }
 0x162   : > { %v1092_v42 = vld [vmem:[%s497_s28] sm:$0xff] }
 0x163   : > { %1093 = vst [vmem:[%s1062_s4] sm:$0xff] %v1092_v42 }
 0x164   : > { %v1094_v43 = vld [vmem:[%s497_s28 + $0x8] sm:$0xff] }
 0x165   : > { %1095 = vst [vmem:[%s1062_s4 + $0x28] sm:$0xff] %v1094_v43 }
 0x166 PF: > { %s13_s16 = sadd.s32 1, %s1471_s16   ;;  %s1789_s12 = smov %s1459_s13 }
 0x167   : > { %p10_p12 = scmp.ge.s32.totalorder %s13_s16, 7   ;;  %s1790_s13 = smov %s1533_s22 }
 0x168   : > { %s1791_s14 = smov %s1467_s15  ;;  %s1792_s15 = smov %s1794_s17 }
 0x169   :  { %12 = sbr.rel (!%p10_p12) target bundleno = 3 (0x3), region = 149 }

// kernel: _lambda_.68
= control target key start
LH: loop header
LB: loop body
LE: loop exit
PB: predicated region body
PF: predicated region fallthrough
CT: control target
= control target key end

     0   :  { %s1145_s15 = smov 0   ;;  %s1147_s16 = smov 0   ;;  %s1350_s0 = inlined_call_operand.vmem [shape: bf16[16,256], index: 0, kind: input, shape index: {}]   ;;  %s1351_s1 = inlined_call_operand.vmem [shape: bf16[256,1024], index: 1, kind: input, shape index: {}]   ;;  %s1352_s2 = inlined_call_operand.vmem [shape: f32[1,1024], index: 2, kind: input, shape index: {}]   ;;  %s1353_s3 = inlined_call_operand.vmem [shape: bf16[16,1024], index: 3, kind: input, shape index: {}]   ;;  %s1354_s4 = inlined_call_operand.vmem [shape: bf16[16,1024], index: 4, kind: output, shape index: {}]  }
   0x1   :  { %s1149_s17 = smov 0   ;;  %s1151_s18 = smov 0  }
   0x2   :  { %s1153_s19 = smov 0  }
   0x3 LB: > { %s23_s20 = sadd.s32 1, %s1114_s18  ;;  %s927_s21 = sadd.s32 4294967295, %s1118_s19   ;;  %s1118_s19 = sphi %s1153_s19, %s14_s19   ;;  %s1114_s18 = sphi %s1151_s18, %s1360_s18   ;;  %s1110_s17 = sphi %s1149_s17, %s1359_s17   ;;  %s1106_s16 = sphi %s1147_s16, %s1358_s16   ;;  %s1102_s15 = sphi %s1145_s15, %s1357_s15  }
   0x4   : > { %p24_p0 = scmp.ge.s32.totalorder %s23_s20, 4  ;;  %p66_p1 = scmp.ne.s32.totalorder %s1106_s16, %s1102_s15 }
   0x5   : > { %p67_p2 = scmp.eq.s32.totalorder %s1118_s19, 0  ;;  %p152_p4 = scmp.eq.s32.totalorder %s927_s21, 3 }
   0x6   : > { %s1362_s20 = smov (%p24_p0, %s23_s20), 0  ;;  %s59_s24 = sadd.s32 1, %s1106_s16 }
   0x7   : > { %p1177_p3 = por %p67_p2, %p66_p1  ;;  %s56_s23 = ssub.s32 %s1114_s18, %s1362_s20 }
   0x8   : > { %p57_p5 = scmp.eq.s32.totalorder %s56_s23, 0  ;;  %p1184_p6 = por %p152_p4, %p66_p1 }
   0x9   : > { %p931_p7 = scmp.ge.s32.totalorder %s1118_s19, 4 }
   0xa   : > { %s1189_s26 = scalar_select %p57_p5, %s1106_s16, %s59_s24  }
   0xb   : > { %184 = sbr.rel (%p931_p7) target bundleno = 61 (0x3d), region = 20 }
  0x12   : > { %187 = sbr.rel (!%p1177_p3) target bundleno = 54 (0x36), region = 24  ;;  %s189_s27 = sand.u32 (%p1177_p3), 1, %s1106_s16  }
  0x13   : > { %s984_s28 = sshll.u32 (%p1177_p3), %s1114_s18, 3  ;;  %s932_s29 = sshll.u32 (%p1177_p3), %s189_s27, 8 }
  0x14   : > { %s1199_s6 = scalar_lea.vmem (%p1177_p3), %s1351_s1, %s984_s28  ;;  %s1204_s7 = scalar_lea.vmem (%p1177_p3), [#allocation2], %s932_s29 }
  0x15   : > { %v284_v0 = vld [vmem:[%s1199_s6] sm:$0xff] (%p1177_p3) }
  0x16   : > { %v286_v1 = vld [vmem:[%s1199_s6 + $0x20] sm:$0xff] (%p1177_p3)  ;;  %285 = vst [vmem:[%s1204_s7] sm:$0xff] (%p1177_p3), %v284_v0 }
  0x17   : > { %v288_v2 = vld [vmem:[%s1199_s6 + $0x40] sm:$0xff] (%p1177_p3)  ;;  %287 = vst [vmem:[%s1204_s7 + $0x8] sm:$0xff] (%p1177_p3), %v286_v1 }
  0x18   : > { %289 = vst [vmem:[%s1204_s7 + $0x10] sm:$0xff] (%p1177_p3), %v288_v2  ;;  %v290_v3 = vld [vmem:[%s1199_s6 + $0x60] sm:$0xff] (%p1177_p3) }
  0x19   : > { %v292_v4 = vld [vmem:[%s1199_s6 + $0x80] sm:$0xff]  ;;  %291 = vst [vmem:[%s1204_s7 + $0x18] sm:$0xff] %v290_v3 }
  0x1a   : > { %v294_v5 = vld [vmem:[%s1199_s6 + $0xa0] sm:$0xff]  ;;  %293 = vst [vmem:[%s1204_s7 + $0x20] sm:$0xff] %v292_v4 }
  0x1b   : > { %295 = vst [vmem:[%s1204_s7 + $0x28] sm:$0xff] %v294_v5  ;;  %v296_v6 = vld [vmem:[%s1199_s6 + $0xc0] sm:$0xff] }
  0x1c   : > { %v298_v7 = vld [vmem:[%s1199_s6 + $0xe0] sm:$0xff]  ;;  %297 = vst [vmem:[%s1204_s7 + $0x30] sm:$0xff] %v296_v6 }
  0x1d   : > { %v300_v8 = vld [vmem:[%s1199_s6 + $0x100] sm:$0xff]  ;;  %299 = vst [vmem:[%s1204_s7 + $0x38] sm:$0xff] %v298_v7 }
  0x1e   : > { %301 = vst [vmem:[%s1204_s7 + $0x40] sm:$0xff] %v300_v8  ;;  %v302_v9 = vld [vmem:[%s1199_s6 + $0x120] sm:$0xff] }
  0x1f   : > { %v304_v10 = vld [vmem:[%s1199_s6 + $0x140] sm:$0xff]  ;;  %303 = vst [vmem:[%s1204_s7 + $0x48] sm:$0xff] %v302_v9 }
  0x20   : > { %v306_v11 = vld [vmem:[%s1199_s6 + $0x160] sm:$0xff]  ;;  %305 = vst [vmem:[%s1204_s7 + $0x50] sm:$0xff] %v304_v10 }
  0x21   : > { %307 = vst [vmem:[%s1204_s7 + $0x58] sm:$0xff] %v306_v11  ;;  %v308_v12 = vld [vmem:[%s1199_s6 + $0x180] sm:$0xff] }
  0x22   : > { %v310_v13 = vld [vmem:[%s1199_s6 + $0x1a0] sm:$0xff]  ;;  %309 = vst [vmem:[%s1204_s7 + $0x60] sm:$0xff] %v308_v12 }
  0x23   : > { %v312_v14 = vld [vmem:[%s1199_s6 + $0x1c0] sm:$0xff]  ;;  %311 = vst [vmem:[%s1204_s7 + $0x68] sm:$0xff] %v310_v13 }
  0x24   : > { %313 = vst [vmem:[%s1204_s7 + $0x70] sm:$0xff] %v312_v14  ;;  %v314_v15 = vld [vmem:[%s1199_s6 + $0x1e0] sm:$0xff] }
  0x25   : > { %v316_v16 = vld [vmem:[%s1199_s6 + $0x200] sm:$0xff]  ;;  %315 = vst [vmem:[%s1204_s7 + $0x78] sm:$0xff] %v314_v15 }
  0x26   : > { %v318_v17 = vld [vmem:[%s1199_s6 + $0x220] sm:$0xff]  ;;  %317 = vst [vmem:[%s1204_s7 + $0x80] sm:$0xff] %v316_v16 }
  0x27   : > { %319 = vst [vmem:[%s1204_s7 + $0x88] sm:$0xff] %v318_v17  ;;  %v320_v18 = vld [vmem:[%s1199_s6 + $0x240] sm:$0xff] }
  0x28   : > { %v322_v19 = vld [vmem:[%s1199_s6 + $0x260] sm:$0xff]  ;;  %321 = vst [vmem:[%s1204_s7 + $0x90] sm:$0xff] %v320_v18 }
  0x29   : > { %v324_v20 = vld [vmem:[%s1199_s6 + $0x280] sm:$0xff]  ;;  %323 = vst [vmem:[%s1204_s7 + $0x98] sm:$0xff] %v322_v19 }
  0x2a   : > { %325 = vst [vmem:[%s1204_s7 + $0xa0] sm:$0xff] %v324_v20  ;;  %v326_v21 = vld [vmem:[%s1199_s6 + $0x2a0] sm:$0xff] }
  0x2b   : > { %v328_v22 = vld [vmem:[%s1199_s6 + $0x2c0] sm:$0xff]  ;;  %327 = vst [vmem:[%s1204_s7 + $0xa8] sm:$0xff] %v326_v21 }
  0x2c   : > { %v330_v23 = vld [vmem:[%s1199_s6 + $0x2e0] sm:$0xff]  ;;  %329 = vst [vmem:[%s1204_s7 + $0xb0] sm:$0xff] %v328_v22 }
  0x2d   : > { %331 = vst [vmem:[%s1204_s7 + $0xb8] sm:$0xff] %v330_v23  ;;  %v332_v24 = vld [vmem:[%s1199_s6 + $0x300] sm:$0xff] }
  0x2e   : > { %v334_v25 = vld [vmem:[%s1199_s6 + $0x320] sm:$0xff]  ;;  %333 = vst [vmem:[%s1204_s7 + $0xc0] sm:$0xff] %v332_v24 }
  0x2f   : > { %v336_v26 = vld [vmem:[%s1199_s6 + $0x340] sm:$0xff]  ;;  %335 = vst [vmem:[%s1204_s7 + $0xc8] sm:$0xff] %v334_v25 }
  0x30   : > { %337 = vst [vmem:[%s1204_s7 + $0xd0] sm:$0xff] %v336_v26  ;;  %v338_v27 = vld [vmem:[%s1199_s6 + $0x360] sm:$0xff] }
  0x31   : > { %v340_v28 = vld [vmem:[%s1199_s6 + $0x380] sm:$0xff]  ;;  %339 = vst [vmem:[%s1204_s7 + $0xd8] sm:$0xff] %v338_v27 }
  0x32   : > { %v342_v29 = vld [vmem:[%s1199_s6 + $0x3a0] sm:$0xff]  ;;  %341 = vst [vmem:[%s1204_s7 + $0xe0] sm:$0xff] %v340_v28 }
  0x33   : > { %343 = vst [vmem:[%s1204_s7 + $0xe8] sm:$0xff] %v342_v29  ;;  %v344_v30 = vld [vmem:[%s1199_s6 + $0x3c0] sm:$0xff] }
  0x34   : > { %v346_v31 = vld [vmem:[%s1199_s6 + $0x3e0] sm:$0xff]  ;;  %345 = vst [vmem:[%s1204_s7 + $0xf0] sm:$0xff] %v344_v30 }
  0x35   : > { %347 = vst [vmem:[%s1204_s7 + $0xf8] sm:$0xff] %v346_v31 }
  0x36 PF: > { %361 = sbr.rel (!%p1177_p3) target bundleno = 61 (0x3d), region = 66  ;;  %s363_s8 = sand.u32 (%p1177_p3), 1, %s1106_s16  }
  0x37   : > { %s985_s9 = sshll.u32 (%p1177_p3), %s1114_s18, 3  ;;  %s935_s10 = sshll.u32 (%p1177_p3), %s363_s8, 4 }
  0x38   : > { %s371_s13 = scalar_lea.vmem (%p1177_p3), %s1353_s3, %s985_s9  ;;  %s365_s14 = scalar_lea.vmem (%p1177_p3), [#allocation3], %s935_s10 }
  0x39   : > { %v401_v32 = vld [vmem:[%s371_s13] sm:$0xff] (%p1177_p3) }
  0x3a   : > { %v403_v33 = vld [vmem:[%s371_s13 + $0x20] sm:$0xff] (%p1177_p3)  ;;  %402 = vst [vmem:[%s365_s14] sm:$0xff] (%p1177_p3), %v401_v32 }
  0x3b   : > { %404 = vst [vmem:[%s365_s14 + $0x8] sm:$0xff] (%p1177_p3), %v403_v33 }
  0x3d PF: > { %p938_p8 = scmp.ge.s32.totalorder %s1118_s19, 1  ;;  %p409_p9 = scmp.lt.s32.totalorder %s1118_s19, 5 }
  0x3f   : > { %p410_p10 = pnand %p938_p8, %p409_p9 }
  0x40   : > { %s416_s21 = sand.u32 (!%p410_p10), 1, %s1102_s15   ;;  %v1079_v34 = vld [vmem:[%s1350_s0 + $0x4] ss:$8 sps:$4 sm:$0xff] (!%p410_p10)   ;;  %v1077_v3 = vld [vmem:[%s1350_s0] ss:$8 sps:$4 sm:$0xff] (!%p410_p10)   ;;  %s942_s30 = sshll.u32 (!%p410_p10), %s1110_s17, 1  ;;  %v514_v4 = vlaneseq (!%p410_p10) }
  0x41   : > { %413 = sbr.rel (%p410_p10) target bundleno = 364 (0x16c), region = 104  ;;  %s939_s22 = sshll.u32 (!%p410_p10), %s416_s21, 8  ;;  %726 = vmatprep.mubr.bf16.mxu0 (!%p410_p10), %v1079_v34 }
  0x42   : > { %s1282_s27 = scalar_lea.vmem (!%p410_p10), [#allocation2], %s939_s22  ;;  %p470_p11 = scmp.lt.s32.totalorder (!%p410_p10), %s942_s30, 7  ;;  %v515_v5 = vshrl.u32 (!%p410_p10), %v514_v4, 7 }
  0x43   : > { %v1029_v35 = vld [vmem:[%s1282_s27 + $0x4] ss:$8 sps:$4 sm:$0xff] (!%p410_p10)   ;;  %v1031_v36 = vld [vmem:[%s1282_s27] ss:$8 sps:$4 sm:$0xff] (!%p410_p10)   ;;  %v1032_v37 = vld [vmem:[%s1282_s27 + $0x14] ss:$8 sps:$4 sm:$0xff] (!%p410_p10)  }
  0x44   : > { %694 = vmatprep.subr.bf16.mxu0 (!%p410_p10), %v1029_v35  ;;  %v1034_v38 = vld [vmem:[%s1282_s27 + $0x10] ss:$8 sps:$4 sm:$0xff] (!%p410_p10)   ;;  %v1035_v39 = vld [vmem:[%s1282_s27 + $0x24] ss:$8 sps:$4 sm:$0xff] (!%p410_p10)   ;;  %v1037_v40 = vld [vmem:[%s1282_s27 + $0x20] ss:$8 sps:$4 sm:$0xff] (!%p410_p10)  }
  0x45   : > { %695 = vmatpush1.bf16.msra.mxu0 (!%p410_p10), %v1031_v36  ;;  %v1038_v41 = vld [vmem:[%s1282_s27 + $0x34] ss:$8 sps:$4 sm:$0xff] (!%p410_p10)   ;;  %v1040_v42 = vld [vmem:[%s1282_s27 + $0x30] ss:$8 sps:$4 sm:$0xff] (!%p410_p10)   ;;  %v1041_v43 = vld [vmem:[%s1282_s27 + $0x44] ss:$8 sps:$4 sm:$0xff] (!%p410_p10)  }
  0x46   : > { %696 = vmatprep.subr.bf16.mxu0 (!%p410_p10), %v1032_v37  ;;  %v1043_v44 = vld [vmem:[%s1282_s27 + $0x40] ss:$8 sps:$4 sm:$0xff] (!%p410_p10)   ;;  %v1044_v45 = vld [vmem:[%s1282_s27 + $0x54] ss:$8 sps:$4 sm:$0xff] (!%p410_p10)   ;;  %v1046_v46 = vld [vmem:[%s1282_s27 + $0x50] ss:$8 sps:$4 sm:$0xff] (!%p410_p10)  }
  0x47   : > { %v1047_v47 = vld [vmem:[%s1282_s27 + $0x64] ss:$8 sps:$4 sm:$0xff] (!%p410_p10)   ;;  %v1049_v48 = vld [vmem:[%s1282_s27 + $0x60] ss:$8 sps:$4 sm:$0xff] (!%p410_p10)   ;;  %v1050_v49 = vld [vmem:[%s1282_s27 + $0x74] ss:$8 sps:$4 sm:$0xff] (!%p410_p10)  }
  0x48   : > { %v1052_v50 = vld [vmem:[%s1282_s27 + $0x70] ss:$8 sps:$4 sm:$0xff]   ;;  %v1053_v51 = vld [vmem:[%s1282_s27 + $0x84] ss:$8 sps:$4 sm:$0xff]   ;;  %v1055_v52 = vld [vmem:[%s1282_s27 + $0x80] ss:$8 sps:$4 sm:$0xff]  }
  0x49   : > { %697 = vmatpush1.bf16.msra.mxu0 %v1034_v38  ;;  %v1056_v53 = vld [vmem:[%s1282_s27 + $0x94] ss:$8 sps:$4 sm:$0xff]   ;;  %v1058_v54 = vld [vmem:[%s1282_s27 + $0x90] ss:$8 sps:$4 sm:$0xff]   ;;  %v1059_v55 = vld [vmem:[%s1282_s27 + $0xa4] ss:$8 sps:$4 sm:$0xff]  }
  0x4a   : > { %698 = vmatprep.subr.bf16.mxu0 %v1035_v39  ;;  %v1061_v56 = vld [vmem:[%s1282_s27 + $0xa0] ss:$8 sps:$4 sm:$0xff]   ;;  %v1062_v57 = vld [vmem:[%s1282_s27 + $0xb4] ss:$8 sps:$4 sm:$0xff]   ;;  %v1064_v58 = vld [vmem:[%s1282_s27 + $0xb0] ss:$8 sps:$4 sm:$0xff]  }
  0x4b   : > { %v1065_v59 = vld [vmem:[%s1282_s27 + $0xc4] ss:$8 sps:$4 sm:$0xff]   ;;  %v1067_v60 = vld [vmem:[%s1282_s27 + $0xc0] ss:$8 sps:$4 sm:$0xff]   ;;  %v1068_v61 = vld [vmem:[%s1282_s27 + $0xd4] ss:$8 sps:$4 sm:$0xff]  }
  0x4c   : > { %v1070_v62 = vld [vmem:[%s1282_s27 + $0xd0] ss:$8 sps:$4 sm:$0xff]   ;;  %v1071_v63 = vld [vmem:[%s1282_s27 + $0xe4] ss:$8 sps:$4 sm:$0xff]   ;;  %v1073_v0 = vld [vmem:[%s1282_s27 + $0xe0] ss:$8 sps:$4 sm:$0xff]  }
  0x4d   : > { %699 = vmatpush1.bf16.msra.mxu0 %v1037_v40  ;;  %v1074_v1 = vld [vmem:[%s1282_s27 + $0xf4] ss:$8 sps:$4 sm:$0xff]   ;;  %v1076_v2 = vld [vmem:[%s1282_s27 + $0xf0] ss:$8 sps:$4 sm:$0xff]   ;;  %s1364_s30 = smov (!%p470_p11, %s942_s30), 7  ;;  %s1322_s5 = sshll.u32 %s416_s21, 4 }
  0x4e   : > { %700 = vmatprep.subr.bf16.mxu0 %v1038_v41  ;;  %s472_s8 = scalar_lea.vmem %s1352_s2, %s1364_s30  ;;  %v516_v6 = vsub.s32 0, %v515_v5  ;;  %v520_v8 = vsub.s32 1, %v515_v5  ;;  %s425_s9 = scalar_lea.vmem [#allocation3], %s1322_s5 }
  0x4f   : > { %v512_v7 = vld [vmem:[%s472_s8] sm:$0x3]  ;;  %v738_v12 = vld [vmem:[%s425_s9 + $0x8] sm:$0xff]  ;;  %s460_s15 = scalar_lea.vmem [#allocation4], %s1322_s5  ;;  %s988_s10 = sshll.u32 (%p1184_p6), %s1110_s17, 3 }
  0x50   : > { %v737_v9 = vld [vmem:[%s425_s9] sm:$0xff]  ;;  %v517_v10 = vrot.slane %v512_v7, %v516_v6  ;;  %v521_v11 = vrot.slane %v512_v7, %v520_v8  ;;  %v741_v18 = vunpack.c.l.bf16 %v738_v12  ;;  %v742_v21 = vunpack.c.h.bf16 %v738_v12  ;;  %s777_s13 = scalar_lea.vmem (%p1184_p6), %s1354_s4, %s988_s10 }
  0x51   : > { %701 = vmatpush1.bf16.msra.mxu0 %v1040_v42  ;;  %v739_v13 = vunpack.c.l.bf16 %v737_v9  ;;  %v740_v15 = vunpack.c.h.bf16 %v737_v9 }
  0x52   : > { %702 = vmatprep.subr.bf16.mxu0 %v1041_v43 }
  0x55   : > { %703 = vmatpush1.bf16.msra.mxu0 %v1043_v44 }
  0x56   : > { %704 = vmatprep.subr.bf16.mxu0 %v1044_v45 }
  0x59   : > { %705 = vmatpush1.bf16.msra.mxu0 %v1046_v46 }
  0x5a   : > { %706 = vmatprep.subr.bf16.mxu0 %v1047_v47 }
  0x5d   : > { %707 = vmatpush1.bf16.msra.mxu0 %v1049_v48 }
  0x5e   : > { %708 = vmatprep.subr.bf16.mxu0 %v1050_v49 }
  0x61   : > { %709 = vmatpush1.bf16.msra.mxu0 %v1052_v50 }
  0x62   : > { %710 = vmatprep.subr.bf16.mxu0 %v1053_v51 }
  0x65   : > { %711 = vmatpush1.bf16.msra.mxu0 %v1055_v52 }
  0x66   : > { %712 = vmatprep.subr.bf16.mxu0 %v1056_v53 }
  0x69   : > { %713 = vmatpush1.bf16.msra.mxu0 %v1058_v54 }
  0x6a   : > { %714 = vmatprep.subr.bf16.mxu0 %v1059_v55 }
  0x6d   : > { %715 = vmatpush1.bf16.msra.mxu0 %v1061_v56 }
  0x6e   : > { %716 = vmatprep.subr.bf16.mxu0 %v1062_v57 }
  0x71   : > { %717 = vmatpush1.bf16.msra.mxu0 %v1064_v58 }
  0x72   : > { %718 = vmatprep.subr.bf16.mxu0 %v1065_v59 }
  0x75   : > { %719 = vmatpush1.bf16.msra.mxu0 %v1067_v60 }
  0x76   : > { %720 = vmatprep.subr.bf16.mxu0 %v1068_v61 }
  0x79   : > { %721 = vmatpush1.bf16.msra.mxu0 %v1070_v62 }
  0x7a   : > { %722 = vmatprep.subr.bf16.mxu0 %v1071_v63 }
  0x7d   : > { %723 = vmatpush1.bf16.msra.mxu0 %v1073_v0 }
  0x7e   : > { %724 = vmatprep.subr.bf16.mxu0 %v1074_v1 }
  0x81   : > { %725 = vmatpush1.bf16.msra.mxu0 %v1076_v2 }
  0x84   : > { %727 = vmatmul.mubr.bf16.vlgmr.msra.gmra.mrb[0].mxu0 %v1077_v3 }
 0x157   : > { %v728_v14 = vpop.f32.mrb[0].mxu0 }
 0x158   : > { %v729_v16 = vadd.f32 %v728_v14, %v517_v10  ;;  %v730_v17 = vpop.f32.mrb[1].mxu0 }
 0x159   : > { %v731_v19 = vadd.f32 %v730_v17, %v521_v11  ;;  %v732_v20 = vpop.f32.mrb[2].mxu0 }
 0x15a   : > { %v743_v22 = vadd.f32 %v739_v13, %v729_v16  ;;  %v733_v23 = vadd.f32 %v732_v20, %v517_v10  ;;  %v734_v24 = vpop.f32.mrb[3].mxu0 }
 0x15b   : > { %v744_v25 = vadd.f32 %v740_v15, %v731_v19  ;;  %v735_v26 = vadd.f32 %v734_v24, %v521_v11 }
 0x15c   : > { %v747_v27 = vmax.f32 %v743_v22, 0.0  ;;  %v745_v28 = vadd.f32 %v741_v18, %v733_v23 }
 0x15d   : > { %v748_v29 = vmax.f32 %v744_v25, 0.0  ;;  %v746_v30 = vadd.f32 %v742_v21, %v735_v26  ;;  %771 = sbr.rel (!%p1184_p6) target bundleno = 364 (0x16c), region = 116 }
 0x15e   : > { %v749_v31 = vmax.f32 %v745_v28, 0.0 }
 0x15f   : > { %v986_v32 = vpack.c.bf16 %v748_v29, %v747_v27  ;;  %v750_v33 = vmax.f32 %v746_v30, 0.0 }
 0x161   : > { %763 = vst [vmem:[%s460_s15] sm:$0xff] %v986_v32  ;;  %v987_v34 = vpack.c.bf16 %v750_v33, %v749_v31 }
 0x163   : > { %764 = vst [vmem:[%s460_s15 + $0x8] sm:$0xff] %v987_v34 }
 0x168   : > { %v807_v35 = vld [vmem:[%s460_s15] sm:$0xff] }
 0x169   : > { %808 = vst [vmem:[%s777_s13] sm:$0xff] %v807_v35 }
 0x16a   : > { %v809_v36 = vld [vmem:[%s460_s15 + $0x8] sm:$0xff] }
 0x16b   : > { %810 = vst [vmem:[%s777_s13 + $0x20] sm:$0xff] %v809_v36 }
 0x16c PF: > { %s14_s19 = sadd.s32 1, %s1118_s19   ;;  %s1357_s15 = smov %s1106_s16 }
 0x16d   : > { %p11_p12 = scmp.ge.s32.totalorder %s14_s19, 6   ;;  %s1358_s16 = smov %s1189_s26 }
 0x16e   : > { %s1359_s17 = smov %s1114_s18  ;;  %s1360_s18 = smov %s1362_s20 }
 0x16f   :  { %13 = sbr.rel (!%p11_p12) target bundleno = 3 (0x3), region = 199 }

// kernel: _lambda_.67
= control target key start
LH: loop header
LB: loop body
LE: loop exit
PB: predicated region body
PF: predicated region fallthrough
CT: control target
= control target key end

     0   :  { %s4023_s1 = inlined_call_operand.vmem [shape: bf16[2304,256], index: 1, kind: input, shape index: {}]   ;;  %s4024_s0 = inlined_call_operand.vmem [shape: bf16[16,2304], index: 0, kind: input, shape index: {}]   ;;  %s4025_s2 = inlined_call_operand.vmem [shape: f32[1,256], index: 2, kind: input, shape index: {}]   ;;  %s4026_s3 = inlined_call_operand.vmem [shape: bf16[16,256], index: 3, kind: output, shape index: {}]  }
   0x1   :  { %v2617_v0 = vld [vmem:[%s4023_s1 + $0x4] ss:$8 sps:$4 sm:$0xff]   ;;  %v2621_v2 = vld [vmem:[%s4023_s1] ss:$8 sps:$4 sm:$0xff]   ;;  %v2623_v4 = vld [vmem:[%s4023_s1 + $0x14] ss:$8 sps:$4 sm:$0xff]  }
   0x2   :  { %v2619_v1 = vld [vmem:[%s4023_s1 + $0x404] ss:$8 sps:$4 sm:$0xff]   ;;  %1862 = vmatprep.subr.bf16.mxu1 %v2617_v0  ;;  %v2622_v3 = vld [vmem:[%s4023_s1 + $0x400] ss:$8 sps:$4 sm:$0xff]   ;;  %v2625_v5 = vld [vmem:[%s4023_s1 + $0x414] ss:$8 sps:$4 sm:$0xff]  }
   0x3   :  { %2034 = vmatprep.subr.bf16.mxu0 %v2619_v1  ;;  %1863 = vmatpush1.bf16.msra.mxu1 %v2621_v2  ;;  %v2627_v6 = vld [vmem:[%s4023_s1 + $0x10] ss:$8 sps:$4 sm:$0xff]   ;;  %v2629_v8 = vld [vmem:[%s4023_s1 + $0x24] ss:$8 sps:$4 sm:$0xff]   ;;  %v2633_v10 = vld [vmem:[%s4023_s1 + $0x20] ss:$8 sps:$4 sm:$0xff]  }
   0x4   :  { %2035 = vmatpush1.bf16.msra.mxu0 %v2622_v3  ;;  %1864 = vmatprep.subr.bf16.mxu1 %v2623_v4  ;;  %v2628_v7 = vld [vmem:[%s4023_s1 + $0x410] ss:$8 sps:$4 sm:$0xff]   ;;  %v2631_v9 = vld [vmem:[%s4023_s1 + $0x424] ss:$8 sps:$4 sm:$0xff]   ;;  %v2634_v11 = vld [vmem:[%s4023_s1 + $0x420] ss:$8 sps:$4 sm:$0xff]  }
   0x5   :  { %2036 = vmatprep.subr.bf16.mxu0 %v2625_v5  ;;  %v2635_v12 = vld [vmem:[%s4023_s1 + $0x34] ss:$8 sps:$4 sm:$0xff]   ;;  %v2639_v14 = vld [vmem:[%s4023_s1 + $0x30] ss:$8 sps:$4 sm:$0xff]   ;;  %v2641_v16 = vld [vmem:[%s4023_s1 + $0x44] ss:$8 sps:$4 sm:$0xff]  }
   0x6   :  { %v2637_v13 = vld [vmem:[%s4023_s1 + $0x434] ss:$8 sps:$4 sm:$0xff]   ;;  %v2640_v15 = vld [vmem:[%s4023_s1 + $0x430] ss:$8 sps:$4 sm:$0xff]   ;;  %v2643_v17 = vld [vmem:[%s4023_s1 + $0x444] ss:$8 sps:$4 sm:$0xff]  }
   0x7   :  { %1865 = vmatpush1.bf16.msra.mxu1 %v2627_v6  ;;  %v2645_v18 = vld [vmem:[%s4023_s1 + $0x40] ss:$8 sps:$4 sm:$0xff]   ;;  %v2647_v20 = vld [vmem:[%s4023_s1 + $0x54] ss:$8 sps:$4 sm:$0xff]   ;;  %v2651_v22 = vld [vmem:[%s4023_s1 + $0x50] ss:$8 sps:$4 sm:$0xff]  }
   0x8   :  { %2037 = vmatpush1.bf16.msra.mxu0 %v2628_v7  ;;  %1866 = vmatprep.subr.bf16.mxu1 %v2629_v8  ;;  %v2646_v19 = vld [vmem:[%s4023_s1 + $0x440] ss:$8 sps:$4 sm:$0xff]   ;;  %v2649_v21 = vld [vmem:[%s4023_s1 + $0x454] ss:$8 sps:$4 sm:$0xff]   ;;  %v2652_v23 = vld [vmem:[%s4023_s1 + $0x450] ss:$8 sps:$4 sm:$0xff]  }
   0x9   :  { %2038 = vmatprep.subr.bf16.mxu0 %v2631_v9  ;;  %v2653_v24 = vld [vmem:[%s4023_s1 + $0x64] ss:$8 sps:$4 sm:$0xff]   ;;  %v2657_v26 = vld [vmem:[%s4023_s1 + $0x60] ss:$8 sps:$4 sm:$0xff]   ;;  %v2659_v28 = vld [vmem:[%s4023_s1 + $0x74] ss:$8 sps:$4 sm:$0xff]  }
   0xa   :  { %v2655_v25 = vld [vmem:[%s4023_s1 + $0x464] ss:$8 sps:$4 sm:$0xff]   ;;  %v2658_v27 = vld [vmem:[%s4023_s1 + $0x460] ss:$8 sps:$4 sm:$0xff]   ;;  %v2661_v29 = vld [vmem:[%s4023_s1 + $0x474] ss:$8 sps:$4 sm:$0xff]  }
   0xb   :  { %1867 = vmatpush1.bf16.msra.mxu1 %v2633_v10  ;;  %v2663_v30 = vld [vmem:[%s4023_s1 + $0x70] ss:$8 sps:$4 sm:$0xff]   ;;  %v2665_v32 = vld [vmem:[%s4023_s1 + $0x84] ss:$8 sps:$4 sm:$0xff]   ;;  %v2669_v34 = vld [vmem:[%s4023_s1 + $0x80] ss:$8 sps:$4 sm:$0xff]  }
   0xc   :  { %2039 = vmatpush1.bf16.msra.mxu0 %v2634_v11  ;;  %1868 = vmatprep.subr.bf16.mxu1 %v2635_v12  ;;  %v2664_v31 = vld [vmem:[%s4023_s1 + $0x470] ss:$8 sps:$4 sm:$0xff]   ;;  %v2667_v33 = vld [vmem:[%s4023_s1 + $0x484] ss:$8 sps:$4 sm:$0xff]   ;;  %v2670_v35 = vld [vmem:[%s4023_s1 + $0x480] ss:$8 sps:$4 sm:$0xff]  }
   0xd   :  { %2040 = vmatprep.subr.bf16.mxu0 %v2637_v13  ;;  %v2671_v36 = vld [vmem:[%s4023_s1 + $0x94] ss:$8 sps:$4 sm:$0xff]   ;;  %v2675_v38 = vld [vmem:[%s4023_s1 + $0x90] ss:$8 sps:$4 sm:$0xff]   ;;  %v2677_v40 = vld [vmem:[%s4023_s1 + $0xa4] ss:$8 sps:$4 sm:$0xff]  }
   0xe   :  { %v2673_v37 = vld [vmem:[%s4023_s1 + $0x494] ss:$8 sps:$4 sm:$0xff]   ;;  %v2676_v39 = vld [vmem:[%s4023_s1 + $0x490] ss:$8 sps:$4 sm:$0xff]   ;;  %v2679_v41 = vld [vmem:[%s4023_s1 + $0x4a4] ss:$8 sps:$4 sm:$0xff]  }
   0xf   :  { %1869 = vmatpush1.bf16.msra.mxu1 %v2639_v14  ;;  %v2681_v42 = vld [vmem:[%s4023_s1 + $0xa0] ss:$8 sps:$4 sm:$0xff]   ;;  %v2683_v44 = vld [vmem:[%s4023_s1 + $0xb4] ss:$8 sps:$4 sm:$0xff]   ;;  %v2687_v46 = vld [vmem:[%s4023_s1 + $0xb0] ss:$8 sps:$4 sm:$0xff]  }
  0x10   :  { %2041 = vmatpush1.bf16.msra.mxu0 %v2640_v15  ;;  %1870 = vmatprep.subr.bf16.mxu1 %v2641_v16  ;;  %v2682_v43 = vld [vmem:[%s4023_s1 + $0x4a0] ss:$8 sps:$4 sm:$0xff]   ;;  %v2685_v45 = vld [vmem:[%s4023_s1 + $0x4b4] ss:$8 sps:$4 sm:$0xff]   ;;  %v2688_v47 = vld [vmem:[%s4023_s1 + $0x4b0] ss:$8 sps:$4 sm:$0xff]  }
  0x11   :  { %2042 = vmatprep.subr.bf16.mxu0 %v2643_v17  ;;  %v2715_v48 = vld [vmem:[%s4024_s0 + $0x4] ss:$72 sps:$4 sm:$0xff]   ;;  %v2693_v52 = vld [vmem:[%s4023_s1 + $0xc0] ss:$8 sps:$4 sm:$0xff]   ;;  %v2695_v54 = vld [vmem:[%s4023_s1 + $0xd4] ss:$8 sps:$4 sm:$0xff]  }
  0x12   :  { %v2689_v49 = vld [vmem:[%s4023_s1 + $0xc4] ss:$8 sps:$4 sm:$0xff]   ;;  %1894 = vmatprep.mubr.bf16.mxu1 %v2715_v48  ;;  %v2694_v53 = vld [vmem:[%s4023_s1 + $0x4c0] ss:$8 sps:$4 sm:$0xff]   ;;  %v2697_v55 = vld [vmem:[%s4023_s1 + $0x4d4] ss:$8 sps:$4 sm:$0xff]  }
  0x13   :  { %1871 = vmatpush1.bf16.msra.mxu1 %v2645_v18  ;;  %v2691_v50 = vld [vmem:[%s4023_s1 + $0x4c4] ss:$8 sps:$4 sm:$0xff]   ;;  %v2699_v56 = vld [vmem:[%s4023_s1 + $0xd0] ss:$8 sps:$4 sm:$0xff]   ;;  %v2705_v60 = vld [vmem:[%s4023_s1 + $0xe0] ss:$8 sps:$4 sm:$0xff]  }
  0x14   :  { %2043 = vmatpush1.bf16.msra.mxu0 %v2646_v19  ;;  %1872 = vmatprep.subr.bf16.mxu1 %v2647_v20  ;;  %v2721_v51 = vld [vmem:[%s4024_s0 + $0x24] ss:$72 sps:$4 sm:$0xff]   ;;  %v2700_v57 = vld [vmem:[%s4023_s1 + $0x4d0] ss:$8 sps:$4 sm:$0xff]   ;;  %v2706_v61 = vld [vmem:[%s4023_s1 + $0x4e0] ss:$8 sps:$4 sm:$0xff]  }
  0x15   :  { %2044 = vmatprep.subr.bf16.mxu0 %v2649_v21  ;;  %2066 = vmatprep.mubr.bf16.mxu0 %v2721_v51  ;;  %v2701_v58 = vld [vmem:[%s4023_s1 + $0xe4] ss:$8 sps:$4 sm:$0xff]   ;;  %v2707_v62 = vld [vmem:[%s4023_s1 + $0xf4] ss:$8 sps:$4 sm:$0xff]   ;;  %v2711_v0 = vld [vmem:[%s4023_s1 + $0xf0] ss:$8 sps:$4 sm:$0xff]  }
  0x16   :  { %v2703_v59 = vld [vmem:[%s4023_s1 + $0x4e4] ss:$8 sps:$4 sm:$0xff]   ;;  %v2709_v63 = vld [vmem:[%s4023_s1 + $0x4f4] ss:$8 sps:$4 sm:$0xff]   ;;  %v2712_v1 = vld [vmem:[%s4023_s1 + $0x4f0] ss:$8 sps:$4 sm:$0xff]  }
  0x17   :  { %1873 = vmatpush1.bf16.msra.mxu1 %v2651_v22  ;;  %v2718_v2 = vld [vmem:[%s4023_s1 + $0x104] ss:$8 sps:$4 sm:$0xff]   ;;  %v2713_v4 = vld [vmem:[%s4024_s0] ss:$72 sps:$4 sm:$0xff]   ;;  %v2727_v8 = vld [vmem:[%s4023_s1 + $0x114] ss:$8 sps:$4 sm:$0xff]  }
  0x18   :  { %2045 = vmatpush1.bf16.msra.mxu0 %v2652_v23  ;;  %1874 = vmatprep.subr.bf16.mxu1 %v2653_v24  ;;  %v2724_v3 = vld [vmem:[%s4023_s1 + $0x504] ss:$8 sps:$4 sm:$0xff]   ;;  %v2716_v5 = vld [vmem:[%s4023_s1 + $0x100] ss:$8 sps:$4 sm:$0xff]   ;;  %v2730_v9 = vld [vmem:[%s4023_s1 + $0x514] ss:$8 sps:$4 sm:$0xff]  }
  0x19   :  { %2046 = vmatprep.subr.bf16.mxu0 %v2655_v25  ;;  %v2719_v6 = vld [vmem:[%s4024_s0 + $0x20] ss:$72 sps:$4 sm:$0xff]   ;;  %v2725_v10 = vld [vmem:[%s4023_s1 + $0x110] ss:$8 sps:$4 sm:$0xff]   ;;  %v2733_v12 = vld [vmem:[%s4023_s1 + $0x124] ss:$8 sps:$4 sm:$0xff]  }
  0x1a   :  { %v2722_v7 = vld [vmem:[%s4023_s1 + $0x500] ss:$8 sps:$4 sm:$0xff]   ;;  %v2728_v11 = vld [vmem:[%s4023_s1 + $0x510] ss:$8 sps:$4 sm:$0xff]   ;;  %v2736_v13 = vld [vmem:[%s4023_s1 + $0x524] ss:$8 sps:$4 sm:$0xff]  }
  0x1b   :  { %1875 = vmatpush1.bf16.msra.mxu1 %v2657_v26  ;;  %v2731_v14 = vld [vmem:[%s4023_s1 + $0x120] ss:$8 sps:$4 sm:$0xff]   ;;  %v2739_v16 = vld [vmem:[%s4023_s1 + $0x134] ss:$8 sps:$4 sm:$0xff]   ;;  %v2737_v18 = vld [vmem:[%s4023_s1 + $0x130] ss:$8 sps:$4 sm:$0xff]  }
  0x1c   :  { %2047 = vmatpush1.bf16.msra.mxu0 %v2658_v27  ;;  %1876 = vmatprep.subr.bf16.mxu1 %v2659_v28  ;;  %v2734_v15 = vld [vmem:[%s4023_s1 + $0x520] ss:$8 sps:$4 sm:$0xff]   ;;  %v2742_v17 = vld [vmem:[%s4023_s1 + $0x534] ss:$8 sps:$4 sm:$0xff]   ;;  %v2740_v19 = vld [vmem:[%s4023_s1 + $0x530] ss:$8 sps:$4 sm:$0xff]  }
  0x1d   :  { %2048 = vmatprep.subr.bf16.mxu0 %v2661_v29  ;;  %v2745_v20 = vld [vmem:[%s4023_s1 + $0x144] ss:$8 sps:$4 sm:$0xff]   ;;  %v2743_v22 = vld [vmem:[%s4023_s1 + $0x140] ss:$8 sps:$4 sm:$0xff]   ;;  %v2751_v24 = vld [vmem:[%s4023_s1 + $0x154] ss:$8 sps:$4 sm:$0xff]  }
  0x1e   :  { %v2748_v21 = vld [vmem:[%s4023_s1 + $0x544] ss:$8 sps:$4 sm:$0xff]   ;;  %v2746_v23 = vld [vmem:[%s4023_s1 + $0x540] ss:$8 sps:$4 sm:$0xff]   ;;  %v2754_v25 = vld [vmem:[%s4023_s1 + $0x554] ss:$8 sps:$4 sm:$0xff]  }
  0x1f   :  { %1877 = vmatpush1.bf16.msra.mxu1 %v2663_v30  ;;  %v2749_v26 = vld [vmem:[%s4023_s1 + $0x150] ss:$8 sps:$4 sm:$0xff]   ;;  %v2757_v28 = vld [vmem:[%s4023_s1 + $0x164] ss:$8 sps:$4 sm:$0xff]   ;;  %v2755_v30 = vld [vmem:[%s4023_s1 + $0x160] ss:$8 sps:$4 sm:$0xff]  }
  0x20   :  { %2049 = vmatpush1.bf16.msra.mxu0 %v2664_v31  ;;  %1878 = vmatprep.subr.bf16.mxu1 %v2665_v32  ;;  %v2752_v27 = vld [vmem:[%s4023_s1 + $0x550] ss:$8 sps:$4 sm:$0xff]   ;;  %v2760_v29 = vld [vmem:[%s4023_s1 + $0x564] ss:$8 sps:$4 sm:$0xff]   ;;  %v2758_v31 = vld [vmem:[%s4023_s1 + $0x560] ss:$8 sps:$4 sm:$0xff]  }
  0x21   :  { %2050 = vmatprep.subr.bf16.mxu0 %v2667_v33  ;;  %v2763_v32 = vld [vmem:[%s4023_s1 + $0x174] ss:$8 sps:$4 sm:$0xff]   ;;  %v2779_v48 = vld [vmem:[%s4023_s1 + $0x1a0] ss:$8 sps:$4 sm:$0xff]  }
  0x22   :  { %v2766_v33 = vld [vmem:[%s4023_s1 + $0x574] ss:$8 sps:$4 sm:$0xff]  }
  0x23   :  { %1879 = vmatpush1.bf16.msra.mxu1 %v2669_v34  ;;  %v2817_v34 = vld [vmem:[%s4024_s0 + $0xc] ss:$72 sps:$4 sm:$0xff]  }
  0x24   :  { %2051 = vmatpush1.bf16.msra.mxu0 %v2670_v35  ;;  %1880 = vmatprep.subr.bf16.mxu1 %v2671_v36  ;;  %v2761_v35 = vld [vmem:[%s4023_s1 + $0x170] ss:$8 sps:$4 sm:$0xff]   ;;  %v2790_v51 = vld [vmem:[%s4023_s1 + $0x5b4] ss:$8 sps:$4 sm:$0xff]  }
  0x25   :  { %2052 = vmatprep.subr.bf16.mxu0 %v2673_v37  ;;  %v2764_v36 = vld [vmem:[%s4023_s1 + $0x570] ss:$8 sps:$4 sm:$0xff]   ;;  %v2823_v37 = vld [vmem:[%s4024_s0 + $0x2c] ss:$72 sps:$4 sm:$0xff]  }
  0x27   :  { %1881 = vmatpush1.bf16.msra.mxu1 %v2675_v38  ;;  %v2769_v38 = vld [vmem:[%s4023_s1 + $0x184] ss:$8 sps:$4 sm:$0xff]  }
  0x28   :  { %2053 = vmatpush1.bf16.msra.mxu0 %v2676_v39  ;;  %1882 = vmatprep.subr.bf16.mxu1 %v2677_v40  ;;  %v2772_v39 = vld [vmem:[%s4023_s1 + $0x584] ss:$8 sps:$4 sm:$0xff]   ;;  %v2767_v40 = vld [vmem:[%s4023_s1 + $0x180] ss:$8 sps:$4 sm:$0xff]  }
  0x29   :  { %2054 = vmatprep.subr.bf16.mxu0 %v2679_v41  ;;  %v2770_v41 = vld [vmem:[%s4023_s1 + $0x580] ss:$8 sps:$4 sm:$0xff]  }
  0x2b   :  { %1883 = vmatpush1.bf16.msra.mxu1 %v2681_v42  ;;  %v2775_v42 = vld [vmem:[%s4023_s1 + $0x194] ss:$8 sps:$4 sm:$0xff]  }
  0x2c   :  { %2055 = vmatpush1.bf16.msra.mxu0 %v2682_v43  ;;  %1884 = vmatprep.subr.bf16.mxu1 %v2683_v44  ;;  %v2778_v43 = vld [vmem:[%s4023_s1 + $0x594] ss:$8 sps:$4 sm:$0xff]   ;;  %v2773_v44 = vld [vmem:[%s4023_s1 + $0x190] ss:$8 sps:$4 sm:$0xff]  }
  0x2d   :  { %2056 = vmatprep.subr.bf16.mxu0 %v2685_v45  ;;  %v2776_v45 = vld [vmem:[%s4023_s1 + $0x590] ss:$8 sps:$4 sm:$0xff]  }
  0x2f   :  { %1885 = vmatpush1.bf16.msra.mxu1 %v2687_v46  ;;  %v2781_v46 = vld [vmem:[%s4023_s1 + $0x1a4] ss:$8 sps:$4 sm:$0xff]  }
  0x30   :  { %2057 = vmatpush1.bf16.msra.mxu0 %v2688_v47  ;;  %1886 = vmatprep.subr.bf16.mxu1 %v2689_v49  ;;  %v2784_v47 = vld [vmem:[%s4023_s1 + $0x5a4] ss:$8 sps:$4 sm:$0xff]   ;;  %v2782_v49 = vld [vmem:[%s4023_s1 + $0x5a0] ss:$8 sps:$4 sm:$0xff]  }
  0x31   :  { %2058 = vmatprep.subr.bf16.mxu0 %v2691_v50  ;;  %v2787_v50 = vld [vmem:[%s4023_s1 + $0x1b4] ss:$8 sps:$4 sm:$0xff]  }
  0x33   :  { %1887 = vmatpush1.bf16.msra.mxu1 %v2693_v52  ;;  %v2785_v52 = vld [vmem:[%s4023_s1 + $0x1b0] ss:$8 sps:$4 sm:$0xff]  }
  0x34   :  { %2059 = vmatpush1.bf16.msra.mxu0 %v2694_v53  ;;  %1888 = vmatprep.subr.bf16.mxu1 %v2695_v54  ;;  %v2788_v53 = vld [vmem:[%s4023_s1 + $0x5b0] ss:$8 sps:$4 sm:$0xff]   ;;  %v2793_v54 = vld [vmem:[%s4023_s1 + $0x1c4] ss:$8 sps:$4 sm:$0xff]  }
  0x35   :  { %2060 = vmatprep.subr.bf16.mxu0 %v2697_v55  ;;  %v2796_v55 = vld [vmem:[%s4023_s1 + $0x5c4] ss:$8 sps:$4 sm:$0xff]  }
  0x37   :  { %1889 = vmatpush1.bf16.msra.mxu1 %v2699_v56  ;;  %v2791_v56 = vld [vmem:[%s4023_s1 + $0x1c0] ss:$8 sps:$4 sm:$0xff]  }
  0x38   :  { %2061 = vmatpush1.bf16.msra.mxu0 %v2700_v57  ;;  %1890 = vmatprep.subr.bf16.mxu1 %v2701_v58  ;;  %v2794_v57 = vld [vmem:[%s4023_s1 + $0x5c0] ss:$8 sps:$4 sm:$0xff]   ;;  %v2799_v58 = vld [vmem:[%s4023_s1 + $0x1d4] ss:$8 sps:$4 sm:$0xff]  }
  0x39   :  { %2062 = vmatprep.subr.bf16.mxu0 %v2703_v59  ;;  %v2802_v59 = vld [vmem:[%s4023_s1 + $0x5d4] ss:$8 sps:$4 sm:$0xff]  }
  0x3b   :  { %1891 = vmatpush1.bf16.msra.mxu1 %v2705_v60  ;;  %v2797_v60 = vld [vmem:[%s4023_s1 + $0x1d0] ss:$8 sps:$4 sm:$0xff]  }
  0x3c   :  { %2063 = vmatpush1.bf16.msra.mxu0 %v2706_v61  ;;  %1892 = vmatprep.subr.bf16.mxu1 %v2707_v62  ;;  %v2800_v61 = vld [vmem:[%s4023_s1 + $0x5d0] ss:$8 sps:$4 sm:$0xff]   ;;  %v2805_v62 = vld [vmem:[%s4023_s1 + $0x1e4] ss:$8 sps:$4 sm:$0xff]  }
  0x3d   :  { %2064 = vmatprep.subr.bf16.mxu0 %v2709_v63  ;;  %v2808_v63 = vld [vmem:[%s4023_s1 + $0x5e4] ss:$8 sps:$4 sm:$0xff]  }
  0x3f   :  { %1893 = vmatpush1.bf16.msra.mxu1 %v2711_v0  ;;  %v2803_v0 = vld [vmem:[%s4023_s1 + $0x1e0] ss:$8 sps:$4 sm:$0xff]  }
  0x40   :  { %2065 = vmatpush1.bf16.msra.mxu0 %v2712_v1  ;;  %1905 = vmatprep.subr.bf16.mxu1 %v2718_v2  ;;  %v2806_v1 = vld [vmem:[%s4023_s1 + $0x5e0] ss:$8 sps:$4 sm:$0xff]   ;;  %v2811_v2 = vld [vmem:[%s4023_s1 + $0x1f4] ss:$8 sps:$4 sm:$0xff]  }
  0x41   :  { %2077 = vmatprep.subr.bf16.mxu0 %v2724_v3  ;;  %v2814_v3 = vld [vmem:[%s4023_s1 + $0x5f4] ss:$8 sps:$4 sm:$0xff]  }
  0x42   :  { %1895 = vmatmul.mubr.bf16.vlgmr.msra.gmra.mrb[0].mxu1 %v2713_v4  ;;  %v2809_v4 = vld [vmem:[%s4023_s1 + $0x1f0] ss:$8 sps:$4 sm:$0xff]  }
  0x43   :  { %2067 = vmatmul.mubr.bf16.vlgmr.msra.gmra.mrb[0].mxu0 %v2719_v6  ;;  %1906 = vmatpush1.bf16.msra.mxu1 %v2716_v5  ;;  %v2812_v5 = vld [vmem:[%s4023_s1 + $0x5f0] ss:$8 sps:$4 sm:$0xff]   ;;  %v2820_v6 = vld [vmem:[%s4023_s1 + $0x204] ss:$8 sps:$4 sm:$0xff]  }
  0x44   :  { %2078 = vmatpush1.bf16.msra.mxu0 %v2722_v7  ;;  %1907 = vmatprep.subr.bf16.mxu1 %v2727_v8  ;;  %v2826_v7 = vld [vmem:[%s4023_s1 + $0x604] ss:$8 sps:$4 sm:$0xff]   ;;  %v2815_v8 = vld [vmem:[%s4024_s0 + $0x8] ss:$72 sps:$4 sm:$0xff]  }
  0x45   :  { %2079 = vmatprep.subr.bf16.mxu0 %v2730_v9  ;;  %1937 = vmatprep.mubr.bf16.mxu1 %v2817_v34  ;;  %v2818_v9 = vld [vmem:[%s4023_s1 + $0x200] ss:$8 sps:$4 sm:$0xff]   ;;  %v2859_v34 = vld [vmem:[%s4023_s1 + $0x264] ss:$8 sps:$4 sm:$0xff]  }
  0x46   :  { %2109 = vmatprep.mubr.bf16.mxu0 %v2823_v37  ;;  %v2860_v37 = vld [vmem:[%s4023_s1 + $0x660] ss:$8 sps:$4 sm:$0xff]  }
  0x47   :  { %1908 = vmatpush1.bf16.msra.mxu1 %v2725_v10  ;;  %v2821_v10 = vld [vmem:[%s4024_s0 + $0x28] ss:$72 sps:$4 sm:$0xff]  }
  0x48   :  { %2080 = vmatpush1.bf16.msra.mxu0 %v2728_v11  ;;  %1909 = vmatprep.subr.bf16.mxu1 %v2733_v12  ;;  %v2824_v11 = vld [vmem:[%s4023_s1 + $0x600] ss:$8 sps:$4 sm:$0xff]   ;;  %v2829_v12 = vld [vmem:[%s4023_s1 + $0x214] ss:$8 sps:$4 sm:$0xff]  }
  0x49   :  { %2081 = vmatprep.subr.bf16.mxu0 %v2736_v13  ;;  %v2832_v13 = vld [vmem:[%s4023_s1 + $0x614] ss:$8 sps:$4 sm:$0xff]  }
  0x4b   :  { %1910 = vmatpush1.bf16.msra.mxu1 %v2731_v14  ;;  %v2827_v14 = vld [vmem:[%s4023_s1 + $0x210] ss:$8 sps:$4 sm:$0xff]  }
  0x4c   :  { %2082 = vmatpush1.bf16.msra.mxu0 %v2734_v15  ;;  %1911 = vmatprep.subr.bf16.mxu1 %v2739_v16  ;;  %v2830_v15 = vld [vmem:[%s4023_s1 + $0x610] ss:$8 sps:$4 sm:$0xff]   ;;  %v2835_v16 = vld [vmem:[%s4023_s1 + $0x224] ss:$8 sps:$4 sm:$0xff]  }
  0x4d   :  { %2083 = vmatprep.subr.bf16.mxu0 %v2742_v17  ;;  %v2838_v17 = vld [vmem:[%s4023_s1 + $0x624] ss:$8 sps:$4 sm:$0xff]  }
  0x4f   :  { %1912 = vmatpush1.bf16.msra.mxu1 %v2737_v18  ;;  %v2833_v18 = vld [vmem:[%s4023_s1 + $0x220] ss:$8 sps:$4 sm:$0xff]  }
  0x50   :  { %2084 = vmatpush1.bf16.msra.mxu0 %v2740_v19  ;;  %1913 = vmatprep.subr.bf16.mxu1 %v2745_v20  ;;  %v2919_v19 = vld [vmem:[%s4024_s0 + $0x14] ss:$72 sps:$4 sm:$0xff]   ;;  %v2836_v20 = vld [vmem:[%s4023_s1 + $0x620] ss:$8 sps:$4 sm:$0xff]  }
  0x51   :  { %2085 = vmatprep.subr.bf16.mxu0 %v2748_v21  ;;  %v2841_v21 = vld [vmem:[%s4023_s1 + $0x234] ss:$8 sps:$4 sm:$0xff]  }
  0x53   :  { %1914 = vmatpush1.bf16.msra.mxu1 %v2743_v22  ;;  %v2844_v22 = vld [vmem:[%s4023_s1 + $0x634] ss:$8 sps:$4 sm:$0xff]  }
  0x54   :  { %2086 = vmatpush1.bf16.msra.mxu0 %v2746_v23  ;;  %1915 = vmatprep.subr.bf16.mxu1 %v2751_v24  ;;  %v2925_v23 = vld [vmem:[%s4024_s0 + $0x34] ss:$72 sps:$4 sm:$0xff]   ;;  %v2839_v24 = vld [vmem:[%s4023_s1 + $0x230] ss:$8 sps:$4 sm:$0xff]  }
  0x55   :  { %2087 = vmatprep.subr.bf16.mxu0 %v2754_v25  ;;  %v2842_v25 = vld [vmem:[%s4023_s1 + $0x630] ss:$8 sps:$4 sm:$0xff]  }
  0x57   :  { %1916 = vmatpush1.bf16.msra.mxu1 %v2749_v26  ;;  %v2847_v26 = vld [vmem:[%s4023_s1 + $0x244] ss:$8 sps:$4 sm:$0xff]  }
  0x58   :  { %2088 = vmatpush1.bf16.msra.mxu0 %v2752_v27  ;;  %1917 = vmatprep.subr.bf16.mxu1 %v2757_v28  ;;  %v2850_v27 = vld [vmem:[%s4023_s1 + $0x644] ss:$8 sps:$4 sm:$0xff]   ;;  %v2845_v28 = vld [vmem:[%s4023_s1 + $0x240] ss:$8 sps:$4 sm:$0xff]  }
  0x59   :  { %2089 = vmatprep.subr.bf16.mxu0 %v2760_v29  ;;  %v2848_v29 = vld [vmem:[%s4023_s1 + $0x640] ss:$8 sps:$4 sm:$0xff]  }
  0x5b   :  { %1918 = vmatpush1.bf16.msra.mxu1 %v2755_v30  ;;  %v2853_v30 = vld [vmem:[%s4023_s1 + $0x254] ss:$8 sps:$4 sm:$0xff]  }
  0x5c   :  { %2090 = vmatpush1.bf16.msra.mxu0 %v2758_v31  ;;  %1919 = vmatprep.subr.bf16.mxu1 %v2763_v32  ;;  %v2856_v31 = vld [vmem:[%s4023_s1 + $0x654] ss:$8 sps:$4 sm:$0xff]   ;;  %v2851_v32 = vld [vmem:[%s4023_s1 + $0x250] ss:$8 sps:$4 sm:$0xff]  }
  0x5d   :  { %2091 = vmatprep.subr.bf16.mxu0 %v2766_v33  ;;  %v2854_v33 = vld [vmem:[%s4023_s1 + $0x650] ss:$8 sps:$4 sm:$0xff]  }
  0x5f   :  { %1920 = vmatpush1.bf16.msra.mxu1 %v2761_v35  ;;  %v2862_v35 = vld [vmem:[%s4023_s1 + $0x664] ss:$8 sps:$4 sm:$0xff]  }
  0x60   :  { %2092 = vmatpush1.bf16.msra.mxu0 %v2764_v36  ;;  %1921 = vmatprep.subr.bf16.mxu1 %v2769_v38  ;;  %v2857_v36 = vld [vmem:[%s4023_s1 + $0x260] ss:$8 sps:$4 sm:$0xff]   ;;  %v2865_v38 = vld [vmem:[%s4023_s1 + $0x274] ss:$8 sps:$4 sm:$0xff]  }
  0x61   :  { %2093 = vmatprep.subr.bf16.mxu0 %v2772_v39  ;;  %v2868_v39 = vld [vmem:[%s4023_s1 + $0x674] ss:$8 sps:$4 sm:$0xff]  }
  0x63   :  { %1922 = vmatpush1.bf16.msra.mxu1 %v2767_v40  ;;  %v2863_v40 = vld [vmem:[%s4023_s1 + $0x270] ss:$8 sps:$4 sm:$0xff]  }
  0x64   :  { %2094 = vmatpush1.bf16.msra.mxu0 %v2770_v41  ;;  %1923 = vmatprep.subr.bf16.mxu1 %v2775_v42  ;;  %v2866_v41 = vld [vmem:[%s4023_s1 + $0x670] ss:$8 sps:$4 sm:$0xff]   ;;  %v2871_v42 = vld [vmem:[%s4023_s1 + $0x284] ss:$8 sps:$4 sm:$0xff]  }
  0x65   :  { %2095 = vmatprep.subr.bf16.mxu0 %v2778_v43  ;;  %v2874_v43 = vld [vmem:[%s4023_s1 + $0x684] ss:$8 sps:$4 sm:$0xff]  }
  0x67   :  { %1924 = vmatpush1.bf16.msra.mxu1 %v2773_v44  ;;  %v2869_v44 = vld [vmem:[%s4023_s1 + $0x280] ss:$8 sps:$4 sm:$0xff]  }
  0x68   :  { %2096 = vmatpush1.bf16.msra.mxu0 %v2776_v45  ;;  %1925 = vmatprep.subr.bf16.mxu1 %v2781_v46  ;;  %v2872_v45 = vld [vmem:[%s4023_s1 + $0x680] ss:$8 sps:$4 sm:$0xff]   ;;  %v2877_v46 = vld [vmem:[%s4023_s1 + $0x294] ss:$8 sps:$4 sm:$0xff]  }
  0x69   :  { %2097 = vmatprep.subr.bf16.mxu0 %v2784_v47  ;;  %v2880_v47 = vld [vmem:[%s4023_s1 + $0x694] ss:$8 sps:$4 sm:$0xff]  }
  0x6b   :  { %1926 = vmatpush1.bf16.msra.mxu1 %v2779_v48  ;;  %v2875_v48 = vld [vmem:[%s4023_s1 + $0x290] ss:$8 sps:$4 sm:$0xff]  }
  0x6c   :  { %2098 = vmatpush1.bf16.msra.mxu0 %v2782_v49  ;;  %1927 = vmatprep.subr.bf16.mxu1 %v2787_v50  ;;  %v2878_v49 = vld [vmem:[%s4023_s1 + $0x690] ss:$8 sps:$4 sm:$0xff]   ;;  %v2883_v50 = vld [vmem:[%s4023_s1 + $0x2a4] ss:$8 sps:$4 sm:$0xff]  }
  0x6d   :  { %2099 = vmatprep.subr.bf16.mxu0 %v2790_v51  ;;  %v2886_v51 = vld [vmem:[%s4023_s1 + $0x6a4] ss:$8 sps:$4 sm:$0xff]  }
  0x6f   :  { %1928 = vmatpush1.bf16.msra.mxu1 %v2785_v52  ;;  %v2881_v52 = vld [vmem:[%s4023_s1 + $0x2a0] ss:$8 sps:$4 sm:$0xff]  }
  0x70   :  { %2100 = vmatpush1.bf16.msra.mxu0 %v2788_v53  ;;  %1929 = vmatprep.subr.bf16.mxu1 %v2793_v54  ;;  %v2884_v53 = vld [vmem:[%s4023_s1 + $0x6a0] ss:$8 sps:$4 sm:$0xff]   ;;  %v2889_v54 = vld [vmem:[%s4023_s1 + $0x2b4] ss:$8 sps:$4 sm:$0xff]  }
  0x71   :  { %2101 = vmatprep.subr.bf16.mxu0 %v2796_v55  ;;  %v2892_v55 = vld [vmem:[%s4023_s1 + $0x6b4] ss:$8 sps:$4 sm:$0xff]  }
  0x73   :  { %1930 = vmatpush1.bf16.msra.mxu1 %v2791_v56  ;;  %v2887_v56 = vld [vmem:[%s4023_s1 + $0x2b0] ss:$8 sps:$4 sm:$0xff]  }
  0x74   :  { %2102 = vmatpush1.bf16.msra.mxu0 %v2794_v57  ;;  %1931 = vmatprep.subr.bf16.mxu1 %v2799_v58  ;;  %v2890_v57 = vld [vmem:[%s4023_s1 + $0x6b0] ss:$8 sps:$4 sm:$0xff]   ;;  %v2895_v58 = vld [vmem:[%s4023_s1 + $0x2c4] ss:$8 sps:$4 sm:$0xff]  }
  0x75   :  { %2103 = vmatprep.subr.bf16.mxu0 %v2802_v59  ;;  %v2898_v59 = vld [vmem:[%s4023_s1 + $0x6c4] ss:$8 sps:$4 sm:$0xff]  }
  0x77   :  { %1932 = vmatpush1.bf16.msra.mxu1 %v2797_v60  ;;  %v2893_v60 = vld [vmem:[%s4023_s1 + $0x2c0] ss:$8 sps:$4 sm:$0xff]  }
  0x78   :  { %2104 = vmatpush1.bf16.msra.mxu0 %v2800_v61  ;;  %1933 = vmatprep.subr.bf16.mxu1 %v2805_v62  ;;  %v2896_v61 = vld [vmem:[%s4023_s1 + $0x6c0] ss:$8 sps:$4 sm:$0xff]   ;;  %v2901_v62 = vld [vmem:[%s4023_s1 + $0x2d4] ss:$8 sps:$4 sm:$0xff]  }
  0x79   :  { %2105 = vmatprep.subr.bf16.mxu0 %v2808_v63  ;;  %v2904_v63 = vld [vmem:[%s4023_s1 + $0x6d4] ss:$8 sps:$4 sm:$0xff]  }
  0x7b   :  { %1934 = vmatpush1.bf16.msra.mxu1 %v2803_v0  ;;  %v2899_v0 = vld [vmem:[%s4023_s1 + $0x2d0] ss:$8 sps:$4 sm:$0xff]  }
  0x7c   :  { %2106 = vmatpush1.bf16.msra.mxu0 %v2806_v1  ;;  %1935 = vmatprep.subr.bf16.mxu1 %v2811_v2  ;;  %v2902_v1 = vld [vmem:[%s4023_s1 + $0x6d0] ss:$8 sps:$4 sm:$0xff]   ;;  %v2907_v2 = vld [vmem:[%s4023_s1 + $0x2e4] ss:$8 sps:$4 sm:$0xff]  }
  0x7d   :  { %2107 = vmatprep.subr.bf16.mxu0 %v2814_v3  ;;  %v2910_v3 = vld [vmem:[%s4023_s1 + $0x6e4] ss:$8 sps:$4 sm:$0xff]  }
  0x7f   :  { %1936 = vmatpush1.bf16.msra.mxu1 %v2809_v4  ;;  %v2905_v4 = vld [vmem:[%s4023_s1 + $0x2e0] ss:$8 sps:$4 sm:$0xff]  }
  0x80   :  { %2108 = vmatpush1.bf16.msra.mxu0 %v2812_v5  ;;  %1948 = vmatprep.subr.bf16.mxu1 %v2820_v6  ;;  %v2908_v5 = vld [vmem:[%s4023_s1 + $0x6e0] ss:$8 sps:$4 sm:$0xff]   ;;  %v2913_v6 = vld [vmem:[%s4023_s1 + $0x2f4] ss:$8 sps:$4 sm:$0xff]  }
  0x81   :  { %2120 = vmatprep.subr.bf16.mxu0 %v2826_v7  ;;  %v2916_v7 = vld [vmem:[%s4023_s1 + $0x6f4] ss:$8 sps:$4 sm:$0xff]  }
  0x82   :  { %1938 = vmatmul.mubr.bf16.vlgmr.msra.gmra.mrb[0].mxu1 %v2815_v8  ;;  %v2911_v8 = vld [vmem:[%s4023_s1 + $0x2f0] ss:$8 sps:$4 sm:$0xff]  }
  0x83   :  { %2110 = vmatmul.mubr.bf16.vlgmr.msra.gmra.mrb[0].mxu0 %v2821_v10  ;;  %1949 = vmatpush1.bf16.msra.mxu1 %v2818_v9  ;;  %v2914_v9 = vld [vmem:[%s4023_s1 + $0x6f0] ss:$8 sps:$4 sm:$0xff]   ;;  %v2922_v10 = vld [vmem:[%s4023_s1 + $0x304] ss:$8 sps:$4 sm:$0xff]  }
  0x84   :  { %2121 = vmatpush1.bf16.msra.mxu0 %v2824_v11  ;;  %1950 = vmatprep.subr.bf16.mxu1 %v2829_v12  ;;  %v2928_v11 = vld [vmem:[%s4023_s1 + $0x704] ss:$8 sps:$4 sm:$0xff]   ;;  %v2917_v12 = vld [vmem:[%s4024_s0 + $0x10] ss:$72 sps:$4 sm:$0xff]  }
  0x85   :  { %2122 = vmatprep.subr.bf16.mxu0 %v2832_v13  ;;  %1980 = vmatprep.mubr.bf16.mxu1 %v2919_v19  ;;  %v2920_v13 = vld [vmem:[%s4023_s1 + $0x300] ss:$8 sps:$4 sm:$0xff]   ;;  %v3024_v19 = vld [vmem:[%s4024_s0 + $0x3c] ss:$72 sps:$4 sm:$0xff]  }
  0x86   :  { %2152 = vmatprep.mubr.bf16.mxu0 %v2925_v23  ;;  %v2940_v23 = vld [vmem:[%s4023_s1 + $0x724] ss:$8 sps:$4 sm:$0xff]  }
  0x87   :  { %1951 = vmatpush1.bf16.msra.mxu1 %v2827_v14  ;;  %v2923_v14 = vld [vmem:[%s4024_s0 + $0x30] ss:$72 sps:$4 sm:$0xff]  }
  0x88   :  { %2123 = vmatpush1.bf16.msra.mxu0 %v2830_v15  ;;  %1952 = vmatprep.subr.bf16.mxu1 %v2835_v16  ;;  %v2926_v15 = vld [vmem:[%s4023_s1 + $0x700] ss:$8 sps:$4 sm:$0xff]   ;;  %v2931_v16 = vld [vmem:[%s4023_s1 + $0x314] ss:$8 sps:$4 sm:$0xff]  }
  0x89   :  { %2124 = vmatprep.subr.bf16.mxu0 %v2838_v17  ;;  %v2934_v17 = vld [vmem:[%s4023_s1 + $0x714] ss:$8 sps:$4 sm:$0xff]  }
  0x8b   :  { %1953 = vmatpush1.bf16.msra.mxu1 %v2833_v18  ;;  %v3021_v18 = vld [vmem:[%s4024_s0 + $0x1c] ss:$72 sps:$4 sm:$0xff]  }
  0x8c   :  { %2125 = vmatpush1.bf16.msra.mxu0 %v2836_v20  ;;  %1954 = vmatprep.subr.bf16.mxu1 %v2841_v21  ;;  %v2929_v20 = vld [vmem:[%s4023_s1 + $0x310] ss:$8 sps:$4 sm:$0xff]  }
  0x8d   :  { %2126 = vmatprep.subr.bf16.mxu0 %v2844_v22  ;;  %v2932_v21 = vld [vmem:[%s4023_s1 + $0x710] ss:$8 sps:$4 sm:$0xff]   ;;  %v2937_v22 = vld [vmem:[%s4023_s1 + $0x324] ss:$8 sps:$4 sm:$0xff]  }
  0x8f   :  { %1955 = vmatpush1.bf16.msra.mxu1 %v2839_v24  ;;  %v2935_v24 = vld [vmem:[%s4023_s1 + $0x320] ss:$8 sps:$4 sm:$0xff]  }
  0x90   :  { %2127 = vmatpush1.bf16.msra.mxu0 %v2842_v25  ;;  %1956 = vmatprep.subr.bf16.mxu1 %v2847_v26  ;;  %v2938_v25 = vld [vmem:[%s4023_s1 + $0x720] ss:$8 sps:$4 sm:$0xff]   ;;  %v2943_v26 = vld [vmem:[%s4023_s1 + $0x334] ss:$8 sps:$4 sm:$0xff]  }
  0x91   :  { %2128 = vmatprep.subr.bf16.mxu0 %v2850_v27  ;;  %v2946_v27 = vld [vmem:[%s4023_s1 + $0x734] ss:$8 sps:$4 sm:$0xff]  }
  0x93   :  { %1957 = vmatpush1.bf16.msra.mxu1 %v2845_v28  ;;  %v2941_v28 = vld [vmem:[%s4023_s1 + $0x330] ss:$8 sps:$4 sm:$0xff]  }
  0x94   :  { %2129 = vmatpush1.bf16.msra.mxu0 %v2848_v29  ;;  %1958 = vmatprep.subr.bf16.mxu1 %v2853_v30  ;;  %v2944_v29 = vld [vmem:[%s4023_s1 + $0x730] ss:$8 sps:$4 sm:$0xff]   ;;  %v2949_v30 = vld [vmem:[%s4023_s1 + $0x344] ss:$8 sps:$4 sm:$0xff]  }
  0x95   :  { %2130 = vmatprep.subr.bf16.mxu0 %v2856_v31  ;;  %v2952_v31 = vld [vmem:[%s4023_s1 + $0x744] ss:$8 sps:$4 sm:$0xff]  }
  0x97   :  { %1959 = vmatpush1.bf16.msra.mxu1 %v2851_v32  ;;  %v2947_v32 = vld [vmem:[%s4023_s1 + $0x340] ss:$8 sps:$4 sm:$0xff]  }
  0x98   :  { %2131 = vmatpush1.bf16.msra.mxu0 %v2854_v33  ;;  %1960 = vmatprep.subr.bf16.mxu1 %v2859_v34  ;;  %v2950_v33 = vld [vmem:[%s4023_s1 + $0x740] ss:$8 sps:$4 sm:$0xff]   ;;  %v2955_v34 = vld [vmem:[%s4023_s1 + $0x354] ss:$8 sps:$4 sm:$0xff]  }
  0x99   :  { %2132 = vmatprep.subr.bf16.mxu0 %v2862_v35  ;;  %v2958_v35 = vld [vmem:[%s4023_s1 + $0x754] ss:$8 sps:$4 sm:$0xff]  }
  0x9b   :  { %1961 = vmatpush1.bf16.msra.mxu1 %v2857_v36  ;;  %v2953_v36 = vld [vmem:[%s4023_s1 + $0x350] ss:$8 sps:$4 sm:$0xff]  }
  0x9c   :  { %2133 = vmatpush1.bf16.msra.mxu0 %v2860_v37  ;;  %1962 = vmatprep.subr.bf16.mxu1 %v2865_v38  ;;  %v2956_v37 = vld [vmem:[%s4023_s1 + $0x750] ss:$8 sps:$4 sm:$0xff]   ;;  %v2961_v38 = vld [vmem:[%s4023_s1 + $0x364] ss:$8 sps:$4 sm:$0xff]  }
  0x9d   :  { %2134 = vmatprep.subr.bf16.mxu0 %v2868_v39  ;;  %v2964_v39 = vld [vmem:[%s4023_s1 + $0x764] ss:$8 sps:$4 sm:$0xff]  }
  0x9f   :  { %1963 = vmatpush1.bf16.msra.mxu1 %v2863_v40  ;;  %v2959_v40 = vld [vmem:[%s4023_s1 + $0x360] ss:$8 sps:$4 sm:$0xff]  }
  0xa0   :  { %2135 = vmatpush1.bf16.msra.mxu0 %v2866_v41  ;;  %1964 = vmatprep.subr.bf16.mxu1 %v2871_v42  ;;  %v2962_v41 = vld [vmem:[%s4023_s1 + $0x760] ss:$8 sps:$4 sm:$0xff]   ;;  %v2967_v42 = vld [vmem:[%s4023_s1 + $0x374] ss:$8 sps:$4 sm:$0xff]  }
  0xa1   :  { %2136 = vmatprep.subr.bf16.mxu0 %v2874_v43  ;;  %v2970_v43 = vld [vmem:[%s4023_s1 + $0x774] ss:$8 sps:$4 sm:$0xff]  }
  0xa3   :  { %1965 = vmatpush1.bf16.msra.mxu1 %v2869_v44  ;;  %v2965_v44 = vld [vmem:[%s4023_s1 + $0x370] ss:$8 sps:$4 sm:$0xff]  }
  0xa4   :  { %2137 = vmatpush1.bf16.msra.mxu0 %v2872_v45  ;;  %1966 = vmatprep.subr.bf16.mxu1 %v2877_v46  ;;  %v2968_v45 = vld [vmem:[%s4023_s1 + $0x770] ss:$8 sps:$4 sm:$0xff]   ;;  %v2973_v46 = vld [vmem:[%s4023_s1 + $0x384] ss:$8 sps:$4 sm:$0xff]  }
  0xa5   :  { %2138 = vmatprep.subr.bf16.mxu0 %v2880_v47  ;;  %v2976_v47 = vld [vmem:[%s4023_s1 + $0x784] ss:$8 sps:$4 sm:$0xff]  }
  0xa7   :  { %1967 = vmatpush1.bf16.msra.mxu1 %v2875_v48  ;;  %v2971_v48 = vld [vmem:[%s4023_s1 + $0x380] ss:$8 sps:$4 sm:$0xff]  }
  0xa8   :  { %2139 = vmatpush1.bf16.msra.mxu0 %v2878_v49  ;;  %1968 = vmatprep.subr.bf16.mxu1 %v2883_v50  ;;  %v2974_v49 = vld [vmem:[%s4023_s1 + $0x780] ss:$8 sps:$4 sm:$0xff]   ;;  %v2979_v50 = vld [vmem:[%s4023_s1 + $0x394] ss:$8 sps:$4 sm:$0xff]  }
  0xa9   :  { %2140 = vmatprep.subr.bf16.mxu0 %v2886_v51  ;;  %v2982_v51 = vld [vmem:[%s4023_s1 + $0x794] ss:$8 sps:$4 sm:$0xff]  }
  0xab   :  { %1969 = vmatpush1.bf16.msra.mxu1 %v2881_v52  ;;  %v2977_v52 = vld [vmem:[%s4023_s1 + $0x390] ss:$8 sps:$4 sm:$0xff]  }
  0xac   :  { %2141 = vmatpush1.bf16.msra.mxu0 %v2884_v53  ;;  %1970 = vmatprep.subr.bf16.mxu1 %v2889_v54  ;;  %v2980_v53 = vld [vmem:[%s4023_s1 + $0x790] ss:$8 sps:$4 sm:$0xff]   ;;  %v2985_v54 = vld [vmem:[%s4023_s1 + $0x3a4] ss:$8 sps:$4 sm:$0xff]  }
  0xad   :  { %2142 = vmatprep.subr.bf16.mxu0 %v2892_v55  ;;  %v2988_v55 = vld [vmem:[%s4023_s1 + $0x7a4] ss:$8 sps:$4 sm:$0xff]  }
  0xaf   :  { %1971 = vmatpush1.bf16.msra.mxu1 %v2887_v56  ;;  %v2983_v56 = vld [vmem:[%s4023_s1 + $0x3a0] ss:$8 sps:$4 sm:$0xff]  }
  0xb0   :  { %2143 = vmatpush1.bf16.msra.mxu0 %v2890_v57  ;;  %1972 = vmatprep.subr.bf16.mxu1 %v2895_v58  ;;  %v2986_v57 = vld [vmem:[%s4023_s1 + $0x7a0] ss:$8 sps:$4 sm:$0xff]   ;;  %v2991_v58 = vld [vmem:[%s4023_s1 + $0x3b4] ss:$8 sps:$4 sm:$0xff]  }
  0xb1   :  { %2144 = vmatprep.subr.bf16.mxu0 %v2898_v59  ;;  %v2994_v59 = vld [vmem:[%s4023_s1 + $0x7b4] ss:$8 sps:$4 sm:$0xff]  }
  0xb3   :  { %1973 = vmatpush1.bf16.msra.mxu1 %v2893_v60  ;;  %v2989_v60 = vld [vmem:[%s4023_s1 + $0x3b0] ss:$8 sps:$4 sm:$0xff]  }
  0xb4   :  { %2145 = vmatpush1.bf16.msra.mxu0 %v2896_v61  ;;  %1974 = vmatprep.subr.bf16.mxu1 %v2901_v62  ;;  %v2992_v61 = vld [vmem:[%s4023_s1 + $0x7b0] ss:$8 sps:$4 sm:$0xff]   ;;  %v2997_v62 = vld [vmem:[%s4023_s1 + $0x3c4] ss:$8 sps:$4 sm:$0xff]  }
  0xb5   :  { %2146 = vmatprep.subr.bf16.mxu0 %v2904_v63  ;;  %v3000_v63 = vld [vmem:[%s4023_s1 + $0x7c4] ss:$8 sps:$4 sm:$0xff]  }
  0xb7   :  { %1975 = vmatpush1.bf16.msra.mxu1 %v2899_v0  ;;  %v2995_v0 = vld [vmem:[%s4023_s1 + $0x3c0] ss:$8 sps:$4 sm:$0xff]  }
  0xb8   :  { %2147 = vmatpush1.bf16.msra.mxu0 %v2902_v1  ;;  %1976 = vmatprep.subr.bf16.mxu1 %v2907_v2  ;;  %v2998_v1 = vld [vmem:[%s4023_s1 + $0x7c0] ss:$8 sps:$4 sm:$0xff]   ;;  %v3003_v2 = vld [vmem:[%s4023_s1 + $0x3d4] ss:$8 sps:$4 sm:$0xff]  }
  0xb9   :  { %2148 = vmatprep.subr.bf16.mxu0 %v2910_v3  ;;  %v3006_v3 = vld [vmem:[%s4023_s1 + $0x7d4] ss:$8 sps:$4 sm:$0xff]  }
  0xbb   :  { %1977 = vmatpush1.bf16.msra.mxu1 %v2905_v4  ;;  %v3001_v4 = vld [vmem:[%s4023_s1 + $0x3d0] ss:$8 sps:$4 sm:$0xff]  }
  0xbc   :  { %2149 = vmatpush1.bf16.msra.mxu0 %v2908_v5  ;;  %1978 = vmatprep.subr.bf16.mxu1 %v2913_v6  ;;  %v3004_v5 = vld [vmem:[%s4023_s1 + $0x7d0] ss:$8 sps:$4 sm:$0xff]   ;;  %v3009_v6 = vld [vmem:[%s4023_s1 + $0x3e4] ss:$8 sps:$4 sm:$0xff]  }
  0xbd   :  { %2150 = vmatprep.subr.bf16.mxu0 %v2916_v7  ;;  %v3012_v7 = vld [vmem:[%s4023_s1 + $0x7e4] ss:$8 sps:$4 sm:$0xff]  }
  0xbf   :  { %1979 = vmatpush1.bf16.msra.mxu1 %v2911_v8  ;;  %v3007_v8 = vld [vmem:[%s4023_s1 + $0x3e0] ss:$8 sps:$4 sm:$0xff]  }
  0xc0   :  { %2151 = vmatpush1.bf16.msra.mxu0 %v2914_v9  ;;  %1991 = vmatprep.subr.bf16.mxu1 %v2922_v10  ;;  %v3010_v9 = vld [vmem:[%s4023_s1 + $0x7e0] ss:$8 sps:$4 sm:$0xff]   ;;  %v3015_v10 = vld [vmem:[%s4023_s1 + $0x3f4] ss:$8 sps:$4 sm:$0xff]  }
  0xc1   :  { %2163 = vmatprep.subr.bf16.mxu0 %v2928_v11  ;;  %v3018_v11 = vld [vmem:[%s4023_s1 + $0x7f4] ss:$8 sps:$4 sm:$0xff]  }
  0xc2   :  { %1981 = vmatmul.mubr.bf16.vlgmr.msra.gmra.mrb[0].mxu1 %v2917_v12  ;;  %v3013_v12 = vld [vmem:[%s4023_s1 + $0x3f0] ss:$8 sps:$4 sm:$0xff]  }
  0xc3   :  { %2153 = vmatmul.mubr.bf16.vlgmr.msra.gmra.mrb[0].mxu0 %v2923_v14  ;;  %1992 = vmatpush1.bf16.msra.mxu1 %v2920_v13  ;;  %v3016_v13 = vld [vmem:[%s4023_s1 + $0x7f0] ss:$8 sps:$4 sm:$0xff]   ;;  %v3027_v14 = vld [vmem:[%s4023_s1 + $0x804] ss:$8 sps:$4 sm:$0xff]  }
  0xc4   :  { %2164 = vmatpush1.bf16.msra.mxu0 %v2926_v15  ;;  %1993 = vmatprep.subr.bf16.mxu1 %v2931_v16  ;;  %v3019_v15 = vld [vmem:[%s4024_s0 + $0x18] ss:$72 sps:$4 sm:$0xff]  }
  0xc5   :  { %2165 = vmatprep.subr.bf16.mxu0 %v2934_v17  ;;  %2023 = vmatprep.mubr.bf16.mxu1 %v3021_v18  ;;  %v3022_v16 = vld [vmem:[%s4024_s0 + $0x38] ss:$72 sps:$4 sm:$0xff]   ;;  %v3075_v18 = vld [vmem:[%s4024_s0 + $0x44] ss:$72 sps:$4 sm:$0xff]  }
  0xc6   :  { %2195 = vmatprep.mubr.bf16.mxu0 %v3024_v19  ;;  %v3025_v17 = vld [vmem:[%s4023_s1 + $0x800] ss:$8 sps:$4 sm:$0xff]   ;;  %v3030_v19 = vld [vmem:[%s4023_s1 + $0x814] ss:$8 sps:$4 sm:$0xff]  }
  0xc7   :  { %1994 = vmatpush1.bf16.msra.mxu1 %v2929_v20  ;;  %v3028_v20 = vld [vmem:[%s4023_s1 + $0x810] ss:$8 sps:$4 sm:$0xff]  }
  0xc8   :  { %2166 = vmatpush1.bf16.msra.mxu0 %v2932_v21  ;;  %1995 = vmatprep.subr.bf16.mxu1 %v2937_v22  ;;  %v3033_v21 = vld [vmem:[%s4023_s1 + $0x824] ss:$8 sps:$4 sm:$0xff]   ;;  %v3031_v22 = vld [vmem:[%s4023_s1 + $0x820] ss:$8 sps:$4 sm:$0xff]  }
  0xc9   :  { %2167 = vmatprep.subr.bf16.mxu0 %v2940_v23  ;;  %v3036_v23 = vld [vmem:[%s4023_s1 + $0x834] ss:$8 sps:$4 sm:$0xff]  }
  0xcb   :  { %1996 = vmatpush1.bf16.msra.mxu1 %v2935_v24  ;;  %v3034_v24 = vld [vmem:[%s4023_s1 + $0x830] ss:$8 sps:$4 sm:$0xff]  }
  0xcc   :  { %2168 = vmatpush1.bf16.msra.mxu0 %v2938_v25  ;;  %1997 = vmatprep.subr.bf16.mxu1 %v2943_v26  ;;  %v3039_v25 = vld [vmem:[%s4023_s1 + $0x844] ss:$8 sps:$4 sm:$0xff]   ;;  %v3037_v26 = vld [vmem:[%s4023_s1 + $0x840] ss:$8 sps:$4 sm:$0xff]  }
  0xcd   :  { %2169 = vmatprep.subr.bf16.mxu0 %v2946_v27  ;;  %v3042_v27 = vld [vmem:[%s4023_s1 + $0x854] ss:$8 sps:$4 sm:$0xff]  }
  0xcf   :  { %1998 = vmatpush1.bf16.msra.mxu1 %v2941_v28  ;;  %v3040_v28 = vld [vmem:[%s4023_s1 + $0x850] ss:$8 sps:$4 sm:$0xff]  }
  0xd0   :  { %2170 = vmatpush1.bf16.msra.mxu0 %v2944_v29  ;;  %1999 = vmatprep.subr.bf16.mxu1 %v2949_v30  ;;  %v3045_v29 = vld [vmem:[%s4023_s1 + $0x864] ss:$8 sps:$4 sm:$0xff]   ;;  %v3043_v30 = vld [vmem:[%s4023_s1 + $0x860] ss:$8 sps:$4 sm:$0xff]  }
  0xd1   :  { %2171 = vmatprep.subr.bf16.mxu0 %v2952_v31  ;;  %v3048_v31 = vld [vmem:[%s4023_s1 + $0x874] ss:$8 sps:$4 sm:$0xff]  }
  0xd3   :  { %2000 = vmatpush1.bf16.msra.mxu1 %v2947_v32  ;;  %v3046_v32 = vld [vmem:[%s4023_s1 + $0x870] ss:$8 sps:$4 sm:$0xff]  }
  0xd4   :  { %2172 = vmatpush1.bf16.msra.mxu0 %v2950_v33  ;;  %2001 = vmatprep.subr.bf16.mxu1 %v2955_v34  ;;  %v3051_v33 = vld [vmem:[%s4023_s1 + $0x884] ss:$8 sps:$4 sm:$0xff]   ;;  %v3049_v34 = vld [vmem:[%s4023_s1 + $0x880] ss:$8 sps:$4 sm:$0xff]  }
  0xd5   :  { %2173 = vmatprep.subr.bf16.mxu0 %v2958_v35  ;;  %v3054_v35 = vld [vmem:[%s4023_s1 + $0x894] ss:$8 sps:$4 sm:$0xff]  }
  0xd7   :  { %2002 = vmatpush1.bf16.msra.mxu1 %v2953_v36  ;;  %v3052_v36 = vld [vmem:[%s4023_s1 + $0x890] ss:$8 sps:$4 sm:$0xff]  }
  0xd8   :  { %2174 = vmatpush1.bf16.msra.mxu0 %v2956_v37  ;;  %2003 = vmatprep.subr.bf16.mxu1 %v2961_v38  ;;  %v3057_v37 = vld [vmem:[%s4023_s1 + $0x8a4] ss:$8 sps:$4 sm:$0xff]   ;;  %v3055_v38 = vld [vmem:[%s4023_s1 + $0x8a0] ss:$8 sps:$4 sm:$0xff]  }
  0xd9   :  { %2175 = vmatprep.subr.bf16.mxu0 %v2964_v39  ;;  %v3060_v39 = vld [vmem:[%s4023_s1 + $0x8b4] ss:$8 sps:$4 sm:$0xff]  }
  0xdb   :  { %2004 = vmatpush1.bf16.msra.mxu1 %v2959_v40  ;;  %v3058_v40 = vld [vmem:[%s4023_s1 + $0x8b0] ss:$8 sps:$4 sm:$0xff]  }
  0xdc   :  { %2176 = vmatpush1.bf16.msra.mxu0 %v2962_v41  ;;  %2005 = vmatprep.subr.bf16.mxu1 %v2967_v42  ;;  %v3063_v41 = vld [vmem:[%s4023_s1 + $0x8c4] ss:$8 sps:$4 sm:$0xff]   ;;  %v3061_v42 = vld [vmem:[%s4023_s1 + $0x8c0] ss:$8 sps:$4 sm:$0xff]  }
  0xdd   :  { %2177 = vmatprep.subr.bf16.mxu0 %v2970_v43  ;;  %v3066_v43 = vld [vmem:[%s4023_s1 + $0x8d4] ss:$8 sps:$4 sm:$0xff]  }
  0xdf   :  { %2006 = vmatpush1.bf16.msra.mxu1 %v2965_v44  ;;  %v3064_v44 = vld [vmem:[%s4023_s1 + $0x8d0] ss:$8 sps:$4 sm:$0xff]  }
  0xe0   :  { %2178 = vmatpush1.bf16.msra.mxu0 %v2968_v45  ;;  %2007 = vmatprep.subr.bf16.mxu1 %v2973_v46  ;;  %v3069_v45 = vld [vmem:[%s4023_s1 + $0x8e4] ss:$8 sps:$4 sm:$0xff]   ;;  %v3067_v46 = vld [vmem:[%s4023_s1 + $0x8e0] ss:$8 sps:$4 sm:$0xff]  }
  0xe1   :  { %2179 = vmatprep.subr.bf16.mxu0 %v2976_v47  ;;  %v3072_v47 = vld [vmem:[%s4023_s1 + $0x8f4] ss:$8 sps:$4 sm:$0xff]  }
  0xe3   :  { %2008 = vmatpush1.bf16.msra.mxu1 %v2971_v48  ;;  %v3070_v48 = vld [vmem:[%s4023_s1 + $0x8f0] ss:$8 sps:$4 sm:$0xff]  }
  0xe4   :  { %2180 = vmatpush1.bf16.msra.mxu0 %v2974_v49  ;;  %2009 = vmatprep.subr.bf16.mxu1 %v2979_v50  ;;  %v3073_v49 = vld [vmem:[%s4024_s0 + $0x40] ss:$72 sps:$4 sm:$0xff]  }
  0xe5   :  { %2181 = vmatprep.subr.bf16.mxu0 %v2982_v51 }
  0xe7   :  { %2010 = vmatpush1.bf16.msra.mxu1 %v2977_v52 }
  0xe8   :  { %2182 = vmatpush1.bf16.msra.mxu0 %v2980_v53  ;;  %2011 = vmatprep.subr.bf16.mxu1 %v2985_v54  ;;  %v322_v54 = vlaneseq }
  0xe9   :  { %2183 = vmatprep.subr.bf16.mxu0 %v2988_v55 }
  0xea   :  { %v323_v55 = vshrl.u32 %v322_v54, 7 }
  0xeb   :  { %2012 = vmatpush1.bf16.msra.mxu1 %v2983_v56 }
  0xec   :  { %2184 = vmatpush1.bf16.msra.mxu0 %v2986_v57  ;;  %2013 = vmatprep.subr.bf16.mxu1 %v2991_v58  ;;  %v324_v56 = vsub.s32 0, %v323_v55  ;;  %v320_v57 = vld [vmem:[%s4025_s2] sm:$0x3]  ;;  %v328_v58 = vsub.s32 1, %v323_v55 }
  0xed   :  { %2185 = vmatprep.subr.bf16.mxu0 %v2994_v59 }
  0xee   :  { %v325_v59 = vrot.slane %v320_v57, %v324_v56 }
  0xef   :  { %2014 = vmatpush1.bf16.msra.mxu1 %v2989_v60  ;;  %v329_v60 = vrot.slane %v320_v57, %v328_v58 }
  0xf0   :  { %2186 = vmatpush1.bf16.msra.mxu0 %v2992_v61  ;;  %2015 = vmatprep.subr.bf16.mxu1 %v2997_v62 }
  0xf1   :  { %2187 = vmatprep.subr.bf16.mxu0 %v3000_v63 }
  0xf3   :  { %2016 = vmatpush1.bf16.msra.mxu1 %v2995_v0 }
  0xf4   :  { %2188 = vmatpush1.bf16.msra.mxu0 %v2998_v1  ;;  %2017 = vmatprep.subr.bf16.mxu1 %v3003_v2 }
  0xf5   :  { %2189 = vmatprep.subr.bf16.mxu0 %v3006_v3 }
  0xf7   :  { %2018 = vmatpush1.bf16.msra.mxu1 %v3001_v4 }
  0xf8   :  { %2190 = vmatpush1.bf16.msra.mxu0 %v3004_v5  ;;  %2019 = vmatprep.subr.bf16.mxu1 %v3009_v6 }
  0xf9   :  { %2191 = vmatprep.subr.bf16.mxu0 %v3012_v7 }
  0xfb   :  { %2020 = vmatpush1.bf16.msra.mxu1 %v3007_v8 }
  0xfc   :  { %2192 = vmatpush1.bf16.msra.mxu0 %v3010_v9  ;;  %2021 = vmatprep.subr.bf16.mxu1 %v3015_v10 }
  0xfd   :  { %2193 = vmatprep.subr.bf16.mxu0 %v3018_v11 }
  0xff   :  { %2022 = vmatpush1.bf16.msra.mxu1 %v3013_v12 }
 0x100   :  { %2194 = vmatpush1.bf16.msra.mxu0 %v3016_v13 }
 0x101   :  { %2206 = vmatprep.subr.bf16.mxu0 %v3027_v14 }
 0x102   :  { %2024 = vmatmul.mubr.bf16.vlgmr.msra.gmra.mrb[0].mxu1 %v3019_v15 }
 0x103   :  { %2196 = vmatmul.mubr.bf16.vlgmr.msra.gmra.mrb[0].mxu0 %v3022_v16 }
 0x104   :  { %2207 = vmatpush1.bf16.msra.mxu0 %v3025_v17  ;;  %2238 = vmatprep.mubr.bf16.mxu0 %v3075_v18 }
 0x105   :  { %2208 = vmatprep.subr.bf16.mxu0 %v3030_v19 }
 0x108   :  { %2209 = vmatpush1.bf16.msra.mxu0 %v3028_v20 }
 0x109   :  { %2210 = vmatprep.subr.bf16.mxu0 %v3033_v21 }
 0x10c   :  { %2211 = vmatpush1.bf16.msra.mxu0 %v3031_v22 }
 0x10d   :  { %2212 = vmatprep.subr.bf16.mxu0 %v3036_v23 }
 0x110   :  { %2213 = vmatpush1.bf16.msra.mxu0 %v3034_v24 }
 0x111   :  { %2214 = vmatprep.subr.bf16.mxu0 %v3039_v25 }
 0x114   :  { %2215 = vmatpush1.bf16.msra.mxu0 %v3037_v26 }
 0x115   :  { %2216 = vmatprep.subr.bf16.mxu0 %v3042_v27 }
 0x118   :  { %2217 = vmatpush1.bf16.msra.mxu0 %v3040_v28 }
 0x119   :  { %2218 = vmatprep.subr.bf16.mxu0 %v3045_v29 }
 0x11c   :  { %2219 = vmatpush1.bf16.msra.mxu0 %v3043_v30 }
 0x11d   :  { %2220 = vmatprep.subr.bf16.mxu0 %v3048_v31 }
 0x120   :  { %2221 = vmatpush1.bf16.msra.mxu0 %v3046_v32 }
 0x121   :  { %2222 = vmatprep.subr.bf16.mxu0 %v3051_v33 }
 0x124   :  { %2223 = vmatpush1.bf16.msra.mxu0 %v3049_v34 }
 0x125   :  { %2224 = vmatprep.subr.bf16.mxu0 %v3054_v35 }
 0x128   :  { %2225 = vmatpush1.bf16.msra.mxu0 %v3052_v36 }
 0x129   :  { %2226 = vmatprep.subr.bf16.mxu0 %v3057_v37 }
 0x12c   :  { %2227 = vmatpush1.bf16.msra.mxu0 %v3055_v38 }
 0x12d   :  { %2228 = vmatprep.subr.bf16.mxu0 %v3060_v39 }
 0x130   :  { %2229 = vmatpush1.bf16.msra.mxu0 %v3058_v40 }
 0x131   :  { %2230 = vmatprep.subr.bf16.mxu0 %v3063_v41 }
 0x134   :  { %2231 = vmatpush1.bf16.msra.mxu0 %v3061_v42 }
 0x135   :  { %2232 = vmatprep.subr.bf16.mxu0 %v3066_v43 }
 0x138   :  { %2233 = vmatpush1.bf16.msra.mxu0 %v3064_v44 }
 0x139   :  { %2234 = vmatprep.subr.bf16.mxu0 %v3069_v45 }
 0x13c   :  { %2235 = vmatpush1.bf16.msra.mxu0 %v3067_v46 }
 0x13d   :  { %2236 = vmatprep.subr.bf16.mxu0 %v3072_v47 }
 0x140   :  { %2237 = vmatpush1.bf16.msra.mxu0 %v3070_v48 }
 0x143   :  { %2239 = vmatmul.mubr.bf16.vlgmr.msra.gmra.mrb[0].mxu0 %v3073_v49 }
 0x1d5   :  { %v2025_v50 = vpop.f32.mrb[0].mxu1 }
 0x1d6   :  { %v2027_v51 = vpop.f32.mrb[1].mxu1  ;;  %v2581_v61 = vadd.f32 %v2025_v50, %v325_v59 }
 0x1d7   :  { %v2029_v52 = vpop.f32.mrb[2].mxu1  ;;  %v2583_v62 = vadd.f32 %v2027_v51, %v329_v60 }
 0x1d8   :  { %v2031_v53 = vpop.f32.mrb[3].mxu1  ;;  %v2585_v0 = vadd.f32 %v2029_v52, %v325_v59 }
 0x1d9   :  { %v2587_v3 = vadd.f32 %v2031_v53, %v329_v60 }
 0x216   :  { %v2240_v63 = vpop.f32.mrb[0].mxu0 }
 0x217   :  { %v2582_v1 = vadd.f32 %v2581_v61, %v2240_v63  ;;  %v2242_v2 = vpop.f32.mrb[1].mxu0 }
 0x218   :  { %v2584_v4 = vadd.f32 %v2583_v62, %v2242_v2  ;;  %v2244_v5 = vpop.f32.mrb[2].mxu0 }
 0x219   :  { %v2249_v6 = vmax.f32 %v2582_v1, 0.0  ;;  %v2586_v7 = vadd.f32 %v2585_v0, %v2244_v5  ;;  %v2246_v8 = vpop.f32.mrb[3].mxu0 }
 0x21a   :  { %v2250_v9 = vmax.f32 %v2584_v4, 0.0  ;;  %v2588_v10 = vadd.f32 %v2587_v3, %v2246_v8 }
 0x21b   :  { %v2251_v11 = vmax.f32 %v2586_v7, 0.0 }
 0x21c   :  { %v2579_v12 = vpack.c.bf16 %v2250_v9, %v2249_v6  ;;  %v2252_v13 = vmax.f32 %v2588_v10, 0.0 }
 0x21e   :  { %2265 = vst [vmem:[%s4026_s3] sm:$0xff] %v2579_v12  ;;  %v2580_v14 = vpack.c.bf16 %v2252_v13, %v2251_v11 }
 0x220   :  { %2266 = vst [vmem:[%s4026_s3 + $0x8] sm:$0xff] %v2580_v14 }

// kernel: _lambda_.69
= control target key start
LH: loop header
LB: loop body
LE: loop exit
PB: predicated region body
PF: predicated region fallthrough
CT: control target
= control target key end

     0   :  { %s1837_s1 = inlined_call_operand.vmem [shape: bf16[1024,256], index: 1, kind: input, shape index: {}]   ;;  %s1838_s0 = inlined_call_operand.vmem [shape: bf16[16,1024], index: 0, kind: input, shape index: {}]   ;;  %s1839_s2 = inlined_call_operand.vmem [shape: f32[1,256], index: 2, kind: input, shape index: {}]   ;;  %s1840_s3 = inlined_call_operand.vmem [shape: bf16[16,256], index: 3, kind: output, shape index: {}]  }
   0x1   :  { %v1192_v0 = vld [vmem:[%s1837_s1 + $0x4] ss:$8 sps:$4 sm:$0xff]   ;;  %v1196_v2 = vld [vmem:[%s1837_s1] ss:$8 sps:$4 sm:$0xff]   ;;  %v1198_v4 = vld [vmem:[%s1837_s1 + $0x14] ss:$8 sps:$4 sm:$0xff]  }
   0x2   :  { %v1194_v1 = vld [vmem:[%s1837_s1 + $0x204] ss:$8 sps:$4 sm:$0xff]   ;;  %842 = vmatprep.subr.bf16.mxu1 %v1192_v0  ;;  %v1197_v3 = vld [vmem:[%s1837_s1 + $0x200] ss:$8 sps:$4 sm:$0xff]   ;;  %v1200_v5 = vld [vmem:[%s1837_s1 + $0x214] ss:$8 sps:$4 sm:$0xff]  }
   0x3   :  { %928 = vmatprep.subr.bf16.mxu0 %v1194_v1  ;;  %843 = vmatpush1.bf16.msra.mxu1 %v1196_v2  ;;  %v1202_v6 = vld [vmem:[%s1837_s1 + $0x10] ss:$8 sps:$4 sm:$0xff]   ;;  %v1204_v8 = vld [vmem:[%s1837_s1 + $0x24] ss:$8 sps:$4 sm:$0xff]   ;;  %v1208_v10 = vld [vmem:[%s1837_s1 + $0x20] ss:$8 sps:$4 sm:$0xff]  }
   0x4   :  { %929 = vmatpush1.bf16.msra.mxu0 %v1197_v3  ;;  %844 = vmatprep.subr.bf16.mxu1 %v1198_v4  ;;  %v1203_v7 = vld [vmem:[%s1837_s1 + $0x210] ss:$8 sps:$4 sm:$0xff]   ;;  %v1206_v9 = vld [vmem:[%s1837_s1 + $0x224] ss:$8 sps:$4 sm:$0xff]   ;;  %v1209_v11 = vld [vmem:[%s1837_s1 + $0x220] ss:$8 sps:$4 sm:$0xff]  }
   0x5   :  { %930 = vmatprep.subr.bf16.mxu0 %v1200_v5  ;;  %v1210_v12 = vld [vmem:[%s1837_s1 + $0x34] ss:$8 sps:$4 sm:$0xff]   ;;  %v1214_v14 = vld [vmem:[%s1837_s1 + $0x30] ss:$8 sps:$4 sm:$0xff]   ;;  %v1216_v16 = vld [vmem:[%s1837_s1 + $0x44] ss:$8 sps:$4 sm:$0xff]  }
   0x6   :  { %v1212_v13 = vld [vmem:[%s1837_s1 + $0x234] ss:$8 sps:$4 sm:$0xff]   ;;  %v1215_v15 = vld [vmem:[%s1837_s1 + $0x230] ss:$8 sps:$4 sm:$0xff]   ;;  %v1218_v17 = vld [vmem:[%s1837_s1 + $0x244] ss:$8 sps:$4 sm:$0xff]  }
   0x7   :  { %845 = vmatpush1.bf16.msra.mxu1 %v1202_v6  ;;  %v1220_v18 = vld [vmem:[%s1837_s1 + $0x40] ss:$8 sps:$4 sm:$0xff]   ;;  %v1222_v20 = vld [vmem:[%s1837_s1 + $0x54] ss:$8 sps:$4 sm:$0xff]   ;;  %v1226_v22 = vld [vmem:[%s1837_s1 + $0x50] ss:$8 sps:$4 sm:$0xff]  }
   0x8   :  { %931 = vmatpush1.bf16.msra.mxu0 %v1203_v7  ;;  %846 = vmatprep.subr.bf16.mxu1 %v1204_v8  ;;  %v1221_v19 = vld [vmem:[%s1837_s1 + $0x240] ss:$8 sps:$4 sm:$0xff]   ;;  %v1224_v21 = vld [vmem:[%s1837_s1 + $0x254] ss:$8 sps:$4 sm:$0xff]   ;;  %v1227_v23 = vld [vmem:[%s1837_s1 + $0x250] ss:$8 sps:$4 sm:$0xff]  }
   0x9   :  { %932 = vmatprep.subr.bf16.mxu0 %v1206_v9  ;;  %v1228_v24 = vld [vmem:[%s1837_s1 + $0x64] ss:$8 sps:$4 sm:$0xff]   ;;  %v1232_v26 = vld [vmem:[%s1837_s1 + $0x60] ss:$8 sps:$4 sm:$0xff]   ;;  %v1234_v28 = vld [vmem:[%s1837_s1 + $0x74] ss:$8 sps:$4 sm:$0xff]  }
   0xa   :  { %v1230_v25 = vld [vmem:[%s1837_s1 + $0x264] ss:$8 sps:$4 sm:$0xff]   ;;  %v1233_v27 = vld [vmem:[%s1837_s1 + $0x260] ss:$8 sps:$4 sm:$0xff]   ;;  %v1236_v29 = vld [vmem:[%s1837_s1 + $0x274] ss:$8 sps:$4 sm:$0xff]  }
   0xb   :  { %847 = vmatpush1.bf16.msra.mxu1 %v1208_v10  ;;  %v1238_v30 = vld [vmem:[%s1837_s1 + $0x70] ss:$8 sps:$4 sm:$0xff]   ;;  %v1240_v32 = vld [vmem:[%s1837_s1 + $0x84] ss:$8 sps:$4 sm:$0xff]   ;;  %v1244_v34 = vld [vmem:[%s1837_s1 + $0x80] ss:$8 sps:$4 sm:$0xff]  }
   0xc   :  { %933 = vmatpush1.bf16.msra.mxu0 %v1209_v11  ;;  %848 = vmatprep.subr.bf16.mxu1 %v1210_v12  ;;  %v1239_v31 = vld [vmem:[%s1837_s1 + $0x270] ss:$8 sps:$4 sm:$0xff]   ;;  %v1242_v33 = vld [vmem:[%s1837_s1 + $0x284] ss:$8 sps:$4 sm:$0xff]   ;;  %v1245_v35 = vld [vmem:[%s1837_s1 + $0x280] ss:$8 sps:$4 sm:$0xff]  }
   0xd   :  { %934 = vmatprep.subr.bf16.mxu0 %v1212_v13  ;;  %v1246_v36 = vld [vmem:[%s1837_s1 + $0x94] ss:$8 sps:$4 sm:$0xff]   ;;  %v1250_v38 = vld [vmem:[%s1837_s1 + $0x90] ss:$8 sps:$4 sm:$0xff]   ;;  %v1252_v40 = vld [vmem:[%s1837_s1 + $0xa4] ss:$8 sps:$4 sm:$0xff]  }
   0xe   :  { %v1248_v37 = vld [vmem:[%s1837_s1 + $0x294] ss:$8 sps:$4 sm:$0xff]   ;;  %v1251_v39 = vld [vmem:[%s1837_s1 + $0x290] ss:$8 sps:$4 sm:$0xff]   ;;  %v1254_v41 = vld [vmem:[%s1837_s1 + $0x2a4] ss:$8 sps:$4 sm:$0xff]  }
   0xf   :  { %849 = vmatpush1.bf16.msra.mxu1 %v1214_v14  ;;  %v1256_v42 = vld [vmem:[%s1837_s1 + $0xa0] ss:$8 sps:$4 sm:$0xff]   ;;  %v1258_v44 = vld [vmem:[%s1837_s1 + $0xb4] ss:$8 sps:$4 sm:$0xff]   ;;  %v1262_v46 = vld [vmem:[%s1837_s1 + $0xb0] ss:$8 sps:$4 sm:$0xff]  }
  0x10   :  { %935 = vmatpush1.bf16.msra.mxu0 %v1215_v15  ;;  %850 = vmatprep.subr.bf16.mxu1 %v1216_v16  ;;  %v1257_v43 = vld [vmem:[%s1837_s1 + $0x2a0] ss:$8 sps:$4 sm:$0xff]   ;;  %v1260_v45 = vld [vmem:[%s1837_s1 + $0x2b4] ss:$8 sps:$4 sm:$0xff]   ;;  %v1263_v47 = vld [vmem:[%s1837_s1 + $0x2b0] ss:$8 sps:$4 sm:$0xff]  }
  0x11   :  { %936 = vmatprep.subr.bf16.mxu0 %v1218_v17  ;;  %v14_v48 = vld [vmem:[%s1838_s0] sm:$0xff]  ;;  %v16_v53 = vld [vmem:[%s1838_s0 + $0x10] sm:$0xff] }
  0x12   :  { %v18_v49 = vld [vmem:[%s1838_s0 + $0x20] sm:$0xff]  ;;  %v20_v54 = vld [vmem:[%s1838_s0 + $0x30] sm:$0xff] }
  0x13   :  { %851 = vmatpush1.bf16.msra.mxu1 %v1220_v18  ;;  %v1264_v50 = vld [vmem:[%s1837_s1 + $0xc4] ss:$8 sps:$4 sm:$0xff]   ;;  %v1037_v52 = vcombine.high %v14_v48, %v18_v49  ;;  %v1041_v55 = vcombine.high %v16_v53, %v20_v54  ;;  %v1268_v56 = vld [vmem:[%s1837_s1 + $0xc0] ss:$8 sps:$4 sm:$0xff]   ;;  %v1270_v58 = vld [vmem:[%s1837_s1 + $0xd4] ss:$8 sps:$4 sm:$0xff]   ;;  %v1036_v8 = vcombine.low %v14_v48, %v18_v49  ;;  %v1040_v10 = vcombine.low %v16_v53, %v20_v54 }
  0x14   :  { %937 = vmatpush1.bf16.msra.mxu0 %v1221_v19  ;;  %852 = vmatprep.subr.bf16.mxu1 %v1222_v20  ;;  %v1266_v51 = vld [vmem:[%s1837_s1 + $0x2c4] ss:$8 sps:$4 sm:$0xff]   ;;  %v1269_v57 = vld [vmem:[%s1837_s1 + $0x2c0] ss:$8 sps:$4 sm:$0xff]   ;;  %v1272_v59 = vld [vmem:[%s1837_s1 + $0x2d4] ss:$8 sps:$4 sm:$0xff]  }
  0x15   :  { %938 = vmatprep.subr.bf16.mxu0 %v1224_v21  ;;  %874 = vmatprep.mubr.bf16.mxu1 %v1037_v52  ;;  %v1274_v60 = vld [vmem:[%s1837_s1 + $0xd0] ss:$8 sps:$4 sm:$0xff]   ;;  %v1276_v62 = vld [vmem:[%s1837_s1 + $0xe4] ss:$8 sps:$4 sm:$0xff]   ;;  %v1280_v0 = vld [vmem:[%s1837_s1 + $0xe0] ss:$8 sps:$4 sm:$0xff]  }
  0x16   :  { %960 = vmatprep.mubr.bf16.mxu0 %v1041_v55  ;;  %v1275_v61 = vld [vmem:[%s1837_s1 + $0x2d0] ss:$8 sps:$4 sm:$0xff]   ;;  %v1278_v63 = vld [vmem:[%s1837_s1 + $0x2e4] ss:$8 sps:$4 sm:$0xff]   ;;  %v1281_v1 = vld [vmem:[%s1837_s1 + $0x2e0] ss:$8 sps:$4 sm:$0xff]  }
  0x17   :  { %853 = vmatpush1.bf16.msra.mxu1 %v1226_v22  ;;  %v1282_v2 = vld [vmem:[%s1837_s1 + $0xf4] ss:$8 sps:$4 sm:$0xff]   ;;  %v1286_v4 = vld [vmem:[%s1837_s1 + $0xf0] ss:$8 sps:$4 sm:$0xff]   ;;  %v1290_v6 = vld [vmem:[%s1837_s1 + $0x104] ss:$8 sps:$4 sm:$0xff]  }
  0x18   :  { %939 = vmatpush1.bf16.msra.mxu0 %v1227_v23  ;;  %854 = vmatprep.subr.bf16.mxu1 %v1228_v24  ;;  %v1284_v3 = vld [vmem:[%s1837_s1 + $0x2f4] ss:$8 sps:$4 sm:$0xff]   ;;  %v1287_v5 = vld [vmem:[%s1837_s1 + $0x2f0] ss:$8 sps:$4 sm:$0xff]   ;;  %v1293_v7 = vld [vmem:[%s1837_s1 + $0x304] ss:$8 sps:$4 sm:$0xff]  }
  0x19   :  { %940 = vmatprep.subr.bf16.mxu0 %v1230_v25  ;;  %v1288_v9 = vld [vmem:[%s1837_s1 + $0x100] ss:$8 sps:$4 sm:$0xff]   ;;  %v1296_v12 = vld [vmem:[%s1837_s1 + $0x114] ss:$8 sps:$4 sm:$0xff]   ;;  %v1294_v14 = vld [vmem:[%s1837_s1 + $0x110] ss:$8 sps:$4 sm:$0xff]  }
  0x1a   :  { %v1291_v11 = vld [vmem:[%s1837_s1 + $0x300] ss:$8 sps:$4 sm:$0xff]   ;;  %v1299_v13 = vld [vmem:[%s1837_s1 + $0x314] ss:$8 sps:$4 sm:$0xff]   ;;  %v1297_v15 = vld [vmem:[%s1837_s1 + $0x310] ss:$8 sps:$4 sm:$0xff]  }
  0x1b   :  { %855 = vmatpush1.bf16.msra.mxu1 %v1232_v26  ;;  %v1302_v16 = vld [vmem:[%s1837_s1 + $0x124] ss:$8 sps:$4 sm:$0xff]   ;;  %v1300_v18 = vld [vmem:[%s1837_s1 + $0x120] ss:$8 sps:$4 sm:$0xff]   ;;  %v1308_v20 = vld [vmem:[%s1837_s1 + $0x134] ss:$8 sps:$4 sm:$0xff]  }
  0x1c   :  { %941 = vmatpush1.bf16.msra.mxu0 %v1233_v27  ;;  %856 = vmatprep.subr.bf16.mxu1 %v1234_v28  ;;  %v1305_v17 = vld [vmem:[%s1837_s1 + $0x324] ss:$8 sps:$4 sm:$0xff]   ;;  %v1303_v19 = vld [vmem:[%s1837_s1 + $0x320] ss:$8 sps:$4 sm:$0xff]   ;;  %v1311_v21 = vld [vmem:[%s1837_s1 + $0x334] ss:$8 sps:$4 sm:$0xff]  }
  0x1d   :  { %942 = vmatprep.subr.bf16.mxu0 %v1236_v29  ;;  %v1306_v22 = vld [vmem:[%s1837_s1 + $0x130] ss:$8 sps:$4 sm:$0xff]   ;;  %v1314_v24 = vld [vmem:[%s1837_s1 + $0x144] ss:$8 sps:$4 sm:$0xff]   ;;  %v1312_v26 = vld [vmem:[%s1837_s1 + $0x140] ss:$8 sps:$4 sm:$0xff]  }
  0x1e   :  { %v1309_v23 = vld [vmem:[%s1837_s1 + $0x330] ss:$8 sps:$4 sm:$0xff]   ;;  %v1317_v25 = vld [vmem:[%s1837_s1 + $0x344] ss:$8 sps:$4 sm:$0xff]   ;;  %v1315_v27 = vld [vmem:[%s1837_s1 + $0x340] ss:$8 sps:$4 sm:$0xff]  }
  0x1f   :  { %857 = vmatpush1.bf16.msra.mxu1 %v1238_v30  ;;  %v1320_v28 = vld [vmem:[%s1837_s1 + $0x154] ss:$8 sps:$4 sm:$0xff]   ;;  %v1318_v30 = vld [vmem:[%s1837_s1 + $0x150] ss:$8 sps:$4 sm:$0xff]   ;;  %v1336_v48 = vld [vmem:[%s1837_s1 + $0x180] ss:$8 sps:$4 sm:$0xff]  }
  0x20   :  { %943 = vmatpush1.bf16.msra.mxu0 %v1239_v31  ;;  %858 = vmatprep.subr.bf16.mxu1 %v1240_v32  ;;  %v1323_v29 = vld [vmem:[%s1837_s1 + $0x354] ss:$8 sps:$4 sm:$0xff]   ;;  %v1321_v31 = vld [vmem:[%s1837_s1 + $0x350] ss:$8 sps:$4 sm:$0xff]   ;;  %v1326_v32 = vld [vmem:[%s1837_s1 + $0x164] ss:$8 sps:$4 sm:$0xff]  }
  0x21   :  { %944 = vmatprep.subr.bf16.mxu0 %v1242_v33  ;;  %v1329_v33 = vld [vmem:[%s1837_s1 + $0x364] ss:$8 sps:$4 sm:$0xff]   ;;  %v1339_v49 = vld [vmem:[%s1837_s1 + $0x380] ss:$8 sps:$4 sm:$0xff]   ;;  %v1342_v52 = vld [vmem:[%s1837_s1 + $0x190] ss:$8 sps:$4 sm:$0xff]  }
  0x22   :  { %v1345_v53 = vld [vmem:[%s1837_s1 + $0x390] ss:$8 sps:$4 sm:$0xff]   ;;  %v1350_v54 = vld [vmem:[%s1837_s1 + $0x1a4] ss:$8 sps:$4 sm:$0xff]  }
  0x23   :  { %859 = vmatpush1.bf16.msra.mxu1 %v1244_v34  ;;  %v1689_v34 = vld [vmem:[%s1838_s0 + $0x8] sm:$0xff] }
  0x24   :  { %945 = vmatpush1.bf16.msra.mxu0 %v1245_v35  ;;  %860 = vmatprep.subr.bf16.mxu1 %v1246_v36  ;;  %v1694_v35 = vld [vmem:[%s1838_s0 + $0x28] sm:$0xff]  ;;  %v1699_v36 = vld [vmem:[%s1838_s0 + $0x18] sm:$0xff] }
  0x25   :  { %946 = vmatprep.subr.bf16.mxu0 %v1248_v37  ;;  %v1704_v37 = vld [vmem:[%s1838_s0 + $0x38] sm:$0xff]  ;;  %v1353_v55 = vld [vmem:[%s1837_s1 + $0x3a4] ss:$8 sps:$4 sm:$0xff]  }
  0x27   :  { %861 = vmatpush1.bf16.msra.mxu1 %v1250_v38  ;;  %v1324_v38 = vld [vmem:[%s1837_s1 + $0x160] ss:$8 sps:$4 sm:$0xff]  }
  0x28   :  { %947 = vmatpush1.bf16.msra.mxu0 %v1251_v39  ;;  %862 = vmatprep.subr.bf16.mxu1 %v1252_v40  ;;  %v1327_v39 = vld [vmem:[%s1837_s1 + $0x360] ss:$8 sps:$4 sm:$0xff]   ;;  %v1039_v40 = vcombine.high %v1689_v34, %v1694_v35 }
  0x29   :  { %948 = vmatprep.subr.bf16.mxu0 %v1254_v41  ;;  %v1332_v41 = vld [vmem:[%s1837_s1 + $0x174] ss:$8 sps:$4 sm:$0xff]  }
  0x2b   :  { %863 = vmatpush1.bf16.msra.mxu1 %v1256_v42  ;;  %v1335_v42 = vld [vmem:[%s1837_s1 + $0x374] ss:$8 sps:$4 sm:$0xff]  }
  0x2c   :  { %949 = vmatpush1.bf16.msra.mxu0 %v1257_v43  ;;  %864 = vmatprep.subr.bf16.mxu1 %v1258_v44  ;;  %v1043_v43 = vcombine.high %v1699_v36, %v1704_v37  ;;  %v1330_v44 = vld [vmem:[%s1837_s1 + $0x170] ss:$8 sps:$4 sm:$0xff]  }
  0x2d   :  { %950 = vmatprep.subr.bf16.mxu0 %v1260_v45  ;;  %v1333_v45 = vld [vmem:[%s1837_s1 + $0x370] ss:$8 sps:$4 sm:$0xff]  }
  0x2f   :  { %865 = vmatpush1.bf16.msra.mxu1 %v1262_v46  ;;  %v1338_v46 = vld [vmem:[%s1837_s1 + $0x184] ss:$8 sps:$4 sm:$0xff]  }
  0x30   :  { %951 = vmatpush1.bf16.msra.mxu0 %v1263_v47  ;;  %866 = vmatprep.subr.bf16.mxu1 %v1264_v50  ;;  %v1341_v47 = vld [vmem:[%s1837_s1 + $0x384] ss:$8 sps:$4 sm:$0xff]   ;;  %v1344_v50 = vld [vmem:[%s1837_s1 + $0x194] ss:$8 sps:$4 sm:$0xff]  }
  0x31   :  { %952 = vmatprep.subr.bf16.mxu0 %v1266_v51  ;;  %v1347_v51 = vld [vmem:[%s1837_s1 + $0x394] ss:$8 sps:$4 sm:$0xff]  }
  0x33   :  { %867 = vmatpush1.bf16.msra.mxu1 %v1268_v56  ;;  %v1348_v56 = vld [vmem:[%s1837_s1 + $0x1a0] ss:$8 sps:$4 sm:$0xff]  }
  0x34   :  { %953 = vmatpush1.bf16.msra.mxu0 %v1269_v57  ;;  %868 = vmatprep.subr.bf16.mxu1 %v1270_v58  ;;  %v1351_v57 = vld [vmem:[%s1837_s1 + $0x3a0] ss:$8 sps:$4 sm:$0xff]   ;;  %v1356_v58 = vld [vmem:[%s1837_s1 + $0x1b4] ss:$8 sps:$4 sm:$0xff]  }
  0x35   :  { %954 = vmatprep.subr.bf16.mxu0 %v1272_v59  ;;  %v1359_v59 = vld [vmem:[%s1837_s1 + $0x3b4] ss:$8 sps:$4 sm:$0xff]  }
  0x37   :  { %869 = vmatpush1.bf16.msra.mxu1 %v1274_v60  ;;  %v1354_v60 = vld [vmem:[%s1837_s1 + $0x1b0] ss:$8 sps:$4 sm:$0xff]  }
  0x38   :  { %955 = vmatpush1.bf16.msra.mxu0 %v1275_v61  ;;  %870 = vmatprep.subr.bf16.mxu1 %v1276_v62  ;;  %v1357_v61 = vld [vmem:[%s1837_s1 + $0x3b0] ss:$8 sps:$4 sm:$0xff]   ;;  %v1362_v62 = vld [vmem:[%s1837_s1 + $0x1c4] ss:$8 sps:$4 sm:$0xff]  }
  0x39   :  { %956 = vmatprep.subr.bf16.mxu0 %v1278_v63  ;;  %v1365_v63 = vld [vmem:[%s1837_s1 + $0x3c4] ss:$8 sps:$4 sm:$0xff]  }
  0x3b   :  { %871 = vmatpush1.bf16.msra.mxu1 %v1280_v0  ;;  %v1360_v0 = vld [vmem:[%s1837_s1 + $0x1c0] ss:$8 sps:$4 sm:$0xff]  }
  0x3c   :  { %957 = vmatpush1.bf16.msra.mxu0 %v1281_v1  ;;  %872 = vmatprep.subr.bf16.mxu1 %v1282_v2  ;;  %v1363_v1 = vld [vmem:[%s1837_s1 + $0x3c0] ss:$8 sps:$4 sm:$0xff]   ;;  %v1368_v2 = vld [vmem:[%s1837_s1 + $0x1d4] ss:$8 sps:$4 sm:$0xff]  }
  0x3d   :  { %958 = vmatprep.subr.bf16.mxu0 %v1284_v3  ;;  %v1371_v3 = vld [vmem:[%s1837_s1 + $0x3d4] ss:$8 sps:$4 sm:$0xff]  }
  0x3f   :  { %873 = vmatpush1.bf16.msra.mxu1 %v1286_v4  ;;  %v1366_v4 = vld [vmem:[%s1837_s1 + $0x1d0] ss:$8 sps:$4 sm:$0xff]  }
  0x40   :  { %959 = vmatpush1.bf16.msra.mxu0 %v1287_v5  ;;  %885 = vmatprep.subr.bf16.mxu1 %v1290_v6  ;;  %v1369_v5 = vld [vmem:[%s1837_s1 + $0x3d0] ss:$8 sps:$4 sm:$0xff]   ;;  %v1374_v6 = vld [vmem:[%s1837_s1 + $0x1e4] ss:$8 sps:$4 sm:$0xff]  }
  0x41   :  { %971 = vmatprep.subr.bf16.mxu0 %v1293_v7  ;;  %v1377_v7 = vld [vmem:[%s1837_s1 + $0x3e4] ss:$8 sps:$4 sm:$0xff]  }
  0x42   :  { %875 = vmatmul.mubr.bf16.vlgmr.msra.gmra.mrb[0].mxu1 %v1036_v8  ;;  %v1372_v8 = vld [vmem:[%s1837_s1 + $0x1e0] ss:$8 sps:$4 sm:$0xff]  }
  0x43   :  { %961 = vmatmul.mubr.bf16.vlgmr.msra.gmra.mrb[0].mxu0 %v1040_v10  ;;  %886 = vmatpush1.bf16.msra.mxu1 %v1288_v9  ;;  %v1375_v9 = vld [vmem:[%s1837_s1 + $0x3e0] ss:$8 sps:$4 sm:$0xff]   ;;  %v1380_v10 = vld [vmem:[%s1837_s1 + $0x1f4] ss:$8 sps:$4 sm:$0xff]  }
  0x44   :  { %972 = vmatpush1.bf16.msra.mxu0 %v1291_v11  ;;  %887 = vmatprep.subr.bf16.mxu1 %v1296_v12  ;;  %v1383_v11 = vld [vmem:[%s1837_s1 + $0x3f4] ss:$8 sps:$4 sm:$0xff]   ;;  %v1378_v12 = vld [vmem:[%s1837_s1 + $0x1f0] ss:$8 sps:$4 sm:$0xff]  }
  0x45   :  { %973 = vmatprep.subr.bf16.mxu0 %v1299_v13  ;;  %917 = vmatprep.mubr.bf16.mxu1 %v1039_v40  ;;  %v1381_v13 = vld [vmem:[%s1837_s1 + $0x3f0] ss:$8 sps:$4 sm:$0xff]  }
  0x46   :  { %1003 = vmatprep.mubr.bf16.mxu0 %v1043_v43 }
  0x47   :  { %888 = vmatpush1.bf16.msra.mxu1 %v1294_v14  ;;  %v1038_v14 = vcombine.low %v1689_v34, %v1694_v35 }
  0x48   :  { %974 = vmatpush1.bf16.msra.mxu0 %v1297_v15  ;;  %889 = vmatprep.subr.bf16.mxu1 %v1302_v16  ;;  %v1042_v15 = vcombine.low %v1699_v36, %v1704_v37  ;;  %v152_v16 = vlaneseq }
  0x49   :  { %975 = vmatprep.subr.bf16.mxu0 %v1305_v17 }
  0x4a   :  { %v153_v17 = vshrl.u32 %v152_v16, 7 }
  0x4b   :  { %890 = vmatpush1.bf16.msra.mxu1 %v1300_v18 }
  0x4c   :  { %976 = vmatpush1.bf16.msra.mxu0 %v1303_v19  ;;  %891 = vmatprep.subr.bf16.mxu1 %v1308_v20  ;;  %v154_v18 = vsub.s32 0, %v153_v17  ;;  %v150_v19 = vld [vmem:[%s1839_s2] sm:$0x3]  ;;  %v158_v20 = vsub.s32 1, %v153_v17 }
  0x4d   :  { %977 = vmatprep.subr.bf16.mxu0 %v1311_v21 }
  0x4e   :  { %v155_v21 = vrot.slane %v150_v19, %v154_v18 }
  0x4f   :  { %892 = vmatpush1.bf16.msra.mxu1 %v1306_v22  ;;  %v159_v22 = vrot.slane %v150_v19, %v158_v20 }
  0x50   :  { %978 = vmatpush1.bf16.msra.mxu0 %v1309_v23  ;;  %893 = vmatprep.subr.bf16.mxu1 %v1314_v24 }
  0x51   :  { %979 = vmatprep.subr.bf16.mxu0 %v1317_v25 }
  0x53   :  { %894 = vmatpush1.bf16.msra.mxu1 %v1312_v26 }
  0x54   :  { %980 = vmatpush1.bf16.msra.mxu0 %v1315_v27  ;;  %895 = vmatprep.subr.bf16.mxu1 %v1320_v28 }
  0x55   :  { %981 = vmatprep.subr.bf16.mxu0 %v1323_v29 }
  0x57   :  { %896 = vmatpush1.bf16.msra.mxu1 %v1318_v30 }
  0x58   :  { %982 = vmatpush1.bf16.msra.mxu0 %v1321_v31  ;;  %897 = vmatprep.subr.bf16.mxu1 %v1326_v32 }
  0x59   :  { %983 = vmatprep.subr.bf16.mxu0 %v1329_v33 }
  0x5b   :  { %898 = vmatpush1.bf16.msra.mxu1 %v1324_v38 }
  0x5c   :  { %984 = vmatpush1.bf16.msra.mxu0 %v1327_v39  ;;  %899 = vmatprep.subr.bf16.mxu1 %v1332_v41 }
  0x5d   :  { %985 = vmatprep.subr.bf16.mxu0 %v1335_v42 }
  0x5f   :  { %900 = vmatpush1.bf16.msra.mxu1 %v1330_v44 }
  0x60   :  { %986 = vmatpush1.bf16.msra.mxu0 %v1333_v45  ;;  %901 = vmatprep.subr.bf16.mxu1 %v1338_v46 }
  0x61   :  { %987 = vmatprep.subr.bf16.mxu0 %v1341_v47 }
  0x63   :  { %902 = vmatpush1.bf16.msra.mxu1 %v1336_v48 }
  0x64   :  { %988 = vmatpush1.bf16.msra.mxu0 %v1339_v49  ;;  %903 = vmatprep.subr.bf16.mxu1 %v1344_v50 }
  0x65   :  { %989 = vmatprep.subr.bf16.mxu0 %v1347_v51 }
  0x67   :  { %904 = vmatpush1.bf16.msra.mxu1 %v1342_v52 }
  0x68   :  { %990 = vmatpush1.bf16.msra.mxu0 %v1345_v53  ;;  %905 = vmatprep.subr.bf16.mxu1 %v1350_v54 }
  0x69   :  { %991 = vmatprep.subr.bf16.mxu0 %v1353_v55 }
  0x6b   :  { %906 = vmatpush1.bf16.msra.mxu1 %v1348_v56 }
  0x6c   :  { %992 = vmatpush1.bf16.msra.mxu0 %v1351_v57  ;;  %907 = vmatprep.subr.bf16.mxu1 %v1356_v58 }
  0x6d   :  { %993 = vmatprep.subr.bf16.mxu0 %v1359_v59 }
  0x6f   :  { %908 = vmatpush1.bf16.msra.mxu1 %v1354_v60 }
  0x70   :  { %994 = vmatpush1.bf16.msra.mxu0 %v1357_v61  ;;  %909 = vmatprep.subr.bf16.mxu1 %v1362_v62 }
  0x71   :  { %995 = vmatprep.subr.bf16.mxu0 %v1365_v63 }
  0x73   :  { %910 = vmatpush1.bf16.msra.mxu1 %v1360_v0 }
  0x74   :  { %996 = vmatpush1.bf16.msra.mxu0 %v1363_v1  ;;  %911 = vmatprep.subr.bf16.mxu1 %v1368_v2 }
  0x75   :  { %997 = vmatprep.subr.bf16.mxu0 %v1371_v3 }
  0x77   :  { %912 = vmatpush1.bf16.msra.mxu1 %v1366_v4 }
  0x78   :  { %998 = vmatpush1.bf16.msra.mxu0 %v1369_v5  ;;  %913 = vmatprep.subr.bf16.mxu1 %v1374_v6 }
  0x79   :  { %999 = vmatprep.subr.bf16.mxu0 %v1377_v7 }
  0x7b   :  { %914 = vmatpush1.bf16.msra.mxu1 %v1372_v8 }
  0x7c   :  { %1000 = vmatpush1.bf16.msra.mxu0 %v1375_v9  ;;  %915 = vmatprep.subr.bf16.mxu1 %v1380_v10 }
  0x7d   :  { %1001 = vmatprep.subr.bf16.mxu0 %v1383_v11 }
  0x7f   :  { %916 = vmatpush1.bf16.msra.mxu1 %v1378_v12 }
  0x80   :  { %1002 = vmatpush1.bf16.msra.mxu0 %v1381_v13 }
  0x82   :  { %918 = vmatmul.mubr.bf16.vlgmr.msra.gmra.mrb[0].mxu1 %v1038_v14 }
  0x83   :  { %1004 = vmatmul.mubr.bf16.vlgmr.msra.gmra.mrb[0].mxu0 %v1042_v15 }
 0x155   :  { %v919_v23 = vpop.f32.mrb[0].mxu1 }
 0x156   :  { %v1005_v24 = vpop.f32.mrb[0].mxu0  ;;  %v1176_v25 = vadd.f32 %v919_v23, %v155_v21  ;;  %v921_v26 = vpop.f32.mrb[1].mxu1 }
 0x157   :  { %v1007_v27 = vpop.f32.mrb[1].mxu0  ;;  %v1178_v28 = vadd.f32 %v921_v26, %v159_v22  ;;  %v923_v29 = vpop.f32.mrb[2].mxu1 }
 0x158   :  { %v1009_v30 = vpop.f32.mrb[2].mxu0  ;;  %v1177_v31 = vadd.f32 %v1176_v25, %v1005_v24  ;;  %v1180_v32 = vadd.f32 %v923_v29, %v155_v21  ;;  %v925_v33 = vpop.f32.mrb[3].mxu1 }
 0x159   :  { %v1011_v34 = vpop.f32.mrb[3].mxu0  ;;  %v1179_v35 = vadd.f32 %v1178_v28, %v1007_v27  ;;  %v1182_v36 = vadd.f32 %v925_v33, %v159_v22 }
 0x15a   :  { %v1014_v37 = vmax.f32 %v1177_v31, 0.0  ;;  %v1181_v38 = vadd.f32 %v1180_v32, %v1009_v30 }
 0x15b   :  { %v1015_v39 = vmax.f32 %v1179_v35, 0.0  ;;  %v1183_v40 = vadd.f32 %v1182_v36, %v1011_v34 }
 0x15c   :  { %v1016_v41 = vmax.f32 %v1181_v38, 0.0 }
 0x15d   :  { %v1174_v42 = vpack.c.bf16 %v1015_v39, %v1014_v37  ;;  %v1017_v43 = vmax.f32 %v1183_v40, 0.0 }
 0x15f   :  { %1030 = vst [vmem:[%s1840_s3] sm:$0xff] %v1174_v42  ;;  %v1175_v44 = vpack.c.bf16 %v1017_v43, %v1016_v41 }
 0x161   :  { %1031 = vst [vmem:[%s1840_s3 + $0x8] sm:$0xff] %v1175_v44 }

</bundles_post_ra>
